<compile_context>
chip_gen: v6e
topology: v6e:2x2x1
jax: 0.10.0
libtpu: 0.0.40
codegen_flags: <defaults>
</compile_context>

<pallas_src>
import functools

import jax
import jax.numpy as jnp
from jax import lax
from jax.experimental import pallas as pl
from jax.experimental.pallas import tpu as pltpu


C_PAD = 16  # padded channel width (real channels are 10/11); lane width = W * C_PAD = 256


# ----------------------------------------------------------------------------
# Fused Pallas kernel: full network forward for one batch element per grid step
# ----------------------------------------------------------------------------
def _fused_kernel(x_ref, w3_ref, b3_ref, w1_ref, b1_ref, g_ref, o_ref,
                  *, n_feat, n_act):
    """x_ref  : (h, w*cp)       one batch element; lane index = w*cp + c
       w3_ref : (3*n3, wc, wc)  banded 3x3 weight matrices, indexed [3*layer + dh]
       b3_ref : (n3, 1, wc)     3x3 biases tiled across w
       w1_ref : (3, wc, wc)     block-diagonal 1x1 weight matrices
       b1_ref : (3, 1, wc)
       g_ref  : (wc, wc)        0/1 group matrix (same w-group AND valid input channel)
       o_ref  : (h, wc)         log-softmax output (lanes with c >= out_valid: garbage)
    """
    f32 = jnp.float32
    h = x_ref.shape[0]

    # Constant H-shift matrices, built once and reused by every 3x3 layer.
    #   (s_up @ x)[r] = x[r-1] (zero row at r = 0)     -> tap dh = 0
    #   (s_dn @ x)[r] = x[r+1] (zero row at r = h-1)   -> tap dh = 2
    ri = lax.broadcasted_iota(jnp.int32, (h, h), 0)
    rj = lax.broadcasted_iota(jnp.int32, (h, h), 1)
    s_up = jnp.where(rj == ri - 1, 1.0, 0.0).astype(f32)
    s_dn = jnp.where(rj == ri + 1, 1.0, 0.0).astype(f32)

    def conv3x3(x, li):  # every 3x3 conv in this network is followed by ReLU
        xu = jnp.dot(s_up, x, preferred_element_type=f32)
        xd = jnp.dot(s_dn, x, preferred_element_type=f32)
        y = jnp.dot(xu, w3_ref[3 * li + 0], preferred_element_type=f32)
        y = y + jnp.dot(x, w3_ref[3 * li + 1], preferred_element_type=f32)
        y = y + jnp.dot(xd, w3_ref[3 * li + 2], preferred_element_type=f32)
        y = y + b3_ref[li]
        return jnp.maximum(y, 0.0)

    def conv1x1(x, li, relu):
        y = jnp.dot(x, w1_ref[li], preferred_element_type=f32) + b1_ref[li]
        return jnp.maximum(y, 0.0) if relu else y

    x = x_ref[...]
    li = 0
    for _ in range(n_feat):                 # FeatureNet: ReLU after every 3x3 conv
        x = conv3x3(x, li)
        li += 1
    x = conv1x1(x, 0, relu=True)            # TaskNetwork: relu, relu, linear
    x = conv1x1(x, 1, relu=True)
    x = conv1x1(x, 2, relu=False)
    for _ in range(n_act):                  # ActionNet: ReLU after every 3x3 conv
        x = conv3x3(x, li)
        li += 1

    # Fused log_softmax over each 16-lane channel group.  The row max is constant within
    # every group, so the shift cancels exactly; exp argument is always <= 0 (safe on the
    # padded lanes), and the 0/1 group matrix excludes padded channels from the sum.
    m = jnp.max(x, axis=-1, keepdims=True)
    s = x - m
    se = jnp.dot(jnp.exp(s), g_ref[...], preferred_element_type=f32)
    o_ref[...] = s - jnp.log(se)


# ----------------------------------------------------------------------------
# One-time weight packing into lane-dense matmul operands (call ONCE at init)
# ----------------------------------------------------------------------------
def pack_params(params, width, c_pad=C_PAD):
    """3x3 convs -> per-tap-row banded (wc,wc) matrices (absorb W shift + SAME padding);
       1x1 convs -> block-diagonal (wc,wc) matrices; biases tiled across W;
       plus the 0/1 group/valid matrix used by the fused log_softmax."""
    wc = width * c_pad
    f32 = jnp.float32

    def pad_cc(w_cc):                        # (cin, cout) -> (c_pad, c_pad), zero padded
        cin, cout = w_cc.shape
        return jnp.zeros((c_pad, c_pad), f32).at[:cin, :cout].set(w_cc)

    def band3(wgt):                          # (3, 3, cin, cout) -> (3, wc, wc)
        mats = []
        for dh in range(3):
            m = jnp.zeros((wc, wc), f32)
            for dw in range(3):
                # output column w_out reads input column w_in = w_out + dw - 1
                m = m + jnp.kron(jnp.eye(width, k=1 - dw, dtype=f32), pad_cc(wgt[dh, dw]))
            mats.append(m)
        return jnp.stack(mats)

    def diag1(wgt):                          # (1, 1, cin, cout) -> (wc, wc)
        return jnp.kron(jnp.eye(width, dtype=f32), pad_cc(wgt[0, 0]))

    def tile_bias(b):                        # (cout,) -> (1, wc)
        bp = jnp.zeros((c_pad,), f32).at[:b.shape[0]].set(b)
        return jnp.tile(bp, width)[None, :]

    convs3 = params["feature"] + params["action"]
    w3 = jnp.concatenate([band3(w) for (w, _) in convs3], axis=0)   # (3*n3, wc, wc)
    b3 = jnp.stack([tile_bias(b) for (_, b) in convs3])             # (n3, 1, wc)
    w1 = jnp.stack([diag1(w) for (w, _) in params["task"]])         # (3, wc, wc)
    b1 = jnp.stack([tile_bias(b) for (_, b) in params["task"]])     # (3, 1, wc)

    out_valid = params["action"][-1][0].shape[-1]
    valid = (jnp.arange(c_pad) < out_valid).astype(f32)
    gmat = jnp.kron(jnp.eye(width, dtype=f32),
                    jnp.broadcast_to(valid[:, None], (c_pad, c_pad)))  # (wc, wc)
    return w3, b3, w1, b1, gmat


# ----------------------------------------------------------------------------
# Forward wrapper: NCHW in / NCHW out, single pallas_call (batch-parallel grid)
# ----------------------------------------------------------------------------
def multi_task_forward(packed, x_nchw, *, n_feat, n_act, out_valid):
    w3, b3, w1, b1, gmat = packed
    n, cin, h, w = x_nchw.shape
    cp = C_PAD
    wc = w * cp

    # NCHW -> NHWC, pad channels to cp, fold (w, c) into the lane dim -> (n*h, w*cp).
    x = jnp.transpose(x_nchw, (0, 2, 3, 1)).astype(jnp.float32)
    x = jnp.pad(x, ((0, 0), (0, 0), (0, 0), (0, cp - cin)))
    x = x.reshape(n * h, wc)

    kernel = functools.partial(_fused_kernel, n_feat=n_feat, n_act=n_act)

    out = pl.pallas_call(
        kernel,
        out_shape=jax.ShapeDtypeStruct((n * h, wc), jnp.float32),
        grid_spec=pltpu.PrefetchScalarGridSpec(
            num_scalar_prefetch=0,
            grid=(n,),                                        # batch-parallel (2 TCs on v7x)
            in_specs=[
                pl.BlockSpec((h, wc), lambda i: (i, 0)),      # one batch element per step
                pl.BlockSpec(w3.shape, lambda i: (0, 0, 0)),  # weights stay VMEM-resident
                pl.BlockSpec(b3.shape, lambda i: (0, 0, 0)),
                pl.BlockSpec(w1.shape, lambda i: (0, 0, 0)),
                pl.BlockSpec(b1.shape, lambda i: (0, 0, 0)),
                pl.BlockSpec(gmat.shape, lambda i: (0, 0)),
            ],
            out_specs=pl.BlockSpec((h, wc), lambda i: (i, 0)),
        ),
        compiler_params=pltpu.CompilerParams(
            dimension_semantics=("parallel",),
            vmem_limit_bytes=32 * 1024 * 1024,
        ),
    )(x, w3, b3, w1, b1, gmat)

    # Channel-strip + NHWC -> NCHW in the wrapper keeps the kernel output lane-dense.
    out = out.reshape(n, h, w, cp)[..., :out_valid]
    return jnp.transpose(out, (0, 3, 1, 2))


# ----------------------------------------------------------------------------
# Parameter construction (deterministic, PyTorch Conv2d-style uniform init)
# ----------------------------------------------------------------------------
def _conv_params(key, kh, kw, cin, cout):
    wk, bk = jax.random.split(key)
    bound = 1.0 / float((cin * kh * kw) ** 0.5)
    wgt = jax.random.uniform(wk, (kh, kw, cin, cout), jnp.float32, -bound, bound)
    b = jax.random.uniform(bk, (cout,), jnp.float32, -bound, bound)
    return wgt, b


def init_params(key, hidden_depth=10, feature_depth=3, action_depth=3,
                in_channels=11, out_channels=11):
    n_layers = (1 + feature_depth) + 3 + (action_depth + 1)
    keys = list(jax.random.split(key, n_layers))
    params = {"feature": [], "task": [], "action": []}
    # FeatureNet: start 3x3 (in->hidden), then feature_depth x 3x3 (hidden->hidden)
    params["feature"].append(_conv_params(keys.pop(0), 3, 3, in_channels, hidden_depth))
    for _ in range(feature_depth):
        params["feature"].append(_conv_params(keys.pop(0), 3, 3, hidden_depth, hidden_depth))
    # TaskNetwork: three 1x1 convs (hidden->hidden)
    for _ in range(3):
        params["task"].append(_conv_params(keys.pop(0), 1, 1, hidden_depth, hidden_depth))
    # ActionNet: action_depth x 3x3 (hidden->hidden), end 3x3 (hidden->out)
    for _ in range(action_depth):
        params["action"].append(_conv_params(keys.pop(0), 3, 3, hidden_depth, hidden_depth))
    params["action"].append(_conv_params(keys.pop(0), 3, 3, hidden_depth, out_channels))
    return params


# ----------------------------------------------------------------------------
# Pure-JAX reference
# ----------------------------------------------------------------------------
def _conv_ref(x, wgt, b, relu):
    y = lax.conv_general_dilated(x, wgt, (1, 1), "SAME",
                                 dimension_numbers=("NHWC", "HWIO", "NHWC")) + b
    return jnp.maximum(y, 0.0) if relu else y


def multi_task_forward_ref(params, x_nchw):
    x = jnp.transpose(x_nchw, (0, 2, 3, 1))
    for wgt, b in params["feature"]:
        x = _conv_ref(x, wgt, b, True)
    (w0, b0), (w1, b1), (w2, b2) = params["task"]
    x = _conv_ref(x, w0, b0, True)
    x = _conv_ref(x, w1, b1, True)
    x = _conv_ref(x, w2, b2, False)
    for wgt, b in params["action"]:
        x = _conv_ref(x, wgt, b, True)
    x = jax.nn.log_softmax(x, axis=-1)
    return jnp.transpose(x, (0, 3, 1, 2))


if __name__ == "__main__":
    key = jax.random.PRNGKey(0)
    pkey, xkey = jax.random.split(key)

    hidden_depth, feature_depth, action_depth = 10, 3, 3
    params = init_params(pkey, hidden_depth, feature_depth, action_depth)

    # PyTorch-style NCHW input: batch=2, channels=11, spatial=16x16
    x = jax.random.normal(xkey, (2, 11, 16, 16), jnp.float32)

    # Pack weights ONCE (banded / block-diagonal slabs) — outside the jitted per-step path.
    packed = pack_params(params, width=x.shape[-1])

    fwd = jax.jit(functools.partial(
        multi_task_forward,
        n_feat=1 + feature_depth, n_act=action_depth + 1, out_valid=11))
    out = jax.block_until_ready(fwd(packed, x))
    assert out.shape == (2, 11, 16, 16)

    ref = jax.block_until_ready(multi_task_forward_ref(params, x))
    if not jnp.allclose(out, ref, atol=2e-4, rtol=2e-4):
        raise AssertionError("Pallas output does not match JAX reference")

    # log-probs over the channel dim must exponentiate-sum to 1
    if not jnp.allclose(jnp.exp(out).sum(axis=1), 1.0, atol=1e-4):
        raise AssertionError("log_softmax channel normalization failed")

    print("KERNEL_OK")
</pallas_src>

<mosaic_0001>
module attributes {stable_mosaic.version = 11 : i64} {
  func.func @_fused_kernel(%arg0: i32, %arg1: memref<16x256xf32, #tpu.memory_space<vmem>>, %arg2: memref<24x256x256xf32, #tpu.memory_space<vmem>>, %arg3: memref<8x1x256xf32, #tpu.memory_space<vmem>>, %arg4: memref<3x256x256xf32, #tpu.memory_space<vmem>>, %arg5: memref<3x1x256xf32, #tpu.memory_space<vmem>>, %arg6: memref<256x256xf32, #tpu.memory_space<vmem>>, %arg7: memref<16x256xf32, #tpu.memory_space<vmem>>) attributes {dimension_semantics = [#tpu.dimension_semantics<parallel>], iteration_bounds = array<i64: 2>, scalar_prefetch = 0 : i64, scratch_operands = 0 : i64, tpu.core_type = #tpu.core_type<tc>, window_params = [{transform_indices = @transform_0, window_bounds = array<i64: 16, 256>}, {pipeline_mode = #tpu.pipeline_mode<synchronous>, transform_indices = @transform_1, window_bounds = array<i64: 24, 256, 256>}, {pipeline_mode = #tpu.pipeline_mode<synchronous>, transform_indices = @transform_2, window_bounds = array<i64: 8, 1, 256>}, {pipeline_mode = #tpu.pipeline_mode<synchronous>, transform_indices = @transform_3, window_bounds = array<i64: 3, 256, 256>}, {pipeline_mode = #tpu.pipeline_mode<synchronous>, transform_indices = @transform_4, window_bounds = array<i64: 3, 1, 256>}, {pipeline_mode = #tpu.pipeline_mode<synchronous>, transform_indices = @transform_5, window_bounds = array<i64: 256, 256>}, {transform_indices = @transform_6, window_bounds = array<i64: 16, 256>}]} {
    %0 = tpu.iota {dimensions = array<i32: 0>} : vector<16x16xi32>
    %1 = tpu.iota {dimensions = array<i32: 1>} : vector<16x16xi32>
    %c1_i32 = arith.constant 1 : i32
    %2 = vector.broadcast %c1_i32 : i32 to vector<16x16xi32>
    %3 = arith.subi %0, %2 : vector<16x16xi32>
    %4 = arith.cmpi eq, %1, %3 : vector<16x16xi32>
    %cst = arith.constant 1.000000e+00 : f32
    %cst_0 = arith.constant 0.000000e+00 : f32
    %5 = vector.broadcast %cst : f32 to vector<16x16xf32>
    %6 = vector.broadcast %cst_0 : f32 to vector<16x16xf32>
    %7 = arith.select %4, %5, %6 : vector<16x16xi1>, vector<16x16xf32>
    %c1_i32_1 = arith.constant 1 : i32
    %8 = vector.broadcast %c1_i32_1 : i32 to vector<16x16xi32>
    %9 = arith.addi %0, %8 : vector<16x16xi32>
    %10 = arith.cmpi eq, %1, %9 : vector<16x16xi32>
    %cst_2 = arith.constant 1.000000e+00 : f32
    %cst_3 = arith.constant 0.000000e+00 : f32
    %11 = vector.broadcast %cst_2 : f32 to vector<16x16xf32>
    %12 = vector.broadcast %cst_3 : f32 to vector<16x16xf32>
    %13 = arith.select %10, %11, %12 : vector<16x16xi1>, vector<16x16xf32>
    %c0 = arith.constant 0 : index
    %c0_4 = arith.constant 0 : index
    %14 = vector.load %arg1[%c0, %c0_4] : memref<16x256xf32, #tpu.memory_space<vmem>>, vector<16x256xf32>
    %cst_5 = arith.constant dense<0.000000e+00> : vector<16x256xf32>
    %15 = tpu.matmul %7, %14, %cst_5 {dimension_numbers = #tpu.dot_dimension_numbers<[1], [0], [0], [1], [0, 0, 1, 1], [], []>} : vector<16x16xf32>, vector<16x256xf32>, vector<16x256xf32> -> vector<16x256xf32>
    %cst_6 = arith.constant dense<0.000000e+00> : vector<16x256xf32>
    %16 = tpu.matmul %13, %14, %cst_6 {dimension_numbers = #tpu.dot_dimension_numbers<[1], [0], [0], [1], [0, 0, 1, 1], [], []>} : vector<16x16xf32>, vector<16x256xf32>, vector<16x256xf32> -> vector<16x256xf32>
    %c0_7 = arith.constant 0 : index
    %c0_8 = arith.constant 0 : index
    %c0_9 = arith.constant 0 : index
    %17 = vector.load %arg2[%c0_7, %c0_8, %c0_9] : memref<24x256x256xf32, #tpu.memory_space<vmem>>, vector<1x256x256xf32>
    %18 = vector.shape_cast %17 : vector<1x256x256xf32> to vector<256x256xf32>
    %cst_10 = arith.constant dense<0.000000e+00> : vector<16x256xf32>
    %19 = tpu.matmul %15, %18, %cst_10 {dimension_numbers = #tpu.dot_dimension_numbers<[1], [0], [0], [1], [0, 0, 1, 1], [], []>} : vector<16x256xf32>, vector<256x256xf32>, vector<16x256xf32> -> vector<16x256xf32>
    %c1 = arith.constant 1 : index
    %c0_11 = arith.constant 0 : index
    %c0_12 = arith.constant 0 : index
    %20 = vector.load %arg2[%c1, %c0_11, %c0_12] : memref<24x256x256xf32, #tpu.memory_space<vmem>>, vector<1x256x256xf32>
    %21 = vector.shape_cast %20 : vector<1x256x256xf32> to vector<256x256xf32>
    %cst_13 = arith.constant dense<0.000000e+00> : vector<16x256xf32>
    %22 = tpu.matmul %14, %21, %cst_13 {dimension_numbers = #tpu.dot_dimension_numbers<[1], [0], [0], [1], [0, 0, 1, 1], [], []>} : vector<16x256xf32>, vector<256x256xf32>, vector<16x256xf32> -> vector<16x256xf32>
    %23 = arith.addf %19, %22 : vector<16x256xf32>
    %c2 = arith.constant 2 : index
    %c0_14 = arith.constant 0 : index
    %c0_15 = arith.constant 0 : index
    %24 = vector.load %arg2[%c2, %c0_14, %c0_15] : memref<24x256x256xf32, #tpu.memory_space<vmem>>, vector<1x256x256xf32>
    %25 = vector.shape_cast %24 : vector<1x256x256xf32> to vector<256x256xf32>
    %cst_16 = arith.constant dense<0.000000e+00> : vector<16x256xf32>
    %26 = tpu.matmul %16, %25, %cst_16 {dimension_numbers = #tpu.dot_dimension_numbers<[1], [0], [0], [1], [0, 0, 1, 1], [], []>} : vector<16x256xf32>, vector<256x256xf32>, vector<16x256xf32> -> vector<16x256xf32>
    %27 = arith.addf %23, %26 : vector<16x256xf32>
    %c0_17 = arith.constant 0 : index
    %c0_18 = arith.constant 0 : index
    %c0_19 = arith.constant 0 : index
    %28 = vector.load %arg3[%c0_17, %c0_18, %c0_19] : memref<8x1x256xf32, #tpu.memory_space<vmem>>, vector<1x1x256xf32>
    %29 = vector.shape_cast %28 : vector<1x1x256xf32> to vector<1x256xf32>
    %30 = vector.broadcast %29 : vector<1x256xf32> to vector<16x256xf32>
    %31 = arith.addf %27, %30 : vector<16x256xf32>
    %cst_20 = arith.constant 0.000000e+00 : f32
    %32 = vector.broadcast %cst_20 : f32 to vector<16x256xf32>
    %33 = arith.maximumf %31, %32 : vector<16x256xf32>
    %cst_21 = arith.constant dense<0.000000e+00> : vector<16x256xf32>
    %34 = tpu.matmul %7, %33, %cst_21 {dimension_numbers = #tpu.dot_dimension_numbers<[1], [0], [0], [1], [0, 0, 1, 1], [], []>} : vector<16x16xf32>, vector<16x256xf32>, vector<16x256xf32> -> vector<16x256xf32>
    %cst_22 = arith.constant dense<0.000000e+00> : vector<16x256xf32>
    %35 = tpu.matmul %13, %33, %cst_22 {dimension_numbers = #tpu.dot_dimension_numbers<[1], [0], [0], [1], [0, 0, 1, 1], [], []>} : vector<16x16xf32>, vector<16x256xf32>, vector<16x256xf32> -> vector<16x256xf32>
    %c3 = arith.constant 3 : index
    %c0_23 = arith.constant 0 : index
    %c0_24 = arith.constant 0 : index
    %36 = vector.load %arg2[%c3, %c0_23, %c0_24] : memref<24x256x256xf32, #tpu.memory_space<vmem>>, vector<1x256x256xf32>
    %37 = vector.shape_cast %36 : vector<1x256x256xf32> to vector<256x256xf32>
    %cst_25 = arith.constant dense<0.000000e+00> : vector<16x256xf32>
    %38 = tpu.matmul %34, %37, %cst_25 {dimension_numbers = #tpu.dot_dimension_numbers<[1], [0], [0], [1], [0, 0, 1, 1], [], []>} : vector<16x256xf32>, vector<256x256xf32>, vector<16x256xf32> -> vector<16x256xf32>
    %c4 = arith.constant 4 : index
    %c0_26 = arith.constant 0 : index
    %c0_27 = arith.constant 0 : index
    %39 = vector.load %arg2[%c4, %c0_26, %c0_27] : memref<24x256x256xf32, #tpu.memory_space<vmem>>, vector<1x256x256xf32>
    %40 = vector.shape_cast %39 : vector<1x256x256xf32> to vector<256x256xf32>
    %cst_28 = arith.constant dense<0.000000e+00> : vector<16x256xf32>
    %41 = tpu.matmul %33, %40, %cst_28 {dimension_numbers = #tpu.dot_dimension_numbers<[1], [0], [0], [1], [0, 0, 1, 1], [], []>} : vector<16x256xf32>, vector<256x256xf32>, vector<16x256xf32> -> vector<16x256xf32>
    %42 = arith.addf %38, %41 : vector<16x256xf32>
    %c5 = arith.constant 5 : index
    %c0_29 = arith.constant 0 : index
    %c0_30 = arith.constant 0 : index
    %43 = vector.load %arg2[%c5, %c0_29, %c0_30] : memref<24x256x256xf32, #tpu.memory_space<vmem>>, vector<1x256x256xf32>
    %44 = vector.shape_cast %43 : vector<1x256x256xf32> to vector<256x256xf32>
    %cst_31 = arith.constant dense<0.000000e+00> : vector<16x256xf32>
    %45 = tpu.matmul %35, %44, %cst_31 {dimension_numbers = #tpu.dot_dimension_numbers<[1], [0], [0], [1], [0, 0, 1, 1], [], []>} : vector<16x256xf32>, vector<256x256xf32>, vector<16x256xf32> -> vector<16x256xf32>
    %46 = arith.addf %42, %45 : vector<16x256xf32>
    %c1_32 = arith.constant 1 : index
    %c0_33 = arith.constant 0 : index
    %c0_34 = arith.constant 0 : index
    %47 = vector.load %arg3[%c1_32, %c0_33, %c0_34] : memref<8x1x256xf32, #tpu.memory_space<vmem>>, vector<1x1x256xf32>
    %48 = vector.shape_cast %47 : vector<1x1x256xf32> to vector<1x256xf32>
    %49 = vector.broadcast %48 : vector<1x256xf32> to vector<16x256xf32>
    %50 = arith.addf %46, %49 : vector<16x256xf32>
    %cst_35 = arith.constant 0.000000e+00 : f32
    %51 = vector.broadcast %cst_35 : f32 to vector<16x256xf32>
    %52 = arith.maximumf %50, %51 : vector<16x256xf32>
    %cst_36 = arith.constant dense<0.000000e+00> : vector<16x256xf32>
    %53 = tpu.matmul %7, %52, %cst_36 {dimension_numbers = #tpu.dot_dimension_numbers<[1], [0], [0], [1], [0, 0, 1, 1], [], []>} : vector<16x16xf32>, vector<16x256xf32>, vector<16x256xf32> -> vector<16x256xf32>
    %cst_37 = arith.constant dense<0.000000e+00> : vector<16x256xf32>
    %54 = tpu.matmul %13, %52, %cst_37 {dimension_numbers = #tpu.dot_dimension_numbers<[1], [0], [0], [1], [0, 0, 1, 1], [], []>} : vector<16x16xf32>, vector<16x256xf32>, vector<16x256xf32> -> vector<16x256xf32>
    %c6 = arith.constant 6 : index
    %c0_38 = arith.constant 0 : index
    %c0_39 = arith.constant 0 : index
    %55 = vector.load %arg2[%c6, %c0_38, %c0_39] : memref<24x256x256xf32, #tpu.memory_space<vmem>>, vector<1x256x256xf32>
    %56 = vector.shape_cast %55 : vector<1x256x256xf32> to vector<256x256xf32>
    %cst_40 = arith.constant dense<0.000000e+00> : vector<16x256xf32>
    %57 = tpu.matmul %53, %56, %cst_40 {dimension_numbers = #tpu.dot_dimension_numbers<[1], [0], [0], [1], [0, 0, 1, 1], [], []>} : vector<16x256xf32>, vector<256x256xf32>, vector<16x256xf32> -> vector<16x256xf32>
    %c7 = arith.constant 7 : index
    %c0_41 = arith.constant 0 : index
    %c0_42 = arith.constant 0 : index
    %58 = vector.load %arg2[%c7, %c0_41, %c0_42] : memref<24x256x256xf32, #tpu.memory_space<vmem>>, vector<1x256x256xf32>
    %59 = vector.shape_cast %58 : vector<1x256x256xf32> to vector<256x256xf32>
    %cst_43 = arith.constant dense<0.000000e+00> : vector<16x256xf32>
    %60 = tpu.matmul %52, %59, %cst_43 {dimension_numbers = #tpu.dot_dimension_numbers<[1], [0], [0], [1], [0, 0, 1, 1], [], []>} : vector<16x256xf32>, vector<256x256xf32>, vector<16x256xf32> -> vector<16x256xf32>
    %61 = arith.addf %57, %60 : vector<16x256xf32>
    %c8 = arith.constant 8 : index
    %c0_44 = arith.constant 0 : index
    %c0_45 = arith.constant 0 : index
    %62 = vector.load %arg2[%c8, %c0_44, %c0_45] : memref<24x256x256xf32, #tpu.memory_space<vmem>>, vector<1x256x256xf32>
    %63 = vector.shape_cast %62 : vector<1x256x256xf32> to vector<256x256xf32>
    %cst_46 = arith.constant dense<0.000000e+00> : vector<16x256xf32>
    %64 = tpu.matmul %54, %63, %cst_46 {dimension_numbers = #tpu.dot_dimension_numbers<[1], [0], [0], [1], [0, 0, 1, 1], [], []>} : vector<16x256xf32>, vector<256x256xf32>, vector<16x256xf32> -> vector<16x256xf32>
    %65 = arith.addf %61, %64 : vector<16x256xf32>
    %c2_47 = arith.constant 2 : index
    %c0_48 = arith.constant 0 : index
    %c0_49 = arith.constant 0 : index
    %66 = vector.load %arg3[%c2_47, %c0_48, %c0_49] : memref<8x1x256xf32, #tpu.memory_space<vmem>>, vector<1x1x256xf32>
    %67 = vector.shape_cast %66 : vector<1x1x256xf32> to vector<1x256xf32>
    %68 = vector.broadcast %67 : vector<1x256xf32> to vector<16x256xf32>
    %69 = arith.addf %65, %68 : vector<16x256xf32>
    %cst_50 = arith.constant 0.000000e+00 : f32
    %70 = vector.broadcast %cst_50 : f32 to vector<16x256xf32>
    %71 = arith.maximumf %69, %70 : vector<16x256xf32>
    %cst_51 = arith.constant dense<0.000000e+00> : vector<16x256xf32>
    %72 = tpu.matmul %7, %71, %cst_51 {dimension_numbers = #tpu.dot_dimension_numbers<[1], [0], [0], [1], [0, 0, 1, 1], [], []>} : vector<16x16xf32>, vector<16x256xf32>, vector<16x256xf32> -> vector<16x256xf32>
    %cst_52 = arith.constant dense<0.000000e+00> : vector<16x256xf32>
    %73 = tpu.matmul %13, %71, %cst_52 {dimension_numbers = #tpu.dot_dimension_numbers<[1], [0], [0], [1], [0, 0, 1, 1], [], []>} : vector<16x16xf32>, vector<16x256xf32>, vector<16x256xf32> -> vector<16x256xf32>
    %c9 = arith.constant 9 : index
    %c0_53 = arith.constant 0 : index
    %c0_54 = arith.constant 0 : index
    %74 = vector.load %arg2[%c9, %c0_53, %c0_54] : memref<24x256x256xf32, #tpu.memory_space<vmem>>, vector<1x256x256xf32>
    %75 = vector.shape_cast %74 : vector<1x256x256xf32> to vector<256x256xf32>
    %cst_55 = arith.constant dense<0.000000e+00> : vector<16x256xf32>
    %76 = tpu.matmul %72, %75, %cst_55 {dimension_numbers = #tpu.dot_dimension_numbers<[1], [0], [0], [1], [0, 0, 1, 1], [], []>} : vector<16x256xf32>, vector<256x256xf32>, vector<16x256xf32> -> vector<16x256xf32>
    %c10 = arith.constant 10 : index
    %c0_56 = arith.constant 0 : index
    %c0_57 = arith.constant 0 : index
    %77 = vector.load %arg2[%c10, %c0_56, %c0_57] : memref<24x256x256xf32, #tpu.memory_space<vmem>>, vector<1x256x256xf32>
    %78 = vector.shape_cast %77 : vector<1x256x256xf32> to vector<256x256xf32>
    %cst_58 = arith.constant dense<0.000000e+00> : vector<16x256xf32>
    %79 = tpu.matmul %71, %78, %cst_58 {dimension_numbers = #tpu.dot_dimension_numbers<[1], [0], [0], [1], [0, 0, 1, 1], [], []>} : vector<16x256xf32>, vector<256x256xf32>, vector<16x256xf32> -> vector<16x256xf32>
    %80 = arith.addf %76, %79 : vector<16x256xf32>
    %c11 = arith.constant 11 : index
    %c0_59 = arith.constant 0 : index
    %c0_60 = arith.constant 0 : index
    %81 = vector.load %arg2[%c11, %c0_59, %c0_60] : memref<24x256x256xf32, #tpu.memory_space<vmem>>, vector<1x256x256xf32>
    %82 = vector.shape_cast %81 : vector<1x256x256xf32> to vector<256x256xf32>
    %cst_61 = arith.constant dense<0.000000e+00> : vector<16x256xf32>
    %83 = tpu.matmul %73, %82, %cst_61 {dimension_numbers = #tpu.dot_dimension_numbers<[1], [0], [0], [1], [0, 0, 1, 1], [], []>} : vector<16x256xf32>, vector<256x256xf32>, vector<16x256xf32> -> vector<16x256xf32>
    %84 = arith.addf %80, %83 : vector<16x256xf32>
    %c3_62 = arith.constant 3 : index
    %c0_63 = arith.constant 0 : index
    %c0_64 = arith.constant 0 : index
    %85 = vector.load %arg3[%c3_62, %c0_63, %c0_64] : memref<8x1x256xf32, #tpu.memory_space<vmem>>, vector<1x1x256xf32>
    %86 = vector.shape_cast %85 : vector<1x1x256xf32> to vector<1x256xf32>
    %87 = vector.broadcast %86 : vector<1x256xf32> to vector<16x256xf32>
    %88 = arith.addf %84, %87 : vector<16x256xf32>
    %cst_65 = arith.constant 0.000000e+00 : f32
    %89 = vector.broadcast %cst_65 : f32 to vector<16x256xf32>
    %90 = arith.maximumf %88, %89 : vector<16x256xf32>
    %c0_66 = arith.constant 0 : index
    %c0_67 = arith.constant 0 : index
    %c0_68 = arith.constant 0 : index
    %91 = vector.load %arg4[%c0_66, %c0_67, %c0_68] : memref<3x256x256xf32, #tpu.memory_space<vmem>>, vector<1x256x256xf32>
    %92 = vector.shape_cast %91 : vector<1x256x256xf32> to vector<256x256xf32>
    %cst_69 = arith.constant dense<0.000000e+00> : vector<16x256xf32>
    %93 = tpu.matmul %90, %92, %cst_69 {dimension_numbers = #tpu.dot_dimension_numbers<[1], [0], [0], [1], [0, 0, 1, 1], [], []>} : vector<16x256xf32>, vector<256x256xf32>, vector<16x256xf32> -> vector<16x256xf32>
    %c0_70 = arith.constant 0 : index
    %c0_71 = arith.constant 0 : index
    %c0_72 = arith.constant 0 : index
    %94 = vector.load %arg5[%c0_70, %c0_71, %c0_72] : memref<3x1x256xf32, #tpu.memory_space<vmem>>, vector<1x1x256xf32>
    %95 = vector.shape_cast %94 : vector<1x1x256xf32> to vector<1x256xf32>
    %96 = vector.broadcast %95 : vector<1x256xf32> to vector<16x256xf32>
    %97 = arith.addf %93, %96 : vector<16x256xf32>
    %cst_73 = arith.constant 0.000000e+00 : f32
    %98 = vector.broadcast %cst_73 : f32 to vector<16x256xf32>
    %99 = arith.maximumf %97, %98 : vector<16x256xf32>
    %c1_74 = arith.constant 1 : index
    %c0_75 = arith.constant 0 : index
    %c0_76 = arith.constant 0 : index
    %100 = vector.load %arg4[%c1_74, %c0_75, %c0_76] : memref<3x256x256xf32, #tpu.memory_space<vmem>>, vector<1x256x256xf32>
    %101 = vector.shape_cast %100 : vector<1x256x256xf32> to vector<256x256xf32>
    %cst_77 = arith.constant dense<0.000000e+00> : vector<16x256xf32>
    %102 = tpu.matmul %99, %101, %cst_77 {dimension_numbers = #tpu.dot_dimension_numbers<[1], [0], [0], [1], [0, 0, 1, 1], [], []>} : vector<16x256xf32>, vector<256x256xf32>, vector<16x256xf32> -> vector<16x256xf32>
    %c1_78 = arith.constant 1 : index
    %c0_79 = arith.constant 0 : index
    %c0_80 = arith.constant 0 : index
    %103 = vector.load %arg5[%c1_78, %c0_79, %c0_80] : memref<3x1x256xf32, #tpu.memory_space<vmem>>, vector<1x1x256xf32>
    %104 = vector.shape_cast %103 : vector<1x1x256xf32> to vector<1x256xf32>
    %105 = vector.broadcast %104 : vector<1x256xf32> to vector<16x256xf32>
    %106 = arith.addf %102, %105 : vector<16x256xf32>
    %cst_81 = arith.constant 0.000000e+00 : f32
    %107 = vector.broadcast %cst_81 : f32 to vector<16x256xf32>
    %108 = arith.maximumf %106, %107 : vector<16x256xf32>
    %c2_82 = arith.constant 2 : index
    %c0_83 = arith.constant 0 : index
    %c0_84 = arith.constant 0 : index
    %109 = vector.load %arg4[%c2_82, %c0_83, %c0_84] : memref<3x256x256xf32, #tpu.memory_space<vmem>>, vector<1x256x256xf32>
    %110 = vector.shape_cast %109 : vector<1x256x256xf32> to vector<256x256xf32>
    %cst_85 = arith.constant dense<0.000000e+00> : vector<16x256xf32>
    %111 = tpu.matmul %108, %110, %cst_85 {dimension_numbers = #tpu.dot_dimension_numbers<[1], [0], [0], [1], [0, 0, 1, 1], [], []>} : vector<16x256xf32>, vector<256x256xf32>, vector<16x256xf32> -> vector<16x256xf32>
    %c2_86 = arith.constant 2 : index
    %c0_87 = arith.constant 0 : index
    %c0_88 = arith.constant 0 : index
    %112 = vector.load %arg5[%c2_86, %c0_87, %c0_88] : memref<3x1x256xf32, #tpu.memory_space<vmem>>, vector<1x1x256xf32>
    %113 = vector.shape_cast %112 : vector<1x1x256xf32> to vector<1x256xf32>
    %114 = vector.broadcast %113 : vector<1x256xf32> to vector<16x256xf32>
    %115 = arith.addf %111, %114 : vector<16x256xf32>
    %cst_89 = arith.constant dense<0.000000e+00> : vector<16x256xf32>
    %116 = tpu.matmul %7, %115, %cst_89 {dimension_numbers = #tpu.dot_dimension_numbers<[1], [0], [0], [1], [0, 0, 1, 1], [], []>} : vector<16x16xf32>, vector<16x256xf32>, vector<16x256xf32> -> vector<16x256xf32>
    %cst_90 = arith.constant dense<0.000000e+00> : vector<16x256xf32>
    %117 = tpu.matmul %13, %115, %cst_90 {dimension_numbers = #tpu.dot_dimension_numbers<[1], [0], [0], [1], [0, 0, 1, 1], [], []>} : vector<16x16xf32>, vector<16x256xf32>, vector<16x256xf32> -> vector<16x256xf32>
    %c12 = arith.constant 12 : index
    %c0_91 = arith.constant 0 : index
    %c0_92 = arith.constant 0 : index
    %118 = vector.load %arg2[%c12, %c0_91, %c0_92] : memref<24x256x256xf32, #tpu.memory_space<vmem>>, vector<1x256x256xf32>
    %119 = vector.shape_cast %118 : vector<1x256x256xf32> to vector<256x256xf32>
    %cst_93 = arith.constant dense<0.000000e+00> : vector<16x256xf32>
    %120 = tpu.matmul %116, %119, %cst_93 {dimension_numbers = #tpu.dot_dimension_numbers<[1], [0], [0], [1], [0, 0, 1, 1], [], []>} : vector<16x256xf32>, vector<256x256xf32>, vector<16x256xf32> -> vector<16x256xf32>
    %c13 = arith.constant 13 : index
    %c0_94 = arith.constant 0 : index
    %c0_95 = arith.constant 0 : index
    %121 = vector.load %arg2[%c13, %c0_94, %c0_95] : memref<24x256x256xf32, #tpu.memory_space<vmem>>, vector<1x256x256xf32>
    %122 = vector.shape_cast %121 : vector<1x256x256xf32> to vector<256x256xf32>
    %cst_96 = arith.constant dense<0.000000e+00> : vector<16x256xf32>
    %123 = tpu.matmul %115, %122, %cst_96 {dimension_numbers = #tpu.dot_dimension_numbers<[1], [0], [0], [1], [0, 0, 1, 1], [], []>} : vector<16x256xf32>, vector<256x256xf32>, vector<16x256xf32> -> vector<16x256xf32>
    %124 = arith.addf %120, %123 : vector<16x256xf32>
    %c14 = arith.constant 14 : index
    %c0_97 = arith.constant 0 : index
    %c0_98 = arith.constant 0 : index
    %125 = vector.load %arg2[%c14, %c0_97, %c0_98] : memref<24x256x256xf32, #tpu.memory_space<vmem>>, vector<1x256x256xf32>
    %126 = vector.shape_cast %125 : vector<1x256x256xf32> to vector<256x256xf32>
    %cst_99 = arith.constant dense<0.000000e+00> : vector<16x256xf32>
    %127 = tpu.matmul %117, %126, %cst_99 {dimension_numbers = #tpu.dot_dimension_numbers<[1], [0], [0], [1], [0, 0, 1, 1], [], []>} : vector<16x256xf32>, vector<256x256xf32>, vector<16x256xf32> -> vector<16x256xf32>
    %128 = arith.addf %124, %127 : vector<16x256xf32>
    %c4_100 = arith.constant 4 : index
    %c0_101 = arith.constant 0 : index
    %c0_102 = arith.constant 0 : index
    %129 = vector.load %arg3[%c4_100, %c0_101, %c0_102] : memref<8x1x256xf32, #tpu.memory_space<vmem>>, vector<1x1x256xf32>
    %130 = vector.shape_cast %129 : vector<1x1x256xf32> to vector<1x256xf32>
    %131 = vector.broadcast %130 : vector<1x256xf32> to vector<16x256xf32>
    %132 = arith.addf %128, %131 : vector<16x256xf32>
    %cst_103 = arith.constant 0.000000e+00 : f32
    %133 = vector.broadcast %cst_103 : f32 to vector<16x256xf32>
    %134 = arith.maximumf %132, %133 : vector<16x256xf32>
    %cst_104 = arith.constant dense<0.000000e+00> : vector<16x256xf32>
    %135 = tpu.matmul %7, %134, %cst_104 {dimension_numbers = #tpu.dot_dimension_numbers<[1], [0], [0], [1], [0, 0, 1, 1], [], []>} : vector<16x16xf32>, vector<16x256xf32>, vector<16x256xf32> -> vector<16x256xf32>
    %cst_105 = arith.constant dense<0.000000e+00> : vector<16x256xf32>
    %136 = tpu.matmul %13, %134, %cst_105 {dimension_numbers = #tpu.dot_dimension_numbers<[1], [0], [0], [1], [0, 0, 1, 1], [], []>} : vector<16x16xf32>, vector<16x256xf32>, vector<16x256xf32> -> vector<16x256xf32>
    %c15 = arith.constant 15 : index
    %c0_106 = arith.constant 0 : index
    %c0_107 = arith.constant 0 : index
    %137 = vector.load %arg2[%c15, %c0_106, %c0_107] : memref<24x256x256xf32, #tpu.memory_space<vmem>>, vector<1x256x256xf32>
    %138 = vector.shape_cast %137 : vector<1x256x256xf32> to vector<256x256xf32>
    %cst_108 = arith.constant dense<0.000000e+00> : vector<16x256xf32>
    %139 = tpu.matmul %135, %138, %cst_108 {dimension_numbers = #tpu.dot_dimension_numbers<[1], [0], [0], [1], [0, 0, 1, 1], [], []>} : vector<16x256xf32>, vector<256x256xf32>, vector<16x256xf32> -> vector<16x256xf32>
    %c16 = arith.constant 16 : index
    %c0_109 = arith.constant 0 : index
    %c0_110 = arith.constant 0 : index
    %140 = vector.load %arg2[%c16, %c0_109, %c0_110] : memref<24x256x256xf32, #tpu.memory_space<vmem>>, vector<1x256x256xf32>
    %141 = vector.shape_cast %140 : vector<1x256x256xf32> to vector<256x256xf32>
    %cst_111 = arith.constant dense<0.000000e+00> : vector<16x256xf32>
    %142 = tpu.matmul %134, %141, %cst_111 {dimension_numbers = #tpu.dot_dimension_numbers<[1], [0], [0], [1], [0, 0, 1, 1], [], []>} : vector<16x256xf32>, vector<256x256xf32>, vector<16x256xf32> -> vector<16x256xf32>
    %143 = arith.addf %139, %142 : vector<16x256xf32>
    %c17 = arith.constant 17 : index
    %c0_112 = arith.constant 0 : index
    %c0_113 = arith.constant 0 : index
    %144 = vector.load %arg2[%c17, %c0_112, %c0_113] : memref<24x256x256xf32, #tpu.memory_space<vmem>>, vector<1x256x256xf32>
    %145 = vector.shape_cast %144 : vector<1x256x256xf32> to vector<256x256xf32>
    %cst_114 = arith.constant dense<0.000000e+00> : vector<16x256xf32>
    %146 = tpu.matmul %136, %145, %cst_114 {dimension_numbers = #tpu.dot_dimension_numbers<[1], [0], [0], [1], [0, 0, 1, 1], [], []>} : vector<16x256xf32>, vector<256x256xf32>, vector<16x256xf32> -> vector<16x256xf32>
    %147 = arith.addf %143, %146 : vector<16x256xf32>
    %c5_115 = arith.constant 5 : index
    %c0_116 = arith.constant 0 : index
    %c0_117 = arith.constant 0 : index
    %148 = vector.load %arg3[%c5_115, %c0_116, %c0_117] : memref<8x1x256xf32, #tpu.memory_space<vmem>>, vector<1x1x256xf32>
    %149 = vector.shape_cast %148 : vector<1x1x256xf32> to vector<1x256xf32>
    %150 = vector.broadcast %149 : vector<1x256xf32> to vector<16x256xf32>
    %151 = arith.addf %147, %150 : vector<16x256xf32>
    %cst_118 = arith.constant 0.000000e+00 : f32
    %152 = vector.broadcast %cst_118 : f32 to vector<16x256xf32>
    %153 = arith.maximumf %151, %152 : vector<16x256xf32>
    %cst_119 = arith.constant dense<0.000000e+00> : vector<16x256xf32>
    %154 = tpu.matmul %7, %153, %cst_119 {dimension_numbers = #tpu.dot_dimension_numbers<[1], [0], [0], [1], [0, 0, 1, 1], [], []>} : vector<16x16xf32>, vector<16x256xf32>, vector<16x256xf32> -> vector<16x256xf32>
    %cst_120 = arith.constant dense<0.000000e+00> : vector<16x256xf32>
    %155 = tpu.matmul %13, %153, %cst_120 {dimension_numbers = #tpu.dot_dimension_numbers<[1], [0], [0], [1], [0, 0, 1, 1], [], []>} : vector<16x16xf32>, vector<16x256xf32>, vector<16x256xf32> -> vector<16x256xf32>
    %c18 = arith.constant 18 : index
    %c0_121 = arith.constant 0 : index
    %c0_122 = arith.constant 0 : index
    %156 = vector.load %arg2[%c18, %c0_121, %c0_122] : memref<24x256x256xf32, #tpu.memory_space<vmem>>, vector<1x256x256xf32>
    %157 = vector.shape_cast %156 : vector<1x256x256xf32> to vector<256x256xf32>
    %cst_123 = arith.constant dense<0.000000e+00> : vector<16x256xf32>
    %158 = tpu.matmul %154, %157, %cst_123 {dimension_numbers = #tpu.dot_dimension_numbers<[1], [0], [0], [1], [0, 0, 1, 1], [], []>} : vector<16x256xf32>, vector<256x256xf32>, vector<16x256xf32> -> vector<16x256xf32>
    %c19 = arith.constant 19 : index
    %c0_124 = arith.constant 0 : index
    %c0_125 = arith.constant 0 : index
    %159 = vector.load %arg2[%c19, %c0_124, %c0_125] : memref<24x256x256xf32, #tpu.memory_space<vmem>>, vector<1x256x256xf32>
    %160 = vector.shape_cast %159 : vector<1x256x256xf32> to vector<256x256xf32>
    %cst_126 = arith.constant dense<0.000000e+00> : vector<16x256xf32>
    %161 = tpu.matmul %153, %160, %cst_126 {dimension_numbers = #tpu.dot_dimension_numbers<[1], [0], [0], [1], [0, 0, 1, 1], [], []>} : vector<16x256xf32>, vector<256x256xf32>, vector<16x256xf32> -> vector<16x256xf32>
    %162 = arith.addf %158, %161 : vector<16x256xf32>
    %c20 = arith.constant 20 : index
    %c0_127 = arith.constant 0 : index
    %c0_128 = arith.constant 0 : index
    %163 = vector.load %arg2[%c20, %c0_127, %c0_128] : memref<24x256x256xf32, #tpu.memory_space<vmem>>, vector<1x256x256xf32>
    %164 = vector.shape_cast %163 : vector<1x256x256xf32> to vector<256x256xf32>
    %cst_129 = arith.constant dense<0.000000e+00> : vector<16x256xf32>
    %165 = tpu.matmul %155, %164, %cst_129 {dimension_numbers = #tpu.dot_dimension_numbers<[1], [0], [0], [1], [0, 0, 1, 1], [], []>} : vector<16x256xf32>, vector<256x256xf32>, vector<16x256xf32> -> vector<16x256xf32>
    %166 = arith.addf %162, %165 : vector<16x256xf32>
    %c6_130 = arith.constant 6 : index
    %c0_131 = arith.constant 0 : index
    %c0_132 = arith.constant 0 : index
    %167 = vector.load %arg3[%c6_130, %c0_131, %c0_132] : memref<8x1x256xf32, #tpu.memory_space<vmem>>, vector<1x1x256xf32>
    %168 = vector.shape_cast %167 : vector<1x1x256xf32> to vector<1x256xf32>
    %169 = vector.broadcast %168 : vector<1x256xf32> to vector<16x256xf32>
    %170 = arith.addf %166, %169 : vector<16x256xf32>
    %cst_133 = arith.constant 0.000000e+00 : f32
    %171 = vector.broadcast %cst_133 : f32 to vector<16x256xf32>
    %172 = arith.maximumf %170, %171 : vector<16x256xf32>
    %cst_134 = arith.constant dense<0.000000e+00> : vector<16x256xf32>
    %173 = tpu.matmul %7, %172, %cst_134 {dimension_numbers = #tpu.dot_dimension_numbers<[1], [0], [0], [1], [0, 0, 1, 1], [], []>} : vector<16x16xf32>, vector<16x256xf32>, vector<16x256xf32> -> vector<16x256xf32>
    %cst_135 = arith.constant dense<0.000000e+00> : vector<16x256xf32>
    %174 = tpu.matmul %13, %172, %cst_135 {dimension_numbers = #tpu.dot_dimension_numbers<[1], [0], [0], [1], [0, 0, 1, 1], [], []>} : vector<16x16xf32>, vector<16x256xf32>, vector<16x256xf32> -> vector<16x256xf32>
    %c21 = arith.constant 21 : index
    %c0_136 = arith.constant 0 : index
    %c0_137 = arith.constant 0 : index
    %175 = vector.load %arg2[%c21, %c0_136, %c0_137] : memref<24x256x256xf32, #tpu.memory_space<vmem>>, vector<1x256x256xf32>
    %176 = vector.shape_cast %175 : vector<1x256x256xf32> to vector<256x256xf32>
    %cst_138 = arith.constant dense<0.000000e+00> : vector<16x256xf32>
    %177 = tpu.matmul %173, %176, %cst_138 {dimension_numbers = #tpu.dot_dimension_numbers<[1], [0], [0], [1], [0, 0, 1, 1], [], []>} : vector<16x256xf32>, vector<256x256xf32>, vector<16x256xf32> -> vector<16x256xf32>
    %c22 = arith.constant 22 : index
    %c0_139 = arith.constant 0 : index
    %c0_140 = arith.constant 0 : index
    %178 = vector.load %arg2[%c22, %c0_139, %c0_140] : memref<24x256x256xf32, #tpu.memory_space<vmem>>, vector<1x256x256xf32>
    %179 = vector.shape_cast %178 : vector<1x256x256xf32> to vector<256x256xf32>
    %cst_141 = arith.constant dense<0.000000e+00> : vector<16x256xf32>
    %180 = tpu.matmul %172, %179, %cst_141 {dimension_numbers = #tpu.dot_dimension_numbers<[1], [0], [0], [1], [0, 0, 1, 1], [], []>} : vector<16x256xf32>, vector<256x256xf32>, vector<16x256xf32> -> vector<16x256xf32>
    %181 = arith.addf %177, %180 : vector<16x256xf32>
    %c23 = arith.constant 23 : index
    %c0_142 = arith.constant 0 : index
    %c0_143 = arith.constant 0 : index
    %182 = vector.load %arg2[%c23, %c0_142, %c0_143] : memref<24x256x256xf32, #tpu.memory_space<vmem>>, vector<1x256x256xf32>
    %183 = vector.shape_cast %182 : vector<1x256x256xf32> to vector<256x256xf32>
    %cst_144 = arith.constant dense<0.000000e+00> : vector<16x256xf32>
    %184 = tpu.matmul %174, %183, %cst_144 {dimension_numbers = #tpu.dot_dimension_numbers<[1], [0], [0], [1], [0, 0, 1, 1], [], []>} : vector<16x256xf32>, vector<256x256xf32>, vector<16x256xf32> -> vector<16x256xf32>
    %185 = arith.addf %181, %184 : vector<16x256xf32>
    %c7_145 = arith.constant 7 : index
    %c0_146 = arith.constant 0 : index
    %c0_147 = arith.constant 0 : index
    %186 = vector.load %arg3[%c7_145, %c0_146, %c0_147] : memref<8x1x256xf32, #tpu.memory_space<vmem>>, vector<1x1x256xf32>
    %187 = vector.shape_cast %186 : vector<1x1x256xf32> to vector<1x256xf32>
    %188 = vector.broadcast %187 : vector<1x256xf32> to vector<16x256xf32>
    %189 = arith.addf %185, %188 : vector<16x256xf32>
    %cst_148 = arith.constant 0.000000e+00 : f32
    %190 = vector.broadcast %cst_148 : f32 to vector<16x256xf32>
    %191 = arith.maximumf %189, %190 : vector<16x256xf32>
    %cst_149 = arith.constant dense<0xFF800000> : vector<16xf32>
    %192 = vector.multi_reduction <maximumf>, %191, %cst_149 [1] : vector<16x256xf32> to vector<16xf32>
    %193 = vector.shape_cast %192 : vector<16xf32> to vector<16x1xf32>
    %194 = vector.broadcast %193 : vector<16x1xf32> to vector<16x256xf32>
    %195 = arith.subf %191, %194 : vector<16x256xf32>
    %196 = math.exp %195 : vector<16x256xf32>
    %c0_150 = arith.constant 0 : index
    %c0_151 = arith.constant 0 : index
    %197 = vector.load %arg6[%c0_150, %c0_151] : memref<256x256xf32, #tpu.memory_space<vmem>>, vector<256x256xf32>
    %cst_152 = arith.constant dense<0.000000e+00> : vector<16x256xf32>
    %198 = tpu.matmul %196, %197, %cst_152 {dimension_numbers = #tpu.dot_dimension_numbers<[1], [0], [0], [1], [0, 0, 1, 1], [], []>} : vector<16x256xf32>, vector<256x256xf32>, vector<16x256xf32> -> vector<16x256xf32>
    %199 = math.log %198 : vector<16x256xf32>
    %200 = arith.subf %195, %199 : vector<16x256xf32>
    %c0_153 = arith.constant 0 : index
    %c0_154 = arith.constant 0 : index
    %201 = vector.load %arg7[%c0_153, %c0_154] : memref<16x256xf32, #tpu.memory_space<vmem>>, vector<16x256xf32>
    tpu.vector_store %arg7[%c0_153, %c0_154], %200 {strides = array<i32>} : memref<16x256xf32, #tpu.memory_space<vmem>>, vector<16x256xf32>,
    return
  }
  func.func @transform_0(%arg0: i32) -> (i32, i32) {
    %c0_i32 = arith.constant 0 : i32
    %c0_i32_0 = arith.constant 0 : i32
    return %arg0, %c0_i32 : i32, i32
  }
  func.func @transform_1(%arg0: i32) -> (i32, i32, i32) {
    %c0_i32 = arith.constant 0 : i32
    %c0_i32_0 = arith.constant 0 : i32
    %c0_i32_1 = arith.constant 0 : i32
    %c0_i32_2 = arith.constant 0 : i32
    return %c0_i32, %c0_i32_0, %c0_i32_1 : i32, i32, i32
  }
  func.func @transform_2(%arg0: i32) -> (i32, i32, i32) {
    %c0_i32 = arith.constant 0 : i32
    %c0_i32_0 = arith.constant 0 : i32
    %c0_i32_1 = arith.constant 0 : i32
    %c0_i32_2 = arith.constant 0 : i32
    return %c0_i32, %c0_i32_0, %c0_i32_1 : i32, i32, i32
  }
  func.func @transform_3(%arg0: i32) -> (i32, i32, i32) {
    %c0_i32 = arith.constant 0 : i32
    %c0_i32_0 = arith.constant 0 : i32
    %c0_i32_1 = arith.constant 0 : i32
    %c0_i32_2 = arith.constant 0 : i32
    return %c0_i32, %c0_i32_0, %c0_i32_1 : i32, i32, i32
  }
  func.func @transform_4(%arg0: i32) -> (i32, i32, i32) {
    %c0_i32 = arith.constant 0 : i32
    %c0_i32_0 = arith.constant 0 : i32
    %c0_i32_1 = arith.constant 0 : i32
    %c0_i32_2 = arith.constant 0 : i32
    return %c0_i32, %c0_i32_0, %c0_i32_1 : i32, i32, i32
  }
  func.func @transform_5(%arg0: i32) -> (i32, i32) {
    %c0_i32 = arith.constant 0 : i32
    %c0_i32_0 = arith.constant 0 : i32
    %c0_i32_1 = arith.constant 0 : i32
    return %c0_i32, %c0_i32_0 : i32, i32
  }
  func.func @transform_6(%arg0: i32) -> (i32, i32) {
    %c0_i32 = arith.constant 0 : i32
    %c0_i32_0 = arith.constant 0 : i32
    return %arg0, %c0_i32 : i32, i32
  }
}

</mosaic_0001>

<bundles_post_ra>
// kernel: multi_task_forward.1
= control target key start
LH: loop header
LB: loop body
LE: loop exit
PB: predicated region body
PF: predicated region fallthrough
CT: control target
= control target key end

     0   :  { %11 = vsyncpa [#allocation3], 0  ;;  %s6676_s0 = inlined_call_operand.vmem [shape: f32[32,256], index: 0, kind: input, shape index: {}]   ;;  %s6677_s1 = inlined_call_operand.hbm [shape: f32[24,256,256], index: 1, kind: input, shape index: {}]   ;;  %s6678_s2 = inlined_call_operand.hbm [shape: f32[8,1,256], index: 2, kind: input, shape index: {}]   ;;  %s6679_s3 = inlined_call_operand.hbm [shape: f32[3,256,256], index: 3, kind: input, shape index: {}]   ;;  %s6680_s4 = inlined_call_operand.hbm [shape: f32[3,1,256], index: 4, kind: input, shape index: {}]   ;;  %s6681_s5 = inlined_call_operand.hbm [shape: f32[256,256], index: 5, kind: input, shape index: {}]   ;;  %s6682_s6 = inlined_call_operand.vmem [shape: f32[32,256], index: 6, kind: output, shape index: {}]  }
   0x1   :  { %12 = vsyncpa [#allocation5], 0 }
   0x2   :  { %13 = vsyncpa [#allocation8], 0  ;;  %s6293_s21 = smov 0  }
   0x3 LB: > { %s6248_s22 = smov [#allocation4]   ;;  %s5959_s24 = sadd.s32 4294967295, %s6246_s21   ;;  %s6246_s21 = sphi %s6293_s21, %s19_s21  }
   0x4   : > { %s206_s23 = sshll.u32 %s6248_s22, 4  ;;  %p5961_p0 = scmp.ge.s32.totalorder %s6246_s21, 1  ;;  %s207_s23 = int_to_ptr.vmem [resolvable:$true] %s206_s23 }
   0x5   : > { %p181_p1 = scmp.lt.s32.totalorder %s6246_s21, 3  ;;  %p6303_p2 = scmp.eq.s32.totalorder %s5959_s24, 0 }
   0x6   : > { %s6249_s27 = smov [#allocation7]   ;;  %s6250_s30 = smov [#allocation2]  }
   0x7   : > { %p6307_p3 = pnand %p5961_p0, %p181_p1  ;;  %s232_s28 = sshll.u32 %s6249_s27, 4  ;;  %s6313_s28 = int_to_ptr.vmem [resolvable:$true] %s232_s28 }
   0x8   : > { %s193_s7 = sshll.u32 %s6250_s30, 4  ;;  %s6109_s9 = scalar_lea.vmem %s207_s23, 256  ;;  %s6321_s7 = int_to_ptr.vmem [resolvable:$true] %s193_s7 }
   0x9   : > { %p6038_p4 = pneg %p6307_p3  ;;  %p6110_p7 = scmp.ne.s32.totalorder %s207_s23, %s6109_s9 }
   0xa   : > { %p6117_p10 = scmp.lt.s32.totalorder %s207_s23, %s207_s23  ;;  %p6118_p11 = scmp.lt.s32.totalorder %s6109_s9, %s6109_s9 }
   0xb   : > { %p6317_p5 = pnand %p6303_p2, %p6038_p4 }
   0xc   : > { %p6119_p12 = por %p6118_p11, %p6117_p10 }
   0xd   : > { %p6325_p6 = pneg %p6317_p5 }
   0xf   : > { %p6112_p8 = pnand %p6110_p7, %p6325_p6 }
  0x11   : > { %p6113_p9 = pneg %p6112_p8 }
  0x13   : > { %p6120_p13 = pnand %p6119_p12, %p6113_p9 }
  0x15   : > { %6123 = shalt.err (!%p6120_p13)
}
  0x16   : > { %s6251_s10 = smov 32   ;;  %s6252_s11 = smov 2  }
  0x17   : > { %6044 = dma.hbm_to_vmem [thread:$0]  (!%p6317_p5), %s6678_s2, 256, %s207_s23, [#allocation5], %s6251_s10, %s6251_s10, %s6252_s11  }
  0x18   : > { %s6135_s14 = scalar_lea.vmem %s6313_s28, 96  ;;  %p6143_p7 = scmp.lt.s32.totalorder %s6313_s28, %s6313_s28 }
  0x19   : > { %p6136_p0 = scmp.ne.s32.totalorder %s6313_s28, %s6135_s14  ;;  %p6144_p8 = scmp.lt.s32.totalorder %s6135_s14, %s6135_s14 }
  0x1b   : > { %p6138_p1 = pnand %p6136_p0, %p6325_p6  ;;  %p6145_p9 = por %p6144_p8, %p6143_p7 }
  0x1d   : > { %p6139_p4 = pneg %p6138_p1 }
  0x1f   : > { %p6146_p10 = pnand %p6145_p9, %p6139_p4 }
  0x21   : > { %6149 = shalt.err (!%p6146_p10)
}
  0x22   : > { %6050 = dma.hbm_to_vmem [thread:$0]  (!%p6317_p5), %s6680_s4, 96, %s6313_s28, [#allocation8], %s6251_s10, %s6251_s10, %s6252_s11  }
  0x23   : > { %s6161_s17 = scalar_lea.vmem %s6321_s7, 196608  ;;  %p6169_p0 = scmp.lt.s32.totalorder %s6321_s7, %s6321_s7 }
  0x24   : > { %p6162_p11 = scmp.ne.s32.totalorder %s6321_s7, %s6161_s17  ;;  %p6170_p1 = scmp.lt.s32.totalorder %s6161_s17, %s6161_s17 }
  0x26   : > { %p6164_p12 = pnand %p6162_p11, %p6325_p6  ;;  %p6171_p4 = por %p6170_p1, %p6169_p0 }
  0x28   : > { %p6165_p13 = pneg %p6164_p12 }
  0x2a   : > { %p6172_p7 = pnand %p6171_p4, %p6165_p13 }
  0x2c   : > { %6175 = shalt.err (!%p6172_p7)
}
  0x2d   : > { %s6253_s18 = smov 256   ;;  %s6254_s19 = smov 16  }
  0x2e   : > { %6041 = dma.hbm_to_vmem [thread:$0]  (!%p6317_p5), %s6677_s1, 196608, %s6321_s7, [#allocation3], %s6253_s18, %s6253_s18, %s6254_s19  }
  0x2f   : > { %s6255_s23 = smov [#allocation6]   ;;  %s6256_s28 = smov [#allocation9]  }
  0x30   : > { %s219_s27 = sshll.u32 %s6255_s23, 4  ;;  %s245_s30 = sshll.u32 %s6256_s28, 4  ;;  %s220_s27 = int_to_ptr.vmem [resolvable:$true] %s219_s27  ;;  %s246_s30 = int_to_ptr.vmem [resolvable:$true] %s245_s30 }
  0x31   : > { %s6187_s9 = scalar_lea.vmem %s220_s27, 24576  ;;  %p6195_p11 = scmp.lt.s32.totalorder %s220_s27, %s220_s27 }
  0x32   : > { %p6188_p8 = scmp.ne.s32.totalorder %s220_s27, %s6187_s9  ;;  %p6196_p12 = scmp.lt.s32.totalorder %s6187_s9, %s6187_s9 }
  0x34   : > { %p6190_p9 = pnand %p6188_p8, %p6325_p6  ;;  %p6197_p13 = por %p6196_p12, %p6195_p11 }
  0x36   : > { %p6191_p10 = pneg %p6190_p9 }
  0x38   : > { %p6198_p0 = pnand %p6197_p13, %p6191_p10 }
  0x3a   : > { %6201 = shalt.err (!%p6198_p0)
}
  0x3b   : > { %6047 = dma.hbm_to_vmem [thread:$0]  (!%p6317_p5), %s6679_s3, 24576, %s220_s27, [#allocation5], %s6253_s18, %s6253_s18, %s6254_s19  }
  0x3c   : > { %s6213_s11 = scalar_lea.vmem %s246_s30, 8192  ;;  %p6221_p8 = scmp.lt.s32.totalorder %s246_s30, %s246_s30 }
  0x3d   : > { %p6214_p1 = scmp.ne.s32.totalorder %s246_s30, %s6213_s11  ;;  %p6222_p9 = scmp.lt.s32.totalorder %s6213_s11, %s6213_s11 }
  0x3f   : > { %p6216_p4 = pnand %p6214_p1, %p6325_p6  ;;  %p6223_p11 = por %p6222_p9, %p6221_p8 }
  0x41   : > { %p6217_p7 = pneg %p6216_p4 }
  0x43   : > { %p6224_p10 = pnand %p6223_p11, %p6217_p7 }
  0x45   : > { %6227 = shalt.err (!%p6224_p10)
}
  0x46   : > { %6053 = dma.hbm_to_vmem [thread:$0]  (!%p6317_p5), %s6681_s5, 8192, %s246_s30, [#allocation8], %s6253_s18, %s6253_s18, %s6254_s19  }
  0x47   : > { %271 = sbr.rel (%p6307_p3) target bundleno = 4352 (0x1100), region = 44 }
  0x4c   : > { %6233 = dma.done.wait (%p6303_p2), [#allocation3], 196608  }
  0x4d   : > { %6235 = vsyncadd (%p6303_p2), [#allocation3], 4294770688 }
  0x4e   : > { %6237 = dma.done.wait (%p6303_p2), [#allocation5], 24832  }
  0x4f   : > { %6239 = vsyncadd (%p6303_p2), [#allocation5], 4294942464 }
  0x50   : > { %6241 = dma.done.wait (%p6303_p2), [#allocation8], 8288  }
  0x51   : > { %6243 = vsyncadd (%p6303_p2), [#allocation8], 4294959008  ;;  %s5974_s26 = sshll.u32 %s5959_s24, 1  ;;  %v333_v0 = vlaneseq  ;;  %v6257_v1 = vmov 0.0   ;;  %vm354_vm2 = vcmask 130048   ;;  %v617_v15 = vld [vmem:[#allocation2 + $0x2f8] sm:$0xff] }
  0x52   : > { %p320_p3 = scmp.lt.s32.totalorder %s5974_s26, 3  ;;  %425 = vmatprep.mubr.f32.mxu0 %v6257_v1  ;;  %508 = vmatprep.mubr.f32.mxu1 %v6257_v1  ;;  %v616_v16 = vld [vmem:[#allocation2 + $0x2f0] sm:$0xff]  ;;  %v615_v19 = vld [vmem:[#allocation2 + $0x2e8] sm:$0xff]  ;;  %v614_v20 = vld [vmem:[#allocation2 + $0x2e0] sm:$0xff] }
  0x53   : > { %v6401_v2 = vshrl.u32 %v333_v0, 7  ;;  %v337_v3 = vand.u32 127, %v333_v0  ;;  %v613_v21 = vld [vmem:[#allocation2 + $0x2d8] sm:$0xff]  ;;  %v612_v22 = vld [vmem:[#allocation2 + $0x2d0] sm:$0xff]  ;;  %v611_v23 = vld [vmem:[#allocation2 + $0x2c8] sm:$0xff] }
  0x54   : > { %s6688_s26 = smov (!%p320_p3, %s5974_s26), 3  ;;  %v610_v24 = vld [vmem:[#allocation2 + $0x2c0] sm:$0xff]  ;;  %v609_v25 = vld [vmem:[#allocation2 + $0x2b8] sm:$0xff]  ;;  %v608_v26 = vld [vmem:[#allocation2 + $0x2b0] sm:$0xff] }
  0x55   : > { %v5980_v4 = vadd.s32 4294967295, %v6401_v2  ;;  %v344_v5 = vadd.s32 1, %v6401_v2  ;;  %s6016_s25 = sshll.u32 %s6688_s26, 4  ;;  %v335_v6 = vadd.s32 8, %v6401_v2  ;;  %v607_v27 = vld [vmem:[#allocation2 + $0x2a8] sm:$0xff]  ;;  %v606_v28 = vld [vmem:[#allocation2 + $0x2a0] sm:$0xff] }
  0x56   : > { %s324_s8 = scalar_lea.vmem %s6676_s0, %s6016_s25  ;;  %v605_v29 = vld [vmem:[#allocation2 + $0x298] sm:$0xff]  ;;  %v604_v30 = vld [vmem:[#allocation2 + $0x290] sm:$0xff]  ;;  %v603_v31 = vld [vmem:[#allocation2 + $0x288] sm:$0xff]  ;;  %s331_s16 = scalar_lea.vmem %s6682_s6, %s6016_s25 }
  0x57   : > { %vm340_vm0 = vcmp.eq.s32.totalorder %v337_v3, %v5980_v4  ;;  %vm346_vm1 = vcmp.eq.s32.totalorder %v337_v3, %v344_v5  ;;  %v6414_v7 = vld [vmem:[%s324_s8 + $0x18] sm:$0xff]  ;;  %v6416_v8 = vld [vmem:[%s324_s8 + $0x10] sm:$0xff]  ;;  %v351_v9 = vld [vmem:[%s324_s8 + $0x8] sm:$0xff]  ;;  %v5981_v10 = vadd.s32 4294967295, %v335_v6  ;;  %v345_v12 = vadd.s32 1, %v335_v6 }
  0x58   : > { %389 = vmatprep.subr.mxu0 %v6414_v7  ;;  %472 = vmatprep.subr.mxu1 %v6414_v7  ;;  %v6420_v11 = vld [vmem:[%s324_s8] sm:$0xff]  ;;  %v6425_v13 = vsel %vm340_vm0, 1.0, %v6257_v1  ;;  %v6428_v14 = vsel %vm346_vm1, 1.0, %v6257_v1  ;;  %v601_v33 = vld [vmem:[#allocation2 + $0x278] sm:$0xff]  ;;  %v600_v34 = vld [vmem:[#allocation2 + $0x270] sm:$0xff] }
  0x59   : > { %390 = vmatpush1.msra.mxu0 %v6416_v8  ;;  %473 = vmatpush1.msra.mxu1 %v6416_v8  ;;  %vm341_vm3 = vcmp.eq.s32.totalorder %v337_v3, %v5981_v10  ;;  %vm347_vm4 = vcmp.eq.s32.totalorder %v337_v3, %v345_v12  ;;  %v602_v32 = vld [vmem:[#allocation2 + $0x280] sm:$0xff]  ;;  %v552_v35 = vld [vmem:[#allocation2 + $0xf8] sm:$0xff]  ;;  %v599_v36 = vld [vmem:[#allocation2 + $0x268] sm:$0xff] }
  0x5a   : > { %391 = vmatprep.subr.mxu0 %v351_v9  ;;  %474 = vmatprep.subr.mxu1 %v351_v9  ;;  %v6439_v17 = vsel %vm341_vm3, 1.0, %v6257_v1  ;;  %v6442_v18 = vsel %vm347_vm4, 1.0, %v6257_v1  ;;  %v551_v37 = vld [vmem:[#allocation2 + $0xf0] sm:$0xff]  ;;  %v598_v38 = vld [vmem:[#allocation2 + $0x260] sm:$0xff]  ;;  %v550_v39 = vld [vmem:[#allocation2 + $0xe8] sm:$0xff] }
  0x5b   : > { %392 = vmatpush1.msra.mxu0 %v6420_v11  ;;  %475 = vmatpush1.msra.mxu1 %v6420_v11  ;;  %v549_v40 = vld [vmem:[#allocation2 + $0xe0] sm:$0xff]  ;;  %v597_v41 = vld [vmem:[#allocation2 + $0x258] sm:$0xff]  ;;  %v596_v43 = vld [vmem:[#allocation2 + $0x250] sm:$0xff] }
  0x5c   : > { %5982 = vmatmul.mubr.msk.f32.vlgmr.msra.gmra.mxu0 %vm354_vm2, %v6425_v13  ;;  %5984 = vmatmul.mubr.msk.f32.vlgmr.msra.gmra.mxu1 %vm354_vm2, %v6428_v14  ;;  %v548_v42 = vld [vmem:[#allocation2 + $0xd8] sm:$0xff]  ;;  %v547_v44 = vld [vmem:[#allocation2 + $0xd0] sm:$0xff]  ;;  %v546_v45 = vld [vmem:[#allocation2 + $0xc8] sm:$0xff] }
  0x5d   : > { %431 = vmatprep.mubr.f32.mxu0 %v6257_v1  ;;  %514 = vmatprep.mubr.f32.mxu1 %v6257_v1  ;;  %v595_v46 = vld [vmem:[#allocation2 + $0x248] sm:$0xff]  ;;  %v545_v47 = vld [vmem:[#allocation2 + $0xc0] sm:$0xff]  ;;  %v544_v49 = vld [vmem:[#allocation2 + $0xb8] sm:$0xff] }
  0x5e   : > { %650 = vmatprep.subr.mxu0 %v617_v15  ;;  %727 = vmatprep.subr.mxu1 %v552_v35  ;;  %v594_v48 = vld [vmem:[#allocation2 + $0x240] sm:$0xff]  ;;  %v593_v50 = vld [vmem:[#allocation2 + $0x238] sm:$0xff]  ;;  %v543_v51 = vld [vmem:[#allocation2 + $0xb0] sm:$0xff] }
  0x5f   : > { %651 = vmatpush1.msra.mxu0 %v616_v16  ;;  %728 = vmatpush1.msra.mxu1 %v551_v37  ;;  %v592_v52 = vld [vmem:[#allocation2 + $0x230] sm:$0xff]  ;;  %v542_v53 = vld [vmem:[#allocation2 + $0xa8] sm:$0xff]  ;;  %v541_v55 = vld [vmem:[#allocation2 + $0xa0] sm:$0xff] }
  0x60   : > { %5983 = vmatmul.mubr.msk.f32.gmra.mxu0 %vm354_vm2, %v6439_v17  ;;  %5985 = vmatmul.mubr.msk.f32.gmra.mxu1 %vm354_vm2, %v6442_v18  ;;  %v591_v54 = vld [vmem:[#allocation2 + $0x228] sm:$0xff]  ;;  %v590_v56 = vld [vmem:[#allocation2 + $0x220] sm:$0xff]  ;;  %v540_v57 = vld [vmem:[#allocation2 + $0x98] sm:$0xff] }
  0x61   : > { %652 = vmatprep.subr.mxu0 %v615_v19  ;;  %714 = vmatprep.mubr.f32.mxu0 %v351_v9  ;;  %v589_v58 = vld [vmem:[#allocation2 + $0x218] sm:$0xff]  ;;  %v539_v59 = vld [vmem:[#allocation2 + $0x90] sm:$0xff]  ;;  %v538_v61 = vld [vmem:[#allocation2 + $0x88] sm:$0xff] }
  0x62   : > { %653 = vmatpush1.msra.mxu0 %v614_v20  ;;  %729 = vmatprep.subr.mxu1 %v550_v39  ;;  %v588_v60 = vld [vmem:[#allocation2 + $0x210] sm:$0xff]  ;;  %v587_v62 = vld [vmem:[#allocation2 + $0x208] sm:$0xff]  ;;  %v537_v63 = vld [vmem:[#allocation2 + $0x80] sm:$0xff] }
  0x63   : > { %654 = vmatprep.subr.mxu0 %v613_v21  ;;  %730 = vmatpush1.msra.mxu1 %v549_v40  ;;  %v586_v0 = vld [vmem:[#allocation2 + $0x200] sm:$0xff]  ;;  %v536_v3 = vld [vmem:[#allocation2 + $0x78] sm:$0xff]  ;;  %v535_v5 = vld [vmem:[#allocation2 + $0x70] sm:$0xff] }
  0x64   : > { %655 = vmatpush1.msra.mxu0 %v612_v22  ;;  %731 = vmatprep.subr.mxu1 %v548_v42  ;;  %v649_v4 = vld [vmem:[#allocation2 + $0x3f8] sm:$0xff]  ;;  %v648_v6 = vld [vmem:[#allocation2 + $0x3f0] sm:$0xff]  ;;  %v534_v9 = vld [vmem:[#allocation2 + $0x68] sm:$0xff] }
  0x65   : > { %656 = vmatprep.subr.mxu0 %v611_v23  ;;  %732 = vmatpush1.msra.mxu1 %v547_v44  ;;  %v647_v10 = vld [vmem:[#allocation2 + $0x3e8] sm:$0xff]  ;;  %v533_v12 = vld [vmem:[#allocation2 + $0x60] sm:$0xff]  ;;  %v532_v16 = vld [vmem:[#allocation2 + $0x58] sm:$0xff] }
  0x66   : > { %657 = vmatpush1.msra.mxu0 %v610_v24  ;;  %733 = vmatprep.subr.mxu1 %v546_v45  ;;  %v646_v15 = vld [vmem:[#allocation2 + $0x3e0] sm:$0xff]  ;;  %v645_v19 = vld [vmem:[#allocation2 + $0x3d8] sm:$0xff]  ;;  %v531_v20 = vld [vmem:[#allocation2 + $0x50] sm:$0xff] }
  0x67   : > { %658 = vmatprep.subr.mxu0 %v609_v25  ;;  %734 = vmatpush1.msra.mxu1 %v545_v47  ;;  %v644_v21 = vld [vmem:[#allocation2 + $0x3d0] sm:$0xff]  ;;  %v530_v22 = vld [vmem:[#allocation2 + $0x48] sm:$0xff]  ;;  %v529_v24 = vld [vmem:[#allocation2 + $0x40] sm:$0xff] }
  0x68   : > { %659 = vmatpush1.msra.mxu0 %v608_v26  ;;  %735 = vmatprep.subr.mxu1 %v544_v49  ;;  %v643_v23 = vld [vmem:[#allocation2 + $0x3c8] sm:$0xff]  ;;  %v642_v25 = vld [vmem:[#allocation2 + $0x3c0] sm:$0xff]  ;;  %v528_v26 = vld [vmem:[#allocation2 + $0x38] sm:$0xff] }
  0x69   : > { %660 = vmatprep.subr.mxu0 %v607_v27  ;;  %736 = vmatpush1.msra.mxu1 %v543_v51  ;;  %v641_v27 = vld [vmem:[#allocation2 + $0x3b8] sm:$0xff]  ;;  %v636_v37 = vld [vmem:[#allocation2 + $0x390] sm:$0xff]  ;;  %v635_v39 = vld [vmem:[#allocation2 + $0x388] sm:$0xff] }
  0x6a   : > { %661 = vmatpush1.msra.mxu0 %v606_v28  ;;  %737 = vmatprep.subr.mxu1 %v542_v53  ;;  %v527_v28 = vld [vmem:[#allocation2 + $0x30] sm:$0xff]  ;;  %v637_v35 = vld [vmem:[#allocation2 + $0x398] sm:$0xff]  ;;  %v521_v40 = vld [vmem:[#allocation2] sm:$0xff] }
  0x6b   : > { %662 = vmatprep.subr.mxu0 %v605_v29  ;;  %738 = vmatpush1.msra.mxu1 %v541_v55  ;;  %v640_v29 = vld [vmem:[#allocation2 + $0x3b0] sm:$0xff]  ;;  %v584_v42 = vld [vmem:[#allocation2 + $0x1f8] sm:$0xff]  ;;  %v631_v47 = vld [vmem:[#allocation2 + $0x368] sm:$0xff] }
  0x6c   : > { %663 = vmatpush1.msra.mxu0 %v604_v30  ;;  %739 = vmatprep.subr.mxu1 %v540_v57  ;;  %v526_v30 = vld [vmem:[#allocation2 + $0x28] sm:$0xff]  ;;  %v583_v44 = vld [vmem:[#allocation2 + $0x1f0] sm:$0xff]  ;;  %v630_v49 = vld [vmem:[#allocation2 + $0x360] sm:$0xff] }
  0x6d   : > { %664 = vmatprep.subr.mxu0 %v603_v31  ;;  %740 = vmatpush1.msra.mxu1 %v539_v59  ;;  %v639_v31 = vld [vmem:[#allocation2 + $0x3a8] sm:$0xff]  ;;  %v632_v45 = vld [vmem:[#allocation2 + $0x370] sm:$0xff]  ;;  %v629_v51 = vld [vmem:[#allocation2 + $0x358] sm:$0xff] }
  0x6e   : > { %665 = vmatpush1.msra.mxu0 %v602_v32  ;;  %741 = vmatprep.subr.mxu1 %v538_v61  ;;  %v525_v32 = vld [vmem:[#allocation2 + $0x20] sm:$0xff]  ;;  %v628_v53 = vld [vmem:[#allocation2 + $0x350] sm:$0xff]  ;;  %v627_v55 = vld [vmem:[#allocation2 + $0x348] sm:$0xff] }
  0x6f   : > { %666 = vmatprep.subr.mxu0 %v601_v33  ;;  %742 = vmatpush1.msra.mxu1 %v537_v63  ;;  %v638_v33 = vld [vmem:[#allocation2 + $0x3a0] sm:$0xff]  ;;  %v625_v59 = vld [vmem:[#allocation2 + $0x338] sm:$0xff]  ;;  %v624_v61 = vld [vmem:[#allocation2 + $0x330] sm:$0xff] }
  0x70   : > { %667 = vmatpush1.msra.mxu0 %v600_v34  ;;  %743 = vmatprep.subr.mxu1 %v536_v3  ;;  %v524_v34 = vld [vmem:[#allocation2 + $0x18] sm:$0xff]  ;;  %v626_v57 = vld [vmem:[#allocation2 + $0x340] sm:$0xff]  ;;  %v623_v63 = vld [vmem:[#allocation2 + $0x328] sm:$0xff] }
  0x71   : > { %668 = vmatprep.subr.mxu0 %v599_v36  ;;  %744 = vmatpush1.msra.mxu1 %v535_v5  ;;  %v523_v36 = vld [vmem:[#allocation2 + $0x10] sm:$0xff]  ;;  %v622_v3 = vld [vmem:[#allocation2 + $0x320] sm:$0xff]  ;;  %v621_v5 = vld [vmem:[#allocation2 + $0x318] sm:$0xff] }
  0x72   : > { %669 = vmatpush1.msra.mxu0 %v598_v38  ;;  %745 = vmatprep.subr.mxu1 %v534_v9  ;;  %v522_v38 = vld [vmem:[#allocation2 + $0x8] sm:$0xff]  ;;  %v620_v9 = vld [vmem:[#allocation2 + $0x310] sm:$0xff] }
  0x73   : > { %670 = vmatprep.subr.mxu0 %v597_v41  ;;  %746 = vmatpush1.msra.mxu1 %v533_v12  ;;  %v634_v41 = vld [vmem:[#allocation2 + $0x380] sm:$0xff]  ;;  %v619_v12 = vld [vmem:[#allocation2 + $0x308] sm:$0xff] }
  0x74   : > { %671 = vmatpush1.msra.mxu0 %v596_v43  ;;  %747 = vmatprep.subr.mxu1 %v532_v16  ;;  %v633_v43 = vld [vmem:[#allocation2 + $0x378] sm:$0xff]  ;;  %v618_v16 = vld [vmem:[#allocation2 + $0x300] sm:$0xff] }
  0x75   : > { %672 = vmatprep.subr.mxu0 %v595_v46  ;;  %748 = vmatpush1.msra.mxu1 %v531_v20  ;;  %v582_v46 = vld [vmem:[#allocation2 + $0x1e8] sm:$0xff]  ;;  %v836_v20 = vld [vmem:[#allocation2 + $0x4f8] sm:$0xff] }
  0x76   : > { %673 = vmatpush1.msra.mxu0 %v594_v48  ;;  %749 = vmatprep.subr.mxu1 %v530_v22  ;;  %v581_v48 = vld [vmem:[#allocation2 + $0x1e0] sm:$0xff]  ;;  %v567_v22 = vld [vmem:[#allocation2 + $0x170] sm:$0xff] }
  0x77   : > { %674 = vmatprep.subr.mxu0 %v593_v50  ;;  %750 = vmatpush1.msra.mxu1 %v529_v24  ;;  %v580_v50 = vld [vmem:[#allocation2 + $0x1d8] sm:$0xff]  ;;  %v566_v24 = vld [vmem:[#allocation2 + $0x168] sm:$0xff] }
  0x78   : > { %675 = vmatpush1.msra.mxu0 %v592_v52  ;;  %751 = vmatprep.subr.mxu1 %v528_v26  ;;  %v579_v52 = vld [vmem:[#allocation2 + $0x1d0] sm:$0xff]  ;;  %v565_v26 = vld [vmem:[#allocation2 + $0x160] sm:$0xff] }
  0x79   : > { %676 = vmatprep.subr.mxu0 %v591_v54  ;;  %752 = vmatpush1.msra.mxu1 %v527_v28  ;;  %v578_v54 = vld [vmem:[#allocation2 + $0x1c8] sm:$0xff]  ;;  %v564_v28 = vld [vmem:[#allocation2 + $0x158] sm:$0xff] }
  0x7a   : > { %677 = vmatpush1.msra.mxu0 %v590_v56  ;;  %753 = vmatprep.subr.mxu1 %v526_v30  ;;  %v577_v56 = vld [vmem:[#allocation2 + $0x1c0] sm:$0xff]  ;;  %v563_v30 = vld [vmem:[#allocation2 + $0x150] sm:$0xff] }
  0x7b   : > { %678 = vmatprep.subr.mxu0 %v589_v58  ;;  %754 = vmatpush1.msra.mxu1 %v525_v32  ;;  %v576_v58 = vld [vmem:[#allocation2 + $0x1b8] sm:$0xff]  ;;  %v562_v32 = vld [vmem:[#allocation2 + $0x148] sm:$0xff] }
  0x7c   : > { %679 = vmatpush1.msra.mxu0 %v588_v60  ;;  %755 = vmatprep.subr.mxu1 %v524_v34  ;;  %v575_v60 = vld [vmem:[#allocation2 + $0x1b0] sm:$0xff]  ;;  %v561_v34 = vld [vmem:[#allocation2 + $0x140] sm:$0xff] }
  0x7d   : > { %680 = vmatprep.subr.mxu0 %v587_v62  ;;  %756 = vmatpush1.msra.mxu1 %v523_v36  ;;  %v574_v62 = vld [vmem:[#allocation2 + $0x1a8] sm:$0xff]  ;;  %v827_v36 = vld [vmem:[#allocation2 + $0x4b0] sm:$0xff] }
  0x7e   : > { %681 = vmatpush1.msra.mxu0 %v586_v0  ;;  %757 = vmatprep.subr.mxu1 %v522_v38  ;;  %v573_v0 = vld [vmem:[#allocation2 + $0x1a0] sm:$0xff]  ;;  %v826_v38 = vld [vmem:[#allocation2 + $0x4a8] sm:$0xff] }
  0x7f   : > { %682 = vmatprep.subr.mxu0 %v649_v4  ;;  %758 = vmatpush1.msra.mxu1 %v521_v40  ;;  %v572_v4 = vld [vmem:[#allocation2 + $0x198] sm:$0xff]  ;;  %v825_v40 = vld [vmem:[#allocation2 + $0x4a0] sm:$0xff] }
  0x80   : > { %683 = vmatpush2.msra.mxu0 %v648_v6  ;;  %759 = vmatprep.subr.mxu1 %v584_v42  ;;  %v571_v6 = vld [vmem:[#allocation2 + $0x190] sm:$0xff]  ;;  %v557_v42 = vld [vmem:[#allocation2 + $0x120] sm:$0xff] }
  0x81   : > { %684 = vmatprep.subr.mxu0 %v647_v10  ;;  %760 = vmatpush2.msra.mxu1 %v583_v44  ;;  %v570_v10 = vld [vmem:[#allocation2 + $0x188] sm:$0xff]  ;;  %v556_v44 = vld [vmem:[#allocation2 + $0x118] sm:$0xff] }
  0x82   : > { %685 = vmatpush2.msra.mxu0 %v646_v15  ;;  %761 = vmatprep.subr.mxu1 %v582_v46  ;;  %v569_v15 = vld [vmem:[#allocation2 + $0x180] sm:$0xff] }
  0x83   : > { %686 = vmatprep.subr.mxu0 %v645_v19  ;;  %762 = vmatpush2.msra.mxu1 %v581_v48  ;;  %v568_v19 = vld [vmem:[#allocation2 + $0x178] sm:$0xff]  ;;  %v821_v46 = vld [vmem:[#allocation2 + $0x480] sm:$0xff] }
  0x84   : > { %687 = vmatpush2.msra.mxu0 %v644_v21  ;;  %763 = vmatprep.subr.mxu1 %v580_v50  ;;  %v835_v21 = vld [vmem:[#allocation2 + $0x4f0] sm:$0xff]  ;;  %v820_v48 = vld [vmem:[#allocation2 + $0x478] sm:$0xff] }
  0x85   : > { %688 = vmatprep.subr.mxu0 %v643_v23  ;;  %764 = vmatpush2.msra.mxu1 %v579_v52  ;;  %v834_v23 = vld [vmem:[#allocation2 + $0x4e8] sm:$0xff]  ;;  %v819_v50 = vld [vmem:[#allocation2 + $0x470] sm:$0xff] }
  0x86   : > { %689 = vmatpush2.msra.mxu0 %v642_v25  ;;  %765 = vmatprep.subr.mxu1 %v578_v54  ;;  %v833_v25 = vld [vmem:[#allocation2 + $0x4e0] sm:$0xff]  ;;  %v818_v52 = vld [vmem:[#allocation2 + $0x468] sm:$0xff]  ;;  %v815_v54 = vld [vmem:[#allocation2 + $0x450] sm:$0xff] }
  0x87   : > { %690 = vmatprep.subr.mxu0 %v641_v27  ;;  %766 = vmatpush2.msra.mxu1 %v577_v56  ;;  %v832_v27 = vld [vmem:[#allocation2 + $0x4d8] sm:$0xff]  ;;  %v813_v56 = vld [vmem:[#allocation2 + $0x440] sm:$0xff] }
  0x88   : > { %691 = vmatpush2.msra.mxu0 %v640_v29  ;;  %767 = vmatprep.subr.mxu1 %v576_v58  ;;  %v831_v29 = vld [vmem:[#allocation2 + $0x4d0] sm:$0xff]  ;;  %v810_v58 = vld [vmem:[#allocation2 + $0x428] sm:$0xff] }
  0x89   : > { %692 = vmatprep.subr.mxu0 %v639_v31  ;;  %768 = vmatpush2.msra.mxu1 %v575_v60  ;;  %v830_v31 = vld [vmem:[#allocation2 + $0x4c8] sm:$0xff]  ;;  %v808_v60 = vld [vmem:[#allocation2 + $0x418] sm:$0xff] }
  0x8a   : > { %693 = vmatpush2.msra.mxu0 %v638_v33  ;;  %769 = vmatprep.subr.mxu1 %v574_v62  ;;  %v829_v33 = vld [vmem:[#allocation2 + $0x4c0] sm:$0xff]  ;;  %v806_v62 = vld [vmem:[#allocation2 + $0x408] sm:$0xff] }
  0x8b   : > { %694 = vmatprep.subr.mxu0 %v637_v35  ;;  %770 = vmatpush2.msra.mxu1 %v573_v0  ;;  %v560_v35 = vld [vmem:[#allocation2 + $0x138] sm:$0xff] }
  0x8c   : > { %695 = vmatpush2.msra.mxu0 %v636_v37  ;;  %771 = vmatprep.subr.mxu1 %v572_v4  ;;  %v559_v37 = vld [vmem:[#allocation2 + $0x130] sm:$0xff]  ;;  %v868_v0 = vld [vmem:[#allocation2 + $0x5f8] sm:$0xff]  ;;  %v866_v4 = vld [vmem:[#allocation2 + $0x5e8] sm:$0xff] }
  0x8d   : > { %696 = vmatprep.subr.mxu0 %v635_v39  ;;  %772 = vmatpush2.msra.mxu1 %v571_v6  ;;  %v558_v39 = vld [vmem:[#allocation2 + $0x128] sm:$0xff]  ;;  %v864_v6 = vld [vmem:[#allocation2 + $0x5d8] sm:$0xff] }
  0x8e   : > { %697 = vmatpush2.msra.mxu0 %v634_v41  ;;  %773 = vmatprep.subr.mxu1 %v570_v10  ;;  %v824_v41 = vld [vmem:[#allocation2 + $0x498] sm:$0xff]  ;;  %v862_v10 = vld [vmem:[#allocation2 + $0x5c8] sm:$0xff] }
  0x8f   : > { %698 = vmatprep.subr.mxu0 %v633_v43  ;;  %774 = vmatpush2.msra.mxu1 %v569_v15  ;;  %v823_v43 = vld [vmem:[#allocation2 + $0x490] sm:$0xff]  ;;  %v860_v15 = vld [vmem:[#allocation2 + $0x5b8] sm:$0xff] }
  0x90   : > { %699 = vmatpush2.msra.mxu0 %v632_v45  ;;  %775 = vmatprep.subr.mxu1 %v568_v19  ;;  %v822_v45 = vld [vmem:[#allocation2 + $0x488] sm:$0xff] }
  0x91   : > { %700 = vmatprep.subr.mxu0 %v631_v47  ;;  %776 = vmatpush2.msra.mxu1 %v567_v22  ;;  %v555_v47 = vld [vmem:[#allocation2 + $0x110] sm:$0xff]  ;;  %v858_v19 = vld [vmem:[#allocation2 + $0x5a8] sm:$0xff] }
  0x92   : > { %701 = vmatpush2.msra.mxu0 %v630_v49  ;;  %777 = vmatprep.subr.mxu1 %v566_v24  ;;  %v554_v49 = vld [vmem:[#allocation2 + $0x108] sm:$0xff]  ;;  %v855_v22 = vld [vmem:[#allocation2 + $0x590] sm:$0xff]  ;;  %v853_v24 = vld [vmem:[#allocation2 + $0x580] sm:$0xff] }
  0x93   : > { %702 = vmatprep.subr.mxu0 %v629_v51  ;;  %778 = vmatpush2.msra.mxu1 %v565_v26  ;;  %v553_v51 = vld [vmem:[#allocation2 + $0x100] sm:$0xff]  ;;  %v851_v26 = vld [vmem:[#allocation2 + $0x570] sm:$0xff] }
  0x94   : > { %703 = vmatpush2.msra.mxu0 %v628_v53  ;;  %779 = vmatprep.subr.mxu1 %v564_v28  ;;  %v817_v53 = vld [vmem:[#allocation2 + $0x460] sm:$0xff] }
  0x95   : > { %704 = vmatprep.subr.mxu0 %v627_v55  ;;  %780 = vmatpush2.msra.mxu1 %v563_v30  ;;  %v814_v55 = vld [vmem:[#allocation2 + $0x448] sm:$0xff]  ;;  %v849_v28 = vld [vmem:[#allocation2 + $0x560] sm:$0xff]  ;;  %v847_v30 = vld [vmem:[#allocation2 + $0x550] sm:$0xff] }
  0x96   : > { %705 = vmatpush2.msra.mxu0 %v626_v57  ;;  %781 = vmatprep.subr.mxu1 %v562_v32  ;;  %v812_v57 = vld [vmem:[#allocation2 + $0x438] sm:$0xff]  ;;  %v845_v32 = vld [vmem:[#allocation2 + $0x540] sm:$0xff] }
  0x97   : > { %706 = vmatprep.subr.mxu0 %v625_v59  ;;  %782 = vmatpush2.msra.mxu1 %v561_v34  ;;  %v809_v59 = vld [vmem:[#allocation2 + $0x420] sm:$0xff]  ;;  %v843_v34 = vld [vmem:[#allocation2 + $0x530] sm:$0xff] }
  0x98   : > { %707 = vmatpush2.msra.mxu0 %v624_v61  ;;  %783 = vmatprep.subr.mxu1 %v560_v35  ;;  %v807_v61 = vld [vmem:[#allocation2 + $0x410] sm:$0xff]  ;;  %v841_v35 = vld [vmem:[#allocation2 + $0x520] sm:$0xff] }
  0x99   : > { %708 = vmatprep.subr.mxu0 %v623_v63  ;;  %784 = vmatpush2.msra.mxu1 %v559_v37  ;;  %v805_v63 = vld [vmem:[#allocation2 + $0x400] sm:$0xff]  ;;  %v839_v37 = vld [vmem:[#allocation2 + $0x510] sm:$0xff] }
  0x9a   : > { %709 = vmatpush2.msra.mxu0 %v622_v3  ;;  %785 = vmatprep.subr.mxu1 %v558_v39  ;;  %v867_v3 = vld [vmem:[#allocation2 + $0x5f0] sm:$0xff]  ;;  %v837_v39 = vld [vmem:[#allocation2 + $0x500] sm:$0xff] }
  0x9b   : > { %710 = vmatprep.subr.mxu0 %v621_v5  ;;  %786 = vmatpush2.msra.mxu1 %v557_v42  ;;  %v865_v5 = vld [vmem:[#allocation2 + $0x5e0] sm:$0xff] }
  0x9c   : > { %711 = vmatpush2.msra.mxu0 %v620_v9  ;;  %787 = vmatprep.subr.mxu1 %v556_v44  ;;  %v863_v9 = vld [vmem:[#allocation2 + $0x5d0] sm:$0xff] }
  0x9d   : > { %712 = vmatprep.subr.mxu0 %v619_v12  ;;  %788 = vmatpush2.msra.mxu1 %v555_v47  ;;  %v861_v12 = vld [vmem:[#allocation2 + $0x5c0] sm:$0xff] }
  0x9e   : > { %713 = vmatpush2.msra.mxu0 %v618_v16  ;;  %789 = vmatprep.subr.mxu1 %v554_v49  ;;  %v859_v16 = vld [vmem:[#allocation2 + $0x5b0] sm:$0xff] }
  0x9f   : > { %869 = vmatprep.subr.mxu0 %v836_v20  ;;  %715 = vmatmul.mubr.f32.vlgmr.msra.gmra.mxu0 %v6420_v11  ;;  %v828_v11 = vld [vmem:[#allocation2 + $0x4b8] sm:$0xff]  ;;  %v857_v20 = vld [vmem:[#allocation2 + $0x5a0] sm:$0xff] }
  0xa0   : > { %870 = vmatpush1.msra.mxu0 %v835_v21  ;;  %720 = vmatprep.mubr.f32.mxu0 %v6414_v7  ;;  %v816_v7 = vld [vmem:[#allocation2 + $0x458] sm:$0xff] }
  0xa1   : > { %871 = vmatprep.subr.mxu0 %v834_v23  ;;  %790 = vmatpush2.msra.mxu1 %v553_v51  ;;  %v856_v21 = vld [vmem:[#allocation2 + $0x598] sm:$0xff]  ;;  %v854_v23 = vld [vmem:[#allocation2 + $0x588] sm:$0xff] }
  0xa2   : > { %872 = vmatpush1.msra.mxu0 %v833_v25  ;;  %v852_v25 = vld [vmem:[#allocation2 + $0x578] sm:$0xff] }
  0xa3   : > { %873 = vmatprep.subr.mxu0 %v832_v27  ;;  %721 = vmatmul.mubr.f32.gmra.mxu0 %v6416_v8  ;;  %v811_v8 = vld [vmem:[#allocation2 + $0x430] sm:$0xff]  ;;  %v850_v27 = vld [vmem:[#allocation2 + $0x568] sm:$0xff] }
  0xa4   : > { %874 = vmatpush1.msra.mxu0 %v831_v29  ;;  %v848_v29 = vld [vmem:[#allocation2 + $0x558] sm:$0xff] }
  0xa5   : > { %875 = vmatprep.subr.mxu0 %v830_v31  ;;  %v846_v31 = vld [vmem:[#allocation2 + $0x548] sm:$0xff] }
  0xa6   : > { %876 = vmatpush1.msra.mxu0 %v829_v33  ;;  %v844_v33 = vld [vmem:[#allocation2 + $0x538] sm:$0xff] }
  0xa7   : > { %877 = vmatprep.subr.mxu0 %v828_v11  ;;  %v842_v11 = vld [vmem:[#allocation2 + $0x528] sm:$0xff] }
  0xa8   : > { %878 = vmatpush1.msra.mxu0 %v827_v36  ;;  %v840_v36 = vld [vmem:[#allocation2 + $0x518] sm:$0xff] }
  0xa9   : > { %879 = vmatprep.subr.mxu0 %v826_v38  ;;  %v838_v38 = vld [vmem:[#allocation2 + $0x508] sm:$0xff] }
  0xaa   : > { %880 = vmatpush1.msra.mxu0 %v825_v40 }
  0xab   : > { %881 = vmatprep.subr.mxu0 %v824_v41 }
  0xac   : > { %882 = vmatpush1.msra.mxu0 %v823_v43 }
  0xad   : > { %883 = vmatprep.subr.mxu0 %v822_v45 }
  0xae   : > { %884 = vmatpush1.msra.mxu0 %v821_v46 }
  0xaf   : > { %885 = vmatprep.subr.mxu0 %v820_v48 }
  0xb0   : > { %886 = vmatpush1.msra.mxu0 %v819_v50 }
  0xb1   : > { %887 = vmatprep.subr.mxu0 %v818_v52 }
  0xb2   : > { %888 = vmatpush1.msra.mxu0 %v817_v53 }
  0xb3   : > { %889 = vmatprep.subr.mxu0 %v816_v7 }
  0xb4   : > { %890 = vmatpush1.msra.mxu0 %v815_v54 }
  0xb5   : > { %891 = vmatprep.subr.mxu0 %v814_v55  ;;  %v6454_v55 = vsub.s32 1, %v6401_v2 }
  0xb6   : > { %892 = vmatpush1.msra.mxu0 %v813_v56 }
  0xb7   : > { %893 = vmatprep.subr.mxu0 %v812_v57  ;;  %v6457_v57 = vsub.s32 0, %v6401_v2 }
  0xb8   : > { %894 = vmatpush1.msra.mxu0 %v811_v8 }
  0xb9   : > { %895 = vmatprep.subr.mxu0 %v810_v58 }
  0xba   : > { %896 = vmatpush1.msra.mxu0 %v809_v59 }
  0xbb   : > { %897 = vmatprep.subr.mxu0 %v808_v60  ;;  %v950_v60 = vld [vmem:[#allocation4] sm:$0x3] }
  0xbc   : > { %898 = vmatpush1.msra.mxu0 %v807_v61 }
  0xbd   : > { %899 = vmatprep.subr.mxu0 %v806_v62 }
  0xbe   : > { %900 = vmatpush1.msra.mxu0 %v805_v63 }
  0xbf   : > { %901 = vmatprep.subr.mxu0 %v868_v0  ;;  %v959_v0 = vrot.slane %v950_v60, %v6454_v55 }
  0xc0   : > { %902 = vmatpush2.msra.mxu0 %v867_v3 }
  0xc1   : > { %903 = vmatprep.subr.mxu0 %v866_v4 }
  0xc2   : > { %904 = vmatpush2.msra.mxu0 %v865_v5 }
  0xc3   : > { %905 = vmatprep.subr.mxu0 %v864_v6  ;;  %v955_v6 = vrot.slane %v950_v60, %v6457_v57  ;;  %v1140_v60 = vld [vmem:[#allocation2 + $0x678] sm:$0xff] }
  0xc4   : > { %906 = vmatpush2.msra.mxu0 %v863_v9 }
  0xc5   : > { %907 = vmatprep.subr.mxu0 %v862_v10 }
  0xc6   : > { %908 = vmatpush2.msra.mxu0 %v861_v12 }
  0xc7   : > { %909 = vmatprep.subr.mxu0 %v860_v15 }
  0xc8   : > { %910 = vmatpush2.msra.mxu0 %v859_v16 }
  0xc9   : > { %911 = vmatprep.subr.mxu0 %v858_v19 }
  0xca   : > { %912 = vmatpush2.msra.mxu0 %v857_v20 }
  0xcb   : > { %913 = vmatprep.subr.mxu0 %v856_v21 }
  0xcc   : > { %914 = vmatpush2.msra.mxu0 %v855_v22 }
  0xcd   : > { %915 = vmatprep.subr.mxu0 %v854_v23  ;;  %v1221_v23 = vld [vmem:[#allocation2 + $0x8f8] sm:$0xff] }
  0xce   : > { %916 = vmatpush2.msra.mxu0 %v853_v24  ;;  %v1220_v24 = vld [vmem:[#allocation2 + $0x8f0] sm:$0xff] }
  0xcf   : > { %917 = vmatprep.subr.mxu0 %v852_v25  ;;  %v1219_v25 = vld [vmem:[#allocation2 + $0x8e8] sm:$0xff] }
  0xd0   : > { %918 = vmatpush2.msra.mxu0 %v851_v26  ;;  %v1156_v26 = vld [vmem:[#allocation2 + $0x6f8] sm:$0xff] }
  0xd1   : > { %919 = vmatprep.subr.mxu0 %v850_v27  ;;  %v1218_v27 = vld [vmem:[#allocation2 + $0x8e0] sm:$0xff] }
  0xd2   : > { %920 = vmatpush2.msra.mxu0 %v849_v28  ;;  %v1217_v28 = vld [vmem:[#allocation2 + $0x8d8] sm:$0xff] }
  0xd3   : > { %921 = vmatprep.subr.mxu0 %v848_v29  ;;  %v1216_v29 = vld [vmem:[#allocation2 + $0x8d0] sm:$0xff] }
  0xd4   : > { %922 = vmatpush2.msra.mxu0 %v847_v30  ;;  %v1215_v30 = vld [vmem:[#allocation2 + $0x8c8] sm:$0xff] }
  0xd5   : > { %923 = vmatprep.subr.mxu0 %v846_v31  ;;  %v1155_v31 = vld [vmem:[#allocation2 + $0x6f0] sm:$0xff] }
  0xd6   : > { %924 = vmatpush2.msra.mxu0 %v845_v32  ;;  %v1214_v32 = vld [vmem:[#allocation2 + $0x8c0] sm:$0xff] }
  0xd7   : > { %925 = vmatprep.subr.mxu0 %v844_v33  ;;  %v1154_v33 = vld [vmem:[#allocation2 + $0x6e8] sm:$0xff] }
  0xd8   : > { %926 = vmatpush2.msra.mxu0 %v843_v34  ;;  %v1213_v34 = vld [vmem:[#allocation2 + $0x8b8] sm:$0xff] }
  0xd9   : > { %927 = vmatprep.subr.mxu0 %v842_v11  ;;  %v1153_v11 = vld [vmem:[#allocation2 + $0x6e0] sm:$0xff] }
  0xda   : > { %928 = vmatpush2.msra.mxu0 %v841_v35  ;;  %v1212_v35 = vld [vmem:[#allocation2 + $0x8b0] sm:$0xff] }
  0xdb   : > { %929 = vmatprep.subr.mxu0 %v840_v36  ;;  %v1152_v36 = vld [vmem:[#allocation2 + $0x6d8] sm:$0xff] }
  0xdc   : > { %930 = vmatpush2.msra.mxu0 %v839_v37  ;;  %v1211_v37 = vld [vmem:[#allocation2 + $0x8a8] sm:$0xff] }
  0xdd   : > { %931 = vmatprep.subr.mxu0 %v838_v38  ;;  %v1151_v38 = vld [vmem:[#allocation2 + $0x6d0] sm:$0xff] }
  0xde   : > { %932 = vmatpush2.msra.mxu0 %v837_v39  ;;  %v1210_v39 = vld [vmem:[#allocation2 + $0x8a0] sm:$0xff] }
 0x11c   : > { %v427_v40 = vpop.f32.mrf.mxu0  ;;  %v510_v41 = vpop.f32.mrf.mxu1 }
 0x11e   : > { %v429_v42 = vpop.f32.mrf.mxu0  ;;  %v512_v43 = vpop.f32.mrf.mxu1 }
 0x11f   : > { %791 = vmatprep.mubr.f32.mxu1 %v429_v42  ;;  %933 = vmatprep.mubr.f32.mxu0 %v512_v43  ;;  %v1149_v42 = vld [vmem:[#allocation2 + $0x6c0] sm:$0xff]  ;;  %v1208_v43 = vld [vmem:[#allocation2 + $0x890] sm:$0xff] }
 0x120   : > { %v433_v44 = vpop.f32.mrf.mxu0  ;;  %v516_v45 = vpop.f32.mrf.mxu1  ;;  %792 = vmatmul.mubr.f32.vlgmr.msra.gmra.mxu1 %v427_v40  ;;  %934 = vmatmul.mubr.f32.vlgmr.msra.gmra.mxu0 %v510_v41  ;;  %v1150_v40 = vld [vmem:[#allocation2 + $0x6c8] sm:$0xff]  ;;  %v1209_v41 = vld [vmem:[#allocation2 + $0x898] sm:$0xff] }
 0x122   : > { %v435_v46 = vpop.f32.mrf.mxu0  ;;  %v518_v47 = vpop.f32.mrf.mxu1 }
 0x123   : > { %797 = vmatprep.mubr.f32.mxu1 %v435_v46  ;;  %939 = vmatprep.mubr.f32.mxu0 %v518_v47  ;;  %v1147_v46 = vld [vmem:[#allocation2 + $0x6b0] sm:$0xff]  ;;  %v1206_v47 = vld [vmem:[#allocation2 + $0x880] sm:$0xff] }
 0x124   : > { %798 = vmatmul.mubr.f32.gmra.mxu1 %v433_v44  ;;  %940 = vmatmul.mubr.f32.gmra.mxu0 %v516_v45  ;;  %v1148_v44 = vld [vmem:[#allocation2 + $0x6b8] sm:$0xff]  ;;  %v1207_v45 = vld [vmem:[#allocation2 + $0x888] sm:$0xff] }
 0x125   : > { %1034 = vmatprep.mubr.f32.mxu0 %v6257_v1  ;;  %1111 = vmatprep.mubr.f32.mxu1 %v6257_v1 }
 0x15f   : > { %v716_v48 = vpop.f32.mrf.mxu0 }
 0x161   : > { %v718_v49 = vpop.f32.mrf.mxu0 }
 0x163   : > { %v722_v50 = vpop.f32.mrf.mxu0 }
 0x165   : > { %v724_v51 = vpop.f32.mrf.mxu0 }
 0x1e0   : > { %v793_v52 = vpop.f32.mrf.mxu1  ;;  %v935_v53 = vpop.f32.mrf.mxu0 }
 0x1e1   : > { %v794_v8 = vadd.f32 %v793_v52, %v716_v48  ;;  %v1146_v48 = vld [vmem:[#allocation2 + $0x6a8] sm:$0xff]  ;;  %v1144_v52 = vld [vmem:[#allocation2 + $0x698] sm:$0xff] }
 0x1e2   : > { %v795_v7 = vpop.f32.mrf.mxu1  ;;  %v937_v54 = vpop.f32.mrf.mxu0 }
 0x1e3   : > { %v796_v56 = vadd.f32 %v795_v7, %v718_v49  ;;  %v946_v5 = vadd.f32 %v935_v53, %v794_v8  ;;  %v1205_v49 = vld [vmem:[#allocation2 + $0x878] sm:$0xff]  ;;  %v1203_v53 = vld [vmem:[#allocation2 + $0x868] sm:$0xff]  ;;  %v1143_v7 = vld [vmem:[#allocation2 + $0x690] sm:$0xff] }
 0x1e4   : > { %v799_v58 = vpop.f32.mrf.mxu1  ;;  %v941_v59 = vpop.f32.mrf.mxu0  ;;  %v1201_v8 = vld [vmem:[#allocation2 + $0x858] sm:$0xff] }
 0x1e5   : > { %v800_v61 = vadd.f32 %v799_v58, %v722_v50  ;;  %v947_v63 = vadd.f32 %v937_v54, %v796_v56  ;;  %v962_v16 = vadd.f32 %v955_v6, %v946_v5  ;;  %v1145_v50 = vld [vmem:[#allocation2 + $0x6a0] sm:$0xff]  ;;  %v1142_v56 = vld [vmem:[#allocation2 + $0x688] sm:$0xff]  ;;  %v1196_v5 = vld [vmem:[#allocation2 + $0x830] sm:$0xff] }
 0x1e6   : > { %v801_v62 = vpop.f32.mrf.mxu1  ;;  %v943_v9 = vpop.f32.mrf.mxu0  ;;  %v1202_v54 = vld [vmem:[#allocation2 + $0x860] sm:$0xff] }
 0x1e7   : > { %v948_v3 = vadd.f32 %v941_v59, %v800_v61  ;;  %v802_v4 = vadd.f32 %v801_v62, %v724_v51  ;;  %v963_v15 = vadd.f32 %v959_v0, %v947_v63  ;;  %v6467_v22 = vmax.f32 %v962_v16, 0.0  ;;  %v1204_v51 = vld [vmem:[#allocation2 + $0x870] sm:$0xff]  ;;  %v1141_v58 = vld [vmem:[#allocation2 + $0x680] sm:$0xff]  ;;  %v1199_v61 = vld [vmem:[#allocation2 + $0x848] sm:$0xff] }
 0x1e8   : > { %v1200_v59 = vld [vmem:[#allocation2 + $0x850] sm:$0xff]  ;;  %v1198_v63 = vld [vmem:[#allocation2 + $0x840] sm:$0xff] }
 0x1e9   : > { %v949_v10 = vadd.f32 %v943_v9, %v802_v4  ;;  %v964_v12 = vadd.f32 %v955_v6, %v948_v3  ;;  %v967_v21 = vmax.f32 %v963_v15, 0.0  ;;  %v1139_v62 = vld [vmem:[#allocation2 + $0x670] sm:$0xff]  ;;  %v1197_v3 = vld [vmem:[#allocation2 + $0x838] sm:$0xff]  ;;  %v1137_v4 = vld [vmem:[#allocation2 + $0x660] sm:$0xff] }
 0x1ea   : > { %v1136_v6 = vld [vmem:[#allocation2 + $0x658] sm:$0xff]  ;;  %v1195_v9 = vld [vmem:[#allocation2 + $0x828] sm:$0xff]  ;;  %v1133_v16 = vld [vmem:[#allocation2 + $0x640] sm:$0xff] }
 0x1eb   : > { %v965_v2 = vadd.f32 %v959_v0, %v949_v10  ;;  %v6463_v20 = vmax.f32 %v964_v12, 0.0  ;;  %v1138_v0 = vld [vmem:[#allocation2 + $0x668] sm:$0xff]  ;;  %v1135_v10 = vld [vmem:[#allocation2 + $0x650] sm:$0xff]  ;;  %v1194_v12 = vld [vmem:[#allocation2 + $0x820] sm:$0xff] }
 0x1ec   : > { %v1134_v15 = vld [vmem:[#allocation2 + $0x648] sm:$0xff] }
 0x1ed   : > { %v6461_v19 = vmax.f32 %v965_v2, 0.0  ;;  %v1193_v2 = vld [vmem:[#allocation2 + $0x818] sm:$0xff] }
 0x1ef   : > { %998 = vmatprep.subr.mxu0 %v6461_v19  ;;  %1075 = vmatprep.subr.mxu1 %v6461_v19 }
 0x1f0   : > { %999 = vmatpush1.msra.mxu0 %v6463_v20  ;;  %1076 = vmatpush1.msra.mxu1 %v6463_v20 }
 0x1f1   : > { %1000 = vmatprep.subr.mxu0 %v967_v21  ;;  %1077 = vmatprep.subr.mxu1 %v967_v21 }
 0x1f2   : > { %1001 = vmatpush1.msra.mxu0 %v6467_v22  ;;  %1078 = vmatpush1.msra.mxu1 %v6467_v22 }
 0x1f3   : > { %5986 = vmatmul.mubr.msk.f32.vlgmr.msra.gmra.mxu0 %vm354_vm2, %v6425_v13  ;;  %5988 = vmatmul.mubr.msk.f32.vlgmr.msra.gmra.mxu1 %vm354_vm2, %v6428_v14 }
 0x1f4   : > { %1254 = vmatprep.subr.mxu1 %v1221_v23  ;;  %1040 = vmatprep.mubr.f32.mxu0 %v6257_v1  ;;  %v1132_v23 = vld [vmem:[#allocation2 + $0x638] sm:$0xff] }
 0x1f5   : > { %1255 = vmatpush1.msra.mxu1 %v1220_v24  ;;  %1117 = vmatprep.mubr.f32.mxu1 %v6257_v1  ;;  %v1191_v24 = vld [vmem:[#allocation2 + $0x808] sm:$0xff] }
 0x1f6   : > { %1256 = vmatprep.subr.mxu1 %v1219_v25  ;;  %1331 = vmatprep.subr.mxu0 %v1156_v26  ;;  %v1131_v25 = vld [vmem:[#allocation2 + $0x630] sm:$0xff]  ;;  %v1190_v26 = vld [vmem:[#allocation2 + $0x800] sm:$0xff] }
 0x1f7   : > { %1257 = vmatpush1.msra.mxu1 %v1218_v27  ;;  %5987 = vmatmul.mubr.msk.f32.gmra.mxu0 %vm354_vm2, %v6439_v17  ;;  %v1130_v27 = vld [vmem:[#allocation2 + $0x628] sm:$0xff] }
 0x1f8   : > { %5989 = vmatmul.mubr.msk.f32.gmra.mxu1 %vm354_vm2, %v6442_v18  ;;  %1258 = vmatprep.subr.mxu1 %v1217_v28  ;;  %v1253_v28 = vld [vmem:[#allocation2 + $0x9f8] sm:$0xff] }
 0x1f9   : > { %1259 = vmatpush1.msra.mxu1 %v1216_v29  ;;  %1318 = vmatprep.mubr.f32.mxu1 %v967_v21  ;;  %v1192_v21 = vld [vmem:[#allocation2 + $0x810] sm:$0xff]  ;;  %v1129_v29 = vld [vmem:[#allocation2 + $0x620] sm:$0xff] }
 0x1fa   : > { %1260 = vmatprep.subr.mxu1 %v1215_v30  ;;  %1332 = vmatpush1.msra.mxu0 %v1155_v31  ;;  %v1252_v30 = vld [vmem:[#allocation2 + $0x9f0] sm:$0xff]  ;;  %v1128_v31 = vld [vmem:[#allocation2 + $0x618] sm:$0xff] }
 0x1fb   : > { %1261 = vmatpush1.msra.mxu1 %v1214_v32  ;;  %1333 = vmatprep.subr.mxu0 %v1154_v33  ;;  %v1251_v32 = vld [vmem:[#allocation2 + $0x9e8] sm:$0xff]  ;;  %v1127_v33 = vld [vmem:[#allocation2 + $0x610] sm:$0xff] }
 0x1fc   : > { %1262 = vmatprep.subr.mxu1 %v1213_v34  ;;  %1334 = vmatpush1.msra.mxu0 %v1153_v11  ;;  %v1250_v34 = vld [vmem:[#allocation2 + $0x9e0] sm:$0xff]  ;;  %v1126_v11 = vld [vmem:[#allocation2 + $0x608] sm:$0xff] }
 0x1fd   : > { %1263 = vmatpush1.msra.mxu1 %v1212_v35  ;;  %1335 = vmatprep.subr.mxu0 %v1152_v36  ;;  %v1249_v35 = vld [vmem:[#allocation2 + $0x9d8] sm:$0xff]  ;;  %v1125_v36 = vld [vmem:[#allocation2 + $0x600] sm:$0xff] }
 0x1fe   : > { %1264 = vmatprep.subr.mxu1 %v1211_v37  ;;  %1336 = vmatpush1.msra.mxu0 %v1151_v38  ;;  %v1248_v37 = vld [vmem:[#allocation2 + $0x9d0] sm:$0xff]  ;;  %v1188_v38 = vld [vmem:[#allocation2 + $0x7f8] sm:$0xff] }
 0x1ff   : > { %1265 = vmatpush1.msra.mxu1 %v1210_v39  ;;  %1337 = vmatprep.subr.mxu0 %v1150_v40  ;;  %v1247_v39 = vld [vmem:[#allocation2 + $0x9c8] sm:$0xff]  ;;  %v1187_v40 = vld [vmem:[#allocation2 + $0x7f0] sm:$0xff] }
 0x200   : > { %1266 = vmatprep.subr.mxu1 %v1209_v41  ;;  %1338 = vmatpush1.msra.mxu0 %v1149_v42  ;;  %v1246_v41 = vld [vmem:[#allocation2 + $0x9c0] sm:$0xff]  ;;  %v1186_v42 = vld [vmem:[#allocation2 + $0x7e8] sm:$0xff] }
 0x201   : > { %1267 = vmatpush1.msra.mxu1 %v1208_v43  ;;  %1339 = vmatprep.subr.mxu0 %v1148_v44  ;;  %v1245_v43 = vld [vmem:[#allocation2 + $0x9b8] sm:$0xff]  ;;  %v1185_v44 = vld [vmem:[#allocation2 + $0x7e0] sm:$0xff] }
 0x202   : > { %1268 = vmatprep.subr.mxu1 %v1207_v45  ;;  %1340 = vmatpush1.msra.mxu0 %v1147_v46  ;;  %v1244_v45 = vld [vmem:[#allocation2 + $0x9b0] sm:$0xff]  ;;  %v1184_v46 = vld [vmem:[#allocation2 + $0x7d8] sm:$0xff] }
 0x203   : > { %1269 = vmatpush1.msra.mxu1 %v1206_v47  ;;  %1341 = vmatprep.subr.mxu0 %v1146_v48  ;;  %v1243_v47 = vld [vmem:[#allocation2 + $0x9a8] sm:$0xff]  ;;  %v1183_v48 = vld [vmem:[#allocation2 + $0x7d0] sm:$0xff] }
 0x204   : > { %1270 = vmatprep.subr.mxu1 %v1205_v49  ;;  %1342 = vmatpush1.msra.mxu0 %v1145_v50  ;;  %v1242_v49 = vld [vmem:[#allocation2 + $0x9a0] sm:$0xff]  ;;  %v1182_v50 = vld [vmem:[#allocation2 + $0x7c8] sm:$0xff] }
 0x205   : > { %1271 = vmatpush1.msra.mxu1 %v1204_v51  ;;  %1343 = vmatprep.subr.mxu0 %v1144_v52  ;;  %v1241_v51 = vld [vmem:[#allocation2 + $0x998] sm:$0xff]  ;;  %v1181_v52 = vld [vmem:[#allocation2 + $0x7c0] sm:$0xff] }
 0x206   : > { %1272 = vmatprep.subr.mxu1 %v1203_v53  ;;  %1344 = vmatpush1.msra.mxu0 %v1143_v7  ;;  %v1240_v53 = vld [vmem:[#allocation2 + $0x990] sm:$0xff]  ;;  %v1180_v7 = vld [vmem:[#allocation2 + $0x7b8] sm:$0xff] }
 0x207   : > { %1273 = vmatpush1.msra.mxu1 %v1202_v54  ;;  %1345 = vmatprep.subr.mxu0 %v1142_v56  ;;  %v1239_v54 = vld [vmem:[#allocation2 + $0x988] sm:$0xff]  ;;  %v1179_v56 = vld [vmem:[#allocation2 + $0x7b0] sm:$0xff] }
 0x208   : > { %1274 = vmatprep.subr.mxu1 %v1201_v8  ;;  %1346 = vmatpush1.msra.mxu0 %v1141_v58  ;;  %v1238_v8 = vld [vmem:[#allocation2 + $0x980] sm:$0xff]  ;;  %v1178_v58 = vld [vmem:[#allocation2 + $0x7a8] sm:$0xff] }
 0x209   : > { %1275 = vmatpush1.msra.mxu1 %v1200_v59  ;;  %1347 = vmatprep.subr.mxu0 %v1140_v60  ;;  %v1237_v59 = vld [vmem:[#allocation2 + $0x978] sm:$0xff]  ;;  %v1177_v60 = vld [vmem:[#allocation2 + $0x7a0] sm:$0xff] }
 0x20a   : > { %1276 = vmatprep.subr.mxu1 %v1199_v61  ;;  %1348 = vmatpush1.msra.mxu0 %v1139_v62  ;;  %v1236_v61 = vld [vmem:[#allocation2 + $0x970] sm:$0xff]  ;;  %v1176_v62 = vld [vmem:[#allocation2 + $0x798] sm:$0xff] }
 0x20b   : > { %1277 = vmatpush1.msra.mxu1 %v1198_v63  ;;  %1349 = vmatprep.subr.mxu0 %v1138_v0  ;;  %v1235_v63 = vld [vmem:[#allocation2 + $0x968] sm:$0xff]  ;;  %v1175_v0 = vld [vmem:[#allocation2 + $0x790] sm:$0xff] }
 0x20c   : > { %1278 = vmatprep.subr.mxu1 %v1197_v3  ;;  %1350 = vmatpush1.msra.mxu0 %v1137_v4  ;;  %v1234_v3 = vld [vmem:[#allocation2 + $0x960] sm:$0xff]  ;;  %v1174_v4 = vld [vmem:[#allocation2 + $0x788] sm:$0xff] }
 0x20d   : > { %1279 = vmatpush1.msra.mxu1 %v1196_v5  ;;  %1351 = vmatprep.subr.mxu0 %v1136_v6  ;;  %v1233_v5 = vld [vmem:[#allocation2 + $0x958] sm:$0xff]  ;;  %v1173_v6 = vld [vmem:[#allocation2 + $0x780] sm:$0xff] }
 0x20e   : > { %1280 = vmatprep.subr.mxu1 %v1195_v9  ;;  %1352 = vmatpush1.msra.mxu0 %v1135_v10  ;;  %v1232_v9 = vld [vmem:[#allocation2 + $0x950] sm:$0xff]  ;;  %v1172_v10 = vld [vmem:[#allocation2 + $0x778] sm:$0xff] }
 0x20f   : > { %1281 = vmatpush1.msra.mxu1 %v1194_v12  ;;  %1353 = vmatprep.subr.mxu0 %v1134_v15  ;;  %v1231_v12 = vld [vmem:[#allocation2 + $0x948] sm:$0xff]  ;;  %v1171_v15 = vld [vmem:[#allocation2 + $0x770] sm:$0xff] }
 0x210   : > { %1282 = vmatprep.subr.mxu1 %v1193_v2  ;;  %1354 = vmatpush1.msra.mxu0 %v1133_v16  ;;  %v1230_v2 = vld [vmem:[#allocation2 + $0x940] sm:$0xff]  ;;  %v1170_v16 = vld [vmem:[#allocation2 + $0x768] sm:$0xff] }
 0x211   : > { %1283 = vmatpush1.msra.mxu1 %v1192_v21  ;;  %1355 = vmatprep.subr.mxu0 %v1132_v23  ;;  %v1229_v21 = vld [vmem:[#allocation2 + $0x938] sm:$0xff]  ;;  %v1169_v23 = vld [vmem:[#allocation2 + $0x760] sm:$0xff] }
 0x212   : > { %1284 = vmatprep.subr.mxu1 %v1191_v24  ;;  %1356 = vmatpush1.msra.mxu0 %v1131_v25  ;;  %v1228_v24 = vld [vmem:[#allocation2 + $0x930] sm:$0xff]  ;;  %v1168_v25 = vld [vmem:[#allocation2 + $0x758] sm:$0xff] }
 0x213   : > { %1285 = vmatpush1.msra.mxu1 %v1190_v26  ;;  %1357 = vmatprep.subr.mxu0 %v1130_v27  ;;  %v1227_v26 = vld [vmem:[#allocation2 + $0x928] sm:$0xff]  ;;  %v1167_v27 = vld [vmem:[#allocation2 + $0x750] sm:$0xff] }
 0x214   : > { %1286 = vmatprep.subr.mxu1 %v1253_v28  ;;  %1358 = vmatpush1.msra.mxu0 %v1129_v29  ;;  %v1226_v28 = vld [vmem:[#allocation2 + $0x920] sm:$0xff]  ;;  %v1166_v29 = vld [vmem:[#allocation2 + $0x748] sm:$0xff] }
 0x215   : > { %1287 = vmatpush2.msra.mxu1 %v1252_v30  ;;  %1359 = vmatprep.subr.mxu0 %v1128_v31  ;;  %v1225_v30 = vld [vmem:[#allocation2 + $0x918] sm:$0xff]  ;;  %v1165_v31 = vld [vmem:[#allocation2 + $0x740] sm:$0xff] }
 0x216   : > { %1288 = vmatprep.subr.mxu1 %v1251_v32  ;;  %1360 = vmatpush1.msra.mxu0 %v1127_v33  ;;  %v1224_v32 = vld [vmem:[#allocation2 + $0x910] sm:$0xff]  ;;  %v1164_v33 = vld [vmem:[#allocation2 + $0x738] sm:$0xff] }
 0x217   : > { %1289 = vmatpush2.msra.mxu1 %v1250_v34  ;;  %1361 = vmatprep.subr.mxu0 %v1126_v11  ;;  %v1223_v34 = vld [vmem:[#allocation2 + $0x908] sm:$0xff]  ;;  %v1163_v11 = vld [vmem:[#allocation2 + $0x730] sm:$0xff] }
 0x218   : > { %1290 = vmatprep.subr.mxu1 %v1249_v35  ;;  %1362 = vmatpush1.msra.mxu0 %v1125_v36  ;;  %v1222_v35 = vld [vmem:[#allocation2 + $0x900] sm:$0xff]  ;;  %v1162_v36 = vld [vmem:[#allocation2 + $0x728] sm:$0xff] }
 0x219   : > { %1291 = vmatpush2.msra.mxu1 %v1248_v37  ;;  %1363 = vmatprep.subr.mxu0 %v1188_v38  ;;  %v1440_v37 = vld [vmem:[#allocation2 + $0xaf8] sm:$0xff]  ;;  %v1439_v38 = vld [vmem:[#allocation2 + $0xaf0] sm:$0xff] }
 0x21a   : > { %1292 = vmatprep.subr.mxu1 %v1247_v39  ;;  %1364 = vmatpush2.msra.mxu0 %v1187_v40  ;;  %v1438_v39 = vld [vmem:[#allocation2 + $0xae8] sm:$0xff]  ;;  %v1161_v40 = vld [vmem:[#allocation2 + $0x720] sm:$0xff] }
 0x21b   : > { %1293 = vmatpush2.msra.mxu1 %v1246_v41  ;;  %1365 = vmatprep.subr.mxu0 %v1186_v42  ;;  %v1437_v41 = vld [vmem:[#allocation2 + $0xae0] sm:$0xff]  ;;  %v1160_v42 = vld [vmem:[#allocation2 + $0x718] sm:$0xff] }
 0x21c   : > { %1294 = vmatprep.subr.mxu1 %v1245_v43  ;;  %1366 = vmatpush2.msra.mxu0 %v1185_v44  ;;  %v1436_v43 = vld [vmem:[#allocation2 + $0xad8] sm:$0xff]  ;;  %v1435_v44 = vld [vmem:[#allocation2 + $0xad0] sm:$0xff] }
 0x21d   : > { %1295 = vmatpush2.msra.mxu1 %v1244_v45  ;;  %1367 = vmatprep.subr.mxu0 %v1184_v46  ;;  %v1159_v45 = vld [vmem:[#allocation2 + $0x710] sm:$0xff]  ;;  %v1434_v46 = vld [vmem:[#allocation2 + $0xac8] sm:$0xff] }
 0x21e   : > { %1296 = vmatprep.subr.mxu1 %v1243_v47  ;;  %1368 = vmatpush2.msra.mxu0 %v1183_v48  ;;  %v1158_v47 = vld [vmem:[#allocation2 + $0x708] sm:$0xff]  ;;  %v1433_v48 = vld [vmem:[#allocation2 + $0xac0] sm:$0xff] }
 0x21f   : > { %1297 = vmatpush2.msra.mxu1 %v1242_v49  ;;  %1369 = vmatprep.subr.mxu0 %v1182_v50  ;;  %v1432_v49 = vld [vmem:[#allocation2 + $0xab8] sm:$0xff]  ;;  %v1430_v50 = vld [vmem:[#allocation2 + $0xaa8] sm:$0xff] }
 0x220   : > { %1298 = vmatprep.subr.mxu1 %v1241_v51  ;;  %1370 = vmatpush2.msra.mxu0 %v1181_v52  ;;  %v1429_v51 = vld [vmem:[#allocation2 + $0xaa0] sm:$0xff]  ;;  %v1428_v52 = vld [vmem:[#allocation2 + $0xa98] sm:$0xff] }
 0x221   : > { %1299 = vmatpush2.msra.mxu1 %v1240_v53  ;;  %1371 = vmatprep.subr.mxu0 %v1180_v7  ;;  %v1427_v53 = vld [vmem:[#allocation2 + $0xa90] sm:$0xff]  ;;  %v1425_v7 = vld [vmem:[#allocation2 + $0xa80] sm:$0xff] }
 0x222   : > { %1300 = vmatprep.subr.mxu1 %v1239_v54  ;;  %1372 = vmatpush2.msra.mxu0 %v1179_v56  ;;  %v1424_v54 = vld [vmem:[#allocation2 + $0xa78] sm:$0xff]  ;;  %v1423_v56 = vld [vmem:[#allocation2 + $0xa70] sm:$0xff] }
 0x223   : > { %1301 = vmatpush2.msra.mxu1 %v1238_v8  ;;  %1373 = vmatprep.subr.mxu0 %v1178_v58  ;;  %v1422_v8 = vld [vmem:[#allocation2 + $0xa68] sm:$0xff]  ;;  %v1421_v58 = vld [vmem:[#allocation2 + $0xa60] sm:$0xff] }
 0x224   : > { %1302 = vmatprep.subr.mxu1 %v1237_v59  ;;  %1374 = vmatpush2.msra.mxu0 %v1177_v60  ;;  %v1420_v59 = vld [vmem:[#allocation2 + $0xa58] sm:$0xff]  ;;  %v1419_v60 = vld [vmem:[#allocation2 + $0xa50] sm:$0xff] }
 0x225   : > { %1303 = vmatpush2.msra.mxu1 %v1236_v61  ;;  %1375 = vmatprep.subr.mxu0 %v1176_v62  ;;  %v1418_v61 = vld [vmem:[#allocation2 + $0xa48] sm:$0xff]  ;;  %v1417_v62 = vld [vmem:[#allocation2 + $0xa40] sm:$0xff] }
 0x226   : > { %1304 = vmatprep.subr.mxu1 %v1235_v63  ;;  %1376 = vmatpush2.msra.mxu0 %v1175_v0  ;;  %v1416_v63 = vld [vmem:[#allocation2 + $0xa38] sm:$0xff]  ;;  %v1415_v0 = vld [vmem:[#allocation2 + $0xa30] sm:$0xff] }
 0x227   : > { %1305 = vmatpush2.msra.mxu1 %v1234_v3  ;;  %1377 = vmatprep.subr.mxu0 %v1174_v4  ;;  %v1414_v3 = vld [vmem:[#allocation2 + $0xa28] sm:$0xff]  ;;  %v1413_v4 = vld [vmem:[#allocation2 + $0xa20] sm:$0xff] }
 0x228   : > { %1306 = vmatprep.subr.mxu1 %v1233_v5  ;;  %1378 = vmatpush2.msra.mxu0 %v1173_v6  ;;  %v1412_v5 = vld [vmem:[#allocation2 + $0xa18] sm:$0xff]  ;;  %v1411_v6 = vld [vmem:[#allocation2 + $0xa10] sm:$0xff] }
 0x229   : > { %1307 = vmatpush2.msra.mxu1 %v1232_v9  ;;  %1379 = vmatprep.subr.mxu0 %v1172_v10  ;;  %v1410_v9 = vld [vmem:[#allocation2 + $0xa08] sm:$0xff]  ;;  %v1409_v10 = vld [vmem:[#allocation2 + $0xa00] sm:$0xff] }
 0x22a   : > { %1308 = vmatprep.subr.mxu1 %v1231_v12  ;;  %1380 = vmatpush2.msra.mxu0 %v1171_v15  ;;  %v1472_v12 = vld [vmem:[#allocation2 + $0xbf8] sm:$0xff]  ;;  %v1471_v15 = vld [vmem:[#allocation2 + $0xbf0] sm:$0xff] }
 0x22b   : > { %1309 = vmatpush2.msra.mxu1 %v1230_v2  ;;  %1381 = vmatprep.subr.mxu0 %v1170_v16  ;;  %v1470_v2 = vld [vmem:[#allocation2 + $0xbe8] sm:$0xff]  ;;  %v1469_v16 = vld [vmem:[#allocation2 + $0xbe0] sm:$0xff] }
 0x22c   : > { %1310 = vmatprep.subr.mxu1 %v1229_v21  ;;  %1382 = vmatpush2.msra.mxu0 %v1169_v23  ;;  %v1468_v21 = vld [vmem:[#allocation2 + $0xbd8] sm:$0xff]  ;;  %v1467_v23 = vld [vmem:[#allocation2 + $0xbd0] sm:$0xff] }
 0x22d   : > { %1311 = vmatpush2.msra.mxu1 %v1228_v24  ;;  %1383 = vmatprep.subr.mxu0 %v1168_v25  ;;  %v1466_v24 = vld [vmem:[#allocation2 + $0xbc8] sm:$0xff]  ;;  %v1465_v25 = vld [vmem:[#allocation2 + $0xbc0] sm:$0xff] }
 0x22e   : > { %1312 = vmatprep.subr.mxu1 %v1227_v26  ;;  %1384 = vmatpush2.msra.mxu0 %v1167_v27  ;;  %v1464_v26 = vld [vmem:[#allocation2 + $0xbb8] sm:$0xff]  ;;  %v1463_v27 = vld [vmem:[#allocation2 + $0xbb0] sm:$0xff] }
 0x22f   : > { %1313 = vmatpush2.msra.mxu1 %v1226_v28  ;;  %1385 = vmatprep.subr.mxu0 %v1166_v29  ;;  %v1462_v28 = vld [vmem:[#allocation2 + $0xba8] sm:$0xff]  ;;  %v1461_v29 = vld [vmem:[#allocation2 + $0xba0] sm:$0xff] }
 0x230   : > { %1314 = vmatprep.subr.mxu1 %v1225_v30  ;;  %1386 = vmatpush2.msra.mxu0 %v1165_v31  ;;  %v1460_v30 = vld [vmem:[#allocation2 + $0xb98] sm:$0xff]  ;;  %v1459_v31 = vld [vmem:[#allocation2 + $0xb90] sm:$0xff] }
 0x231   : > { %1315 = vmatpush2.msra.mxu1 %v1224_v32  ;;  %1387 = vmatprep.subr.mxu0 %v1164_v33  ;;  %v1458_v32 = vld [vmem:[#allocation2 + $0xb88] sm:$0xff]  ;;  %v1457_v33 = vld [vmem:[#allocation2 + $0xb80] sm:$0xff] }
 0x232   : > { %1316 = vmatprep.subr.mxu1 %v1223_v34  ;;  %1388 = vmatpush2.msra.mxu0 %v1163_v11  ;;  %v1456_v34 = vld [vmem:[#allocation2 + $0xb78] sm:$0xff]  ;;  %v1455_v11 = vld [vmem:[#allocation2 + $0xb70] sm:$0xff] }
 0x233   : > { %1317 = vmatpush2.msra.mxu1 %v1222_v35  ;;  %1389 = vmatprep.subr.mxu0 %v1162_v36  ;;  %v1454_v35 = vld [vmem:[#allocation2 + $0xb68] sm:$0xff]  ;;  %v1453_v36 = vld [vmem:[#allocation2 + $0xb60] sm:$0xff] }
 0x234   : > { %1319 = vmatmul.mubr.f32.vlgmr.msra.gmra.mxu1 %v6467_v22  ;;  %1473 = vmatprep.subr.mxu1 %v1440_v37  ;;  %v1157_v22 = vld [vmem:[#allocation2 + $0x700] sm:$0xff]  ;;  %v1452_v37 = vld [vmem:[#allocation2 + $0xb58] sm:$0xff] }
 0x235   : > { %1324 = vmatprep.mubr.f32.mxu1 %v6461_v19  ;;  %1474 = vmatpush1.msra.mxu1 %v1439_v38  ;;  %v1431_v19 = vld [vmem:[#allocation2 + $0xab0] sm:$0xff] }
 0x236   : > { %1475 = vmatprep.subr.mxu1 %v1438_v39  ;;  %1390 = vmatpush2.msra.mxu0 %v1161_v40  ;;  %v1451_v38 = vld [vmem:[#allocation2 + $0xb50] sm:$0xff]  ;;  %v1450_v39 = vld [vmem:[#allocation2 + $0xb48] sm:$0xff]  ;;  %v1449_v40 = vld [vmem:[#allocation2 + $0xb40] sm:$0xff] }
 0x237   : > { %1476 = vmatpush1.msra.mxu1 %v1437_v41  ;;  %1391 = vmatprep.subr.mxu0 %v1160_v42  ;;  %v1448_v41 = vld [vmem:[#allocation2 + $0xb38] sm:$0xff]  ;;  %v1447_v42 = vld [vmem:[#allocation2 + $0xb30] sm:$0xff] }
 0x238   : > { %1325 = vmatmul.mubr.f32.gmra.mxu1 %v6463_v20  ;;  %1477 = vmatprep.subr.mxu1 %v1436_v43  ;;  %v1426_v20 = vld [vmem:[#allocation2 + $0xa88] sm:$0xff] }
 0x239   : > { %1478 = vmatpush1.msra.mxu1 %v1435_v44  ;;  %1392 = vmatpush2.msra.mxu0 %v1159_v45  ;;  %v1446_v43 = vld [vmem:[#allocation2 + $0xb28] sm:$0xff]  ;;  %v1445_v44 = vld [vmem:[#allocation2 + $0xb20] sm:$0xff]  ;;  %v1444_v45 = vld [vmem:[#allocation2 + $0xb18] sm:$0xff] }
 0x23a   : > { %1479 = vmatprep.subr.mxu1 %v1434_v46  ;;  %1393 = vmatprep.subr.mxu0 %v1158_v47  ;;  %v1443_v46 = vld [vmem:[#allocation2 + $0xb10] sm:$0xff]  ;;  %v1442_v47 = vld [vmem:[#allocation2 + $0xb08] sm:$0xff] }
 0x23b   : > { %1480 = vmatpush1.msra.mxu1 %v1433_v48  ;;  %1394 = vmatpush2.msra.mxu0 %v1157_v22  ;;  %v1441_v48 = vld [vmem:[#allocation2 + $0xb00] sm:$0xff] }
 0x23c   : > { %1481 = vmatprep.subr.mxu1 %v1432_v49 }
 0x23d   : > { %1482 = vmatpush1.msra.mxu1 %v1431_v19 }
 0x23e   : > { %1483 = vmatprep.subr.mxu1 %v1430_v50 }
 0x23f   : > { %1484 = vmatpush1.msra.mxu1 %v1429_v51 }
 0x240   : > { %1485 = vmatprep.subr.mxu1 %v1428_v52 }
 0x241   : > { %1486 = vmatpush1.msra.mxu1 %v1427_v53 }
 0x242   : > { %1487 = vmatprep.subr.mxu1 %v1426_v20 }
 0x243   : > { %1488 = vmatpush1.msra.mxu1 %v1425_v7  ;;  %v1761_v7 = vld [vmem:[#allocation2 + $0xcf8] sm:$0xff] }
 0x244   : > { %1489 = vmatprep.subr.mxu1 %v1424_v54  ;;  %v1760_v54 = vld [vmem:[#allocation2 + $0xcf0] sm:$0xff] }
 0x245   : > { %1490 = vmatpush1.msra.mxu1 %v1423_v56  ;;  %v1759_v56 = vld [vmem:[#allocation2 + $0xce8] sm:$0xff] }
 0x246   : > { %1491 = vmatprep.subr.mxu1 %v1422_v8  ;;  %v1758_v8 = vld [vmem:[#allocation2 + $0xce0] sm:$0xff] }
 0x247   : > { %1492 = vmatpush1.msra.mxu1 %v1421_v58  ;;  %v1757_v58 = vld [vmem:[#allocation2 + $0xcd8] sm:$0xff] }
 0x248   : > { %1493 = vmatprep.subr.mxu1 %v1420_v59  ;;  %v1756_v59 = vld [vmem:[#allocation2 + $0xcd0] sm:$0xff] }
 0x249   : > { %1494 = vmatpush1.msra.mxu1 %v1419_v60  ;;  %v1755_v60 = vld [vmem:[#allocation2 + $0xcc8] sm:$0xff] }
 0x24a   : > { %1495 = vmatprep.subr.mxu1 %v1418_v61  ;;  %v1754_v61 = vld [vmem:[#allocation2 + $0xcc0] sm:$0xff] }
 0x24b   : > { %1496 = vmatpush1.msra.mxu1 %v1417_v62  ;;  %v1753_v62 = vld [vmem:[#allocation2 + $0xcb8] sm:$0xff] }
 0x24c   : > { %1497 = vmatprep.subr.mxu1 %v1416_v63  ;;  %v1752_v63 = vld [vmem:[#allocation2 + $0xcb0] sm:$0xff] }
 0x24d   : > { %1498 = vmatpush1.msra.mxu1 %v1415_v0  ;;  %v1751_v0 = vld [vmem:[#allocation2 + $0xca8] sm:$0xff] }
 0x24e   : > { %1499 = vmatprep.subr.mxu1 %v1414_v3  ;;  %v1750_v3 = vld [vmem:[#allocation2 + $0xca0] sm:$0xff] }
 0x24f   : > { %1500 = vmatpush1.msra.mxu1 %v1413_v4  ;;  %v1749_v4 = vld [vmem:[#allocation2 + $0xc98] sm:$0xff] }
 0x250   : > { %1501 = vmatprep.subr.mxu1 %v1412_v5  ;;  %v1748_v5 = vld [vmem:[#allocation2 + $0xc90] sm:$0xff] }
 0x251   : > { %1502 = vmatpush1.msra.mxu1 %v1411_v6  ;;  %v1747_v6 = vld [vmem:[#allocation2 + $0xc88] sm:$0xff] }
 0x252   : > { %1503 = vmatprep.subr.mxu1 %v1410_v9  ;;  %v1746_v9 = vld [vmem:[#allocation2 + $0xc80] sm:$0xff] }
 0x253   : > { %1504 = vmatpush1.msra.mxu1 %v1409_v10  ;;  %v1745_v10 = vld [vmem:[#allocation2 + $0xc78] sm:$0xff] }
 0x254   : > { %1505 = vmatprep.subr.mxu1 %v1472_v12  ;;  %v1744_v12 = vld [vmem:[#allocation2 + $0xc70] sm:$0xff] }
 0x255   : > { %1506 = vmatpush2.msra.mxu1 %v1471_v15  ;;  %v1743_v15 = vld [vmem:[#allocation2 + $0xc68] sm:$0xff] }
 0x256   : > { %1507 = vmatprep.subr.mxu1 %v1470_v2  ;;  %v1742_v2 = vld [vmem:[#allocation2 + $0xc60] sm:$0xff] }
 0x257   : > { %1508 = vmatpush2.msra.mxu1 %v1469_v16  ;;  %v1741_v16 = vld [vmem:[#allocation2 + $0xc58] sm:$0xff] }
 0x258   : > { %1509 = vmatprep.subr.mxu1 %v1468_v21 }
 0x259   : > { %1510 = vmatpush2.msra.mxu1 %v1467_v23  ;;  %v1740_v23 = vld [vmem:[#allocation2 + $0xc50] sm:$0xff] }
 0x25a   : > { %1511 = vmatprep.subr.mxu1 %v1466_v24  ;;  %v1739_v24 = vld [vmem:[#allocation2 + $0xc48] sm:$0xff] }
 0x25b   : > { %1512 = vmatpush2.msra.mxu1 %v1465_v25  ;;  %v1738_v25 = vld [vmem:[#allocation2 + $0xc40] sm:$0xff] }
 0x25c   : > { %1513 = vmatprep.subr.mxu1 %v1464_v26  ;;  %v1737_v26 = vld [vmem:[#allocation2 + $0xc38] sm:$0xff] }
 0x25d   : > { %1514 = vmatpush2.msra.mxu1 %v1463_v27 }
 0x25e   : > { %1515 = vmatprep.subr.mxu1 %v1462_v28  ;;  %v1736_v28 = vld [vmem:[#allocation2 + $0xc30] sm:$0xff] }
 0x25f   : > { %1516 = vmatpush2.msra.mxu1 %v1461_v29  ;;  %v1735_v29 = vld [vmem:[#allocation2 + $0xc28] sm:$0xff] }
 0x260   : > { %1517 = vmatprep.subr.mxu1 %v1460_v30  ;;  %v1734_v30 = vld [vmem:[#allocation2 + $0xc20] sm:$0xff] }
 0x261   : > { %1518 = vmatpush2.msra.mxu1 %v1459_v31  ;;  %v1733_v31 = vld [vmem:[#allocation2 + $0xc18] sm:$0xff] }
 0x262   : > { %1519 = vmatprep.subr.mxu1 %v1458_v32 }
 0x263   : > { %1520 = vmatpush2.msra.mxu1 %v1457_v33  ;;  %v1732_v33 = vld [vmem:[#allocation2 + $0xc10] sm:$0xff] }
 0x264   : > { %1521 = vmatprep.subr.mxu1 %v1456_v34  ;;  %v1731_v34 = vld [vmem:[#allocation2 + $0xc08] sm:$0xff] }
 0x265   : > { %1522 = vmatpush2.msra.mxu1 %v1455_v11  ;;  %v1730_v11 = vld [vmem:[#allocation2 + $0xc00] sm:$0xff] }
 0x266   : > { %1523 = vmatprep.subr.mxu1 %v1454_v35  ;;  %v1793_v35 = vld [vmem:[#allocation2 + $0xdf8] sm:$0xff] }
 0x267   : > { %1524 = vmatpush2.msra.mxu1 %v1453_v36 }
 0x268   : > { %1525 = vmatprep.subr.mxu1 %v1452_v37  ;;  %v1792_v37 = vld [vmem:[#allocation2 + $0xdf0] sm:$0xff] }
 0x269   : > { %1526 = vmatpush2.msra.mxu1 %v1451_v38  ;;  %v1791_v38 = vld [vmem:[#allocation2 + $0xde8] sm:$0xff] }
 0x26a   : > { %1527 = vmatprep.subr.mxu1 %v1450_v39 }
 0x26b   : > { %1528 = vmatpush2.msra.mxu1 %v1449_v40 }
 0x26c   : > { %1529 = vmatprep.subr.mxu1 %v1448_v41  ;;  %v1790_v41 = vld [vmem:[#allocation2 + $0xde0] sm:$0xff] }
 0x26d   : > { %1530 = vmatpush2.msra.mxu1 %v1447_v42  ;;  %v1789_v42 = vld [vmem:[#allocation2 + $0xdd8] sm:$0xff] }
 0x26e   : > { %1531 = vmatprep.subr.mxu1 %v1446_v43 }
 0x26f   : > { %1532 = vmatpush2.msra.mxu1 %v1445_v44 }
 0x270   : > { %1533 = vmatprep.subr.mxu1 %v1444_v45  ;;  %v1788_v45 = vld [vmem:[#allocation2 + $0xdd0] sm:$0xff] }
 0x271   : > { %1534 = vmatpush2.msra.mxu1 %v1443_v46 }
 0x272   : > { %1535 = vmatprep.subr.mxu1 %v1442_v47  ;;  %v1787_v47 = vld [vmem:[#allocation2 + $0xdc8] sm:$0xff] }
 0x273   : > { %1536 = vmatpush2.msra.mxu1 %v1441_v48 }
 0x274   : > { %1936 = vmatprep.subr.mxu1 %v1761_v7 }
 0x2b3   : > { %v1036_v22 = vpop.f32.mrf.mxu0  ;;  %v1113_v49 = vpop.f32.mrf.mxu1 }
 0x2b5   : > { %v1038_v19 = vpop.f32.mrf.mxu0  ;;  %v1115_v50 = vpop.f32.mrf.mxu1 }
 0x2b6   : > { %1395 = vmatprep.mubr.f32.mxu0 %v1038_v19  ;;  %1537 = vmatprep.mubr.f32.mxu1 %v1115_v50  ;;  %v1555_v19 = vld [vmem:[#allocation4 + $0x2] sm:$0x3] }
 0x2b7   : > { %v1042_v51 = vpop.f32.mrf.mxu0  ;;  %1396 = vmatmul.mubr.f32.vlgmr.msra.gmra.mxu0 %v1036_v22  ;;  %1538 = vmatmul.mubr.f32.vlgmr.msra.gmra.mxu1 %v1113_v49  ;;  %v1786_v49 = vld [vmem:[#allocation2 + $0xdc0] sm:$0xff] }
 0x2b8   : > { %v1119_v52 = vpop.f32.mrf.mxu1  ;;  %1937 = vmatpush1.msra.mxu1 %v1760_v54  ;;  %v1564_v54 = vrot.slane %v1555_v19, %v6454_v55 }
 0x2b9   : > { %v1044_v53 = vpop.f32.mrf.mxu0  ;;  %1938 = vmatprep.subr.mxu1 %v1759_v56 }
 0x2ba   : > { %v1121_v20 = vpop.f32.mrf.mxu1  ;;  %1401 = vmatprep.mubr.f32.mxu0 %v1044_v53  ;;  %1939 = vmatpush1.msra.mxu1 %v1758_v8 }
 0x2bb   : > { %1543 = vmatprep.mubr.f32.mxu1 %v1121_v20  ;;  %1402 = vmatmul.mubr.f32.gmra.mxu0 %v1042_v51  ;;  %v1784_v20 = vld [vmem:[#allocation2 + $0xdb0] sm:$0xff] }
 0x2bc   : > { %1544 = vmatmul.mubr.f32.gmra.mxu1 %v1119_v52  ;;  %1639 = vmatprep.mubr.f32.mxu0 %v6257_v1  ;;  %v1785_v52 = vld [vmem:[#allocation2 + $0xdb8] sm:$0xff] }
 0x2bd   : > { %1940 = vmatprep.subr.mxu1 %v1757_v58  ;;  %v1783_v58 = vld [vmem:[#allocation2 + $0xda8] sm:$0xff] }
 0x2be   : > { %1941 = vmatpush1.msra.mxu1 %v1756_v59 }
 0x2bf   : > { %1942 = vmatprep.subr.mxu1 %v1755_v60  ;;  %v1560_v60 = vrot.slane %v1555_v19, %v6457_v57  ;;  %v1809_v19 = vld [vmem:[#allocation2 + $0xe70] sm:$0xff] }
 0x2c0   : > { %1943 = vmatpush1.msra.mxu1 %v1754_v61 }
 0x2c1   : > { %1944 = vmatprep.subr.mxu1 %v1753_v62  ;;  %v1782_v62 = vld [vmem:[#allocation2 + $0xda0] sm:$0xff] }
 0x2c2   : > { %1945 = vmatpush1.msra.mxu1 %v1752_v63 }
 0x2c3   : > { %1946 = vmatprep.subr.mxu1 %v1751_v0  ;;  %v1781_v0 = vld [vmem:[#allocation2 + $0xd98] sm:$0xff] }
 0x2c4   : > { %1947 = vmatpush1.msra.mxu1 %v1750_v3 }
 0x2c5   : > { %1948 = vmatprep.subr.mxu1 %v1749_v4  ;;  %v1780_v4 = vld [vmem:[#allocation2 + $0xd90] sm:$0xff] }
 0x2c6   : > { %1949 = vmatpush1.msra.mxu1 %v1748_v5 }
 0x2c7   : > { %1950 = vmatprep.subr.mxu1 %v1747_v6 }
 0x2c8   : > { %1951 = vmatpush1.msra.mxu1 %v1746_v9  ;;  %v1779_v9 = vld [vmem:[#allocation2 + $0xd88] sm:$0xff] }
 0x2c9   : > { %1952 = vmatprep.subr.mxu1 %v1745_v10 }
 0x2ca   : > { %1953 = vmatpush1.msra.mxu1 %v1744_v12  ;;  %v1778_v12 = vld [vmem:[#allocation2 + $0xd80] sm:$0xff] }
 0x2cb   : > { %1954 = vmatprep.subr.mxu1 %v1743_v15 }
 0x2cc   : > { %1955 = vmatpush1.msra.mxu1 %v1742_v2  ;;  %v1777_v2 = vld [vmem:[#allocation2 + $0xd78] sm:$0xff] }
 0x2cd   : > { %1956 = vmatprep.subr.mxu1 %v1741_v16 }
 0x2ce   : > { %1957 = vmatpush1.msra.mxu1 %v1740_v23 }
 0x2cf   : > { %1958 = vmatprep.subr.mxu1 %v1739_v24  ;;  %v1775_v24 = vld [vmem:[#allocation2 + $0xd68] sm:$0xff] }
 0x2d0   : > { %1959 = vmatpush1.msra.mxu1 %v1738_v25 }
 0x2d1   : > { %1960 = vmatprep.subr.mxu1 %v1737_v26  ;;  %v1774_v26 = vld [vmem:[#allocation2 + $0xd60] sm:$0xff] }
 0x2d2   : > { %1961 = vmatpush1.msra.mxu1 %v1736_v28  ;;  %v1826_v28 = vld [vmem:[#allocation2 + $0xef8] sm:$0xff] }
 0x2d3   : > { %1962 = vmatprep.subr.mxu1 %v1735_v29  ;;  %v1772_v29 = vld [vmem:[#allocation2 + $0xd50] sm:$0xff] }
 0x2d4   : > { %1963 = vmatpush1.msra.mxu1 %v1734_v30  ;;  %v1771_v30 = vld [vmem:[#allocation2 + $0xd48] sm:$0xff] }
 0x2d5   : > { %1964 = vmatprep.subr.mxu1 %v1733_v31  ;;  %v1770_v31 = vld [vmem:[#allocation2 + $0xd40] sm:$0xff] }
 0x2d6   : > { %1965 = vmatpush1.msra.mxu1 %v1732_v33  ;;  %v1825_v33 = vld [vmem:[#allocation2 + $0xef0] sm:$0xff] }
 0x2d7   : > { %1966 = vmatprep.subr.mxu1 %v1731_v34  ;;  %v1824_v34 = vld [vmem:[#allocation2 + $0xee8] sm:$0xff] }
 0x2d8   : > { %1967 = vmatpush1.msra.mxu1 %v1730_v11  ;;  %v1768_v11 = vld [vmem:[#allocation2 + $0xd30] sm:$0xff] }
 0x2d9   : > { %1968 = vmatprep.subr.mxu1 %v1793_v35  ;;  %v1823_v35 = vld [vmem:[#allocation2 + $0xee0] sm:$0xff] }
 0x2da   : > { %1969 = vmatpush2.msra.mxu1 %v1792_v37  ;;  %v1822_v37 = vld [vmem:[#allocation2 + $0xed8] sm:$0xff] }
 0x2db   : > { %1970 = vmatprep.subr.mxu1 %v1791_v38  ;;  %v1821_v38 = vld [vmem:[#allocation2 + $0xed0] sm:$0xff] }
 0x2dc   : > { %1971 = vmatpush2.msra.mxu1 %v1790_v41  ;;  %v1819_v41 = vld [vmem:[#allocation2 + $0xec0] sm:$0xff] }
 0x2dd   : > { %1972 = vmatprep.subr.mxu1 %v1789_v42  ;;  %v1818_v42 = vld [vmem:[#allocation2 + $0xeb8] sm:$0xff] }
 0x2de   : > { %1973 = vmatpush2.msra.mxu1 %v1788_v45  ;;  %v1815_v45 = vld [vmem:[#allocation2 + $0xea0] sm:$0xff] }
 0x2df   : > { %1974 = vmatprep.subr.mxu1 %v1787_v47  ;;  %v1813_v47 = vld [vmem:[#allocation2 + $0xe90] sm:$0xff] }
 0x2e0   : > { %1975 = vmatpush2.msra.mxu1 %v1786_v49  ;;  %v1810_v49 = vld [vmem:[#allocation2 + $0xe78] sm:$0xff] }
 0x2e1   : > { %1976 = vmatprep.subr.mxu1 %v1785_v52  ;;  %v1806_v52 = vld [vmem:[#allocation2 + $0xe58] sm:$0xff] }
 0x2e2   : > { %1977 = vmatpush2.msra.mxu1 %v1784_v20  ;;  %v1804_v20 = vld [vmem:[#allocation2 + $0xe48] sm:$0xff] }
 0x2e3   : > { %1978 = vmatprep.subr.mxu1 %v1783_v58  ;;  %v1799_v58 = vld [vmem:[#allocation2 + $0xe20] sm:$0xff] }
 0x2e4   : > { %1979 = vmatpush2.msra.mxu1 %v1782_v62  ;;  %v1795_v62 = vld [vmem:[#allocation2 + $0xe00] sm:$0xff] }
 0x2e5   : > { %1980 = vmatprep.subr.mxu1 %v1781_v0  ;;  %v1857_v0 = vld [vmem:[#allocation2 + $0xff0] sm:$0xff] }
 0x2e6   : > { %1981 = vmatpush2.msra.mxu1 %v1780_v4  ;;  %v1855_v4 = vld [vmem:[#allocation2 + $0xfe0] sm:$0xff] }
 0x2e7   : > { %1982 = vmatprep.subr.mxu1 %v1779_v9  ;;  %v1852_v9 = vld [vmem:[#allocation2 + $0xfc8] sm:$0xff] }
 0x2e8   : > { %1983 = vmatpush2.msra.mxu1 %v1778_v12  ;;  %v1850_v12 = vld [vmem:[#allocation2 + $0xfb8] sm:$0xff] }
 0x2e9   : > { %1984 = vmatprep.subr.mxu1 %v1777_v2  ;;  %v1849_v2 = vld [vmem:[#allocation2 + $0xfb0] sm:$0xff] }
 0x2f4   : > { %v1320_v21 = vpop.f32.mrf.mxu1 }
 0x2f6   : > { %v1322_v27 = vpop.f32.mrf.mxu1 }
 0x2f8   : > { %v1326_v32 = vpop.f32.mrf.mxu1 }
 0x2fa   : > { %v1328_v36 = vpop.f32.mrf.mxu1 }
 0x377   : > { %v1397_v39 = vpop.f32.mrf.mxu0  ;;  %v1539_v40 = vpop.f32.mrf.mxu1 }
 0x378   : > { %v1398_v48 = vadd.f32 %v1397_v39, %v1320_v21  ;;  %v1776_v21 = vld [vmem:[#allocation2 + $0xd70] sm:$0xff]  ;;  %v1820_v39 = vld [vmem:[#allocation2 + $0xec8] sm:$0xff] }
 0x379   : > { %v1399_v43 = vpop.f32.mrf.mxu0  ;;  %v1541_v44 = vpop.f32.mrf.mxu1  ;;  %1985 = vmatpush2.msra.mxu1 %v1776_v21  ;;  %v1848_v21 = vld [vmem:[#allocation2 + $0xfa8] sm:$0xff] }
 0x37a   : > { %v1400_v46 = vadd.f32 %v1399_v43, %v1322_v27  ;;  %v1550_v59 = vadd.f32 %v1539_v40, %v1398_v48  ;;  %1986 = vmatprep.subr.mxu1 %v1775_v24  ;;  %v1773_v27 = vld [vmem:[#allocation2 + $0xd58] sm:$0xff]  ;;  %v1766_v40 = vld [vmem:[#allocation2 + $0xd20] sm:$0xff]  ;;  %v1817_v43 = vld [vmem:[#allocation2 + $0xeb0] sm:$0xff] }
 0x37b   : > { %v1403_v22 = vpop.f32.mrf.mxu0  ;;  %1987 = vmatpush2.msra.mxu1 %v1774_v26  ;;  %v1812_v48 = vld [vmem:[#allocation2 + $0xe88] sm:$0xff]  ;;  %v1846_v24 = vld [vmem:[#allocation2 + $0xf98] sm:$0xff]  ;;  %v1845_v26 = vld [vmem:[#allocation2 + $0xf90] sm:$0xff] }
 0x37c   : > { %v1404_v50 = vadd.f32 %v1403_v22, %v1326_v32  ;;  %v1545_v51 = vpop.f32.mrf.mxu1  ;;  %v1551_v7 = vadd.f32 %v1541_v44, %v1400_v46  ;;  %v1567_v10 = vadd.f32 %v1560_v60, %v1550_v59  ;;  %1988 = vmatprep.subr.mxu1 %v1773_v27  ;;  %v1769_v32 = vld [vmem:[#allocation2 + $0xd38] sm:$0xff]  ;;  %v1816_v44 = vld [vmem:[#allocation2 + $0xea8] sm:$0xff]  ;;  %v1811_v22 = vld [vmem:[#allocation2 + $0xe80] sm:$0xff] }
 0x37d   : > { %v1405_v53 = vpop.f32.mrf.mxu0  ;;  %1989 = vmatpush2.msra.mxu1 %v1772_v29  ;;  %v1814_v46 = vld [vmem:[#allocation2 + $0xe98] sm:$0xff]  ;;  %v1844_v27 = vld [vmem:[#allocation2 + $0xf88] sm:$0xff] }
 0x37e   : > { %v1552_v56 = vadd.f32 %v1545_v51, %v1404_v50  ;;  %v1406_v8 = vadd.f32 %v1405_v53, %v1328_v36  ;;  %v1547_v61 = vpop.f32.mrf.mxu1  ;;  %v1568_v5 = vadd.f32 %v1564_v54, %v1551_v7  ;;  %v6494_v25 = vmax.f32 %v1567_v10, 0.0  ;;  %1990 = vmatprep.subr.mxu1 %v1771_v30  ;;  %v1767_v36 = vld [vmem:[#allocation2 + $0xd28] sm:$0xff]  ;;  %v1807_v51 = vld [vmem:[#allocation2 + $0xe60] sm:$0xff]  ;;  %v1805_v53 = vld [vmem:[#allocation2 + $0xe50] sm:$0xff] }
 0x37f   : > { %1991 = vmatpush2.msra.mxu1 %v1770_v31  ;;  %v1808_v50 = vld [vmem:[#allocation2 + $0xe68] sm:$0xff]  ;;  %v1803_v7 = vld [vmem:[#allocation2 + $0xe40] sm:$0xff]  ;;  %v1798_v59 = vld [vmem:[#allocation2 + $0xe18] sm:$0xff] }
 0x380   : > { %v1553_v63 = vadd.f32 %v1547_v61, %v1406_v8  ;;  %v1569_v3 = vadd.f32 %v1560_v60, %v1552_v56  ;;  %v1572_v23 = vmax.f32 %v1568_v5, 0.0  ;;  %1992 = vmatprep.subr.mxu1 %v1769_v32  ;;  %v1801_v56 = vld [vmem:[#allocation2 + $0xe30] sm:$0xff]  ;;  %v1800_v8 = vld [vmem:[#allocation2 + $0xe28] sm:$0xff]  ;;  %v1854_v5 = vld [vmem:[#allocation2 + $0xfd8] sm:$0xff] }
 0x381   : > { %1993 = vmatpush2.msra.mxu1 %v1768_v11  ;;  %v1797_v60 = vld [vmem:[#allocation2 + $0xe10] sm:$0xff]  ;;  %v1796_v61 = vld [vmem:[#allocation2 + $0xe08] sm:$0xff]  ;;  %v1851_v10 = vld [vmem:[#allocation2 + $0xfc0] sm:$0xff] }
 0x382   : > { %v1570_v6 = vadd.f32 %v1564_v54, %v1553_v63  ;;  %v6491_v16 = vmax.f32 %v1569_v3, 0.0  ;;  %1994 = vmatprep.subr.mxu1 %v1767_v36  ;;  %v1802_v54 = vld [vmem:[#allocation2 + $0xe38] sm:$0xff]  ;;  %v1856_v3 = vld [vmem:[#allocation2 + $0xfe8] sm:$0xff]  ;;  %v1841_v30 = vld [vmem:[#allocation2 + $0xf70] sm:$0xff] }
 0x383   : > { %1995 = vmatpush2.msra.mxu1 %v1766_v40  ;;  %v1858_v63 = vld [vmem:[#allocation2 + $0xff8] sm:$0xff]  ;;  %v1840_v31 = vld [vmem:[#allocation2 + $0xf68] sm:$0xff]  ;;  %v1839_v32 = vld [vmem:[#allocation2 + $0xf60] sm:$0xff] }
 0x384   : > { %v6489_v15 = vmax.f32 %v1570_v6, 0.0  ;;  %v1853_v6 = vld [vmem:[#allocation2 + $0xfd0] sm:$0xff]  ;;  %v1842_v29 = vld [vmem:[#allocation2 + $0xf78] sm:$0xff]  ;;  %v1836_v11 = vld [vmem:[#allocation2 + $0xf48] sm:$0xff] }
 0x385   : > { %v1834_v36 = vld [vmem:[#allocation2 + $0xf38] sm:$0xff] }
 0x386   : > { %1603 = vmatprep.subr.mxu0 %v6489_v15  ;;  %v1765_v40 = vld [vmem:[#allocation2 + $0xd18] sm:$0xff] }
 0x387   : > { %1604 = vmatpush1.msra.mxu0 %v6491_v16  ;;  %1996 = vmatprep.subr.mxu1 %v1765_v40  ;;  %v2060_v40 = vld [vmem:[#allocation2 + $0x1170] sm:$0xff] }
 0x388   : > { %1605 = vmatprep.subr.mxu0 %v1572_v23 }
 0x389   : > { %1606 = vmatpush1.msra.mxu0 %v6494_v25 }
 0x38a   : > { %5990 = vmatmul.mubr.msk.f32.vlgmr.msra.gmra.mxu0 %vm354_vm2, %v6425_v13  ;;  %1680 = vmatprep.subr.mxu0 %v6489_v15 }
 0x38b   : > { %1681 = vmatpush1.msra.mxu0 %v6491_v16  ;;  %1645 = vmatprep.mubr.f32.mxu0 %v6257_v1 }
 0x38c   : > { %1682 = vmatprep.subr.mxu0 %v1572_v23 }
 0x38d   : > { %1683 = vmatpush1.msra.mxu0 %v6494_v25 }
 0x38e   : > { %5991 = vmatmul.mubr.msk.f32.gmra.mxu0 %vm354_vm2, %v6439_v17  ;;  %1859 = vmatprep.subr.mxu0 %v1826_v28  ;;  %v1843_v28 = vld [vmem:[#allocation2 + $0xf80] sm:$0xff] }
 0x38f   : > { %1716 = vmatprep.mubr.f32.mxu0 %v6257_v1 }
 0x392   : > { %5992 = vmatmul.mubr.msk.f32.vlgmr.msra.gmra.mxu0 %vm354_vm2, %v6428_v14 }
 0x393   : > { %1860 = vmatpush1.msra.mxu0 %v1825_v33  ;;  %1722 = vmatprep.mubr.f32.mxu0 %v6257_v1  ;;  %v1838_v33 = vld [vmem:[#allocation2 + $0xf58] sm:$0xff] }
 0x394   : > { %1861 = vmatprep.subr.mxu0 %v1824_v34  ;;  %v1837_v34 = vld [vmem:[#allocation2 + $0xf50] sm:$0xff] }
 0x395   : > { %1862 = vmatpush1.msra.mxu0 %v1823_v35  ;;  %v1835_v35 = vld [vmem:[#allocation2 + $0xf40] sm:$0xff] }
 0x396   : > { %1863 = vmatprep.subr.mxu0 %v1822_v37  ;;  %5993 = vmatmul.mubr.msk.f32.gmra.mxu0 %vm354_vm2, %v6442_v18  ;;  %v1833_v37 = vld [vmem:[#allocation2 + $0xf30] sm:$0xff] }
 0x397   : > { %1864 = vmatpush1.msra.mxu0 %v1821_v38  ;;  %1923 = vmatprep.mubr.f32.mxu0 %v1572_v23  ;;  %v1847_v23 = vld [vmem:[#allocation2 + $0xfa0] sm:$0xff]  ;;  %v1832_v38 = vld [vmem:[#allocation2 + $0xf28] sm:$0xff] }
 0x398   : > { %1865 = vmatprep.subr.mxu0 %v1820_v39  ;;  %v1831_v39 = vld [vmem:[#allocation2 + $0xf20] sm:$0xff] }
 0x399   : > { %1866 = vmatpush1.msra.mxu0 %v1819_v41  ;;  %v1764_v41 = vld [vmem:[#allocation2 + $0xd10] sm:$0xff] }
 0x39a   : > { %1867 = vmatprep.subr.mxu0 %v1818_v42  ;;  %v1830_v42 = vld [vmem:[#allocation2 + $0xf18] sm:$0xff]  ;;  %1997 = vmatpush2.msra.mxu1 %v1764_v41  ;;  %v2059_v41 = vld [vmem:[#allocation2 + $0x1168] sm:$0xff] }
 0x39b   : > { %1868 = vmatpush1.msra.mxu0 %v1817_v43  ;;  %v1829_v43 = vld [vmem:[#allocation2 + $0xf10] sm:$0xff] }
 0x39c   : > { %1869 = vmatprep.subr.mxu0 %v1816_v44  ;;  %v1763_v44 = vld [vmem:[#allocation2 + $0xd08] sm:$0xff] }
 0x39d   : > { %1870 = vmatpush1.msra.mxu0 %v1815_v45  ;;  %v1762_v45 = vld [vmem:[#allocation2 + $0xd00] sm:$0xff]  ;;  %1998 = vmatprep.subr.mxu1 %v1763_v44  ;;  %v2056_v44 = vld [vmem:[#allocation2 + $0x1150] sm:$0xff] }
 0x39e   : > { %1871 = vmatprep.subr.mxu0 %v1814_v46  ;;  %v1828_v46 = vld [vmem:[#allocation2 + $0xf08] sm:$0xff]  ;;  %1999 = vmatpush2.msra.mxu1 %v1762_v45 }
 0x39f   : > { %1872 = vmatpush1.msra.mxu0 %v1813_v47  ;;  %v1827_v47 = vld [vmem:[#allocation2 + $0xf00] sm:$0xff]  ;;  %v2055_v45 = vld [vmem:[#allocation2 + $0x1148] sm:$0xff] }
 0x3a0   : > { %1873 = vmatprep.subr.mxu0 %v1812_v48  ;;  %v2045_v48 = vld [vmem:[#allocation2 + $0x10f8] sm:$0xff] }
 0x3a1   : > { %1874 = vmatpush1.msra.mxu0 %v1811_v22  ;;  %v2044_v22 = vld [vmem:[#allocation2 + $0x10f0] sm:$0xff] }
 0x3a2   : > { %1875 = vmatprep.subr.mxu0 %v1810_v49  ;;  %v2043_v49 = vld [vmem:[#allocation2 + $0x10e8] sm:$0xff] }
 0x3a3   : > { %1876 = vmatpush1.msra.mxu0 %v1809_v19  ;;  %v2042_v19 = vld [vmem:[#allocation2 + $0x10e0] sm:$0xff] }
 0x3a4   : > { %1877 = vmatprep.subr.mxu0 %v1808_v50  ;;  %v2041_v50 = vld [vmem:[#allocation2 + $0x10d8] sm:$0xff] }
 0x3a5   : > { %1878 = vmatpush1.msra.mxu0 %v1807_v51  ;;  %v2040_v51 = vld [vmem:[#allocation2 + $0x10d0] sm:$0xff] }
 0x3a6   : > { %1879 = vmatprep.subr.mxu0 %v1806_v52  ;;  %v2039_v52 = vld [vmem:[#allocation2 + $0x10c8] sm:$0xff] }
 0x3a7   : > { %1880 = vmatpush1.msra.mxu0 %v1805_v53  ;;  %v2038_v53 = vld [vmem:[#allocation2 + $0x10c0] sm:$0xff] }
 0x3a8   : > { %1881 = vmatprep.subr.mxu0 %v1804_v20  ;;  %v2037_v20 = vld [vmem:[#allocation2 + $0x10b8] sm:$0xff] }
 0x3a9   : > { %1882 = vmatpush1.msra.mxu0 %v1803_v7  ;;  %v2036_v7 = vld [vmem:[#allocation2 + $0x10b0] sm:$0xff] }
 0x3aa   : > { %1883 = vmatprep.subr.mxu0 %v1802_v54  ;;  %v2034_v54 = vld [vmem:[#allocation2 + $0x10a0] sm:$0xff] }
 0x3ab   : > { %1884 = vmatpush1.msra.mxu0 %v1801_v56  ;;  %v2032_v56 = vld [vmem:[#allocation2 + $0x1090] sm:$0xff] }
 0x3ac   : > { %1885 = vmatprep.subr.mxu0 %v1800_v8  ;;  %v2031_v8 = vld [vmem:[#allocation2 + $0x1088] sm:$0xff] }
 0x3ad   : > { %1886 = vmatpush1.msra.mxu0 %v1799_v58  ;;  %v2030_v58 = vld [vmem:[#allocation2 + $0x1080] sm:$0xff] }
 0x3ae   : > { %1887 = vmatprep.subr.mxu0 %v1798_v59  ;;  %v2028_v59 = vld [vmem:[#allocation2 + $0x1070] sm:$0xff] }
 0x3af   : > { %1888 = vmatpush1.msra.mxu0 %v1797_v60  ;;  %v2027_v60 = vld [vmem:[#allocation2 + $0x1068] sm:$0xff] }
 0x3b0   : > { %1889 = vmatprep.subr.mxu0 %v1796_v61  ;;  %v2026_v61 = vld [vmem:[#allocation2 + $0x1060] sm:$0xff] }
 0x3b1   : > { %1890 = vmatpush1.msra.mxu0 %v1795_v62  ;;  %v2025_v62 = vld [vmem:[#allocation2 + $0x1058] sm:$0xff] }
 0x3b2   : > { %1891 = vmatprep.subr.mxu0 %v1858_v63  ;;  %v2024_v63 = vld [vmem:[#allocation2 + $0x1050] sm:$0xff] }
 0x3b3   : > { %1892 = vmatpush2.msra.mxu0 %v1857_v0  ;;  %v2023_v0 = vld [vmem:[#allocation2 + $0x1048] sm:$0xff] }
 0x3b4   : > { %1893 = vmatprep.subr.mxu0 %v1856_v3  ;;  %v2022_v3 = vld [vmem:[#allocation2 + $0x1040] sm:$0xff] }
 0x3b5   : > { %1894 = vmatpush2.msra.mxu0 %v1855_v4  ;;  %v2021_v4 = vld [vmem:[#allocation2 + $0x1038] sm:$0xff] }
 0x3b6   : > { %1895 = vmatprep.subr.mxu0 %v1854_v5  ;;  %v2020_v5 = vld [vmem:[#allocation2 + $0x1030] sm:$0xff] }
 0x3b7   : > { %1896 = vmatpush2.msra.mxu0 %v1853_v6  ;;  %v2019_v6 = vld [vmem:[#allocation2 + $0x1028] sm:$0xff] }
 0x3b8   : > { %1897 = vmatprep.subr.mxu0 %v1852_v9  ;;  %v2018_v9 = vld [vmem:[#allocation2 + $0x1020] sm:$0xff] }
 0x3b9   : > { %1898 = vmatpush2.msra.mxu0 %v1851_v10  ;;  %v2017_v10 = vld [vmem:[#allocation2 + $0x1018] sm:$0xff] }
 0x3ba   : > { %1899 = vmatprep.subr.mxu0 %v1850_v12  ;;  %v2016_v12 = vld [vmem:[#allocation2 + $0x1010] sm:$0xff] }
 0x3bb   : > { %1900 = vmatpush2.msra.mxu0 %v1849_v2  ;;  %v2015_v2 = vld [vmem:[#allocation2 + $0x1008] sm:$0xff] }
 0x3bc   : > { %1901 = vmatprep.subr.mxu0 %v1848_v21  ;;  %v2014_v21 = vld [vmem:[#allocation2 + $0x1000] sm:$0xff] }
 0x3bd   : > { %1902 = vmatpush2.msra.mxu0 %v1847_v23  ;;  %v2077_v23 = vld [vmem:[#allocation2 + $0x11f8] sm:$0xff] }
 0x3be   : > { %1903 = vmatprep.subr.mxu0 %v1846_v24  ;;  %v2076_v24 = vld [vmem:[#allocation2 + $0x11f0] sm:$0xff] }
 0x3bf   : > { %1904 = vmatpush2.msra.mxu0 %v1845_v26  ;;  %v2075_v26 = vld [vmem:[#allocation2 + $0x11e8] sm:$0xff] }
 0x3c0   : > { %1905 = vmatprep.subr.mxu0 %v1844_v27  ;;  %v2074_v27 = vld [vmem:[#allocation2 + $0x11e0] sm:$0xff] }
 0x3c1   : > { %1906 = vmatpush2.msra.mxu0 %v1843_v28  ;;  %v2073_v28 = vld [vmem:[#allocation2 + $0x11d8] sm:$0xff] }
 0x3c2   : > { %1907 = vmatprep.subr.mxu0 %v1842_v29  ;;  %v2072_v29 = vld [vmem:[#allocation2 + $0x11d0] sm:$0xff] }
 0x3c3   : > { %1908 = vmatpush2.msra.mxu0 %v1841_v30  ;;  %v2071_v30 = vld [vmem:[#allocation2 + $0x11c8] sm:$0xff] }
 0x3c4   : > { %1909 = vmatprep.subr.mxu0 %v1840_v31  ;;  %v2070_v31 = vld [vmem:[#allocation2 + $0x11c0] sm:$0xff] }
 0x3c5   : > { %1910 = vmatpush2.msra.mxu0 %v1839_v32  ;;  %v2069_v32 = vld [vmem:[#allocation2 + $0x11b8] sm:$0xff] }
 0x3c6   : > { %1911 = vmatprep.subr.mxu0 %v1838_v33  ;;  %v2068_v33 = vld [vmem:[#allocation2 + $0x11b0] sm:$0xff] }
 0x3c7   : > { %1912 = vmatpush2.msra.mxu0 %v1837_v34  ;;  %v2067_v34 = vld [vmem:[#allocation2 + $0x11a8] sm:$0xff] }
 0x3c8   : > { %1913 = vmatprep.subr.mxu0 %v1836_v11  ;;  %v2066_v11 = vld [vmem:[#allocation2 + $0x11a0] sm:$0xff] }
 0x3c9   : > { %1914 = vmatpush2.msra.mxu0 %v1835_v35  ;;  %v2065_v35 = vld [vmem:[#allocation2 + $0x1198] sm:$0xff] }
 0x3ca   : > { %1915 = vmatprep.subr.mxu0 %v1834_v36  ;;  %v2064_v36 = vld [vmem:[#allocation2 + $0x1190] sm:$0xff] }
 0x3cb   : > { %1916 = vmatpush2.msra.mxu0 %v1833_v37  ;;  %v2063_v37 = vld [vmem:[#allocation2 + $0x1188] sm:$0xff] }
 0x3cc   : > { %1917 = vmatprep.subr.mxu0 %v1832_v38  ;;  %v2062_v38 = vld [vmem:[#allocation2 + $0x1180] sm:$0xff] }
 0x3cd   : > { %1918 = vmatpush2.msra.mxu0 %v1831_v39  ;;  %v2061_v39 = vld [vmem:[#allocation2 + $0x1178] sm:$0xff] }
 0x3ce   : > { %1919 = vmatprep.subr.mxu0 %v1830_v42  ;;  %v2058_v42 = vld [vmem:[#allocation2 + $0x1160] sm:$0xff] }
 0x3cf   : > { %1920 = vmatpush2.msra.mxu0 %v1829_v43  ;;  %v2057_v43 = vld [vmem:[#allocation2 + $0x1158] sm:$0xff] }
 0x3d0   : > { %1921 = vmatprep.subr.mxu0 %v1828_v46  ;;  %v2054_v46 = vld [vmem:[#allocation2 + $0x1140] sm:$0xff] }
 0x3d1   : > { %1922 = vmatpush2.msra.mxu0 %v1827_v47  ;;  %v2053_v47 = vld [vmem:[#allocation2 + $0x1138] sm:$0xff] }
 0x3d2   : > { %1924 = vmatmul.mubr.f32.vlgmr.msra.gmra.mxu0 %v6494_v25  ;;  %2078 = vmatprep.subr.mxu0 %v2045_v48  ;;  %v2035_v25 = vld [vmem:[#allocation2 + $0x10a8] sm:$0xff]  ;;  %v2052_v48 = vld [vmem:[#allocation2 + $0x1130] sm:$0xff] }
 0x3d3   : > { %1929 = vmatprep.mubr.f32.mxu0 %v6489_v15  ;;  %2079 = vmatpush1.msra.mxu0 %v2044_v22  ;;  %v2033_v15 = vld [vmem:[#allocation2 + $0x1098] sm:$0xff]  ;;  %v2051_v22 = vld [vmem:[#allocation2 + $0x1128] sm:$0xff] }
 0x3d4   : > { %2080 = vmatprep.subr.mxu0 %v2043_v49  ;;  %v2050_v49 = vld [vmem:[#allocation2 + $0x1120] sm:$0xff] }
 0x3d5   : > { %2081 = vmatpush1.msra.mxu0 %v2042_v19  ;;  %v2049_v19 = vld [vmem:[#allocation2 + $0x1118] sm:$0xff] }
 0x3d6   : > { %1930 = vmatmul.mubr.f32.gmra.mxu0 %v6491_v16  ;;  %2082 = vmatprep.subr.mxu0 %v2041_v50  ;;  %v2029_v16 = vld [vmem:[#allocation2 + $0x1078] sm:$0xff]  ;;  %v2048_v50 = vld [vmem:[#allocation2 + $0x1110] sm:$0xff] }
 0x3d7   : > { %2083 = vmatpush1.msra.mxu0 %v2040_v51  ;;  %v2047_v51 = vld [vmem:[#allocation2 + $0x1108] sm:$0xff] }
 0x3d8   : > { %2084 = vmatprep.subr.mxu0 %v2039_v52  ;;  %v2046_v52 = vld [vmem:[#allocation2 + $0x1100] sm:$0xff] }
 0x3d9   : > { %2085 = vmatpush1.msra.mxu0 %v2038_v53 }
 0x3da   : > { %2086 = vmatprep.subr.mxu0 %v2037_v20 }
 0x3db   : > { %2087 = vmatpush1.msra.mxu0 %v2036_v7 }
 0x3dc   : > { %2088 = vmatprep.subr.mxu0 %v2035_v25 }
 0x3dd   : > { %2089 = vmatpush1.msra.mxu0 %v2034_v54 }
 0x3de   : > { %2090 = vmatprep.subr.mxu0 %v2033_v15 }
 0x3df   : > { %2091 = vmatpush1.msra.mxu0 %v2032_v56 }
 0x3e0   : > { %2092 = vmatprep.subr.mxu0 %v2031_v8 }
 0x3e1   : > { %2093 = vmatpush1.msra.mxu0 %v2030_v58  ;;  %v2366_v58 = vld [vmem:[#allocation2 + $0x12f8] sm:$0xff] }
 0x3e2   : > { %2094 = vmatprep.subr.mxu0 %v2029_v16  ;;  %v2365_v16 = vld [vmem:[#allocation2 + $0x12f0] sm:$0xff] }
 0x3e3   : > { %2095 = vmatpush1.msra.mxu0 %v2028_v59  ;;  %v2364_v59 = vld [vmem:[#allocation2 + $0x12e8] sm:$0xff] }
 0x3e4   : > { %2096 = vmatprep.subr.mxu0 %v2027_v60  ;;  %v2363_v60 = vld [vmem:[#allocation2 + $0x12e0] sm:$0xff] }
 0x3e5   : > { %2097 = vmatpush1.msra.mxu0 %v2026_v61  ;;  %v2362_v61 = vld [vmem:[#allocation2 + $0x12d8] sm:$0xff] }
 0x3e6   : > { %2098 = vmatprep.subr.mxu0 %v2025_v62  ;;  %v2361_v62 = vld [vmem:[#allocation2 + $0x12d0] sm:$0xff] }
 0x3e7   : > { %2099 = vmatpush1.msra.mxu0 %v2024_v63  ;;  %v2360_v63 = vld [vmem:[#allocation2 + $0x12c8] sm:$0xff] }
 0x3e8   : > { %2100 = vmatprep.subr.mxu0 %v2023_v0  ;;  %v2359_v0 = vld [vmem:[#allocation2 + $0x12c0] sm:$0xff] }
 0x3e9   : > { %2101 = vmatpush1.msra.mxu0 %v2022_v3  ;;  %v2358_v3 = vld [vmem:[#allocation2 + $0x12b8] sm:$0xff] }
 0x3ea   : > { %2102 = vmatprep.subr.mxu0 %v2021_v4  ;;  %v2357_v4 = vld [vmem:[#allocation2 + $0x12b0] sm:$0xff] }
 0x3eb   : > { %2103 = vmatpush1.msra.mxu0 %v2020_v5  ;;  %v2356_v5 = vld [vmem:[#allocation2 + $0x12a8] sm:$0xff] }
 0x3ec   : > { %2104 = vmatprep.subr.mxu0 %v2019_v6  ;;  %v2355_v6 = vld [vmem:[#allocation2 + $0x12a0] sm:$0xff] }
 0x3ed   : > { %2105 = vmatpush1.msra.mxu0 %v2018_v9  ;;  %v2354_v9 = vld [vmem:[#allocation2 + $0x1298] sm:$0xff] }
 0x3ee   : > { %2106 = vmatprep.subr.mxu0 %v2017_v10  ;;  %v2353_v10 = vld [vmem:[#allocation2 + $0x1290] sm:$0xff] }
 0x3ef   : > { %2107 = vmatpush1.msra.mxu0 %v2016_v12  ;;  %v2352_v12 = vld [vmem:[#allocation2 + $0x1288] sm:$0xff] }
 0x3f0   : > { %2108 = vmatprep.subr.mxu0 %v2015_v2  ;;  %v2351_v2 = vld [vmem:[#allocation2 + $0x1280] sm:$0xff] }
 0x3f1   : > { %2109 = vmatpush1.msra.mxu0 %v2014_v21  ;;  %v2350_v21 = vld [vmem:[#allocation2 + $0x1278] sm:$0xff] }
 0x3f2   : > { %2110 = vmatprep.subr.mxu0 %v2077_v23  ;;  %v2349_v23 = vld [vmem:[#allocation2 + $0x1270] sm:$0xff] }
 0x3f3   : > { %2111 = vmatpush2.msra.mxu0 %v2076_v24  ;;  %v2348_v24 = vld [vmem:[#allocation2 + $0x1268] sm:$0xff] }
 0x3f4   : > { %2112 = vmatprep.subr.mxu0 %v2075_v26  ;;  %v2347_v26 = vld [vmem:[#allocation2 + $0x1260] sm:$0xff] }
 0x3f5   : > { %2113 = vmatpush2.msra.mxu0 %v2074_v27  ;;  %v2346_v27 = vld [vmem:[#allocation2 + $0x1258] sm:$0xff] }
 0x3f6   : > { %2114 = vmatprep.subr.mxu0 %v2073_v28  ;;  %v2345_v28 = vld [vmem:[#allocation2 + $0x1250] sm:$0xff] }
 0x3f7   : > { %2115 = vmatpush2.msra.mxu0 %v2072_v29  ;;  %v2344_v29 = vld [vmem:[#allocation2 + $0x1248] sm:$0xff] }
 0x3f8   : > { %2116 = vmatprep.subr.mxu0 %v2071_v30 }
 0x3f9   : > { %2117 = vmatpush2.msra.mxu0 %v2070_v31  ;;  %v2343_v31 = vld [vmem:[#allocation2 + $0x1240] sm:$0xff] }
 0x3fa   : > { %2118 = vmatprep.subr.mxu0 %v2069_v32  ;;  %v2342_v32 = vld [vmem:[#allocation2 + $0x1238] sm:$0xff] }
 0x3fb   : > { %2119 = vmatpush2.msra.mxu0 %v2068_v33  ;;  %v2341_v33 = vld [vmem:[#allocation2 + $0x1230] sm:$0xff] }
 0x3fc   : > { %2120 = vmatprep.subr.mxu0 %v2067_v34  ;;  %v2340_v34 = vld [vmem:[#allocation2 + $0x1228] sm:$0xff] }
 0x3fd   : > { %2121 = vmatpush2.msra.mxu0 %v2066_v11 }
 0x3fe   : > { %2122 = vmatprep.subr.mxu0 %v2065_v35  ;;  %v2339_v35 = vld [vmem:[#allocation2 + $0x1220] sm:$0xff] }
 0x3ff   : > { %2123 = vmatpush2.msra.mxu0 %v2064_v36  ;;  %v2338_v36 = vld [vmem:[#allocation2 + $0x1218] sm:$0xff] }
 0x400   : > { %2124 = vmatprep.subr.mxu0 %v2063_v37 }
 0x401   : > { %2125 = vmatpush2.msra.mxu0 %v2062_v38  ;;  %v2337_v38 = vld [vmem:[#allocation2 + $0x1210] sm:$0xff] }
 0x402   : > { %2126 = vmatprep.subr.mxu0 %v2061_v39  ;;  %v2336_v39 = vld [vmem:[#allocation2 + $0x1208] sm:$0xff] }
 0x403   : > { %2127 = vmatpush2.msra.mxu0 %v2060_v40 }
 0x404   : > { %2128 = vmatprep.subr.mxu0 %v2059_v41 }
 0x405   : > { %2129 = vmatpush2.msra.mxu0 %v2058_v42  ;;  %v2335_v42 = vld [vmem:[#allocation2 + $0x1200] sm:$0xff] }
 0x406   : > { %2130 = vmatprep.subr.mxu0 %v2057_v43  ;;  %v2398_v43 = vld [vmem:[#allocation2 + $0x13f8] sm:$0xff] }
 0x407   : > { %2131 = vmatpush2.msra.mxu0 %v2056_v44  ;;  %v2397_v44 = vld [vmem:[#allocation2 + $0x13f0] sm:$0xff] }
 0x408   : > { %2132 = vmatprep.subr.mxu0 %v2055_v45  ;;  %v2396_v45 = vld [vmem:[#allocation2 + $0x13e8] sm:$0xff] }
 0x409   : > { %2133 = vmatpush2.msra.mxu0 %v2054_v46 }
 0x40a   : > { %2134 = vmatprep.subr.mxu0 %v2053_v47 }
 0x40b   : > { %2135 = vmatpush2.msra.mxu0 %v2052_v48  ;;  %v2395_v48 = vld [vmem:[#allocation2 + $0x13e0] sm:$0xff] }
 0x40c   : > { %2136 = vmatprep.subr.mxu0 %v2051_v22  ;;  %v2394_v22 = vld [vmem:[#allocation2 + $0x13d8] sm:$0xff] }
 0x40d   : > { %2137 = vmatpush2.msra.mxu0 %v2050_v49 }
 0x40e   : > { %2138 = vmatprep.subr.mxu0 %v2049_v19  ;;  %v2393_v19 = vld [vmem:[#allocation2 + $0x13d0] sm:$0xff] }
 0x40f   : > { %2139 = vmatpush2.msra.mxu0 %v2048_v50  ;;  %v2392_v50 = vld [vmem:[#allocation2 + $0x13c8] sm:$0xff] }
 0x410   : > { %2140 = vmatprep.subr.mxu0 %v2047_v51 }
 0x411   : > { %2141 = vmatpush2.msra.mxu0 %v2046_v52 }
 0x412   : > { %2541 = vmatprep.subr.mxu0 %v2366_v58 }
 0x44a   : > { %v1641_v53 = vpop.f32.mrf.mxu0 }
 0x44c   : > { %v1643_v20 = vpop.f32.mrf.mxu0 }
 0x44d   : > { %2000 = vmatprep.mubr.f32.mxu1 %v1643_v20 }
 0x44e   : > { %v1647_v7 = vpop.f32.mrf.mxu0  ;;  %2001 = vmatmul.mubr.f32.vlgmr.msra.gmra.mxu1 %v1641_v53  ;;  %v2391_v53 = vld [vmem:[#allocation2 + $0x13c0] sm:$0xff] }
 0x450   : > { %v1649_v25 = vpop.f32.mrf.mxu0 }
 0x451   : > { %2006 = vmatprep.mubr.f32.mxu1 %v1649_v25  ;;  %v2160_v25 = vld [vmem:[#allocation4 + $0x4] sm:$0x3] }
 0x452   : > { %v1718_v54 = vpop.f32.mrf.mxu0  ;;  %2007 = vmatmul.mubr.f32.gmra.mxu1 %v1647_v7 }
 0x453   : > { %2244 = vmatprep.mubr.f32.mxu1 %v6257_v1 }
 0x454   : > { %v1720_v15 = vpop.f32.mrf.mxu0 }
 0x455   : > { %2142 = vmatprep.mubr.f32.mxu0 %v1720_v15 }
 0x456   : > { %v1724_v56 = vpop.f32.mrf.mxu0  ;;  %2143 = vmatmul.mubr.f32.vlgmr.msra.gmra.mxu0 %v1718_v54  ;;  %v2390_v54 = vld [vmem:[#allocation2 + $0x13b8] sm:$0xff] }
 0x457   : > { %2542 = vmatpush1.msra.mxu0 %v2365_v16 }
 0x458   : > { %v1726_v8 = vpop.f32.mrf.mxu0  ;;  %2543 = vmatprep.subr.mxu0 %v2364_v59  ;;  %v2169_v59 = vrot.slane %v2160_v25, %v6454_v55 }
 0x459   : > { %2148 = vmatprep.mubr.f32.mxu0 %v1726_v8  ;;  %2544 = vmatpush1.msra.mxu0 %v2363_v60  ;;  %v2389_v8 = vld [vmem:[#allocation2 + $0x13b0] sm:$0xff] }
 0x45a   : > { %2149 = vmatmul.mubr.f32.gmra.mxu0 %v1724_v56  ;;  %2545 = vmatprep.subr.mxu0 %v2362_v61  ;;  %v2388_v61 = vld [vmem:[#allocation2 + $0x13a8] sm:$0xff] }
 0x45b   : > { %2546 = vmatpush1.msra.mxu0 %v2361_v62 }
 0x45c   : > { %2547 = vmatprep.subr.mxu0 %v2360_v63  ;;  %v2165_v63 = vrot.slane %v2160_v25, %v6457_v57  ;;  %v2413_v25 = vld [vmem:[#allocation2 + $0x1468] sm:$0xff] }
 0x45d   : > { %2548 = vmatpush1.msra.mxu0 %v2359_v0 }
 0x45e   : > { %2549 = vmatprep.subr.mxu0 %v2358_v3  ;;  %v2387_v3 = vld [vmem:[#allocation2 + $0x13a0] sm:$0xff] }
 0x45f   : > { %2550 = vmatpush1.msra.mxu0 %v2357_v4 }
 0x460   : > { %2551 = vmatprep.subr.mxu0 %v2356_v5  ;;  %v2386_v5 = vld [vmem:[#allocation2 + $0x1398] sm:$0xff] }
 0x461   : > { %2552 = vmatpush1.msra.mxu0 %v2355_v6 }
 0x462   : > { %2553 = vmatprep.subr.mxu0 %v2354_v9  ;;  %v2385_v9 = vld [vmem:[#allocation2 + $0x1390] sm:$0xff] }
 0x463   : > { %2554 = vmatpush1.msra.mxu0 %v2353_v10 }
 0x464   : > { %2555 = vmatprep.subr.mxu0 %v2352_v12 }
 0x465   : > { %2556 = vmatpush1.msra.mxu0 %v2351_v2  ;;  %v2384_v2 = vld [vmem:[#allocation2 + $0x1388] sm:$0xff] }
 0x466   : > { %2557 = vmatprep.subr.mxu0 %v2350_v21 }
 0x467   : > { %2558 = vmatpush1.msra.mxu0 %v2349_v23  ;;  %v2383_v23 = vld [vmem:[#allocation2 + $0x1380] sm:$0xff] }
 0x468   : > { %2559 = vmatprep.subr.mxu0 %v2348_v24 }
 0x469   : > { %2560 = vmatpush1.msra.mxu0 %v2347_v26  ;;  %v2382_v26 = vld [vmem:[#allocation2 + $0x1378] sm:$0xff] }
 0x46a   : > { %2561 = vmatprep.subr.mxu0 %v2346_v27 }
 0x46b   : > { %2562 = vmatpush1.msra.mxu0 %v2345_v28  ;;  %v2381_v28 = vld [vmem:[#allocation2 + $0x1370] sm:$0xff] }
 0x46c   : > { %2563 = vmatprep.subr.mxu0 %v2344_v29 }
 0x46d   : > { %2564 = vmatpush1.msra.mxu0 %v2343_v31 }
 0x46e   : > { %2565 = vmatprep.subr.mxu0 %v2342_v32  ;;  %v2379_v32 = vld [vmem:[#allocation2 + $0x1360] sm:$0xff] }
 0x46f   : > { %2566 = vmatpush1.msra.mxu0 %v2341_v33  ;;  %v2378_v33 = vld [vmem:[#allocation2 + $0x1358] sm:$0xff] }
 0x470   : > { %2567 = vmatprep.subr.mxu0 %v2340_v34  ;;  %v2431_v34 = vld [vmem:[#allocation2 + $0x14f8] sm:$0xff] }
 0x471   : > { %2568 = vmatpush1.msra.mxu0 %v2339_v35  ;;  %v2376_v35 = vld [vmem:[#allocation2 + $0x1348] sm:$0xff] }
 0x472   : > { %2569 = vmatprep.subr.mxu0 %v2338_v36  ;;  %v2375_v36 = vld [vmem:[#allocation2 + $0x1340] sm:$0xff] }
 0x473   : > { %2570 = vmatpush1.msra.mxu0 %v2337_v38  ;;  %v2430_v38 = vld [vmem:[#allocation2 + $0x14f0] sm:$0xff] }
 0x474   : > { %2571 = vmatprep.subr.mxu0 %v2336_v39  ;;  %v2429_v39 = vld [vmem:[#allocation2 + $0x14e8] sm:$0xff] }
 0x475   : > { %2572 = vmatpush1.msra.mxu0 %v2335_v42  ;;  %v2372_v42 = vld [vmem:[#allocation2 + $0x1328] sm:$0xff] }
 0x476   : > { %2573 = vmatprep.subr.mxu0 %v2398_v43  ;;  %v2427_v43 = vld [vmem:[#allocation2 + $0x14d8] sm:$0xff] }
 0x477   : > { %2574 = vmatpush2.msra.mxu0 %v2397_v44  ;;  %v2426_v44 = vld [vmem:[#allocation2 + $0x14d0] sm:$0xff] }
 0x478   : > { %2575 = vmatprep.subr.mxu0 %v2396_v45  ;;  %v2425_v45 = vld [vmem:[#allocation2 + $0x14c8] sm:$0xff] }
 0x479   : > { %2576 = vmatpush2.msra.mxu0 %v2395_v48  ;;  %v2423_v48 = vld [vmem:[#allocation2 + $0x14b8] sm:$0xff] }
 0x47a   : > { %2577 = vmatprep.subr.mxu0 %v2394_v22  ;;  %v2422_v22 = vld [vmem:[#allocation2 + $0x14b0] sm:$0xff] }
 0x47b   : > { %2578 = vmatpush2.msra.mxu0 %v2393_v19  ;;  %v2420_v19 = vld [vmem:[#allocation2 + $0x14a0] sm:$0xff] }
 0x47c   : > { %2579 = vmatprep.subr.mxu0 %v2392_v50  ;;  %v2419_v50 = vld [vmem:[#allocation2 + $0x1498] sm:$0xff] }
 0x47d   : > { %2580 = vmatpush2.msra.mxu0 %v2391_v53  ;;  %v2416_v53 = vld [vmem:[#allocation2 + $0x1480] sm:$0xff] }
 0x47e   : > { %2581 = vmatprep.subr.mxu0 %v2390_v54  ;;  %v2412_v54 = vld [vmem:[#allocation2 + $0x1460] sm:$0xff] }
 0x47f   : > { %2582 = vmatpush2.msra.mxu0 %v2389_v8  ;;  %v2409_v8 = vld [vmem:[#allocation2 + $0x1448] sm:$0xff] }
 0x480   : > { %2583 = vmatprep.subr.mxu0 %v2388_v61  ;;  %v2404_v61 = vld [vmem:[#allocation2 + $0x1420] sm:$0xff] }
 0x481   : > { %2584 = vmatpush2.msra.mxu0 %v2387_v3  ;;  %v2400_v3 = vld [vmem:[#allocation2 + $0x1400] sm:$0xff] }
 0x482   : > { %2585 = vmatprep.subr.mxu0 %v2386_v5  ;;  %v2462_v5 = vld [vmem:[#allocation2 + $0x15f0] sm:$0xff] }
 0x483   : > { %2586 = vmatpush2.msra.mxu0 %v2385_v9  ;;  %v2460_v9 = vld [vmem:[#allocation2 + $0x15e0] sm:$0xff] }
 0x484   : > { %2587 = vmatprep.subr.mxu0 %v2384_v2  ;;  %v2457_v2 = vld [vmem:[#allocation2 + $0x15c8] sm:$0xff] }
 0x485   : > { %2588 = vmatpush2.msra.mxu0 %v2383_v23  ;;  %v2455_v23 = vld [vmem:[#allocation2 + $0x15b8] sm:$0xff] }
 0x486   : > { %2589 = vmatprep.subr.mxu0 %v2382_v26  ;;  %v2454_v26 = vld [vmem:[#allocation2 + $0x15b0] sm:$0xff] }
 0x487   : > { %2590 = vmatpush2.msra.mxu0 %v2381_v28  ;;  %v2453_v28 = vld [vmem:[#allocation2 + $0x15a8] sm:$0xff] }
 0x492   : > { %v1925_v30 = vpop.f32.mrf.mxu0 }
 0x494   : > { %v1927_v11 = vpop.f32.mrf.mxu0 }
 0x496   : > { %v1931_v40 = vpop.f32.mrf.mxu0 }
 0x498   : > { %v1933_v46 = vpop.f32.mrf.mxu0 }
 0x50e   : > { %v2002_v37 = vpop.f32.mrf.mxu1 }
 0x50f   : > { %v2003_v15 = vadd.f32 %v2002_v37, %v1925_v30  ;;  %v2380_v30 = vld [vmem:[#allocation2 + $0x1368] sm:$0xff]  ;;  %v2374_v37 = vld [vmem:[#allocation2 + $0x1338] sm:$0xff] }
 0x510   : > { %v2004_v41 = vpop.f32.mrf.mxu1  ;;  %2591 = vmatprep.subr.mxu0 %v2380_v30  ;;  %v2451_v30 = vld [vmem:[#allocation2 + $0x1598] sm:$0xff] }
 0x511   : > { %v2005_v20 = vadd.f32 %v2004_v41, %v1927_v11  ;;  %2592 = vmatpush2.msra.mxu0 %v2379_v32  ;;  %v2377_v11 = vld [vmem:[#allocation2 + $0x1350] sm:$0xff]  ;;  %v2428_v41 = vld [vmem:[#allocation2 + $0x14e0] sm:$0xff] }
 0x512   : > { %v2008_v47 = vpop.f32.mrf.mxu1  ;;  %2593 = vmatprep.subr.mxu0 %v2378_v33  ;;  %v2450_v32 = vld [vmem:[#allocation2 + $0x1590] sm:$0xff]  ;;  %v2449_v33 = vld [vmem:[#allocation2 + $0x1588] sm:$0xff] }
 0x513   : > { %v2009_v7 = vadd.f32 %v2008_v47, %v1931_v40  ;;  %2594 = vmatpush2.msra.mxu0 %v2377_v11  ;;  %v2373_v40 = vld [vmem:[#allocation2 + $0x1330] sm:$0xff]  ;;  %v2424_v47 = vld [vmem:[#allocation2 + $0x14c0] sm:$0xff]  ;;  %v2447_v11 = vld [vmem:[#allocation2 + $0x1578] sm:$0xff] }
 0x514   : > { %v2010_v51 = vpop.f32.mrf.mxu1  ;;  %2595 = vmatprep.subr.mxu0 %v2376_v35  ;;  %v2446_v35 = vld [vmem:[#allocation2 + $0x1570] sm:$0xff] }
 0x515   : > { %v2011_v58 = vadd.f32 %v2010_v51, %v1933_v46  ;;  %2596 = vmatpush2.msra.mxu0 %v2375_v36  ;;  %v2371_v46 = vld [vmem:[#allocation2 + $0x1320] sm:$0xff]  ;;  %v2418_v51 = vld [vmem:[#allocation2 + $0x1490] sm:$0xff]  ;;  %v2445_v36 = vld [vmem:[#allocation2 + $0x1568] sm:$0xff] }
 0x516   : > { %v2144_v49 = vpop.f32.mrf.mxu0  ;;  %2597 = vmatprep.subr.mxu0 %v2374_v37  ;;  %v2444_v37 = vld [vmem:[#allocation2 + $0x1560] sm:$0xff] }
 0x517   : > { %v2155_v62 = vadd.f32 %v2144_v49, %v2003_v15  ;;  %2598 = vmatpush2.msra.mxu0 %v2373_v40  ;;  %v2421_v49 = vld [vmem:[#allocation2 + $0x14a8] sm:$0xff]  ;;  %v2411_v15 = vld [vmem:[#allocation2 + $0x1458] sm:$0xff] }
 0x518   : > { %v2146_v52 = vpop.f32.mrf.mxu0  ;;  %2599 = vmatprep.subr.mxu0 %v2372_v42  ;;  %v2441_v40 = vld [vmem:[#allocation2 + $0x1548] sm:$0xff]  ;;  %v2439_v42 = vld [vmem:[#allocation2 + $0x1538] sm:$0xff] }
 0x519   : > { %v2156_v16 = vadd.f32 %v2146_v52, %v2005_v20  ;;  %v2172_v21 = vadd.f32 %v2165_v63, %v2155_v62  ;;  %2600 = vmatpush2.msra.mxu0 %v2371_v46  ;;  %v2417_v52 = vld [vmem:[#allocation2 + $0x1488] sm:$0xff]  ;;  %v2415_v20 = vld [vmem:[#allocation2 + $0x1478] sm:$0xff] }
 0x51a   : > { %v2150_v56 = vpop.f32.mrf.mxu0  ;;  %v2403_v62 = vld [vmem:[#allocation2 + $0x1418] sm:$0xff] }
 0x51b   : > { %v2157_v60 = vadd.f32 %v2150_v56, %v2009_v7  ;;  %v2173_v10 = vadd.f32 %v2169_v59, %v2156_v16  ;;  %v6523_v31 = vmax.f32 %v2172_v21, 0.0  ;;  %v2414_v7 = vld [vmem:[#allocation2 + $0x1470] sm:$0xff]  ;;  %v2407_v16 = vld [vmem:[#allocation2 + $0x1438] sm:$0xff]  ;;  %v2456_v21 = vld [vmem:[#allocation2 + $0x15c0] sm:$0xff] }
 0x51c   : > { %v2152_v0 = vpop.f32.mrf.mxu0  ;;  %v2410_v56 = vld [vmem:[#allocation2 + $0x1450] sm:$0xff]  ;;  %v2370_v46 = vld [vmem:[#allocation2 + $0x1318] sm:$0xff] }
 0x51d   : > { %v2158_v4 = vadd.f32 %v2152_v0, %v2011_v58  ;;  %v2174_v6 = vadd.f32 %v2165_v63, %v2157_v60  ;;  %v2177_v29 = vmax.f32 %v2173_v10, 0.0  ;;  %v2408_v58 = vld [vmem:[#allocation2 + $0x1440] sm:$0xff]  ;;  %v2405_v60 = vld [vmem:[#allocation2 + $0x1428] sm:$0xff]  ;;  %v2402_v63 = vld [vmem:[#allocation2 + $0x1410] sm:$0xff]  ;;  %2601 = vmatprep.subr.mxu0 %v2370_v46 }
 0x51e   : > { %v2401_v0 = vld [vmem:[#allocation2 + $0x1408] sm:$0xff]  ;;  %v2459_v10 = vld [vmem:[#allocation2 + $0x15d8] sm:$0xff]  ;;  %v2665_v46 = vld [vmem:[#allocation2 + $0x1770] sm:$0xff] }
 0x51f   : > { %v2175_v12 = vadd.f32 %v2169_v59, %v2158_v4  ;;  %v6520_v27 = vmax.f32 %v2174_v6, 0.0  ;;  %v2406_v59 = vld [vmem:[#allocation2 + $0x1430] sm:$0xff]  ;;  %v2463_v4 = vld [vmem:[#allocation2 + $0x15f8] sm:$0xff]  ;;  %v2461_v6 = vld [vmem:[#allocation2 + $0x15e8] sm:$0xff] }
 0x521   : > { %v6518_v24 = vmax.f32 %v2175_v12, 0.0  ;;  %v2458_v12 = vld [vmem:[#allocation2 + $0x15d0] sm:$0xff] }
 0x523   : > { %2208 = vmatprep.subr.mxu1 %v6518_v24 }
 0x524   : > { %2209 = vmatpush1.msra.mxu1 %v6520_v27 }
 0x525   : > { %2210 = vmatprep.subr.mxu1 %v2177_v29 }
 0x526   : > { %2211 = vmatpush1.msra.mxu1 %v6523_v31 }
 0x527   : > { %5994 = vmatmul.mubr.msk.f32.vlgmr.msra.gmra.mxu1 %vm354_vm2, %v6425_v13  ;;  %2285 = vmatprep.subr.mxu1 %v6518_v24 }
 0x528   : > { %2286 = vmatpush1.msra.mxu1 %v6520_v27  ;;  %2250 = vmatprep.mubr.f32.mxu1 %v6257_v1 }
 0x529   : > { %2287 = vmatprep.subr.mxu1 %v2177_v29 }
 0x52a   : > { %2288 = vmatpush1.msra.mxu1 %v6523_v31 }
 0x52b   : > { %5995 = vmatmul.mubr.msk.f32.gmra.mxu1 %vm354_vm2, %v6439_v17  ;;  %2464 = vmatprep.subr.mxu1 %v2431_v34  ;;  %v2448_v34 = vld [vmem:[#allocation2 + $0x1580] sm:$0xff] }
 0x52c   : > { %2321 = vmatprep.mubr.f32.mxu1 %v6257_v1 }
 0x52f   : > { %5996 = vmatmul.mubr.msk.f32.vlgmr.msra.gmra.mxu1 %vm354_vm2, %v6428_v14 }
 0x530   : > { %2465 = vmatpush1.msra.mxu1 %v2430_v38  ;;  %2327 = vmatprep.mubr.f32.mxu1 %v6257_v1  ;;  %v2443_v38 = vld [vmem:[#allocation2 + $0x1558] sm:$0xff] }
 0x531   : > { %2466 = vmatprep.subr.mxu1 %v2429_v39  ;;  %v2442_v39 = vld [vmem:[#allocation2 + $0x1550] sm:$0xff] }
 0x532   : > { %2467 = vmatpush1.msra.mxu1 %v2428_v41  ;;  %v2440_v41 = vld [vmem:[#allocation2 + $0x1540] sm:$0xff] }
 0x533   : > { %2468 = vmatprep.subr.mxu1 %v2427_v43  ;;  %5997 = vmatmul.mubr.msk.f32.gmra.mxu1 %vm354_vm2, %v6442_v18  ;;  %v2438_v43 = vld [vmem:[#allocation2 + $0x1530] sm:$0xff] }
 0x534   : > { %2469 = vmatpush1.msra.mxu1 %v2426_v44  ;;  %2528 = vmatprep.mubr.f32.mxu1 %v2177_v29  ;;  %v2452_v29 = vld [vmem:[#allocation2 + $0x15a0] sm:$0xff]  ;;  %v2437_v44 = vld [vmem:[#allocation2 + $0x1528] sm:$0xff] }
 0x535   : > { %2470 = vmatprep.subr.mxu1 %v2425_v45  ;;  %v2436_v45 = vld [vmem:[#allocation2 + $0x1520] sm:$0xff] }
 0x536   : > { %2471 = vmatpush1.msra.mxu1 %v2424_v47  ;;  %v2369_v47 = vld [vmem:[#allocation2 + $0x1310] sm:$0xff] }
 0x537   : > { %2472 = vmatprep.subr.mxu1 %v2423_v48  ;;  %v2435_v48 = vld [vmem:[#allocation2 + $0x1518] sm:$0xff]  ;;  %2602 = vmatpush2.msra.mxu0 %v2369_v47  ;;  %v2664_v47 = vld [vmem:[#allocation2 + $0x1768] sm:$0xff] }
 0x538   : > { %2473 = vmatpush1.msra.mxu1 %v2422_v22  ;;  %v2434_v22 = vld [vmem:[#allocation2 + $0x1510] sm:$0xff] }
 0x539   : > { %2474 = vmatprep.subr.mxu1 %v2421_v49  ;;  %v2368_v49 = vld [vmem:[#allocation2 + $0x1308] sm:$0xff] }
 0x53a   : > { %2475 = vmatpush1.msra.mxu1 %v2420_v19  ;;  %v2367_v19 = vld [vmem:[#allocation2 + $0x1300] sm:$0xff]  ;;  %2603 = vmatprep.subr.mxu0 %v2368_v49  ;;  %v2661_v49 = vld [vmem:[#allocation2 + $0x1750] sm:$0xff] }
 0x53b   : > { %2476 = vmatprep.subr.mxu1 %v2419_v50  ;;  %v2433_v50 = vld [vmem:[#allocation2 + $0x1508] sm:$0xff]  ;;  %2604 = vmatpush2.msra.mxu0 %v2367_v19 }
 0x53c   : > { %2477 = vmatpush1.msra.mxu1 %v2418_v51  ;;  %v2432_v51 = vld [vmem:[#allocation2 + $0x1500] sm:$0xff]  ;;  %v2660_v19 = vld [vmem:[#allocation2 + $0x1748] sm:$0xff] }
 0x53d   : > { %2478 = vmatprep.subr.mxu1 %v2417_v52  ;;  %v2650_v52 = vld [vmem:[#allocation2 + $0x16f8] sm:$0xff] }
 0x53e   : > { %2479 = vmatpush1.msra.mxu1 %v2416_v53  ;;  %v2649_v53 = vld [vmem:[#allocation2 + $0x16f0] sm:$0xff] }
 0x53f   : > { %2480 = vmatprep.subr.mxu1 %v2415_v20  ;;  %v2648_v20 = vld [vmem:[#allocation2 + $0x16e8] sm:$0xff] }
 0x540   : > { %2481 = vmatpush1.msra.mxu1 %v2414_v7  ;;  %v2647_v7 = vld [vmem:[#allocation2 + $0x16e0] sm:$0xff] }
 0x541   : > { %2482 = vmatprep.subr.mxu1 %v2413_v25  ;;  %v2646_v25 = vld [vmem:[#allocation2 + $0x16d8] sm:$0xff] }
 0x542   : > { %2483 = vmatpush1.msra.mxu1 %v2412_v54  ;;  %v2645_v54 = vld [vmem:[#allocation2 + $0x16d0] sm:$0xff] }
 0x543   : > { %2484 = vmatprep.subr.mxu1 %v2411_v15  ;;  %v2644_v15 = vld [vmem:[#allocation2 + $0x16c8] sm:$0xff] }
 0x544   : > { %2485 = vmatpush1.msra.mxu1 %v2410_v56  ;;  %v2643_v56 = vld [vmem:[#allocation2 + $0x16c0] sm:$0xff] }
 0x545   : > { %2486 = vmatprep.subr.mxu1 %v2409_v8  ;;  %v2642_v8 = vld [vmem:[#allocation2 + $0x16b8] sm:$0xff] }
 0x546   : > { %2487 = vmatpush1.msra.mxu1 %v2408_v58  ;;  %v2641_v58 = vld [vmem:[#allocation2 + $0x16b0] sm:$0xff] }
 0x547   : > { %2488 = vmatprep.subr.mxu1 %v2407_v16  ;;  %v2639_v16 = vld [vmem:[#allocation2 + $0x16a0] sm:$0xff] }
 0x548   : > { %2489 = vmatpush1.msra.mxu1 %v2406_v59  ;;  %v2637_v59 = vld [vmem:[#allocation2 + $0x1690] sm:$0xff] }
 0x549   : > { %2490 = vmatprep.subr.mxu1 %v2405_v60  ;;  %v2636_v60 = vld [vmem:[#allocation2 + $0x1688] sm:$0xff] }
 0x54a   : > { %2491 = vmatpush1.msra.mxu1 %v2404_v61  ;;  %v2635_v61 = vld [vmem:[#allocation2 + $0x1680] sm:$0xff] }
 0x54b   : > { %2492 = vmatprep.subr.mxu1 %v2403_v62  ;;  %v2633_v62 = vld [vmem:[#allocation2 + $0x1670] sm:$0xff] }
 0x54c   : > { %2493 = vmatpush1.msra.mxu1 %v2402_v63  ;;  %v2632_v63 = vld [vmem:[#allocation2 + $0x1668] sm:$0xff] }
 0x54d   : > { %2494 = vmatprep.subr.mxu1 %v2401_v0  ;;  %v2631_v0 = vld [vmem:[#allocation2 + $0x1660] sm:$0xff] }
 0x54e   : > { %2495 = vmatpush1.msra.mxu1 %v2400_v3  ;;  %v2630_v3 = vld [vmem:[#allocation2 + $0x1658] sm:$0xff] }
 0x54f   : > { %2496 = vmatprep.subr.mxu1 %v2463_v4  ;;  %v2629_v4 = vld [vmem:[#allocation2 + $0x1650] sm:$0xff] }
 0x550   : > { %2497 = vmatpush2.msra.mxu1 %v2462_v5  ;;  %v2628_v5 = vld [vmem:[#allocation2 + $0x1648] sm:$0xff] }
 0x551   : > { %2498 = vmatprep.subr.mxu1 %v2461_v6  ;;  %v2627_v6 = vld [vmem:[#allocation2 + $0x1640] sm:$0xff] }
 0x552   : > { %2499 = vmatpush2.msra.mxu1 %v2460_v9  ;;  %v2626_v9 = vld [vmem:[#allocation2 + $0x1638] sm:$0xff] }
 0x553   : > { %2500 = vmatprep.subr.mxu1 %v2459_v10  ;;  %v2625_v10 = vld [vmem:[#allocation2 + $0x1630] sm:$0xff] }
 0x554   : > { %2501 = vmatpush2.msra.mxu1 %v2458_v12  ;;  %v2624_v12 = vld [vmem:[#allocation2 + $0x1628] sm:$0xff] }
 0x555   : > { %2502 = vmatprep.subr.mxu1 %v2457_v2  ;;  %v2623_v2 = vld [vmem:[#allocation2 + $0x1620] sm:$0xff] }
 0x556   : > { %2503 = vmatpush2.msra.mxu1 %v2456_v21  ;;  %v2622_v21 = vld [vmem:[#allocation2 + $0x1618] sm:$0xff] }
 0x557   : > { %2504 = vmatprep.subr.mxu1 %v2455_v23  ;;  %v2621_v23 = vld [vmem:[#allocation2 + $0x1610] sm:$0xff] }
 0x558   : > { %2505 = vmatpush2.msra.mxu1 %v2454_v26  ;;  %v2620_v26 = vld [vmem:[#allocation2 + $0x1608] sm:$0xff] }
 0x559   : > { %2506 = vmatprep.subr.mxu1 %v2453_v28  ;;  %v2619_v28 = vld [vmem:[#allocation2 + $0x1600] sm:$0xff] }
 0x55a   : > { %2507 = vmatpush2.msra.mxu1 %v2452_v29  ;;  %v2682_v29 = vld [vmem:[#allocation2 + $0x17f8] sm:$0xff] }
 0x55b   : > { %2508 = vmatprep.subr.mxu1 %v2451_v30  ;;  %v2681_v30 = vld [vmem:[#allocation2 + $0x17f0] sm:$0xff] }
 0x55c   : > { %2509 = vmatpush2.msra.mxu1 %v2450_v32  ;;  %v2680_v32 = vld [vmem:[#allocation2 + $0x17e8] sm:$0xff] }
 0x55d   : > { %2510 = vmatprep.subr.mxu1 %v2449_v33  ;;  %v2679_v33 = vld [vmem:[#allocation2 + $0x17e0] sm:$0xff] }
 0x55e   : > { %2511 = vmatpush2.msra.mxu1 %v2448_v34  ;;  %v2678_v34 = vld [vmem:[#allocation2 + $0x17d8] sm:$0xff] }
 0x55f   : > { %2512 = vmatprep.subr.mxu1 %v2447_v11  ;;  %v2677_v11 = vld [vmem:[#allocation2 + $0x17d0] sm:$0xff] }
 0x560   : > { %2513 = vmatpush2.msra.mxu1 %v2446_v35  ;;  %v2676_v35 = vld [vmem:[#allocation2 + $0x17c8] sm:$0xff] }
 0x561   : > { %2514 = vmatprep.subr.mxu1 %v2445_v36  ;;  %v2675_v36 = vld [vmem:[#allocation2 + $0x17c0] sm:$0xff] }
 0x562   : > { %2515 = vmatpush2.msra.mxu1 %v2444_v37  ;;  %v2674_v37 = vld [vmem:[#allocation2 + $0x17b8] sm:$0xff] }
 0x563   : > { %2516 = vmatprep.subr.mxu1 %v2443_v38  ;;  %v2673_v38 = vld [vmem:[#allocation2 + $0x17b0] sm:$0xff] }
 0x564   : > { %2517 = vmatpush2.msra.mxu1 %v2442_v39  ;;  %v2672_v39 = vld [vmem:[#allocation2 + $0x17a8] sm:$0xff] }
 0x565   : > { %2518 = vmatprep.subr.mxu1 %v2441_v40  ;;  %v2671_v40 = vld [vmem:[#allocation2 + $0x17a0] sm:$0xff] }
 0x566   : > { %2519 = vmatpush2.msra.mxu1 %v2440_v41  ;;  %v2670_v41 = vld [vmem:[#allocation2 + $0x1798] sm:$0xff] }
 0x567   : > { %2520 = vmatprep.subr.mxu1 %v2439_v42  ;;  %v2669_v42 = vld [vmem:[#allocation2 + $0x1790] sm:$0xff] }
 0x568   : > { %2521 = vmatpush2.msra.mxu1 %v2438_v43  ;;  %v2668_v43 = vld [vmem:[#allocation2 + $0x1788] sm:$0xff] }
 0x569   : > { %2522 = vmatprep.subr.mxu1 %v2437_v44  ;;  %v2667_v44 = vld [vmem:[#allocation2 + $0x1780] sm:$0xff] }
 0x56a   : > { %2523 = vmatpush2.msra.mxu1 %v2436_v45  ;;  %v2666_v45 = vld [vmem:[#allocation2 + $0x1778] sm:$0xff] }
 0x56b   : > { %2524 = vmatprep.subr.mxu1 %v2435_v48  ;;  %v2663_v48 = vld [vmem:[#allocation2 + $0x1760] sm:$0xff] }
 0x56c   : > { %2525 = vmatpush2.msra.mxu1 %v2434_v22  ;;  %v2662_v22 = vld [vmem:[#allocation2 + $0x1758] sm:$0xff] }
 0x56d   : > { %2526 = vmatprep.subr.mxu1 %v2433_v50  ;;  %v2659_v50 = vld [vmem:[#allocation2 + $0x1740] sm:$0xff] }
 0x56e   : > { %2527 = vmatpush2.msra.mxu1 %v2432_v51  ;;  %v2658_v51 = vld [vmem:[#allocation2 + $0x1738] sm:$0xff] }
 0x56f   : > { %2529 = vmatmul.mubr.f32.vlgmr.msra.gmra.mxu1 %v6523_v31  ;;  %2683 = vmatprep.subr.mxu1 %v2650_v52  ;;  %v2640_v31 = vld [vmem:[#allocation2 + $0x16a8] sm:$0xff]  ;;  %v2657_v52 = vld [vmem:[#allocation2 + $0x1730] sm:$0xff] }
 0x570   : > { %2534 = vmatprep.mubr.f32.mxu1 %v6518_v24  ;;  %2684 = vmatpush1.msra.mxu1 %v2649_v53  ;;  %v2638_v24 = vld [vmem:[#allocation2 + $0x1698] sm:$0xff]  ;;  %v2656_v53 = vld [vmem:[#allocation2 + $0x1728] sm:$0xff] }
 0x571   : > { %2685 = vmatprep.subr.mxu1 %v2648_v20  ;;  %v2655_v20 = vld [vmem:[#allocation2 + $0x1720] sm:$0xff] }
 0x572   : > { %2686 = vmatpush1.msra.mxu1 %v2647_v7  ;;  %v2654_v7 = vld [vmem:[#allocation2 + $0x1718] sm:$0xff] }
 0x573   : > { %2535 = vmatmul.mubr.f32.gmra.mxu1 %v6520_v27  ;;  %2687 = vmatprep.subr.mxu1 %v2646_v25  ;;  %v2634_v27 = vld [vmem:[#allocation2 + $0x1678] sm:$0xff]  ;;  %v2653_v25 = vld [vmem:[#allocation2 + $0x1710] sm:$0xff] }
 0x574   : > { %2688 = vmatpush1.msra.mxu1 %v2645_v54  ;;  %v2652_v54 = vld [vmem:[#allocation2 + $0x1708] sm:$0xff] }
 0x575   : > { %2689 = vmatprep.subr.mxu1 %v2644_v15  ;;  %v2651_v15 = vld [vmem:[#allocation2 + $0x1700] sm:$0xff] }
 0x576   : > { %2690 = vmatpush1.msra.mxu1 %v2643_v56  ;;  %v2816_v56 = vld [vmem:[#allocation6 + $0xf8] sm:$0xff] }
 0x577   : > { %2691 = vmatprep.subr.mxu1 %v2642_v8  ;;  %2861 = vmatprep.subr.mxu0 %v2816_v56  ;;  %v2831_v56 = vld [vmem:[#allocation6 + $0x170] sm:$0xff] }
 0x578   : > { %2692 = vmatpush1.msra.mxu1 %v2641_v58 }
 0x579   : > { %2693 = vmatprep.subr.mxu1 %v2640_v31  ;;  %v2815_v31 = vld [vmem:[#allocation6 + $0xf0] sm:$0xff] }
 0x57a   : > { %2694 = vmatpush1.msra.mxu1 %v2639_v16  ;;  %v2814_v16 = vld [vmem:[#allocation6 + $0xe8] sm:$0xff] }
 0x57b   : > { %2695 = vmatprep.subr.mxu1 %v2638_v24 }
 0x57c   : > { %2696 = vmatpush1.msra.mxu1 %v2637_v59  ;;  %v2813_v59 = vld [vmem:[#allocation6 + $0xe0] sm:$0xff] }
 0x57d   : > { %2697 = vmatprep.subr.mxu1 %v2636_v60  ;;  %v2812_v60 = vld [vmem:[#allocation6 + $0xd8] sm:$0xff] }
 0x57e   : > { %2698 = vmatpush1.msra.mxu1 %v2635_v61 }
 0x57f   : > { %2699 = vmatprep.subr.mxu1 %v2634_v27  ;;  %v2811_v27 = vld [vmem:[#allocation6 + $0xd0] sm:$0xff] }
 0x580   : > { %2700 = vmatpush1.msra.mxu1 %v2633_v62  ;;  %v2810_v62 = vld [vmem:[#allocation6 + $0xc8] sm:$0xff] }
 0x581   : > { %2701 = vmatprep.subr.mxu1 %v2632_v63 }
 0x582   : > { %2702 = vmatpush1.msra.mxu1 %v2631_v0  ;;  %v2809_v0 = vld [vmem:[#allocation6 + $0xc0] sm:$0xff] }
 0x583   : > { %2703 = vmatprep.subr.mxu1 %v2630_v3  ;;  %v2808_v3 = vld [vmem:[#allocation6 + $0xb8] sm:$0xff] }
 0x584   : > { %2704 = vmatpush1.msra.mxu1 %v2629_v4 }
 0x585   : > { %2705 = vmatprep.subr.mxu1 %v2628_v5  ;;  %v2807_v5 = vld [vmem:[#allocation6 + $0xb0] sm:$0xff] }
 0x586   : > { %2706 = vmatpush1.msra.mxu1 %v2627_v6  ;;  %v2806_v6 = vld [vmem:[#allocation6 + $0xa8] sm:$0xff] }
 0x587   : > { %2707 = vmatprep.subr.mxu1 %v2626_v9 }
 0x588   : > { %2708 = vmatpush1.msra.mxu1 %v2625_v10  ;;  %v2805_v10 = vld [vmem:[#allocation6 + $0xa0] sm:$0xff] }
 0x589   : > { %2709 = vmatprep.subr.mxu1 %v2624_v12  ;;  %v2804_v12 = vld [vmem:[#allocation6 + $0x98] sm:$0xff] }
 0x58a   : > { %2710 = vmatpush1.msra.mxu1 %v2623_v2 }
 0x58b   : > { %2711 = vmatprep.subr.mxu1 %v2622_v21  ;;  %v2803_v21 = vld [vmem:[#allocation6 + $0x90] sm:$0xff] }
 0x58c   : > { %2712 = vmatpush1.msra.mxu1 %v2621_v23  ;;  %v2802_v23 = vld [vmem:[#allocation6 + $0x88] sm:$0xff] }
 0x58d   : > { %2713 = vmatprep.subr.mxu1 %v2620_v26  ;;  %v2801_v26 = vld [vmem:[#allocation6 + $0x80] sm:$0xff] }
 0x58e   : > { %2714 = vmatpush1.msra.mxu1 %v2619_v28  ;;  %v2800_v28 = vld [vmem:[#allocation6 + $0x78] sm:$0xff] }
 0x58f   : > { %2715 = vmatprep.subr.mxu1 %v2682_v29  ;;  %v2799_v29 = vld [vmem:[#allocation6 + $0x70] sm:$0xff] }
 0x590   : > { %2716 = vmatpush2.msra.mxu1 %v2681_v30  ;;  %v2798_v30 = vld [vmem:[#allocation6 + $0x68] sm:$0xff] }
 0x591   : > { %2717 = vmatprep.subr.mxu1 %v2680_v32  ;;  %v2797_v32 = vld [vmem:[#allocation6 + $0x60] sm:$0xff] }
 0x592   : > { %2718 = vmatpush2.msra.mxu1 %v2679_v33  ;;  %v2796_v33 = vld [vmem:[#allocation6 + $0x58] sm:$0xff] }
 0x593   : > { %2719 = vmatprep.subr.mxu1 %v2678_v34  ;;  %v2795_v34 = vld [vmem:[#allocation6 + $0x50] sm:$0xff] }
 0x594   : > { %2720 = vmatpush2.msra.mxu1 %v2677_v11  ;;  %v2794_v11 = vld [vmem:[#allocation6 + $0x48] sm:$0xff] }
 0x595   : > { %2721 = vmatprep.subr.mxu1 %v2676_v35  ;;  %v2793_v35 = vld [vmem:[#allocation6 + $0x40] sm:$0xff] }
 0x596   : > { %2722 = vmatpush2.msra.mxu1 %v2675_v36  ;;  %v2792_v36 = vld [vmem:[#allocation6 + $0x38] sm:$0xff] }
 0x597   : > { %2723 = vmatprep.subr.mxu1 %v2674_v37  ;;  %v2791_v37 = vld [vmem:[#allocation6 + $0x30] sm:$0xff] }
 0x598   : > { %2724 = vmatpush2.msra.mxu1 %v2673_v38  ;;  %v2790_v38 = vld [vmem:[#allocation6 + $0x28] sm:$0xff] }
 0x599   : > { %2725 = vmatprep.subr.mxu1 %v2672_v39  ;;  %v2789_v39 = vld [vmem:[#allocation6 + $0x20] sm:$0xff] }
 0x59a   : > { %2726 = vmatpush2.msra.mxu1 %v2671_v40  ;;  %v2788_v40 = vld [vmem:[#allocation6 + $0x18] sm:$0xff] }
 0x59b   : > { %2727 = vmatprep.subr.mxu1 %v2670_v41  ;;  %v2787_v41 = vld [vmem:[#allocation6 + $0x10] sm:$0xff] }
 0x59c   : > { %2728 = vmatpush2.msra.mxu1 %v2669_v42  ;;  %v2786_v42 = vld [vmem:[#allocation6 + $0x8] sm:$0xff] }
 0x59d   : > { %2729 = vmatprep.subr.mxu1 %v2668_v43  ;;  %v2785_v43 = vld [vmem:[#allocation6] sm:$0xff] }
 0x59e   : > { %2730 = vmatpush2.msra.mxu1 %v2667_v44  ;;  %v2848_v44 = vld [vmem:[#allocation6 + $0x1f8] sm:$0xff] }
 0x59f   : > { %2731 = vmatprep.subr.mxu1 %v2666_v45  ;;  %v2847_v45 = vld [vmem:[#allocation6 + $0x1f0] sm:$0xff] }
 0x5a0   : > { %2732 = vmatpush2.msra.mxu1 %v2665_v46  ;;  %v2846_v46 = vld [vmem:[#allocation6 + $0x1e8] sm:$0xff] }
 0x5a1   : > { %2733 = vmatprep.subr.mxu1 %v2664_v47  ;;  %v2845_v47 = vld [vmem:[#allocation6 + $0x1e0] sm:$0xff] }
 0x5a2   : > { %2734 = vmatpush2.msra.mxu1 %v2663_v48  ;;  %v2844_v48 = vld [vmem:[#allocation6 + $0x1d8] sm:$0xff] }
 0x5a3   : > { %2735 = vmatprep.subr.mxu1 %v2662_v22  ;;  %v2843_v22 = vld [vmem:[#allocation6 + $0x1d0] sm:$0xff] }
 0x5a4   : > { %2736 = vmatpush2.msra.mxu1 %v2661_v49  ;;  %v2842_v49 = vld [vmem:[#allocation6 + $0x1c8] sm:$0xff] }
 0x5a5   : > { %2737 = vmatprep.subr.mxu1 %v2660_v19  ;;  %v2841_v19 = vld [vmem:[#allocation6 + $0x1c0] sm:$0xff] }
 0x5a6   : > { %2738 = vmatpush2.msra.mxu1 %v2659_v50  ;;  %v2840_v50 = vld [vmem:[#allocation6 + $0x1b8] sm:$0xff] }
 0x5a7   : > { %2739 = vmatprep.subr.mxu1 %v2658_v51  ;;  %v2839_v51 = vld [vmem:[#allocation6 + $0x1b0] sm:$0xff] }
 0x5a8   : > { %2740 = vmatpush2.msra.mxu1 %v2657_v52  ;;  %v2838_v52 = vld [vmem:[#allocation6 + $0x1a8] sm:$0xff] }
 0x5a9   : > { %2741 = vmatprep.subr.mxu1 %v2656_v53  ;;  %v2837_v53 = vld [vmem:[#allocation6 + $0x1a0] sm:$0xff] }
 0x5aa   : > { %2742 = vmatpush2.msra.mxu1 %v2655_v20  ;;  %v2836_v20 = vld [vmem:[#allocation6 + $0x198] sm:$0xff] }
 0x5ab   : > { %2743 = vmatprep.subr.mxu1 %v2654_v7  ;;  %v2835_v7 = vld [vmem:[#allocation6 + $0x190] sm:$0xff] }
 0x5ac   : > { %2744 = vmatpush2.msra.mxu1 %v2653_v25  ;;  %v2834_v25 = vld [vmem:[#allocation6 + $0x188] sm:$0xff] }
 0x5ad   : > { %2745 = vmatprep.subr.mxu1 %v2652_v54  ;;  %v2833_v54 = vld [vmem:[#allocation6 + $0x180] sm:$0xff] }
 0x5ae   : > { %2746 = vmatpush2.msra.mxu1 %v2651_v15  ;;  %v2832_v15 = vld [vmem:[#allocation6 + $0x178] sm:$0xff] }
 0x5e7   : > { %v2246_v8 = vpop.f32.mrf.mxu1 }
 0x5e9   : > { %v2248_v58 = vpop.f32.mrf.mxu1 }
 0x5ea   : > { %2605 = vmatprep.mubr.f32.mxu0 %v2248_v58  ;;  %v2829_v58 = vld [vmem:[#allocation6 + $0x160] sm:$0xff] }
 0x5eb   : > { %v2252_v24 = vpop.f32.mrf.mxu1  ;;  %2606 = vmatmul.mubr.f32.vlgmr.msra.gmra.mxu0 %v2246_v8  ;;  %v2830_v8 = vld [vmem:[#allocation6 + $0x168] sm:$0xff] }
 0x5ec   : > { %2862 = vmatpush1.msra.mxu0 %v2815_v31  ;;  %v2828_v31 = vld [vmem:[#allocation6 + $0x158] sm:$0xff] }
 0x5ed   : > { %v2254_v61 = vpop.f32.mrf.mxu1  ;;  %2863 = vmatprep.subr.mxu0 %v2814_v16  ;;  %v2827_v16 = vld [vmem:[#allocation6 + $0x150] sm:$0xff] }
 0x5ee   : > { %2611 = vmatprep.mubr.f32.mxu0 %v2254_v61  ;;  %2864 = vmatpush1.msra.mxu0 %v2813_v59  ;;  %v2825_v59 = vld [vmem:[#allocation6 + $0x140] sm:$0xff]  ;;  %v2823_v61 = vld [vmem:[#allocation6 + $0x130] sm:$0xff] }
 0x5ef   : > { %v2323_v63 = vpop.f32.mrf.mxu1  ;;  %2612 = vmatmul.mubr.f32.gmra.mxu0 %v2252_v24  ;;  %2865 = vmatprep.subr.mxu0 %v2812_v60  ;;  %v2826_v24 = vld [vmem:[#allocation6 + $0x148] sm:$0xff]  ;;  %v2824_v60 = vld [vmem:[#allocation6 + $0x138] sm:$0xff] }
 0x5f0   : > { %2866 = vmatpush1.msra.mxu0 %v2811_v27  ;;  %v2822_v27 = vld [vmem:[#allocation6 + $0x128] sm:$0xff] }
 0x5f1   : > { %v2325_v4 = vpop.f32.mrf.mxu1  ;;  %2867 = vmatprep.subr.mxu0 %v2810_v62  ;;  %v2821_v62 = vld [vmem:[#allocation6 + $0x120] sm:$0xff] }
 0x5f2   : > { %2747 = vmatprep.mubr.f32.mxu1 %v2325_v4  ;;  %2868 = vmatpush1.msra.mxu0 %v2809_v0  ;;  %v2819_v0 = vld [vmem:[#allocation6 + $0x110] sm:$0xff]  ;;  %v2817_v4 = vld [vmem:[#allocation6 + $0x100] sm:$0xff] }
 0x5f3   : > { %v2329_v9 = vpop.f32.mrf.mxu1  ;;  %2748 = vmatmul.mubr.f32.vlgmr.msra.gmra.mxu1 %v2323_v63  ;;  %2869 = vmatprep.subr.mxu0 %v2808_v3  ;;  %v2820_v63 = vld [vmem:[#allocation6 + $0x118] sm:$0xff]  ;;  %v2818_v3 = vld [vmem:[#allocation6 + $0x108] sm:$0xff] }
 0x5f4   : > { %2870 = vmatpush1.msra.mxu0 %v2807_v5  ;;  %v2974_v5 = vld [vmem:[#allocation6 + $0x2f8] sm:$0xff] }
 0x5f5   : > { %v2331_v2 = vpop.f32.mrf.mxu1  ;;  %2871 = vmatprep.subr.mxu0 %v2806_v6  ;;  %v2973_v6 = vld [vmem:[#allocation6 + $0x2f0] sm:$0xff]  ;;  %3020 = vmatprep.subr.mxu1 %v2974_v5 }
 0x5f6   : > { %2753 = vmatprep.mubr.f32.mxu1 %v2331_v2  ;;  %2872 = vmatpush1.msra.mxu0 %v2805_v10  ;;  %v2971_v10 = vld [vmem:[#allocation6 + $0x2e0] sm:$0xff]  ;;  %v2969_v2 = vld [vmem:[#allocation6 + $0x2d0] sm:$0xff] }
 0x5f7   : > { %2754 = vmatmul.mubr.f32.gmra.mxu1 %v2329_v9  ;;  %2873 = vmatprep.subr.mxu0 %v2804_v12  ;;  %v2972_v9 = vld [vmem:[#allocation6 + $0x2e8] sm:$0xff]  ;;  %v2970_v12 = vld [vmem:[#allocation6 + $0x2d8] sm:$0xff] }
 0x5f8   : > { %2874 = vmatpush1.msra.mxu0 %v2803_v21  ;;  %3021 = vmatpush1.msra.mxu1 %v2973_v6  ;;  %v2968_v21 = vld [vmem:[#allocation6 + $0x2c8] sm:$0xff] }
 0x5f9   : > { %2875 = vmatprep.subr.mxu0 %v2802_v23  ;;  %3022 = vmatprep.subr.mxu1 %v2972_v9  ;;  %v2967_v23 = vld [vmem:[#allocation6 + $0x2c0] sm:$0xff] }
 0x5fa   : > { %2876 = vmatpush1.msra.mxu0 %v2801_v26  ;;  %3023 = vmatpush1.msra.mxu1 %v2971_v10  ;;  %v2966_v26 = vld [vmem:[#allocation6 + $0x2b8] sm:$0xff] }
 0x5fb   : > { %2877 = vmatprep.subr.mxu0 %v2800_v28  ;;  %3024 = vmatprep.subr.mxu1 %v2970_v12  ;;  %v2965_v28 = vld [vmem:[#allocation6 + $0x2b0] sm:$0xff] }
 0x5fc   : > { %2878 = vmatpush1.msra.mxu0 %v2799_v29  ;;  %3025 = vmatpush1.msra.mxu1 %v2969_v2  ;;  %v2964_v29 = vld [vmem:[#allocation6 + $0x2a8] sm:$0xff]  ;;  %v2765_v12 = vld [vmem:[#allocation4 + $0x6] sm:$0x3] }
 0x5fd   : > { %2879 = vmatprep.subr.mxu0 %v2798_v30  ;;  %3026 = vmatprep.subr.mxu1 %v2968_v21  ;;  %v2963_v30 = vld [vmem:[#allocation6 + $0x2a0] sm:$0xff] }
 0x5fe   : > { %2880 = vmatpush1.msra.mxu0 %v2797_v32  ;;  %3027 = vmatpush1.msra.mxu1 %v2967_v23  ;;  %v2962_v32 = vld [vmem:[#allocation6 + $0x298] sm:$0xff] }
 0x5ff   : > { %2881 = vmatprep.subr.mxu0 %v2796_v33  ;;  %3028 = vmatprep.subr.mxu1 %v2966_v26  ;;  %v2961_v33 = vld [vmem:[#allocation6 + $0x290] sm:$0xff] }
 0x600   : > { %2882 = vmatpush1.msra.mxu0 %v2795_v34  ;;  %3029 = vmatpush1.msra.mxu1 %v2965_v28  ;;  %v2960_v34 = vld [vmem:[#allocation6 + $0x288] sm:$0xff]  ;;  %v2770_v28 = vrot.slane %v2765_v12, %v6457_v57 }
 0x601   : > { %2883 = vmatprep.subr.mxu0 %v2794_v11  ;;  %3030 = vmatprep.subr.mxu1 %v2964_v29  ;;  %v2959_v11 = vld [vmem:[#allocation6 + $0x280] sm:$0xff] }
 0x602   : > { %2884 = vmatpush1.msra.mxu0 %v2793_v35  ;;  %3031 = vmatpush1.msra.mxu1 %v2963_v30  ;;  %v2958_v35 = vld [vmem:[#allocation6 + $0x278] sm:$0xff] }
 0x603   : > { %2885 = vmatprep.subr.mxu0 %v2792_v36  ;;  %3032 = vmatprep.subr.mxu1 %v2962_v32  ;;  %v2957_v36 = vld [vmem:[#allocation6 + $0x270] sm:$0xff]  ;;  %v2774_v32 = vrot.slane %v2765_v12, %v6454_v55  ;;  %v3110_v12 = vld [vmem:[#allocation6 + $0x440] sm:$0xff] }
 0x604   : > { %2886 = vmatpush1.msra.mxu0 %v2791_v37  ;;  %3033 = vmatpush1.msra.mxu1 %v2961_v33  ;;  %v2956_v37 = vld [vmem:[#allocation6 + $0x268] sm:$0xff] }
 0x605   : > { %2887 = vmatprep.subr.mxu0 %v2790_v38  ;;  %3034 = vmatprep.subr.mxu1 %v2960_v34  ;;  %v2955_v38 = vld [vmem:[#allocation6 + $0x260] sm:$0xff] }
 0x606   : > { %2888 = vmatpush1.msra.mxu0 %v2789_v39  ;;  %3035 = vmatpush1.msra.mxu1 %v2959_v11  ;;  %v2954_v39 = vld [vmem:[#allocation6 + $0x258] sm:$0xff] }
 0x607   : > { %2889 = vmatprep.subr.mxu0 %v2788_v40  ;;  %3036 = vmatprep.subr.mxu1 %v2958_v35  ;;  %v2953_v40 = vld [vmem:[#allocation6 + $0x250] sm:$0xff] }
 0x608   : > { %2890 = vmatpush1.msra.mxu0 %v2787_v41  ;;  %3037 = vmatpush1.msra.mxu1 %v2957_v36  ;;  %v2952_v41 = vld [vmem:[#allocation6 + $0x248] sm:$0xff] }
 0x609   : > { %2891 = vmatprep.subr.mxu0 %v2786_v42  ;;  %3038 = vmatprep.subr.mxu1 %v2956_v37  ;;  %v2951_v42 = vld [vmem:[#allocation6 + $0x240] sm:$0xff] }
 0x60a   : > { %2892 = vmatpush1.msra.mxu0 %v2785_v43  ;;  %3039 = vmatpush1.msra.mxu1 %v2955_v38  ;;  %v2950_v43 = vld [vmem:[#allocation6 + $0x238] sm:$0xff] }
 0x60b   : > { %2893 = vmatprep.subr.mxu0 %v2848_v44  ;;  %3040 = vmatprep.subr.mxu1 %v2954_v39  ;;  %v2949_v44 = vld [vmem:[#allocation6 + $0x230] sm:$0xff] }
 0x60c   : > { %2894 = vmatpush2.msra.mxu0 %v2847_v45  ;;  %3041 = vmatpush1.msra.mxu1 %v2953_v40  ;;  %v2948_v45 = vld [vmem:[#allocation6 + $0x228] sm:$0xff] }
 0x60d   : > { %2895 = vmatprep.subr.mxu0 %v2846_v46  ;;  %3042 = vmatprep.subr.mxu1 %v2952_v41  ;;  %v2947_v46 = vld [vmem:[#allocation6 + $0x220] sm:$0xff] }
 0x60e   : > { %2896 = vmatpush2.msra.mxu0 %v2845_v47  ;;  %3043 = vmatpush1.msra.mxu1 %v2951_v42  ;;  %v2946_v47 = vld [vmem:[#allocation6 + $0x218] sm:$0xff] }
 0x60f   : > { %2897 = vmatprep.subr.mxu0 %v2844_v48  ;;  %3044 = vmatprep.subr.mxu1 %v2950_v43  ;;  %v2945_v48 = vld [vmem:[#allocation6 + $0x210] sm:$0xff] }
 0x610   : > { %2898 = vmatpush2.msra.mxu0 %v2843_v22  ;;  %3045 = vmatpush1.msra.mxu1 %v2949_v44  ;;  %v2944_v22 = vld [vmem:[#allocation6 + $0x208] sm:$0xff] }
 0x611   : > { %2899 = vmatprep.subr.mxu0 %v2842_v49  ;;  %3046 = vmatprep.subr.mxu1 %v2948_v45  ;;  %v2943_v49 = vld [vmem:[#allocation6 + $0x200] sm:$0xff] }
 0x612   : > { %2900 = vmatpush2.msra.mxu0 %v2841_v19  ;;  %3047 = vmatpush1.msra.mxu1 %v2947_v46  ;;  %v3006_v19 = vld [vmem:[#allocation6 + $0x3f8] sm:$0xff] }
 0x613   : > { %2901 = vmatprep.subr.mxu0 %v2840_v50  ;;  %3048 = vmatprep.subr.mxu1 %v2946_v47  ;;  %v3005_v50 = vld [vmem:[#allocation6 + $0x3f0] sm:$0xff] }
 0x614   : > { %2902 = vmatpush2.msra.mxu0 %v2839_v51  ;;  %3049 = vmatpush1.msra.mxu1 %v2945_v48  ;;  %v3004_v51 = vld [vmem:[#allocation6 + $0x3e8] sm:$0xff] }
 0x615   : > { %2903 = vmatprep.subr.mxu0 %v2838_v52  ;;  %3050 = vmatprep.subr.mxu1 %v2944_v22  ;;  %v3003_v52 = vld [vmem:[#allocation6 + $0x3e0] sm:$0xff]  ;;  %v2982_v22 = vld [vmem:[#allocation6 + $0x338] sm:$0xff] }
 0x616   : > { %2904 = vmatpush2.msra.mxu0 %v2837_v53  ;;  %3051 = vmatpush1.msra.mxu1 %v2943_v49  ;;  %v3002_v53 = vld [vmem:[#allocation6 + $0x3d8] sm:$0xff]  ;;  %v2981_v49 = vld [vmem:[#allocation6 + $0x330] sm:$0xff] }
 0x617   : > { %2905 = vmatprep.subr.mxu0 %v2836_v20  ;;  %3052 = vmatprep.subr.mxu1 %v3006_v19  ;;  %v3001_v20 = vld [vmem:[#allocation6 + $0x3d0] sm:$0xff]  ;;  %v2980_v19 = vld [vmem:[#allocation6 + $0x328] sm:$0xff] }
 0x618   : > { %2906 = vmatpush2.msra.mxu0 %v2835_v7  ;;  %3053 = vmatpush2.msra.mxu1 %v3005_v50  ;;  %v3000_v7 = vld [vmem:[#allocation6 + $0x3c8] sm:$0xff]  ;;  %v2979_v50 = vld [vmem:[#allocation6 + $0x320] sm:$0xff] }
 0x619   : > { %2907 = vmatprep.subr.mxu0 %v2834_v25  ;;  %3054 = vmatprep.subr.mxu1 %v3004_v51  ;;  %v2999_v25 = vld [vmem:[#allocation6 + $0x3c0] sm:$0xff]  ;;  %v2978_v51 = vld [vmem:[#allocation6 + $0x318] sm:$0xff] }
 0x61a   : > { %2908 = vmatpush2.msra.mxu0 %v2833_v54  ;;  %3055 = vmatpush2.msra.mxu1 %v3003_v52  ;;  %v2998_v54 = vld [vmem:[#allocation6 + $0x3b8] sm:$0xff]  ;;  %v2977_v52 = vld [vmem:[#allocation6 + $0x310] sm:$0xff] }
 0x61b   : > { %2909 = vmatprep.subr.mxu0 %v2832_v15  ;;  %3056 = vmatprep.subr.mxu1 %v3002_v53  ;;  %v2997_v15 = vld [vmem:[#allocation6 + $0x3b0] sm:$0xff]  ;;  %v2976_v53 = vld [vmem:[#allocation6 + $0x308] sm:$0xff] }
 0x61c   : > { %2910 = vmatpush2.msra.mxu0 %v2831_v56  ;;  %3057 = vmatpush2.msra.mxu1 %v3001_v20  ;;  %v2996_v56 = vld [vmem:[#allocation6 + $0x3a8] sm:$0xff]  ;;  %v2975_v20 = vld [vmem:[#allocation6 + $0x300] sm:$0xff] }
 0x61d   : > { %2911 = vmatprep.subr.mxu0 %v2830_v8  ;;  %3058 = vmatprep.subr.mxu1 %v3000_v7  ;;  %v2995_v8 = vld [vmem:[#allocation6 + $0x3a0] sm:$0xff]  ;;  %v3133_v7 = vld [vmem:[#allocation6 + $0x4f8] sm:$0xff] }
 0x61e   : > { %2912 = vmatpush2.msra.mxu0 %v2829_v58  ;;  %3059 = vmatpush2.msra.mxu1 %v2999_v25  ;;  %v2994_v58 = vld [vmem:[#allocation6 + $0x398] sm:$0xff]  ;;  %v3132_v25 = vld [vmem:[#allocation6 + $0x4f0] sm:$0xff] }
 0x61f   : > { %2913 = vmatprep.subr.mxu0 %v2828_v31  ;;  %3060 = vmatprep.subr.mxu1 %v2998_v54  ;;  %v2993_v31 = vld [vmem:[#allocation6 + $0x390] sm:$0xff]  ;;  %v3131_v54 = vld [vmem:[#allocation6 + $0x4e8] sm:$0xff] }
 0x620   : > { %2914 = vmatpush2.msra.mxu0 %v2827_v16  ;;  %3061 = vmatpush2.msra.mxu1 %v2997_v15  ;;  %v2992_v16 = vld [vmem:[#allocation6 + $0x388] sm:$0xff]  ;;  %v3130_v15 = vld [vmem:[#allocation6 + $0x4e0] sm:$0xff] }
 0x621   : > { %2915 = vmatprep.subr.mxu0 %v2826_v24  ;;  %3062 = vmatprep.subr.mxu1 %v2996_v56  ;;  %v2991_v24 = vld [vmem:[#allocation6 + $0x380] sm:$0xff]  ;;  %v3129_v56 = vld [vmem:[#allocation6 + $0x4d8] sm:$0xff] }
 0x622   : > { %2916 = vmatpush2.msra.mxu0 %v2825_v59  ;;  %3063 = vmatpush2.msra.mxu1 %v2995_v8  ;;  %v2990_v59 = vld [vmem:[#allocation6 + $0x378] sm:$0xff]  ;;  %v3128_v8 = vld [vmem:[#allocation6 + $0x4d0] sm:$0xff] }
 0x623   : > { %2917 = vmatprep.subr.mxu0 %v2824_v60  ;;  %3064 = vmatprep.subr.mxu1 %v2994_v58  ;;  %v2989_v60 = vld [vmem:[#allocation6 + $0x370] sm:$0xff]  ;;  %v3127_v58 = vld [vmem:[#allocation6 + $0x4c8] sm:$0xff] }
 0x624   : > { %2918 = vmatpush2.msra.mxu0 %v2823_v61  ;;  %3065 = vmatpush2.msra.mxu1 %v2993_v31  ;;  %v2988_v61 = vld [vmem:[#allocation6 + $0x368] sm:$0xff]  ;;  %v3126_v31 = vld [vmem:[#allocation6 + $0x4c0] sm:$0xff] }
 0x625   : > { %2919 = vmatprep.subr.mxu0 %v2822_v27  ;;  %3066 = vmatprep.subr.mxu1 %v2992_v16  ;;  %v2987_v27 = vld [vmem:[#allocation6 + $0x360] sm:$0xff]  ;;  %v3125_v16 = vld [vmem:[#allocation6 + $0x4b8] sm:$0xff] }
 0x626   : > { %2920 = vmatpush2.msra.mxu0 %v2821_v62  ;;  %3067 = vmatpush2.msra.mxu1 %v2991_v24  ;;  %v2986_v62 = vld [vmem:[#allocation6 + $0x358] sm:$0xff]  ;;  %v3124_v24 = vld [vmem:[#allocation6 + $0x4b0] sm:$0xff] }
 0x627   : > { %2921 = vmatprep.subr.mxu0 %v2820_v63  ;;  %3068 = vmatprep.subr.mxu1 %v2990_v59  ;;  %v2985_v63 = vld [vmem:[#allocation6 + $0x350] sm:$0xff]  ;;  %v3123_v59 = vld [vmem:[#allocation6 + $0x4a8] sm:$0xff] }
 0x628   : > { %2922 = vmatpush2.msra.mxu0 %v2819_v0  ;;  %3069 = vmatpush2.msra.mxu1 %v2989_v60  ;;  %v2984_v0 = vld [vmem:[#allocation6 + $0x348] sm:$0xff]  ;;  %v3122_v60 = vld [vmem:[#allocation6 + $0x4a0] sm:$0xff] }
 0x629   : > { %2923 = vmatprep.subr.mxu0 %v2818_v3  ;;  %3070 = vmatprep.subr.mxu1 %v2988_v61  ;;  %v2983_v3 = vld [vmem:[#allocation6 + $0x340] sm:$0xff]  ;;  %v3121_v61 = vld [vmem:[#allocation6 + $0x498] sm:$0xff] }
 0x62a   : > { %2924 = vmatpush2.msra.mxu0 %v2817_v4  ;;  %3071 = vmatpush2.msra.mxu1 %v2987_v27  ;;  %v3120_v27 = vld [vmem:[#allocation6 + $0x490] sm:$0xff] }
 0x62b   : > { %3072 = vmatprep.subr.mxu1 %v2986_v62  ;;  %3179 = vmatprep.subr.mxu0 %v3133_v7  ;;  %v3119_v62 = vld [vmem:[#allocation6 + $0x488] sm:$0xff] }
 0x62c   : > { %3073 = vmatpush2.msra.mxu1 %v2985_v63  ;;  %v3118_v63 = vld [vmem:[#allocation6 + $0x480] sm:$0xff] }
 0x62d   : > { %3074 = vmatprep.subr.mxu1 %v2984_v0  ;;  %v3117_v0 = vld [vmem:[#allocation6 + $0x478] sm:$0xff] }
 0x62e   : > { %3075 = vmatpush2.msra.mxu1 %v2983_v3  ;;  %v3116_v3 = vld [vmem:[#allocation6 + $0x470] sm:$0xff] }
 0x62f   : > { %v2530_v4 = vpop.f32.mrf.mxu1  ;;  %3076 = vmatprep.subr.mxu1 %v2982_v22  ;;  %v3148_v22 = vld [vmem:[#allocation6 + $0x570] sm:$0xff] }
 0x630   : > { %3077 = vmatpush2.msra.mxu1 %v2981_v49  ;;  %v3147_v49 = vld [vmem:[#allocation6 + $0x568] sm:$0xff] }
 0x631   : > { %v2532_v5 = vpop.f32.mrf.mxu1  ;;  %3078 = vmatprep.subr.mxu1 %v2980_v19  ;;  %v3146_v19 = vld [vmem:[#allocation6 + $0x560] sm:$0xff] }
 0x632   : > { %3079 = vmatpush2.msra.mxu1 %v2979_v50  ;;  %v3145_v50 = vld [vmem:[#allocation6 + $0x558] sm:$0xff] }
 0x633   : > { %v2536_v9 = vpop.f32.mrf.mxu1  ;;  %3080 = vmatprep.subr.mxu1 %v2978_v51  ;;  %v3144_v51 = vld [vmem:[#allocation6 + $0x550] sm:$0xff] }
 0x634   : > { %3081 = vmatpush2.msra.mxu1 %v2977_v52  ;;  %v3143_v52 = vld [vmem:[#allocation6 + $0x548] sm:$0xff] }
 0x635   : > { %v2538_v2 = vpop.f32.mrf.mxu1  ;;  %3082 = vmatprep.subr.mxu1 %v2976_v53  ;;  %v3142_v53 = vld [vmem:[#allocation6 + $0x540] sm:$0xff] }
 0x636   : > { %3083 = vmatpush2.msra.mxu1 %v2975_v20  ;;  %v2849_v20 = vld [vmem:[#allocation7] sm:$0x3] }
 0x637   : > { %v2854_v7 = vrot.slane %v2849_v20, %v6457_v57 }
 0x6ab   : > { %v2607_v6 = vpop.f32.mrf.mxu0 }
 0x6ac   : > { %v2608_v23 = vadd.f32 %v2607_v6, %v2530_v4  ;;  %v3115_v4 = vld [vmem:[#allocation6 + $0x468] sm:$0xff]  ;;  %v3113_v6 = vld [vmem:[#allocation6 + $0x458] sm:$0xff] }
 0x6ad   : > { %v2609_v10 = vpop.f32.mrf.mxu0 }
 0x6ae   : > { %v2610_v29 = vadd.f32 %v2609_v10, %v2532_v5  ;;  %v3114_v5 = vld [vmem:[#allocation6 + $0x460] sm:$0xff]  ;;  %v3111_v10 = vld [vmem:[#allocation6 + $0x448] sm:$0xff] }
 0x6af   : > { %v2613_v21 = vpop.f32.mrf.mxu0 }
 0x6b0   : > { %v2614_v11 = vadd.f32 %v2613_v21, %v2536_v9  ;;  %v3112_v9 = vld [vmem:[#allocation6 + $0x450] sm:$0xff] }
 0x6b1   : > { %v2615_v33 = vpop.f32.mrf.mxu0  ;;  %v3108_v21 = vld [vmem:[#allocation6 + $0x430] sm:$0xff] }
 0x6b2   : > { %v2616_v38 = vadd.f32 %v2615_v33, %v2538_v2  ;;  %v3109_v2 = vld [vmem:[#allocation6 + $0x438] sm:$0xff] }
 0x6b3   : > { %v2749_v26 = vpop.f32.mrf.mxu1  ;;  %v3165_v33 = vld [vmem:[#allocation6 + $0x5f8] sm:$0xff] }
 0x6b4   : > { %v2760_v30 = vadd.f32 %v2749_v26, %v2608_v23  ;;  %v3107_v23 = vld [vmem:[#allocation6 + $0x428] sm:$0xff]  ;;  %v3106_v26 = vld [vmem:[#allocation6 + $0x420] sm:$0xff] }
 0x6b5   : > { %v2751_v34 = vpop.f32.mrf.mxu1 }
 0x6b6   : > { %v2761_v35 = vadd.f32 %v2751_v34, %v2610_v29  ;;  %v2777_v36 = vadd.f32 %v2770_v28, %v2760_v30  ;;  %v3104_v29 = vld [vmem:[#allocation6 + $0x410] sm:$0xff]  ;;  %v3103_v30 = vld [vmem:[#allocation6 + $0x408] sm:$0xff] }
 0x6b7   : > { %v2755_v37 = vpop.f32.mrf.mxu1  ;;  %v3164_v34 = vld [vmem:[#allocation6 + $0x5f0] sm:$0xff] }
 0x6b8   : > { %v2778_v39 = vadd.f32 %v2774_v32, %v2761_v35  ;;  %v2762_v40 = vadd.f32 %v2755_v37, %v2614_v11  ;;  %v2781_v44 = vmax.f32 %v2777_v36, 0.0  ;;  %v3163_v11 = vld [vmem:[#allocation6 + $0x5e8] sm:$0xff]  ;;  %v3162_v35 = vld [vmem:[#allocation6 + $0x5e0] sm:$0xff]  ;;  %v3161_v36 = vld [vmem:[#allocation6 + $0x5d8] sm:$0xff] }
 0x6b9   : > { %v2757_v41 = vpop.f32.mrf.mxu1  ;;  %v3160_v37 = vld [vmem:[#allocation6 + $0x5d0] sm:$0xff] }
 0x6ba   : > { %v2782_v42 = vmax.f32 %v2778_v39, 0.0  ;;  %v2763_v43 = vadd.f32 %v2757_v41, %v2616_v38  ;;  %v2779_v45 = vadd.f32 %v2770_v28, %v2762_v40  ;;  %v3105_v28 = vld [vmem:[#allocation6 + $0x418] sm:$0xff]  ;;  %v3159_v38 = vld [vmem:[#allocation6 + $0x5c8] sm:$0xff]  ;;  %v3158_v39 = vld [vmem:[#allocation6 + $0x5c0] sm:$0xff] }
 0x6bb   : > { %v3157_v40 = vld [vmem:[#allocation6 + $0x5b8] sm:$0xff]  ;;  %v3156_v41 = vld [vmem:[#allocation6 + $0x5b0] sm:$0xff] }
 0x6bc   : > { %v2780_v46 = vadd.f32 %v2774_v32, %v2763_v43  ;;  %2925 = vmatprep.mubr.f32.mxu0 %v2782_v42  ;;  %v2783_v48 = vmax.f32 %v2779_v45, 0.0  ;;  %v3102_v32 = vld [vmem:[#allocation6 + $0x400] sm:$0xff]  ;;  %v3155_v42 = vld [vmem:[#allocation6 + $0x5a8] sm:$0xff]  ;;  %v3152_v45 = vld [vmem:[#allocation6 + $0x590] sm:$0xff] }
 0x6bd   : > { %2926 = vmatmul.mubr.f32.vlgmr.msra.gmra.mxu0 %v2781_v44  ;;  %v3154_v43 = vld [vmem:[#allocation6 + $0x5a0] sm:$0xff]  ;;  %v3153_v44 = vld [vmem:[#allocation6 + $0x598] sm:$0xff] }
 0x6be   : > { %v2784_v47 = vmax.f32 %v2780_v46, 0.0  ;;  %3180 = vmatpush1.msra.mxu0 %v3132_v25  ;;  %v3151_v46 = vld [vmem:[#allocation6 + $0x588] sm:$0xff]  ;;  %v2858_v25 = vrot.slane %v2849_v20, %v6454_v55  ;;  %v3423_v20 = vld [vmem:[#allocation2 + $0x1860] sm:$0xff] }
 0x6bf   : > { %3181 = vmatprep.subr.mxu0 %v3131_v54 }
 0x6c0   : > { %2931 = vmatprep.mubr.f32.mxu0 %v2784_v47  ;;  %3182 = vmatpush1.msra.mxu0 %v3130_v15  ;;  %v3150_v47 = vld [vmem:[#allocation6 + $0x580] sm:$0xff] }
 0x6c1   : > { %2932 = vmatmul.mubr.f32.gmra.mxu0 %v2783_v48  ;;  %3183 = vmatprep.subr.mxu0 %v3129_v56  ;;  %v3149_v48 = vld [vmem:[#allocation6 + $0x578] sm:$0xff] }
 0x6c2   : > { %3184 = vmatpush1.msra.mxu0 %v3128_v8 }
 0x6c3   : > { %3185 = vmatprep.subr.mxu0 %v3127_v58 }
 0x6c4   : > { %3186 = vmatpush1.msra.mxu0 %v3126_v31 }
 0x6c5   : > { %3187 = vmatprep.subr.mxu0 %v3125_v16 }
 0x6c6   : > { %3188 = vmatpush1.msra.mxu0 %v3124_v24 }
 0x6c7   : > { %3189 = vmatprep.subr.mxu0 %v3123_v59 }
 0x6c8   : > { %3190 = vmatpush1.msra.mxu0 %v3122_v60 }
 0x6c9   : > { %3191 = vmatprep.subr.mxu0 %v3121_v61 }
 0x6ca   : > { %3192 = vmatpush1.msra.mxu0 %v3120_v27 }
 0x6cb   : > { %3193 = vmatprep.subr.mxu0 %v3119_v62  ;;  %v3141_v62 = vld [vmem:[#allocation6 + $0x538] sm:$0xff] }
 0x6cc   : > { %3194 = vmatpush1.msra.mxu0 %v3118_v63  ;;  %v3140_v63 = vld [vmem:[#allocation6 + $0x530] sm:$0xff] }
 0x6cd   : > { %3195 = vmatprep.subr.mxu0 %v3117_v0  ;;  %v3139_v0 = vld [vmem:[#allocation6 + $0x528] sm:$0xff] }
 0x6ce   : > { %3196 = vmatpush1.msra.mxu0 %v3116_v3  ;;  %v3138_v3 = vld [vmem:[#allocation6 + $0x520] sm:$0xff] }
 0x6cf   : > { %3197 = vmatprep.subr.mxu0 %v3115_v4  ;;  %v3137_v4 = vld [vmem:[#allocation6 + $0x518] sm:$0xff] }
 0x6d0   : > { %3198 = vmatpush1.msra.mxu0 %v3114_v5  ;;  %v3136_v5 = vld [vmem:[#allocation6 + $0x510] sm:$0xff] }
 0x6d1   : > { %3199 = vmatprep.subr.mxu0 %v3113_v6  ;;  %v3135_v6 = vld [vmem:[#allocation6 + $0x508] sm:$0xff] }
 0x6d2   : > { %3200 = vmatpush1.msra.mxu0 %v3112_v9  ;;  %v3134_v9 = vld [vmem:[#allocation6 + $0x500] sm:$0xff] }
 0x6d3   : > { %3201 = vmatprep.subr.mxu0 %v3111_v10  ;;  %v3008_v10 = vld [vmem:[#allocation7 + $0x2] sm:$0x3] }
 0x6d4   : > { %3202 = vmatpush1.msra.mxu0 %v3110_v12  ;;  %v3013_v12 = vrot.slane %v3008_v10, %v6457_v57 }
 0x6d5   : > { %3203 = vmatprep.subr.mxu0 %v3109_v2  ;;  %v3017_v2 = vrot.slane %v3008_v10, %v6454_v55  ;;  %v3465_v10 = vld [vmem:[#allocation2 + $0x19b0] sm:$0xff] }
 0x6d6   : > { %3204 = vmatpush1.msra.mxu0 %v3108_v21 }
 0x6d7   : > { %3205 = vmatprep.subr.mxu0 %v3107_v23 }
 0x6d8   : > { %3206 = vmatpush1.msra.mxu0 %v3106_v26 }
 0x6d9   : > { %3207 = vmatprep.subr.mxu0 %v3105_v28 }
 0x6da   : > { %3208 = vmatpush1.msra.mxu0 %v3104_v29 }
 0x6db   : > { %3209 = vmatprep.subr.mxu0 %v3103_v30 }
 0x6dc   : > { %3210 = vmatpush1.msra.mxu0 %v3102_v32 }
 0x6dd   : > { %3211 = vmatprep.subr.mxu0 %v3165_v33 }
 0x6de   : > { %3212 = vmatpush2.msra.mxu0 %v3164_v34 }
 0x6df   : > { %3213 = vmatprep.subr.mxu0 %v3163_v11 }
 0x6e0   : > { %3214 = vmatpush2.msra.mxu0 %v3162_v35 }
 0x6e1   : > { %3215 = vmatprep.subr.mxu0 %v3161_v36 }
 0x6e2   : > { %3216 = vmatpush2.msra.mxu0 %v3160_v37  ;;  %v3442_v37 = vld [vmem:[#allocation2 + $0x18f8] sm:$0xff] }
 0x6e3   : > { %3217 = vmatprep.subr.mxu0 %v3159_v38  ;;  %v3441_v38 = vld [vmem:[#allocation2 + $0x18f0] sm:$0xff] }
 0x6e4   : > { %3218 = vmatpush2.msra.mxu0 %v3158_v39  ;;  %v3440_v39 = vld [vmem:[#allocation2 + $0x18e8] sm:$0xff] }
 0x6e5   : > { %3219 = vmatprep.subr.mxu0 %v3157_v40  ;;  %v3439_v40 = vld [vmem:[#allocation2 + $0x18e0] sm:$0xff] }
 0x6e6   : > { %3220 = vmatpush2.msra.mxu0 %v3156_v41  ;;  %v3438_v41 = vld [vmem:[#allocation2 + $0x18d8] sm:$0xff] }
 0x6e7   : > { %3221 = vmatprep.subr.mxu0 %v3155_v42  ;;  %v3437_v42 = vld [vmem:[#allocation2 + $0x18d0] sm:$0xff] }
 0x6e8   : > { %3222 = vmatpush2.msra.mxu0 %v3154_v43  ;;  %v3436_v43 = vld [vmem:[#allocation2 + $0x18c8] sm:$0xff] }
 0x6e9   : > { %3223 = vmatprep.subr.mxu0 %v3153_v44  ;;  %v3435_v44 = vld [vmem:[#allocation2 + $0x18c0] sm:$0xff] }
 0x6ea   : > { %3224 = vmatpush2.msra.mxu0 %v3152_v45  ;;  %v3434_v45 = vld [vmem:[#allocation2 + $0x18b8] sm:$0xff] }
 0x6eb   : > { %3225 = vmatprep.subr.mxu0 %v3151_v46  ;;  %v3433_v46 = vld [vmem:[#allocation2 + $0x18b0] sm:$0xff] }
 0x6ec   : > { %3226 = vmatpush2.msra.mxu0 %v3150_v47  ;;  %v3432_v47 = vld [vmem:[#allocation2 + $0x18a8] sm:$0xff] }
 0x6ed   : > { %3227 = vmatprep.subr.mxu0 %v3149_v48  ;;  %v3431_v48 = vld [vmem:[#allocation2 + $0x18a0] sm:$0xff] }
 0x6ee   : > { %3228 = vmatpush2.msra.mxu0 %v3148_v22  ;;  %v3430_v22 = vld [vmem:[#allocation2 + $0x1898] sm:$0xff] }
 0x6ef   : > { %3229 = vmatprep.subr.mxu0 %v3147_v49  ;;  %v3429_v49 = vld [vmem:[#allocation2 + $0x1890] sm:$0xff] }
 0x6f0   : > { %3230 = vmatpush2.msra.mxu0 %v3146_v19  ;;  %v3428_v19 = vld [vmem:[#allocation2 + $0x1888] sm:$0xff] }
 0x6f1   : > { %3231 = vmatprep.subr.mxu0 %v3145_v50  ;;  %v3427_v50 = vld [vmem:[#allocation2 + $0x1880] sm:$0xff] }
 0x6f2   : > { %3232 = vmatpush2.msra.mxu0 %v3144_v51  ;;  %v3426_v51 = vld [vmem:[#allocation2 + $0x1878] sm:$0xff] }
 0x6f3   : > { %3233 = vmatprep.subr.mxu0 %v3143_v52  ;;  %v3425_v52 = vld [vmem:[#allocation2 + $0x1870] sm:$0xff] }
 0x6f4   : > { %3234 = vmatpush2.msra.mxu0 %v3142_v53  ;;  %v3424_v53 = vld [vmem:[#allocation2 + $0x1868] sm:$0xff] }
 0x6f5   : > { %3235 = vmatprep.subr.mxu0 %v3141_v62  ;;  %v3472_v62 = vld [vmem:[#allocation2 + $0x19e8] sm:$0xff] }
 0x6f6   : > { %3236 = vmatpush2.msra.mxu0 %v3140_v63  ;;  %v3471_v63 = vld [vmem:[#allocation2 + $0x19e0] sm:$0xff] }
 0x6f7   : > { %3237 = vmatprep.subr.mxu0 %v3139_v0  ;;  %v3470_v0 = vld [vmem:[#allocation2 + $0x19d8] sm:$0xff] }
 0x6f8   : > { %3238 = vmatpush2.msra.mxu0 %v3138_v3  ;;  %v3469_v3 = vld [vmem:[#allocation2 + $0x19d0] sm:$0xff] }
 0x6f9   : > { %3239 = vmatprep.subr.mxu0 %v3137_v4  ;;  %v3468_v4 = vld [vmem:[#allocation2 + $0x19c8] sm:$0xff] }
 0x6fa   : > { %3240 = vmatpush2.msra.mxu0 %v3136_v5  ;;  %v3467_v5 = vld [vmem:[#allocation2 + $0x19c0] sm:$0xff] }
 0x6fb   : > { %3241 = vmatprep.subr.mxu0 %v3135_v6  ;;  %v3466_v6 = vld [vmem:[#allocation2 + $0x19b8] sm:$0xff] }
 0x6fc   : > { %3242 = vmatpush2.msra.mxu0 %v3134_v9 }
 0x6fd   : > { %3617 = vmatprep.subr.mxu0 %v3442_v37 }
 0x77d   : > { %v2927_v54 = vpop.f32.mrf.mxu0 }
 0x77e   : > { %v2928_v15 = vadd.f32 %v2927_v54, %v2854_v7  ;;  %v3420_v54 = vld [vmem:[#allocation2 + $0x1848] sm:$0xff] }
 0x77f   : > { %v2929_v56 = vpop.f32.mrf.mxu0 }
 0x780   : > { %v2930_v8 = vadd.f32 %v2929_v56, %v2858_v25  ;;  %v2938_v16 = vmax.f32 %v2928_v15, 0.0  ;;  %v3419_v15 = vld [vmem:[#allocation2 + $0x1840] sm:$0xff]  ;;  %v3418_v56 = vld [vmem:[#allocation2 + $0x1838] sm:$0xff] }
 0x781   : > { %v2933_v58 = vpop.f32.mrf.mxu0 }
 0x782   : > { %v2939_v31 = vmax.f32 %v2930_v8, 0.0  ;;  %v2934_v24 = vadd.f32 %v2933_v58, %v2854_v7  ;;  %v3422_v7 = vld [vmem:[#allocation2 + $0x1858] sm:$0xff]  ;;  %v3417_v8 = vld [vmem:[#allocation2 + $0x1830] sm:$0xff]  ;;  %v3416_v58 = vld [vmem:[#allocation2 + $0x1828] sm:$0xff] }
 0x783   : > { %v2935_v59 = vpop.f32.mrf.mxu0 }
 0x784   : > { %v2936_v60 = vadd.f32 %v2935_v59, %v2858_v25  ;;  %3084 = vmatprep.mubr.f32.mxu1 %v2939_v31  ;;  %v2940_v27 = vmax.f32 %v2934_v24, 0.0  ;;  %v3421_v25 = vld [vmem:[#allocation2 + $0x1850] sm:$0xff]  ;;  %v3415_v31 = vld [vmem:[#allocation2 + $0x1820] sm:$0xff]  ;;  %v3412_v59 = vld [vmem:[#allocation2 + $0x1808] sm:$0xff] }
 0x785   : > { %3085 = vmatmul.mubr.f32.vlgmr.msra.gmra.mxu1 %v2938_v16  ;;  %v3414_v16 = vld [vmem:[#allocation2 + $0x1818] sm:$0xff]  ;;  %v3413_v24 = vld [vmem:[#allocation2 + $0x1810] sm:$0xff] }
 0x786   : > { %v2941_v61 = vmax.f32 %v2936_v60, 0.0  ;;  %v3411_v60 = vld [vmem:[#allocation2 + $0x1800] sm:$0xff] }
 0x788   : > { %3090 = vmatprep.mubr.f32.mxu1 %v2941_v61  ;;  %v3474_v61 = vld [vmem:[#allocation2 + $0x19f8] sm:$0xff] }
 0x789   : > { %3091 = vmatmul.mubr.f32.gmra.mxu1 %v2940_v27  ;;  %v3473_v27 = vld [vmem:[#allocation2 + $0x19f0] sm:$0xff] }
 0x78a   : > { %3320 = vmatprep.mubr.f32.mxu1 %v6257_v1 }
 0x845   : > { %v3086_v21 = vpop.f32.mrf.mxu1 }
 0x846   : > { %v3087_v23 = vadd.f32 %v3086_v21, %v3013_v12  ;;  %v3463_v21 = vld [vmem:[#allocation2 + $0x19a0] sm:$0xff] }
 0x847   : > { %v3088_v26 = vpop.f32.mrf.mxu1 }
 0x848   : > { %v3089_v28 = vadd.f32 %v3088_v26, %v3017_v2  ;;  %v3097_v32 = vmax.f32 %v3087_v23, 0.0  ;;  %v3167_v23 = vld [vmem:[#allocation7 + $0x4] sm:$0x3]  ;;  %v3462_v26 = vld [vmem:[#allocation2 + $0x1998] sm:$0xff] }
 0x849   : > { %v3092_v29 = vpop.f32.mrf.mxu1 }
 0x84a   : > { %v3098_v30 = vmax.f32 %v3089_v28, 0.0  ;;  %v3093_v33 = vadd.f32 %v3092_v29, %v3013_v12  ;;  %v3464_v12 = vld [vmem:[#allocation2 + $0x19a8] sm:$0xff]  ;;  %v3461_v29 = vld [vmem:[#allocation2 + $0x1990] sm:$0xff] }
 0x84b   : > { %v3094_v34 = vpop.f32.mrf.mxu1 }
 0x84c   : > { %v3095_v11 = vadd.f32 %v3094_v34, %v3017_v2  ;;  %3243 = vmatprep.mubr.f32.mxu0 %v3098_v30  ;;  %v3099_v36 = vmax.f32 %v3093_v33, 0.0  ;;  %v3176_v30 = vrot.slane %v3167_v23, %v6454_v55  ;;  %v3172_v33 = vrot.slane %v3167_v23, %v6457_v57  ;;  %v3539_v23 = vld [vmem:[#allocation2 + $0x1bf8] sm:$0xff] }
 0x84d   : > { %3244 = vmatmul.mubr.f32.vlgmr.msra.gmra.mxu0 %v3097_v32  ;;  %v3460_v32 = vld [vmem:[#allocation2 + $0x1988] sm:$0xff] }
 0x84e   : > { %v3100_v35 = vmax.f32 %v3095_v11, 0.0  ;;  %3618 = vmatpush1.msra.mxu0 %v3441_v38  ;;  %v3459_v11 = vld [vmem:[#allocation2 + $0x1980] sm:$0xff]  ;;  %v3457_v38 = vld [vmem:[#allocation2 + $0x1970] sm:$0xff] }
 0x84f   : > { %3619 = vmatprep.subr.mxu0 %v3440_v39 }
 0x850   : > { %3249 = vmatprep.mubr.f32.mxu0 %v3100_v35  ;;  %3620 = vmatpush1.msra.mxu0 %v3439_v40  ;;  %v3456_v40 = vld [vmem:[#allocation2 + $0x1968] sm:$0xff] }
 0x851   : > { %3250 = vmatmul.mubr.f32.gmra.mxu0 %v3099_v36  ;;  %3621 = vmatprep.subr.mxu0 %v3438_v41  ;;  %v3458_v36 = vld [vmem:[#allocation2 + $0x1978] sm:$0xff] }
 0x852   : > { %3622 = vmatpush1.msra.mxu0 %v3437_v42  ;;  %v3455_v42 = vld [vmem:[#allocation2 + $0x1960] sm:$0xff] }
 0x853   : > { %3623 = vmatprep.subr.mxu0 %v3436_v43  ;;  %v3454_v43 = vld [vmem:[#allocation2 + $0x1958] sm:$0xff] }
 0x854   : > { %3624 = vmatpush1.msra.mxu0 %v3435_v44  ;;  %v3507_v44 = vld [vmem:[#allocation2 + $0x1af8] sm:$0xff] }
 0x855   : > { %3625 = vmatprep.subr.mxu0 %v3434_v45  ;;  %v3453_v45 = vld [vmem:[#allocation2 + $0x1950] sm:$0xff] }
 0x856   : > { %3626 = vmatpush1.msra.mxu0 %v3433_v46  ;;  %v3452_v46 = vld [vmem:[#allocation2 + $0x1948] sm:$0xff] }
 0x857   : > { %3627 = vmatprep.subr.mxu0 %v3432_v47  ;;  %v3451_v47 = vld [vmem:[#allocation2 + $0x1940] sm:$0xff] }
 0x858   : > { %3628 = vmatpush1.msra.mxu0 %v3431_v48  ;;  %v3450_v48 = vld [vmem:[#allocation2 + $0x1938] sm:$0xff] }
 0x859   : > { %3629 = vmatprep.subr.mxu0 %v3430_v22  ;;  %v3506_v22 = vld [vmem:[#allocation2 + $0x1af0] sm:$0xff] }
 0x85a   : > { %3630 = vmatpush1.msra.mxu0 %v3429_v49  ;;  %v3505_v49 = vld [vmem:[#allocation2 + $0x1ae8] sm:$0xff] }
 0x85b   : > { %3631 = vmatprep.subr.mxu0 %v3428_v19  ;;  %v3449_v19 = vld [vmem:[#allocation2 + $0x1930] sm:$0xff] }
 0x85c   : > { %3632 = vmatpush1.msra.mxu0 %v3427_v50  ;;  %v3504_v50 = vld [vmem:[#allocation2 + $0x1ae0] sm:$0xff] }
 0x85d   : > { %3633 = vmatprep.subr.mxu0 %v3426_v51  ;;  %v3448_v51 = vld [vmem:[#allocation2 + $0x1928] sm:$0xff] }
 0x85e   : > { %3634 = vmatpush1.msra.mxu0 %v3425_v52  ;;  %v3503_v52 = vld [vmem:[#allocation2 + $0x1ad8] sm:$0xff] }
 0x85f   : > { %3635 = vmatprep.subr.mxu0 %v3424_v53  ;;  %v3502_v53 = vld [vmem:[#allocation2 + $0x1ad0] sm:$0xff] }
 0x860   : > { %3636 = vmatpush1.msra.mxu0 %v3423_v20  ;;  %v3501_v20 = vld [vmem:[#allocation2 + $0x1ac8] sm:$0xff] }
 0x861   : > { %3637 = vmatprep.subr.mxu0 %v3422_v7  ;;  %v3447_v7 = vld [vmem:[#allocation2 + $0x1920] sm:$0xff] }
 0x862   : > { %3638 = vmatpush1.msra.mxu0 %v3421_v25  ;;  %v3500_v25 = vld [vmem:[#allocation2 + $0x1ac0] sm:$0xff] }
 0x863   : > { %3639 = vmatprep.subr.mxu0 %v3420_v54  ;;  %v3499_v54 = vld [vmem:[#allocation2 + $0x1ab8] sm:$0xff] }
 0x864   : > { %3640 = vmatpush1.msra.mxu0 %v3419_v15  ;;  %v3498_v15 = vld [vmem:[#allocation2 + $0x1ab0] sm:$0xff] }
 0x865   : > { %3641 = vmatprep.subr.mxu0 %v3418_v56  ;;  %v3497_v56 = vld [vmem:[#allocation2 + $0x1aa8] sm:$0xff] }
 0x866   : > { %3642 = vmatpush1.msra.mxu0 %v3417_v8  ;;  %v3496_v8 = vld [vmem:[#allocation2 + $0x1aa0] sm:$0xff] }
 0x867   : > { %3643 = vmatprep.subr.mxu0 %v3416_v58  ;;  %v3495_v58 = vld [vmem:[#allocation2 + $0x1a98] sm:$0xff] }
 0x868   : > { %3644 = vmatpush1.msra.mxu0 %v3415_v31  ;;  %v3494_v31 = vld [vmem:[#allocation2 + $0x1a90] sm:$0xff] }
 0x869   : > { %3645 = vmatprep.subr.mxu0 %v3414_v16  ;;  %v3493_v16 = vld [vmem:[#allocation2 + $0x1a88] sm:$0xff] }
 0x86a   : > { %3646 = vmatpush1.msra.mxu0 %v3413_v24  ;;  %v3492_v24 = vld [vmem:[#allocation2 + $0x1a80] sm:$0xff] }
 0x86b   : > { %3647 = vmatprep.subr.mxu0 %v3412_v59  ;;  %v3491_v59 = vld [vmem:[#allocation2 + $0x1a78] sm:$0xff] }
 0x86c   : > { %3648 = vmatpush1.msra.mxu0 %v3411_v60  ;;  %v3490_v60 = vld [vmem:[#allocation2 + $0x1a70] sm:$0xff] }
 0x86d   : > { %3649 = vmatprep.subr.mxu0 %v3474_v61  ;;  %v3489_v61 = vld [vmem:[#allocation2 + $0x1a68] sm:$0xff] }
 0x86e   : > { %3650 = vmatpush2.msra.mxu0 %v3473_v27  ;;  %v3488_v27 = vld [vmem:[#allocation2 + $0x1a60] sm:$0xff] }
 0x86f   : > { %3651 = vmatprep.subr.mxu0 %v3472_v62  ;;  %v3487_v62 = vld [vmem:[#allocation2 + $0x1a58] sm:$0xff] }
 0x870   : > { %3652 = vmatpush2.msra.mxu0 %v3471_v63  ;;  %v3486_v63 = vld [vmem:[#allocation2 + $0x1a50] sm:$0xff] }
 0x871   : > { %3653 = vmatprep.subr.mxu0 %v3470_v0  ;;  %v3485_v0 = vld [vmem:[#allocation2 + $0x1a48] sm:$0xff] }
 0x872   : > { %3654 = vmatpush2.msra.mxu0 %v3469_v3  ;;  %v3484_v3 = vld [vmem:[#allocation2 + $0x1a40] sm:$0xff] }
 0x873   : > { %3655 = vmatprep.subr.mxu0 %v3468_v4  ;;  %v3483_v4 = vld [vmem:[#allocation2 + $0x1a38] sm:$0xff] }
 0x874   : > { %3656 = vmatpush2.msra.mxu0 %v3467_v5  ;;  %v3482_v5 = vld [vmem:[#allocation2 + $0x1a30] sm:$0xff] }
 0x875   : > { %3657 = vmatprep.subr.mxu0 %v3466_v6  ;;  %v3481_v6 = vld [vmem:[#allocation2 + $0x1a28] sm:$0xff] }
 0x876   : > { %3658 = vmatpush2.msra.mxu0 %v3465_v10  ;;  %v3479_v10 = vld [vmem:[#allocation2 + $0x1a18] sm:$0xff] }
 0x877   : > { %3659 = vmatprep.subr.mxu0 %v3464_v12  ;;  %v3478_v12 = vld [vmem:[#allocation2 + $0x1a10] sm:$0xff] }
 0x878   : > { %3660 = vmatpush2.msra.mxu0 %v3463_v21  ;;  %v3476_v21 = vld [vmem:[#allocation2 + $0x1a00] sm:$0xff] }
 0x879   : > { %3661 = vmatprep.subr.mxu0 %v3462_v26  ;;  %v3538_v26 = vld [vmem:[#allocation2 + $0x1bf0] sm:$0xff] }
 0x87a   : > { %3662 = vmatpush2.msra.mxu0 %v3461_v29  ;;  %v3536_v29 = vld [vmem:[#allocation2 + $0x1be0] sm:$0xff] }
 0x87b   : > { %3663 = vmatprep.subr.mxu0 %v3460_v32  ;;  %v3534_v32 = vld [vmem:[#allocation2 + $0x1bd0] sm:$0xff] }
 0x87c   : > { %3664 = vmatpush2.msra.mxu0 %v3459_v11  ;;  %v3531_v11 = vld [vmem:[#allocation2 + $0x1bb8] sm:$0xff] }
 0x87d   : > { %3665 = vmatprep.subr.mxu0 %v3458_v36  ;;  %v3530_v36 = vld [vmem:[#allocation2 + $0x1bb0] sm:$0xff] }
 0x87e   : > { %3666 = vmatpush2.msra.mxu0 %v3457_v38  ;;  %v3529_v38 = vld [vmem:[#allocation2 + $0x1ba8] sm:$0xff] }
 0x87f   : > { %3667 = vmatprep.subr.mxu0 %v3456_v40  ;;  %v3527_v40 = vld [vmem:[#allocation2 + $0x1b98] sm:$0xff] }
 0x880   : > { %3668 = vmatpush2.msra.mxu0 %v3455_v42  ;;  %v3526_v42 = vld [vmem:[#allocation2 + $0x1b90] sm:$0xff] }
 0x881   : > { %3669 = vmatprep.subr.mxu0 %v3454_v43  ;;  %v3525_v43 = vld [vmem:[#allocation2 + $0x1b88] sm:$0xff] }
 0x882   : > { %3670 = vmatpush2.msra.mxu0 %v3453_v45  ;;  %v3523_v45 = vld [vmem:[#allocation2 + $0x1b78] sm:$0xff] }
 0x883   : > { %3671 = vmatprep.subr.mxu0 %v3452_v46  ;;  %v3522_v46 = vld [vmem:[#allocation2 + $0x1b70] sm:$0xff] }
 0x884   : > { %3672 = vmatpush2.msra.mxu0 %v3451_v47  ;;  %v3521_v47 = vld [vmem:[#allocation2 + $0x1b68] sm:$0xff] }
 0x885   : > { %3673 = vmatprep.subr.mxu0 %v3450_v48  ;;  %v3520_v48 = vld [vmem:[#allocation2 + $0x1b60] sm:$0xff] }
 0x886   : > { %3674 = vmatpush2.msra.mxu0 %v3449_v19  ;;  %v3517_v19 = vld [vmem:[#allocation2 + $0x1b48] sm:$0xff] }
 0x887   : > { %3675 = vmatprep.subr.mxu0 %v3448_v51  ;;  %v3515_v51 = vld [vmem:[#allocation2 + $0x1b38] sm:$0xff] }
 0x888   : > { %3676 = vmatpush2.msra.mxu0 %v3447_v7  ;;  %v3446_v7 = vld [vmem:[#allocation2 + $0x1918] sm:$0xff] }
 0x889   : > { %3677 = vmatprep.subr.mxu0 %v3446_v7  ;;  %v3741_v7 = vld [vmem:[#allocation2 + $0x1d70] sm:$0xff] }
 0x90d   : > { %v3245_v9 = vpop.f32.mrf.mxu0 }
 0x90e   : > { %v6558_v41 = vadd.f32 %v3245_v9, %v3172_v33  ;;  %v3480_v9 = vld [vmem:[#allocation2 + $0x1a20] sm:$0xff] }
 0x90f   : > { %v3247_v2 = vpop.f32.mrf.mxu0 }
 0x910   : > { %v3248_v39 = vadd.f32 %v3247_v2, %v3176_v30  ;;  %v3477_v2 = vld [vmem:[#allocation2 + $0x1a08] sm:$0xff] }
 0x911   : > { %v3251_v28 = vpop.f32.mrf.mxu0 }
 0x912   : > { %v6555_v37 = vadd.f32 %v3251_v28, %v3172_v33  ;;  %v3537_v28 = vld [vmem:[#allocation2 + $0x1be8] sm:$0xff] }
 0x913   : > { %v3253_v34 = vpop.f32.mrf.mxu0  ;;  %v3533_v33 = vld [vmem:[#allocation2 + $0x1bc8] sm:$0xff] }
 0x914   : > { %v6553_v35 = vadd.f32 %v3253_v34, %v3176_v30  ;;  %v3535_v30 = vld [vmem:[#allocation2 + $0x1bd8] sm:$0xff]  ;;  %v3532_v34 = vld [vmem:[#allocation2 + $0x1bc0] sm:$0xff] }
 0x916   : > { %3284 = vmatprep.subr.mxu1 %v6553_v35 }
 0x917   : > { %3285 = vmatpush1.msra.mxu1 %v6555_v37 }
 0x918   : > { %3286 = vmatprep.subr.mxu1 %v3248_v39 }
 0x919   : > { %3287 = vmatpush1.msra.mxu1 %v6558_v41 }
 0x91a   : > { %5998 = vmatmul.mubr.msk.f32.vlgmr.msra.gmra.mxu1 %vm354_vm2, %v6425_v13  ;;  %3361 = vmatprep.subr.mxu1 %v6553_v35 }
 0x91b   : > { %3362 = vmatpush1.msra.mxu1 %v6555_v37  ;;  %3326 = vmatprep.mubr.f32.mxu1 %v6257_v1 }
 0x91c   : > { %3363 = vmatprep.subr.mxu1 %v3248_v39 }
 0x91d   : > { %3364 = vmatpush1.msra.mxu1 %v6558_v41 }
 0x91e   : > { %5999 = vmatmul.mubr.msk.f32.gmra.mxu1 %vm354_vm2, %v6439_v17  ;;  %3540 = vmatprep.subr.mxu1 %v3507_v44  ;;  %v3524_v44 = vld [vmem:[#allocation2 + $0x1b80] sm:$0xff] }
 0x91f   : > { %3397 = vmatprep.mubr.f32.mxu1 %v6257_v1 }
 0x922   : > { %6000 = vmatmul.mubr.msk.f32.vlgmr.msra.gmra.mxu1 %vm354_vm2, %v6428_v14 }
 0x923   : > { %3541 = vmatpush1.msra.mxu1 %v3506_v22  ;;  %3403 = vmatprep.mubr.f32.mxu1 %v6257_v1  ;;  %v3519_v22 = vld [vmem:[#allocation2 + $0x1b58] sm:$0xff] }
 0x924   : > { %3542 = vmatprep.subr.mxu1 %v3505_v49  ;;  %v3518_v49 = vld [vmem:[#allocation2 + $0x1b50] sm:$0xff] }
 0x925   : > { %3543 = vmatpush1.msra.mxu1 %v3504_v50  ;;  %v3516_v50 = vld [vmem:[#allocation2 + $0x1b40] sm:$0xff] }
 0x926   : > { %3544 = vmatprep.subr.mxu1 %v3503_v52  ;;  %6001 = vmatmul.mubr.msk.f32.gmra.mxu1 %vm354_vm2, %v6442_v18  ;;  %v3514_v52 = vld [vmem:[#allocation2 + $0x1b30] sm:$0xff] }
 0x927   : > { %3545 = vmatpush1.msra.mxu1 %v3502_v53  ;;  %3604 = vmatprep.mubr.f32.mxu1 %v3248_v39  ;;  %v3528_v39 = vld [vmem:[#allocation2 + $0x1ba0] sm:$0xff]  ;;  %v3513_v53 = vld [vmem:[#allocation2 + $0x1b28] sm:$0xff] }
 0x928   : > { %3546 = vmatprep.subr.mxu1 %v3501_v20  ;;  %v3512_v20 = vld [vmem:[#allocation2 + $0x1b20] sm:$0xff] }
 0x929   : > { %3547 = vmatpush1.msra.mxu1 %v3500_v25  ;;  %v3445_v25 = vld [vmem:[#allocation2 + $0x1910] sm:$0xff] }
 0x92a   : > { %3548 = vmatprep.subr.mxu1 %v3499_v54  ;;  %v3511_v54 = vld [vmem:[#allocation2 + $0x1b18] sm:$0xff]  ;;  %3678 = vmatpush2.msra.mxu0 %v3445_v25  ;;  %v3740_v25 = vld [vmem:[#allocation2 + $0x1d68] sm:$0xff] }
 0x92b   : > { %3549 = vmatpush1.msra.mxu1 %v3498_v15  ;;  %v3510_v15 = vld [vmem:[#allocation2 + $0x1b10] sm:$0xff] }
 0x92c   : > { %3550 = vmatprep.subr.mxu1 %v3497_v56  ;;  %v3444_v56 = vld [vmem:[#allocation2 + $0x1908] sm:$0xff] }
 0x92d   : > { %3551 = vmatpush1.msra.mxu1 %v3496_v8  ;;  %v3443_v8 = vld [vmem:[#allocation2 + $0x1900] sm:$0xff]  ;;  %3679 = vmatprep.subr.mxu0 %v3444_v56  ;;  %v3737_v56 = vld [vmem:[#allocation2 + $0x1d50] sm:$0xff] }
 0x92e   : > { %3552 = vmatprep.subr.mxu1 %v3495_v58  ;;  %v3509_v58 = vld [vmem:[#allocation2 + $0x1b08] sm:$0xff]  ;;  %3680 = vmatpush2.msra.mxu0 %v3443_v8 }
 0x92f   : > { %3553 = vmatpush1.msra.mxu1 %v3494_v31  ;;  %v3508_v31 = vld [vmem:[#allocation2 + $0x1b00] sm:$0xff]  ;;  %v3736_v8 = vld [vmem:[#allocation2 + $0x1d48] sm:$0xff] }
 0x930   : > { %3554 = vmatprep.subr.mxu1 %v3493_v16  ;;  %v3726_v16 = vld [vmem:[#allocation2 + $0x1cf8] sm:$0xff] }
 0x931   : > { %3555 = vmatpush1.msra.mxu1 %v3492_v24  ;;  %v3725_v24 = vld [vmem:[#allocation2 + $0x1cf0] sm:$0xff] }
 0x932   : > { %3556 = vmatprep.subr.mxu1 %v3491_v59  ;;  %v3724_v59 = vld [vmem:[#allocation2 + $0x1ce8] sm:$0xff] }
 0x933   : > { %3557 = vmatpush1.msra.mxu1 %v3490_v60  ;;  %v3723_v60 = vld [vmem:[#allocation2 + $0x1ce0] sm:$0xff] }
 0x934   : > { %3558 = vmatprep.subr.mxu1 %v3489_v61  ;;  %v3722_v61 = vld [vmem:[#allocation2 + $0x1cd8] sm:$0xff] }
 0x935   : > { %3559 = vmatpush1.msra.mxu1 %v3488_v27  ;;  %v3721_v27 = vld [vmem:[#allocation2 + $0x1cd0] sm:$0xff] }
 0x936   : > { %3560 = vmatprep.subr.mxu1 %v3487_v62  ;;  %v3720_v62 = vld [vmem:[#allocation2 + $0x1cc8] sm:$0xff] }
 0x937   : > { %3561 = vmatpush1.msra.mxu1 %v3486_v63  ;;  %v3719_v63 = vld [vmem:[#allocation2 + $0x1cc0] sm:$0xff] }
 0x938   : > { %3562 = vmatprep.subr.mxu1 %v3485_v0  ;;  %v3718_v0 = vld [vmem:[#allocation2 + $0x1cb8] sm:$0xff] }
 0x939   : > { %3563 = vmatpush1.msra.mxu1 %v3484_v3  ;;  %v3717_v3 = vld [vmem:[#allocation2 + $0x1cb0] sm:$0xff] }
 0x93a   : > { %3564 = vmatprep.subr.mxu1 %v3483_v4  ;;  %v3715_v4 = vld [vmem:[#allocation2 + $0x1ca0] sm:$0xff] }
 0x93b   : > { %3565 = vmatpush1.msra.mxu1 %v3482_v5  ;;  %v3713_v5 = vld [vmem:[#allocation2 + $0x1c90] sm:$0xff] }
 0x93c   : > { %3566 = vmatprep.subr.mxu1 %v3481_v6  ;;  %v3712_v6 = vld [vmem:[#allocation2 + $0x1c88] sm:$0xff] }
 0x93d   : > { %3567 = vmatpush1.msra.mxu1 %v3480_v9  ;;  %v3711_v9 = vld [vmem:[#allocation2 + $0x1c80] sm:$0xff] }
 0x93e   : > { %3568 = vmatprep.subr.mxu1 %v3479_v10  ;;  %v3709_v10 = vld [vmem:[#allocation2 + $0x1c70] sm:$0xff] }
 0x93f   : > { %3569 = vmatpush1.msra.mxu1 %v3478_v12  ;;  %v3708_v12 = vld [vmem:[#allocation2 + $0x1c68] sm:$0xff] }
 0x940   : > { %3570 = vmatprep.subr.mxu1 %v3477_v2  ;;  %v3707_v2 = vld [vmem:[#allocation2 + $0x1c60] sm:$0xff] }
 0x941   : > { %3571 = vmatpush1.msra.mxu1 %v3476_v21  ;;  %v3706_v21 = vld [vmem:[#allocation2 + $0x1c58] sm:$0xff] }
 0x942   : > { %3572 = vmatprep.subr.mxu1 %v3539_v23  ;;  %v3705_v23 = vld [vmem:[#allocation2 + $0x1c50] sm:$0xff] }
 0x943   : > { %3573 = vmatpush2.msra.mxu1 %v3538_v26  ;;  %v3704_v26 = vld [vmem:[#allocation2 + $0x1c48] sm:$0xff] }
 0x944   : > { %3574 = vmatprep.subr.mxu1 %v3537_v28  ;;  %v3703_v28 = vld [vmem:[#allocation2 + $0x1c40] sm:$0xff] }
 0x945   : > { %3575 = vmatpush2.msra.mxu1 %v3536_v29  ;;  %v3702_v29 = vld [vmem:[#allocation2 + $0x1c38] sm:$0xff] }
 0x946   : > { %3576 = vmatprep.subr.mxu1 %v3535_v30  ;;  %v3701_v30 = vld [vmem:[#allocation2 + $0x1c30] sm:$0xff] }
 0x947   : > { %3577 = vmatpush2.msra.mxu1 %v3534_v32  ;;  %v3700_v32 = vld [vmem:[#allocation2 + $0x1c28] sm:$0xff] }
 0x948   : > { %3578 = vmatprep.subr.mxu1 %v3533_v33  ;;  %v3699_v33 = vld [vmem:[#allocation2 + $0x1c20] sm:$0xff] }
 0x949   : > { %3579 = vmatpush2.msra.mxu1 %v3532_v34  ;;  %v3698_v34 = vld [vmem:[#allocation2 + $0x1c18] sm:$0xff] }
 0x94a   : > { %3580 = vmatprep.subr.mxu1 %v3531_v11  ;;  %v3697_v11 = vld [vmem:[#allocation2 + $0x1c10] sm:$0xff] }
 0x94b   : > { %3581 = vmatpush2.msra.mxu1 %v3530_v36  ;;  %v3696_v36 = vld [vmem:[#allocation2 + $0x1c08] sm:$0xff] }
 0x94c   : > { %3582 = vmatprep.subr.mxu1 %v3529_v38  ;;  %v3695_v38 = vld [vmem:[#allocation2 + $0x1c00] sm:$0xff] }
 0x94d   : > { %3583 = vmatpush2.msra.mxu1 %v3528_v39  ;;  %v3758_v39 = vld [vmem:[#allocation2 + $0x1df8] sm:$0xff] }
 0x94e   : > { %3584 = vmatprep.subr.mxu1 %v3527_v40  ;;  %v3757_v40 = vld [vmem:[#allocation2 + $0x1df0] sm:$0xff] }
 0x94f   : > { %3585 = vmatpush2.msra.mxu1 %v3526_v42  ;;  %v3756_v42 = vld [vmem:[#allocation2 + $0x1de8] sm:$0xff] }
 0x950   : > { %3586 = vmatprep.subr.mxu1 %v3525_v43  ;;  %v3755_v43 = vld [vmem:[#allocation2 + $0x1de0] sm:$0xff] }
 0x951   : > { %3587 = vmatpush2.msra.mxu1 %v3524_v44  ;;  %v3754_v44 = vld [vmem:[#allocation2 + $0x1dd8] sm:$0xff] }
 0x952   : > { %3588 = vmatprep.subr.mxu1 %v3523_v45  ;;  %v3753_v45 = vld [vmem:[#allocation2 + $0x1dd0] sm:$0xff] }
 0x953   : > { %3589 = vmatpush2.msra.mxu1 %v3522_v46  ;;  %v3752_v46 = vld [vmem:[#allocation2 + $0x1dc8] sm:$0xff] }
 0x954   : > { %3590 = vmatprep.subr.mxu1 %v3521_v47  ;;  %v3751_v47 = vld [vmem:[#allocation2 + $0x1dc0] sm:$0xff] }
 0x955   : > { %3591 = vmatpush2.msra.mxu1 %v3520_v48  ;;  %v3750_v48 = vld [vmem:[#allocation2 + $0x1db8] sm:$0xff] }
 0x956   : > { %3592 = vmatprep.subr.mxu1 %v3519_v22  ;;  %v3749_v22 = vld [vmem:[#allocation2 + $0x1db0] sm:$0xff] }
 0x957   : > { %3593 = vmatpush2.msra.mxu1 %v3518_v49  ;;  %v3748_v49 = vld [vmem:[#allocation2 + $0x1da8] sm:$0xff] }
 0x958   : > { %3594 = vmatprep.subr.mxu1 %v3517_v19  ;;  %v3747_v19 = vld [vmem:[#allocation2 + $0x1da0] sm:$0xff] }
 0x959   : > { %3595 = vmatpush2.msra.mxu1 %v3516_v50  ;;  %v3746_v50 = vld [vmem:[#allocation2 + $0x1d98] sm:$0xff] }
 0x95a   : > { %3596 = vmatprep.subr.mxu1 %v3515_v51  ;;  %v3745_v51 = vld [vmem:[#allocation2 + $0x1d90] sm:$0xff] }
 0x95b   : > { %3597 = vmatpush2.msra.mxu1 %v3514_v52  ;;  %v3744_v52 = vld [vmem:[#allocation2 + $0x1d88] sm:$0xff] }
 0x95c   : > { %3598 = vmatprep.subr.mxu1 %v3513_v53  ;;  %v3743_v53 = vld [vmem:[#allocation2 + $0x1d80] sm:$0xff] }
 0x95d   : > { %3599 = vmatpush2.msra.mxu1 %v3512_v20  ;;  %v3742_v20 = vld [vmem:[#allocation2 + $0x1d78] sm:$0xff] }
 0x95e   : > { %3600 = vmatprep.subr.mxu1 %v3511_v54  ;;  %v3739_v54 = vld [vmem:[#allocation2 + $0x1d60] sm:$0xff] }
 0x95f   : > { %3601 = vmatpush2.msra.mxu1 %v3510_v15  ;;  %v3738_v15 = vld [vmem:[#allocation2 + $0x1d58] sm:$0xff] }
 0x960   : > { %3602 = vmatprep.subr.mxu1 %v3509_v58  ;;  %v3735_v58 = vld [vmem:[#allocation2 + $0x1d40] sm:$0xff] }
 0x961   : > { %3603 = vmatpush2.msra.mxu1 %v3508_v31  ;;  %v3734_v31 = vld [vmem:[#allocation2 + $0x1d38] sm:$0xff] }
 0x962   : > { %3605 = vmatmul.mubr.f32.vlgmr.msra.gmra.mxu1 %v6558_v41  ;;  %3759 = vmatprep.subr.mxu1 %v3726_v16  ;;  %v3716_v41 = vld [vmem:[#allocation2 + $0x1ca8] sm:$0xff]  ;;  %v3733_v16 = vld [vmem:[#allocation2 + $0x1d30] sm:$0xff] }
 0x963   : > { %3610 = vmatprep.mubr.f32.mxu1 %v6553_v35  ;;  %3760 = vmatpush1.msra.mxu1 %v3725_v24  ;;  %v3714_v35 = vld [vmem:[#allocation2 + $0x1c98] sm:$0xff]  ;;  %v3732_v24 = vld [vmem:[#allocation2 + $0x1d28] sm:$0xff] }
 0x964   : > { %3761 = vmatprep.subr.mxu1 %v3724_v59  ;;  %v3731_v59 = vld [vmem:[#allocation2 + $0x1d20] sm:$0xff] }
 0x965   : > { %3762 = vmatpush1.msra.mxu1 %v3723_v60  ;;  %v3730_v60 = vld [vmem:[#allocation2 + $0x1d18] sm:$0xff] }
 0x966   : > { %3611 = vmatmul.mubr.f32.gmra.mxu1 %v6555_v37  ;;  %3763 = vmatprep.subr.mxu1 %v3722_v61  ;;  %v3710_v37 = vld [vmem:[#allocation2 + $0x1c78] sm:$0xff]  ;;  %v3729_v61 = vld [vmem:[#allocation2 + $0x1d10] sm:$0xff] }
 0x967   : > { %3764 = vmatpush1.msra.mxu1 %v3721_v27  ;;  %v3728_v27 = vld [vmem:[#allocation2 + $0x1d08] sm:$0xff] }
 0x968   : > { %3765 = vmatprep.subr.mxu1 %v3720_v62  ;;  %v3727_v62 = vld [vmem:[#allocation2 + $0x1d00] sm:$0xff] }
 0x969   : > { %3766 = vmatpush1.msra.mxu1 %v3719_v63 }
 0x96a   : > { %3767 = vmatprep.subr.mxu1 %v3718_v0 }
 0x96b   : > { %3768 = vmatpush1.msra.mxu1 %v3717_v3 }
 0x96c   : > { %3769 = vmatprep.subr.mxu1 %v3716_v41 }
 0x96d   : > { %3770 = vmatpush1.msra.mxu1 %v3715_v4 }
 0x96e   : > { %3771 = vmatprep.subr.mxu1 %v3714_v35 }
 0x96f   : > { %3772 = vmatpush1.msra.mxu1 %v3713_v5 }
 0x970   : > { %3773 = vmatprep.subr.mxu1 %v3712_v6 }
 0x971   : > { %3774 = vmatpush1.msra.mxu1 %v3711_v9  ;;  %v4047_v9 = vld [vmem:[#allocation2 + $0x1ef8] sm:$0xff] }
 0x972   : > { %3775 = vmatprep.subr.mxu1 %v3710_v37  ;;  %v4046_v37 = vld [vmem:[#allocation2 + $0x1ef0] sm:$0xff] }
 0x973   : > { %3776 = vmatpush1.msra.mxu1 %v3709_v10  ;;  %v4045_v10 = vld [vmem:[#allocation2 + $0x1ee8] sm:$0xff] }
 0x974   : > { %3777 = vmatprep.subr.mxu1 %v3708_v12  ;;  %v4044_v12 = vld [vmem:[#allocation2 + $0x1ee0] sm:$0xff] }
 0x975   : > { %3778 = vmatpush1.msra.mxu1 %v3707_v2  ;;  %v4043_v2 = vld [vmem:[#allocation2 + $0x1ed8] sm:$0xff] }
 0x976   : > { %3779 = vmatprep.subr.mxu1 %v3706_v21  ;;  %v4042_v21 = vld [vmem:[#allocation2 + $0x1ed0] sm:$0xff] }
 0x977   : > { %3780 = vmatpush1.msra.mxu1 %v3705_v23  ;;  %v4041_v23 = vld [vmem:[#allocation2 + $0x1ec8] sm:$0xff] }
 0x978   : > { %3781 = vmatprep.subr.mxu1 %v3704_v26  ;;  %v4040_v26 = vld [vmem:[#allocation2 + $0x1ec0] sm:$0xff] }
 0x979   : > { %3782 = vmatpush1.msra.mxu1 %v3703_v28  ;;  %v4039_v28 = vld [vmem:[#allocation2 + $0x1eb8] sm:$0xff] }
 0x97a   : > { %3783 = vmatprep.subr.mxu1 %v3702_v29  ;;  %v4038_v29 = vld [vmem:[#allocation2 + $0x1eb0] sm:$0xff] }
 0x97b   : > { %3784 = vmatpush1.msra.mxu1 %v3701_v30  ;;  %v4037_v30 = vld [vmem:[#allocation2 + $0x1ea8] sm:$0xff] }
 0x97c   : > { %3785 = vmatprep.subr.mxu1 %v3700_v32  ;;  %v4036_v32 = vld [vmem:[#allocation2 + $0x1ea0] sm:$0xff] }
 0x97d   : > { %3786 = vmatpush1.msra.mxu1 %v3699_v33  ;;  %v4035_v33 = vld [vmem:[#allocation2 + $0x1e98] sm:$0xff] }
 0x97e   : > { %3787 = vmatprep.subr.mxu1 %v3698_v34  ;;  %v4034_v34 = vld [vmem:[#allocation2 + $0x1e90] sm:$0xff] }
 0x97f   : > { %3788 = vmatpush1.msra.mxu1 %v3697_v11  ;;  %v4033_v11 = vld [vmem:[#allocation2 + $0x1e88] sm:$0xff] }
 0x980   : > { %3789 = vmatprep.subr.mxu1 %v3696_v36  ;;  %v4032_v36 = vld [vmem:[#allocation2 + $0x1e80] sm:$0xff] }
 0x981   : > { %3790 = vmatpush1.msra.mxu1 %v3695_v38  ;;  %v4031_v38 = vld [vmem:[#allocation2 + $0x1e78] sm:$0xff] }
 0x982   : > { %3791 = vmatprep.subr.mxu1 %v3758_v39  ;;  %v4030_v39 = vld [vmem:[#allocation2 + $0x1e70] sm:$0xff] }
 0x983   : > { %3792 = vmatpush2.msra.mxu1 %v3757_v40  ;;  %v4029_v40 = vld [vmem:[#allocation2 + $0x1e68] sm:$0xff] }
 0x984   : > { %3793 = vmatprep.subr.mxu1 %v3756_v42  ;;  %v4028_v42 = vld [vmem:[#allocation2 + $0x1e60] sm:$0xff] }
 0x985   : > { %3794 = vmatpush2.msra.mxu1 %v3755_v43  ;;  %v4027_v43 = vld [vmem:[#allocation2 + $0x1e58] sm:$0xff] }
 0x986   : > { %3795 = vmatprep.subr.mxu1 %v3754_v44  ;;  %v4026_v44 = vld [vmem:[#allocation2 + $0x1e50] sm:$0xff] }
 0x987   : > { %3796 = vmatpush2.msra.mxu1 %v3753_v45  ;;  %v4025_v45 = vld [vmem:[#allocation2 + $0x1e48] sm:$0xff] }
 0x988   : > { %3797 = vmatprep.subr.mxu1 %v3752_v46 }
 0x989   : > { %3798 = vmatpush2.msra.mxu1 %v3751_v47  ;;  %v4024_v47 = vld [vmem:[#allocation2 + $0x1e40] sm:$0xff] }
 0x98a   : > { %3799 = vmatprep.subr.mxu1 %v3750_v48  ;;  %v4023_v48 = vld [vmem:[#allocation2 + $0x1e38] sm:$0xff] }
 0x98b   : > { %3800 = vmatpush2.msra.mxu1 %v3749_v22  ;;  %v4022_v22 = vld [vmem:[#allocation2 + $0x1e30] sm:$0xff] }
 0x98c   : > { %3801 = vmatprep.subr.mxu1 %v3748_v49  ;;  %v4021_v49 = vld [vmem:[#allocation2 + $0x1e28] sm:$0xff] }
 0x98d   : > { %3802 = vmatpush2.msra.mxu1 %v3747_v19 }
 0x98e   : > { %3803 = vmatprep.subr.mxu1 %v3746_v50  ;;  %v4020_v50 = vld [vmem:[#allocation2 + $0x1e20] sm:$0xff] }
 0x98f   : > { %3804 = vmatpush2.msra.mxu1 %v3745_v51  ;;  %v4019_v51 = vld [vmem:[#allocation2 + $0x1e18] sm:$0xff] }
 0x990   : > { %3805 = vmatprep.subr.mxu1 %v3744_v52 }
 0x991   : > { %3806 = vmatpush2.msra.mxu1 %v3743_v53  ;;  %v4018_v53 = vld [vmem:[#allocation2 + $0x1e10] sm:$0xff] }
 0x992   : > { %3807 = vmatprep.subr.mxu1 %v3742_v20  ;;  %v4017_v20 = vld [vmem:[#allocation2 + $0x1e08] sm:$0xff] }
 0x993   : > { %3808 = vmatpush2.msra.mxu1 %v3741_v7 }
 0x994   : > { %3809 = vmatprep.subr.mxu1 %v3740_v25 }
 0x995   : > { %3810 = vmatpush2.msra.mxu1 %v3739_v54  ;;  %v4016_v54 = vld [vmem:[#allocation2 + $0x1e00] sm:$0xff] }
 0x996   : > { %3811 = vmatprep.subr.mxu1 %v3738_v15  ;;  %v4079_v15 = vld [vmem:[#allocation2 + $0x1ff8] sm:$0xff] }
 0x997   : > { %3812 = vmatpush2.msra.mxu1 %v3737_v56  ;;  %v4078_v56 = vld [vmem:[#allocation2 + $0x1ff0] sm:$0xff] }
 0x998   : > { %3813 = vmatprep.subr.mxu1 %v3736_v8  ;;  %v4077_v8 = vld [vmem:[#allocation2 + $0x1fe8] sm:$0xff] }
 0x999   : > { %3814 = vmatpush2.msra.mxu1 %v3735_v58 }
 0x99a   : > { %3815 = vmatprep.subr.mxu1 %v3734_v31 }
 0x99b   : > { %3816 = vmatpush2.msra.mxu1 %v3733_v16  ;;  %v4076_v16 = vld [vmem:[#allocation2 + $0x1fe0] sm:$0xff] }
 0x99c   : > { %3817 = vmatprep.subr.mxu1 %v3732_v24  ;;  %v4075_v24 = vld [vmem:[#allocation2 + $0x1fd8] sm:$0xff] }
 0x99d   : > { %3818 = vmatpush2.msra.mxu1 %v3731_v59 }
 0x99e   : > { %3819 = vmatprep.subr.mxu1 %v3730_v60  ;;  %v4074_v60 = vld [vmem:[#allocation2 + $0x1fd0] sm:$0xff] }
 0x99f   : > { %3820 = vmatpush2.msra.mxu1 %v3729_v61  ;;  %v4073_v61 = vld [vmem:[#allocation2 + $0x1fc8] sm:$0xff] }
 0x9a0   : > { %3821 = vmatprep.subr.mxu1 %v3728_v27 }
 0x9a1   : > { %3822 = vmatpush2.msra.mxu1 %v3727_v62 }
 0x9a2   : > { %4222 = vmatprep.subr.mxu1 %v4047_v9 }
 0x9da   : > { %v3322_v63 = vpop.f32.mrf.mxu1 }
 0x9dc   : > { %v3324_v0 = vpop.f32.mrf.mxu1 }
 0x9dd   : > { %3681 = vmatprep.mubr.f32.mxu0 %v3324_v0 }
 0x9de   : > { %v3328_v3 = vpop.f32.mrf.mxu1  ;;  %3682 = vmatmul.mubr.f32.vlgmr.msra.gmra.mxu0 %v3322_v63  ;;  %v4072_v63 = vld [vmem:[#allocation2 + $0x1fc0] sm:$0xff] }
 0x9e0   : > { %v3330_v41 = vpop.f32.mrf.mxu1 }
 0x9e1   : > { %3687 = vmatprep.mubr.f32.mxu0 %v3330_v41  ;;  %v3841_v41 = vld [vmem:[#allocation4 + $0x8] sm:$0x3] }
 0x9e2   : > { %v3399_v4 = vpop.f32.mrf.mxu1  ;;  %3688 = vmatmul.mubr.f32.gmra.mxu0 %v3328_v3 }
 0x9e3   : > { %3925 = vmatprep.mubr.f32.mxu0 %v6257_v1 }
 0x9e4   : > { %v3401_v35 = vpop.f32.mrf.mxu1 }
 0x9e5   : > { %3823 = vmatprep.mubr.f32.mxu1 %v3401_v35 }
 0x9e6   : > { %v3405_v5 = vpop.f32.mrf.mxu1  ;;  %3824 = vmatmul.mubr.f32.vlgmr.msra.gmra.mxu1 %v3399_v4  ;;  %v4071_v4 = vld [vmem:[#allocation2 + $0x1fb8] sm:$0xff] }
 0x9e7   : > { %4223 = vmatpush1.msra.mxu1 %v4046_v37 }
 0x9e8   : > { %v3407_v6 = vpop.f32.mrf.mxu1  ;;  %4224 = vmatprep.subr.mxu1 %v4045_v10  ;;  %v3850_v10 = vrot.slane %v3841_v41, %v6454_v55 }
 0x9e9   : > { %3829 = vmatprep.mubr.f32.mxu1 %v3407_v6  ;;  %4225 = vmatpush1.msra.mxu1 %v4044_v12  ;;  %v4070_v6 = vld [vmem:[#allocation2 + $0x1fb0] sm:$0xff] }
 0x9ea   : > { %3830 = vmatmul.mubr.f32.gmra.mxu1 %v3405_v5  ;;  %4226 = vmatprep.subr.mxu1 %v4043_v2  ;;  %v4069_v2 = vld [vmem:[#allocation2 + $0x1fa8] sm:$0xff] }
 0x9eb   : > { %4227 = vmatpush1.msra.mxu1 %v4042_v21 }
 0x9ec   : > { %4228 = vmatprep.subr.mxu1 %v4041_v23  ;;  %v3846_v23 = vrot.slane %v3841_v41, %v6457_v57  ;;  %v4094_v41 = vld [vmem:[#allocation2 + $0x2068] sm:$0xff] }
 0x9ed   : > { %4229 = vmatpush1.msra.mxu1 %v4040_v26 }
 0x9ee   : > { %4230 = vmatprep.subr.mxu1 %v4039_v28  ;;  %v4068_v28 = vld [vmem:[#allocation2 + $0x1fa0] sm:$0xff] }
 0x9ef   : > { %4231 = vmatpush1.msra.mxu1 %v4038_v29 }
 0x9f0   : > { %4232 = vmatprep.subr.mxu1 %v4037_v30  ;;  %v4067_v30 = vld [vmem:[#allocation2 + $0x1f98] sm:$0xff] }
 0x9f1   : > { %4233 = vmatpush1.msra.mxu1 %v4036_v32 }
 0x9f2   : > { %4234 = vmatprep.subr.mxu1 %v4035_v33  ;;  %v4066_v33 = vld [vmem:[#allocation2 + $0x1f90] sm:$0xff] }
 0x9f3   : > { %4235 = vmatpush1.msra.mxu1 %v4034_v34 }
 0x9f4   : > { %4236 = vmatprep.subr.mxu1 %v4033_v11 }
 0x9f5   : > { %4237 = vmatpush1.msra.mxu1 %v4032_v36  ;;  %v4065_v36 = vld [vmem:[#allocation2 + $0x1f88] sm:$0xff] }
 0x9f6   : > { %4238 = vmatprep.subr.mxu1 %v4031_v38 }
 0x9f7   : > { %4239 = vmatpush1.msra.mxu1 %v4030_v39  ;;  %v4064_v39 = vld [vmem:[#allocation2 + $0x1f80] sm:$0xff] }
 0x9f8   : > { %4240 = vmatprep.subr.mxu1 %v4029_v40 }
 0x9f9   : > { %4241 = vmatpush1.msra.mxu1 %v4028_v42  ;;  %v4063_v42 = vld [vmem:[#allocation2 + $0x1f78] sm:$0xff] }
 0x9fa   : > { %4242 = vmatprep.subr.mxu1 %v4027_v43 }
 0x9fb   : > { %4243 = vmatpush1.msra.mxu1 %v4026_v44  ;;  %v4062_v44 = vld [vmem:[#allocation2 + $0x1f70] sm:$0xff] }
 0x9fc   : > { %4244 = vmatprep.subr.mxu1 %v4025_v45 }
 0x9fd   : > { %4245 = vmatpush1.msra.mxu1 %v4024_v47 }
 0x9fe   : > { %4246 = vmatprep.subr.mxu1 %v4023_v48  ;;  %v4060_v48 = vld [vmem:[#allocation2 + $0x1f60] sm:$0xff] }
 0x9ff   : > { %4247 = vmatpush1.msra.mxu1 %v4022_v22  ;;  %v4059_v22 = vld [vmem:[#allocation2 + $0x1f58] sm:$0xff] }
 0xa00   : > { %4248 = vmatprep.subr.mxu1 %v4021_v49  ;;  %v4112_v49 = vld [vmem:[#allocation2 + $0x20f8] sm:$0xff] }
 0xa01   : > { %4249 = vmatpush1.msra.mxu1 %v4020_v50  ;;  %v4057_v50 = vld [vmem:[#allocation2 + $0x1f48] sm:$0xff] }
 0xa02   : > { %4250 = vmatprep.subr.mxu1 %v4019_v51  ;;  %v4056_v51 = vld [vmem:[#allocation2 + $0x1f40] sm:$0xff] }
 0xa03   : > { %4251 = vmatpush1.msra.mxu1 %v4018_v53  ;;  %v4111_v53 = vld [vmem:[#allocation2 + $0x20f0] sm:$0xff] }
 0xa04   : > { %4252 = vmatprep.subr.mxu1 %v4017_v20  ;;  %v4110_v20 = vld [vmem:[#allocation2 + $0x20e8] sm:$0xff] }
 0xa05   : > { %4253 = vmatpush1.msra.mxu1 %v4016_v54  ;;  %v4053_v54 = vld [vmem:[#allocation2 + $0x1f28] sm:$0xff] }
 0xa06   : > { %4254 = vmatprep.subr.mxu1 %v4079_v15  ;;  %v4108_v15 = vld [vmem:[#allocation2 + $0x20d8] sm:$0xff] }
 0xa07   : > { %4255 = vmatpush2.msra.mxu1 %v4078_v56  ;;  %v4107_v56 = vld [vmem:[#allocation2 + $0x20d0] sm:$0xff] }
 0xa08   : > { %4256 = vmatprep.subr.mxu1 %v4077_v8  ;;  %v4106_v8 = vld [vmem:[#allocation2 + $0x20c8] sm:$0xff] }
 0xa09   : > { %4257 = vmatpush2.msra.mxu1 %v4076_v16  ;;  %v4104_v16 = vld [vmem:[#allocation2 + $0x20b8] sm:$0xff] }
 0xa0a   : > { %4258 = vmatprep.subr.mxu1 %v4075_v24  ;;  %v4103_v24 = vld [vmem:[#allocation2 + $0x20b0] sm:$0xff] }
 0xa0b   : > { %4259 = vmatpush2.msra.mxu1 %v4074_v60  ;;  %v4101_v60 = vld [vmem:[#allocation2 + $0x20a0] sm:$0xff] }
 0xa0c   : > { %4260 = vmatprep.subr.mxu1 %v4073_v61  ;;  %v4100_v61 = vld [vmem:[#allocation2 + $0x2098] sm:$0xff] }
 0xa0d   : > { %4261 = vmatpush2.msra.mxu1 %v4072_v63  ;;  %v4097_v63 = vld [vmem:[#allocation2 + $0x2080] sm:$0xff] }
 0xa0e   : > { %4262 = vmatprep.subr.mxu1 %v4071_v4  ;;  %v4093_v4 = vld [vmem:[#allocation2 + $0x2060] sm:$0xff] }
 0xa0f   : > { %4263 = vmatpush2.msra.mxu1 %v4070_v6  ;;  %v4090_v6 = vld [vmem:[#allocation2 + $0x2048] sm:$0xff] }
 0xa10   : > { %4264 = vmatprep.subr.mxu1 %v4069_v2  ;;  %v4085_v2 = vld [vmem:[#allocation2 + $0x2020] sm:$0xff] }
 0xa11   : > { %4265 = vmatpush2.msra.mxu1 %v4068_v28  ;;  %v4081_v28 = vld [vmem:[#allocation2 + $0x2000] sm:$0xff] }
 0xa12   : > { %4266 = vmatprep.subr.mxu1 %v4067_v30  ;;  %v4143_v30 = vld [vmem:[#allocation2 + $0x21f0] sm:$0xff] }
 0xa13   : > { %4267 = vmatpush2.msra.mxu1 %v4066_v33  ;;  %v4141_v33 = vld [vmem:[#allocation2 + $0x21e0] sm:$0xff] }
 0xa14   : > { %4268 = vmatprep.subr.mxu1 %v4065_v36  ;;  %v4138_v36 = vld [vmem:[#allocation2 + $0x21c8] sm:$0xff] }
 0xa15   : > { %4269 = vmatpush2.msra.mxu1 %v4064_v39  ;;  %v4136_v39 = vld [vmem:[#allocation2 + $0x21b8] sm:$0xff] }
 0xa16   : > { %4270 = vmatprep.subr.mxu1 %v4063_v42  ;;  %v4135_v42 = vld [vmem:[#allocation2 + $0x21b0] sm:$0xff] }
 0xa17   : > { %4271 = vmatpush2.msra.mxu1 %v4062_v44  ;;  %v4134_v44 = vld [vmem:[#allocation2 + $0x21a8] sm:$0xff] }
 0xa22   : > { %v3606_v46 = vpop.f32.mrf.mxu1 }
 0xa24   : > { %v3608_v19 = vpop.f32.mrf.mxu1 }
 0xa26   : > { %v3612_v7 = vpop.f32.mrf.mxu1 }
 0xa28   : > { %v3614_v58 = vpop.f32.mrf.mxu1 }
 0xa9e   : > { %v3683_v52 = vpop.f32.mrf.mxu0 }
 0xa9f   : > { %v3684_v35 = vadd.f32 %v3683_v52, %v3606_v46  ;;  %v4061_v46 = vld [vmem:[#allocation2 + $0x1f68] sm:$0xff]  ;;  %v4055_v52 = vld [vmem:[#allocation2 + $0x1f38] sm:$0xff] }
 0xaa0   : > { %v3685_v25 = vpop.f32.mrf.mxu0  ;;  %4272 = vmatprep.subr.mxu1 %v4061_v46  ;;  %v4132_v46 = vld [vmem:[#allocation2 + $0x2198] sm:$0xff] }
 0xaa1   : > { %v3686_v0 = vadd.f32 %v3685_v25, %v3608_v19  ;;  %4273 = vmatpush2.msra.mxu1 %v4060_v48  ;;  %v4058_v19 = vld [vmem:[#allocation2 + $0x1f50] sm:$0xff]  ;;  %v4109_v25 = vld [vmem:[#allocation2 + $0x20e0] sm:$0xff] }
 0xaa2   : > { %v3689_v31 = vpop.f32.mrf.mxu0  ;;  %4274 = vmatprep.subr.mxu1 %v4059_v22  ;;  %v4131_v48 = vld [vmem:[#allocation2 + $0x2190] sm:$0xff]  ;;  %v4130_v22 = vld [vmem:[#allocation2 + $0x2188] sm:$0xff] }
 0xaa3   : > { %v3690_v3 = vadd.f32 %v3689_v31, %v3612_v7  ;;  %4275 = vmatpush2.msra.mxu1 %v4058_v19  ;;  %v4054_v7 = vld [vmem:[#allocation2 + $0x1f30] sm:$0xff]  ;;  %v4105_v31 = vld [vmem:[#allocation2 + $0x20c0] sm:$0xff]  ;;  %v4128_v19 = vld [vmem:[#allocation2 + $0x2178] sm:$0xff] }
 0xaa4   : > { %v3691_v27 = vpop.f32.mrf.mxu0  ;;  %4276 = vmatprep.subr.mxu1 %v4057_v50  ;;  %v4127_v50 = vld [vmem:[#allocation2 + $0x2170] sm:$0xff] }
 0xaa5   : > { %v3692_v9 = vadd.f32 %v3691_v27, %v3614_v58  ;;  %4277 = vmatpush2.msra.mxu1 %v4056_v51  ;;  %v4052_v58 = vld [vmem:[#allocation2 + $0x1f20] sm:$0xff]  ;;  %v4099_v27 = vld [vmem:[#allocation2 + $0x2090] sm:$0xff]  ;;  %v4126_v51 = vld [vmem:[#allocation2 + $0x2168] sm:$0xff] }
 0xaa6   : > { %v3825_v59 = vpop.f32.mrf.mxu1  ;;  %4278 = vmatprep.subr.mxu1 %v4055_v52  ;;  %v4125_v52 = vld [vmem:[#allocation2 + $0x2160] sm:$0xff] }
 0xaa7   : > { %v3836_v21 = vadd.f32 %v3825_v59, %v3684_v35  ;;  %4279 = vmatpush2.msra.mxu1 %v4054_v7  ;;  %v4102_v59 = vld [vmem:[#allocation2 + $0x20a8] sm:$0xff]  ;;  %v4092_v35 = vld [vmem:[#allocation2 + $0x2058] sm:$0xff] }
 0xaa8   : > { %v3827_v62 = vpop.f32.mrf.mxu1  ;;  %4280 = vmatprep.subr.mxu1 %v4053_v54  ;;  %v4122_v7 = vld [vmem:[#allocation2 + $0x2148] sm:$0xff]  ;;  %v4120_v54 = vld [vmem:[#allocation2 + $0x2138] sm:$0xff] }
 0xaa9   : > { %v3837_v37 = vadd.f32 %v3827_v62, %v3686_v0  ;;  %v3853_v38 = vadd.f32 %v3846_v23, %v3836_v21  ;;  %4281 = vmatpush2.msra.mxu1 %v4052_v58  ;;  %v4098_v62 = vld [vmem:[#allocation2 + $0x2088] sm:$0xff]  ;;  %v4096_v0 = vld [vmem:[#allocation2 + $0x2078] sm:$0xff] }
 0xaaa   : > { %v3831_v5 = vpop.f32.mrf.mxu1  ;;  %v4084_v21 = vld [vmem:[#allocation2 + $0x2018] sm:$0xff] }
 0xaab   : > { %v3838_v12 = vadd.f32 %v3831_v5, %v3690_v3  ;;  %v3854_v34 = vadd.f32 %v3850_v10, %v3837_v37  ;;  %v6587_v47 = vmax.f32 %v3853_v38, 0.0  ;;  %v4095_v3 = vld [vmem:[#allocation2 + $0x2070] sm:$0xff]  ;;  %v4088_v37 = vld [vmem:[#allocation2 + $0x2038] sm:$0xff]  ;;  %v4137_v38 = vld [vmem:[#allocation2 + $0x21c0] sm:$0xff] }
 0xaac   : > { %v3833_v26 = vpop.f32.mrf.mxu1  ;;  %v4091_v5 = vld [vmem:[#allocation2 + $0x2050] sm:$0xff]  ;;  %v4051_v58 = vld [vmem:[#allocation2 + $0x1f18] sm:$0xff] }
 0xaad   : > { %v3839_v29 = vadd.f32 %v3833_v26, %v3692_v9  ;;  %v3855_v32 = vadd.f32 %v3846_v23, %v3838_v12  ;;  %v3858_v45 = vmax.f32 %v3854_v34, 0.0  ;;  %v4089_v9 = vld [vmem:[#allocation2 + $0x2040] sm:$0xff]  ;;  %v4086_v12 = vld [vmem:[#allocation2 + $0x2028] sm:$0xff]  ;;  %v4083_v23 = vld [vmem:[#allocation2 + $0x2010] sm:$0xff]  ;;  %4282 = vmatprep.subr.mxu1 %v4051_v58 }
 0xaae   : > { %v4082_v26 = vld [vmem:[#allocation2 + $0x2008] sm:$0xff]  ;;  %v4140_v34 = vld [vmem:[#allocation2 + $0x21d8] sm:$0xff]  ;;  %v4346_v58 = vld [vmem:[#allocation2 + $0x2370] sm:$0xff] }
 0xaaf   : > { %v3856_v11 = vadd.f32 %v3850_v10, %v3839_v29  ;;  %v6584_v43 = vmax.f32 %v3855_v32, 0.0  ;;  %v4087_v10 = vld [vmem:[#allocation2 + $0x2030] sm:$0xff]  ;;  %v4144_v29 = vld [vmem:[#allocation2 + $0x21f8] sm:$0xff]  ;;  %v4142_v32 = vld [vmem:[#allocation2 + $0x21e8] sm:$0xff] }
 0xab1   : > { %v6582_v40 = vmax.f32 %v3856_v11, 0.0  ;;  %v4139_v11 = vld [vmem:[#allocation2 + $0x21d0] sm:$0xff] }
 0xab3   : > { %3889 = vmatprep.subr.mxu0 %v6582_v40 }
 0xab4   : > { %3890 = vmatpush1.msra.mxu0 %v6584_v43 }
 0xab5   : > { %3891 = vmatprep.subr.mxu0 %v3858_v45 }
 0xab6   : > { %3892 = vmatpush1.msra.mxu0 %v6587_v47 }
 0xab7   : > { %6002 = vmatmul.mubr.msk.f32.vlgmr.msra.gmra.mxu0 %vm354_vm2, %v6425_v13  ;;  %3966 = vmatprep.subr.mxu0 %v6582_v40 }
 0xab8   : > { %3967 = vmatpush1.msra.mxu0 %v6584_v43  ;;  %3931 = vmatprep.mubr.f32.mxu0 %v6257_v1 }
 0xab9   : > { %3968 = vmatprep.subr.mxu0 %v3858_v45 }
 0xaba   : > { %3969 = vmatpush1.msra.mxu0 %v6587_v47 }
 0xabb   : > { %6003 = vmatmul.mubr.msk.f32.gmra.mxu0 %vm354_vm2, %v6439_v17  ;;  %4145 = vmatprep.subr.mxu0 %v4112_v49  ;;  %v4129_v49 = vld [vmem:[#allocation2 + $0x2180] sm:$0xff] }
 0xabc   : > { %4002 = vmatprep.mubr.f32.mxu0 %v6257_v1 }
 0xabf   : > { %6004 = vmatmul.mubr.msk.f32.vlgmr.msra.gmra.mxu0 %vm354_vm2, %v6428_v14 }
 0xac0   : > { %4146 = vmatpush1.msra.mxu0 %v4111_v53  ;;  %4008 = vmatprep.mubr.f32.mxu0 %v6257_v1  ;;  %v4124_v53 = vld [vmem:[#allocation2 + $0x2158] sm:$0xff] }
 0xac1   : > { %4147 = vmatprep.subr.mxu0 %v4110_v20  ;;  %v4123_v20 = vld [vmem:[#allocation2 + $0x2150] sm:$0xff] }
 0xac2   : > { %4148 = vmatpush1.msra.mxu0 %v4109_v25  ;;  %v4121_v25 = vld [vmem:[#allocation2 + $0x2140] sm:$0xff] }
 0xac3   : > { %4149 = vmatprep.subr.mxu0 %v4108_v15  ;;  %6005 = vmatmul.mubr.msk.f32.gmra.mxu0 %vm354_vm2, %v6442_v18  ;;  %v4119_v15 = vld [vmem:[#allocation2 + $0x2130] sm:$0xff] }
 0xac4   : > { %4150 = vmatpush1.msra.mxu0 %v4107_v56  ;;  %4209 = vmatprep.mubr.f32.mxu0 %v3858_v45  ;;  %v4133_v45 = vld [vmem:[#allocation2 + $0x21a0] sm:$0xff]  ;;  %v4118_v56 = vld [vmem:[#allocation2 + $0x2128] sm:$0xff] }
 0xac5   : > { %4151 = vmatprep.subr.mxu0 %v4106_v8  ;;  %v4117_v8 = vld [vmem:[#allocation2 + $0x2120] sm:$0xff] }
 0xac6   : > { %4152 = vmatpush1.msra.mxu0 %v4105_v31  ;;  %v4050_v31 = vld [vmem:[#allocation2 + $0x1f10] sm:$0xff] }
 0xac7   : > { %4153 = vmatprep.subr.mxu0 %v4104_v16  ;;  %v4116_v16 = vld [vmem:[#allocation2 + $0x2118] sm:$0xff]  ;;  %4283 = vmatpush2.msra.mxu1 %v4050_v31  ;;  %v4345_v31 = vld [vmem:[#allocation2 + $0x2368] sm:$0xff] }
 0xac8   : > { %4154 = vmatpush1.msra.mxu0 %v4103_v24  ;;  %v4115_v24 = vld [vmem:[#allocation2 + $0x2110] sm:$0xff] }
 0xac9   : > { %4155 = vmatprep.subr.mxu0 %v4102_v59  ;;  %v4049_v59 = vld [vmem:[#allocation2 + $0x1f08] sm:$0xff] }
 0xaca   : > { %4156 = vmatpush1.msra.mxu0 %v4101_v60  ;;  %v4048_v60 = vld [vmem:[#allocation2 + $0x1f00] sm:$0xff]  ;;  %4284 = vmatprep.subr.mxu1 %v4049_v59  ;;  %v4342_v59 = vld [vmem:[#allocation2 + $0x2350] sm:$0xff] }
 0xacb   : > { %4157 = vmatprep.subr.mxu0 %v4100_v61  ;;  %v4114_v61 = vld [vmem:[#allocation2 + $0x2108] sm:$0xff]  ;;  %4285 = vmatpush2.msra.mxu1 %v4048_v60 }
 0xacc   : > { %4158 = vmatpush1.msra.mxu0 %v4099_v27  ;;  %v4113_v27 = vld [vmem:[#allocation2 + $0x2100] sm:$0xff]  ;;  %v4341_v60 = vld [vmem:[#allocation2 + $0x2348] sm:$0xff] }
 0xacd   : > { %4159 = vmatprep.subr.mxu0 %v4098_v62  ;;  %v4331_v62 = vld [vmem:[#allocation2 + $0x22f8] sm:$0xff] }
 0xace   : > { %4160 = vmatpush1.msra.mxu0 %v4097_v63  ;;  %v4330_v63 = vld [vmem:[#allocation2 + $0x22f0] sm:$0xff] }
 0xacf   : > { %4161 = vmatprep.subr.mxu0 %v4096_v0  ;;  %v4329_v0 = vld [vmem:[#allocation2 + $0x22e8] sm:$0xff] }
 0xad0   : > { %4162 = vmatpush1.msra.mxu0 %v4095_v3  ;;  %v4328_v3 = vld [vmem:[#allocation2 + $0x22e0] sm:$0xff] }
 0xad1   : > { %4163 = vmatprep.subr.mxu0 %v4094_v41  ;;  %v4327_v41 = vld [vmem:[#allocation2 + $0x22d8] sm:$0xff] }
 0xad2   : > { %4164 = vmatpush1.msra.mxu0 %v4093_v4  ;;  %v4326_v4 = vld [vmem:[#allocation2 + $0x22d0] sm:$0xff] }
 0xad3   : > { %4165 = vmatprep.subr.mxu0 %v4092_v35  ;;  %v4325_v35 = vld [vmem:[#allocation2 + $0x22c8] sm:$0xff] }
 0xad4   : > { %4166 = vmatpush1.msra.mxu0 %v4091_v5  ;;  %v4324_v5 = vld [vmem:[#allocation2 + $0x22c0] sm:$0xff] }
 0xad5   : > { %4167 = vmatprep.subr.mxu0 %v4090_v6  ;;  %v4323_v6 = vld [vmem:[#allocation2 + $0x22b8] sm:$0xff] }
 0xad6   : > { %4168 = vmatpush1.msra.mxu0 %v4089_v9  ;;  %v4322_v9 = vld [vmem:[#allocation2 + $0x22b0] sm:$0xff] }
 0xad7   : > { %4169 = vmatprep.subr.mxu0 %v4088_v37  ;;  %v4320_v37 = vld [vmem:[#allocation2 + $0x22a0] sm:$0xff] }
 0xad8   : > { %4170 = vmatpush1.msra.mxu0 %v4087_v10  ;;  %v4318_v10 = vld [vmem:[#allocation2 + $0x2290] sm:$0xff] }
 0xad9   : > { %4171 = vmatprep.subr.mxu0 %v4086_v12  ;;  %v4317_v12 = vld [vmem:[#allocation2 + $0x2288] sm:$0xff] }
 0xada   : > { %4172 = vmatpush1.msra.mxu0 %v4085_v2  ;;  %v4316_v2 = vld [vmem:[#allocation2 + $0x2280] sm:$0xff] }
 0xadb   : > { %4173 = vmatprep.subr.mxu0 %v4084_v21  ;;  %v4314_v21 = vld [vmem:[#allocation2 + $0x2270] sm:$0xff] }
 0xadc   : > { %4174 = vmatpush1.msra.mxu0 %v4083_v23  ;;  %v4313_v23 = vld [vmem:[#allocation2 + $0x2268] sm:$0xff] }
 0xadd   : > { %4175 = vmatprep.subr.mxu0 %v4082_v26  ;;  %v4312_v26 = vld [vmem:[#allocation2 + $0x2260] sm:$0xff] }
 0xade   : > { %4176 = vmatpush1.msra.mxu0 %v4081_v28  ;;  %v4311_v28 = vld [vmem:[#allocation2 + $0x2258] sm:$0xff] }
 0xadf   : > { %4177 = vmatprep.subr.mxu0 %v4144_v29  ;;  %v4310_v29 = vld [vmem:[#allocation2 + $0x2250] sm:$0xff] }
 0xae0   : > { %4178 = vmatpush2.msra.mxu0 %v4143_v30  ;;  %v4309_v30 = vld [vmem:[#allocation2 + $0x2248] sm:$0xff] }
 0xae1   : > { %4179 = vmatprep.subr.mxu0 %v4142_v32  ;;  %v4308_v32 = vld [vmem:[#allocation2 + $0x2240] sm:$0xff] }
 0xae2   : > { %4180 = vmatpush2.msra.mxu0 %v4141_v33  ;;  %v4307_v33 = vld [vmem:[#allocation2 + $0x2238] sm:$0xff] }
 0xae3   : > { %4181 = vmatprep.subr.mxu0 %v4140_v34  ;;  %v4306_v34 = vld [vmem:[#allocation2 + $0x2230] sm:$0xff] }
 0xae4   : > { %4182 = vmatpush2.msra.mxu0 %v4139_v11  ;;  %v4305_v11 = vld [vmem:[#allocation2 + $0x2228] sm:$0xff] }
 0xae5   : > { %4183 = vmatprep.subr.mxu0 %v4138_v36  ;;  %v4304_v36 = vld [vmem:[#allocation2 + $0x2220] sm:$0xff] }
 0xae6   : > { %4184 = vmatpush2.msra.mxu0 %v4137_v38  ;;  %v4303_v38 = vld [vmem:[#allocation2 + $0x2218] sm:$0xff] }
 0xae7   : > { %4185 = vmatprep.subr.mxu0 %v4136_v39  ;;  %v4302_v39 = vld [vmem:[#allocation2 + $0x2210] sm:$0xff] }
 0xae8   : > { %4186 = vmatpush2.msra.mxu0 %v4135_v42  ;;  %v4301_v42 = vld [vmem:[#allocation2 + $0x2208] sm:$0xff] }
 0xae9   : > { %4187 = vmatprep.subr.mxu0 %v4134_v44  ;;  %v4300_v44 = vld [vmem:[#allocation2 + $0x2200] sm:$0xff] }
 0xaea   : > { %4188 = vmatpush2.msra.mxu0 %v4133_v45  ;;  %v4363_v45 = vld [vmem:[#allocation2 + $0x23f8] sm:$0xff] }
 0xaeb   : > { %4189 = vmatprep.subr.mxu0 %v4132_v46  ;;  %v4362_v46 = vld [vmem:[#allocation2 + $0x23f0] sm:$0xff] }
 0xaec   : > { %4190 = vmatpush2.msra.mxu0 %v4131_v48  ;;  %v4361_v48 = vld [vmem:[#allocation2 + $0x23e8] sm:$0xff] }
 0xaed   : > { %4191 = vmatprep.subr.mxu0 %v4130_v22  ;;  %v4360_v22 = vld [vmem:[#allocation2 + $0x23e0] sm:$0xff] }
 0xaee   : > { %4192 = vmatpush2.msra.mxu0 %v4129_v49  ;;  %v4359_v49 = vld [vmem:[#allocation2 + $0x23d8] sm:$0xff] }
 0xaef   : > { %4193 = vmatprep.subr.mxu0 %v4128_v19  ;;  %v4358_v19 = vld [vmem:[#allocation2 + $0x23d0] sm:$0xff] }
 0xaf0   : > { %4194 = vmatpush2.msra.mxu0 %v4127_v50  ;;  %v4357_v50 = vld [vmem:[#allocation2 + $0x23c8] sm:$0xff] }
 0xaf1   : > { %4195 = vmatprep.subr.mxu0 %v4126_v51  ;;  %v4356_v51 = vld [vmem:[#allocation2 + $0x23c0] sm:$0xff] }
 0xaf2   : > { %4196 = vmatpush2.msra.mxu0 %v4125_v52  ;;  %v4355_v52 = vld [vmem:[#allocation2 + $0x23b8] sm:$0xff] }
 0xaf3   : > { %4197 = vmatprep.subr.mxu0 %v4124_v53  ;;  %v4354_v53 = vld [vmem:[#allocation2 + $0x23b0] sm:$0xff] }
 0xaf4   : > { %4198 = vmatpush2.msra.mxu0 %v4123_v20  ;;  %v4353_v20 = vld [vmem:[#allocation2 + $0x23a8] sm:$0xff] }
 0xaf5   : > { %4199 = vmatprep.subr.mxu0 %v4122_v7  ;;  %v4352_v7 = vld [vmem:[#allocation2 + $0x23a0] sm:$0xff] }
 0xaf6   : > { %4200 = vmatpush2.msra.mxu0 %v4121_v25  ;;  %v4351_v25 = vld [vmem:[#allocation2 + $0x2398] sm:$0xff] }
 0xaf7   : > { %4201 = vmatprep.subr.mxu0 %v4120_v54  ;;  %v4350_v54 = vld [vmem:[#allocation2 + $0x2390] sm:$0xff] }
 0xaf8   : > { %4202 = vmatpush2.msra.mxu0 %v4119_v15  ;;  %v4349_v15 = vld [vmem:[#allocation2 + $0x2388] sm:$0xff] }
 0xaf9   : > { %4203 = vmatprep.subr.mxu0 %v4118_v56  ;;  %v4348_v56 = vld [vmem:[#allocation2 + $0x2380] sm:$0xff] }
 0xafa   : > { %4204 = vmatpush2.msra.mxu0 %v4117_v8  ;;  %v4347_v8 = vld [vmem:[#allocation2 + $0x2378] sm:$0xff] }
 0xafb   : > { %4205 = vmatprep.subr.mxu0 %v4116_v16  ;;  %v4344_v16 = vld [vmem:[#allocation2 + $0x2360] sm:$0xff] }
 0xafc   : > { %4206 = vmatpush2.msra.mxu0 %v4115_v24  ;;  %v4343_v24 = vld [vmem:[#allocation2 + $0x2358] sm:$0xff] }
 0xafd   : > { %4207 = vmatprep.subr.mxu0 %v4114_v61  ;;  %v4340_v61 = vld [vmem:[#allocation2 + $0x2340] sm:$0xff] }
 0xafe   : > { %4208 = vmatpush2.msra.mxu0 %v4113_v27  ;;  %v4339_v27 = vld [vmem:[#allocation2 + $0x2338] sm:$0xff] }
 0xaff   : > { %4210 = vmatmul.mubr.f32.vlgmr.msra.gmra.mxu0 %v6587_v47  ;;  %4364 = vmatprep.subr.mxu0 %v4331_v62  ;;  %v4321_v47 = vld [vmem:[#allocation2 + $0x22a8] sm:$0xff]  ;;  %v4338_v62 = vld [vmem:[#allocation2 + $0x2330] sm:$0xff] }
 0xb00   : > { %4215 = vmatprep.mubr.f32.mxu0 %v6582_v40  ;;  %4365 = vmatpush1.msra.mxu0 %v4330_v63  ;;  %v4319_v40 = vld [vmem:[#allocation2 + $0x2298] sm:$0xff]  ;;  %v4337_v63 = vld [vmem:[#allocation2 + $0x2328] sm:$0xff] }
 0xb01   : > { %4366 = vmatprep.subr.mxu0 %v4329_v0  ;;  %v4336_v0 = vld [vmem:[#allocation2 + $0x2320] sm:$0xff] }
 0xb02   : > { %4367 = vmatpush1.msra.mxu0 %v4328_v3  ;;  %v4335_v3 = vld [vmem:[#allocation2 + $0x2318] sm:$0xff] }
 0xb03   : > { %4216 = vmatmul.mubr.f32.gmra.mxu0 %v6584_v43  ;;  %4368 = vmatprep.subr.mxu0 %v4327_v41  ;;  %v4315_v43 = vld [vmem:[#allocation2 + $0x2278] sm:$0xff]  ;;  %v4334_v41 = vld [vmem:[#allocation2 + $0x2310] sm:$0xff] }
 0xb04   : > { %4369 = vmatpush1.msra.mxu0 %v4326_v4  ;;  %v4333_v4 = vld [vmem:[#allocation2 + $0x2308] sm:$0xff] }
 0xb05   : > { %4370 = vmatprep.subr.mxu0 %v4325_v35  ;;  %v4332_v35 = vld [vmem:[#allocation2 + $0x2300] sm:$0xff] }
 0xb06   : > { %4371 = vmatpush1.msra.mxu0 %v4324_v5 }
 0xb07   : > { %4372 = vmatprep.subr.mxu0 %v4323_v6 }
 0xb08   : > { %4373 = vmatpush1.msra.mxu0 %v4322_v9 }
 0xb09   : > { %4374 = vmatprep.subr.mxu0 %v4321_v47 }
 0xb0a   : > { %4375 = vmatpush1.msra.mxu0 %v4320_v37 }
 0xb0b   : > { %4376 = vmatprep.subr.mxu0 %v4319_v40 }
 0xb0c   : > { %4377 = vmatpush1.msra.mxu0 %v4318_v10 }
 0xb0d   : > { %4378 = vmatprep.subr.mxu0 %v4317_v12 }
 0xb0e   : > { %4379 = vmatpush1.msra.mxu0 %v4316_v2  ;;  %v4652_v2 = vld [vmem:[#allocation2 + $0x24f8] sm:$0xff] }
 0xb0f   : > { %4380 = vmatprep.subr.mxu0 %v4315_v43  ;;  %v4651_v43 = vld [vmem:[#allocation2 + $0x24f0] sm:$0xff] }
 0xb10   : > { %4381 = vmatpush1.msra.mxu0 %v4314_v21  ;;  %v4650_v21 = vld [vmem:[#allocation2 + $0x24e8] sm:$0xff] }
 0xb11   : > { %4382 = vmatprep.subr.mxu0 %v4313_v23  ;;  %v4649_v23 = vld [vmem:[#allocation2 + $0x24e0] sm:$0xff] }
 0xb12   : > { %4383 = vmatpush1.msra.mxu0 %v4312_v26  ;;  %v4648_v26 = vld [vmem:[#allocation2 + $0x24d8] sm:$0xff] }
 0xb13   : > { %4384 = vmatprep.subr.mxu0 %v4311_v28  ;;  %v4647_v28 = vld [vmem:[#allocation2 + $0x24d0] sm:$0xff] }
 0xb14   : > { %4385 = vmatpush1.msra.mxu0 %v4310_v29  ;;  %v4646_v29 = vld [vmem:[#allocation2 + $0x24c8] sm:$0xff] }
 0xb15   : > { %4386 = vmatprep.subr.mxu0 %v4309_v30  ;;  %v4645_v30 = vld [vmem:[#allocation2 + $0x24c0] sm:$0xff] }
 0xb16   : > { %4387 = vmatpush1.msra.mxu0 %v4308_v32  ;;  %v4644_v32 = vld [vmem:[#allocation2 + $0x24b8] sm:$0xff] }
 0xb17   : > { %4388 = vmatprep.subr.mxu0 %v4307_v33  ;;  %v4643_v33 = vld [vmem:[#allocation2 + $0x24b0] sm:$0xff] }
 0xb18   : > { %4389 = vmatpush1.msra.mxu0 %v4306_v34  ;;  %v4642_v34 = vld [vmem:[#allocation2 + $0x24a8] sm:$0xff] }
 0xb19   : > { %4390 = vmatprep.subr.mxu0 %v4305_v11  ;;  %v4641_v11 = vld [vmem:[#allocation2 + $0x24a0] sm:$0xff] }
 0xb1a   : > { %4391 = vmatpush1.msra.mxu0 %v4304_v36  ;;  %v4640_v36 = vld [vmem:[#allocation2 + $0x2498] sm:$0xff] }
 0xb1b   : > { %4392 = vmatprep.subr.mxu0 %v4303_v38  ;;  %v4639_v38 = vld [vmem:[#allocation2 + $0x2490] sm:$0xff] }
 0xb1c   : > { %4393 = vmatpush1.msra.mxu0 %v4302_v39  ;;  %v4638_v39 = vld [vmem:[#allocation2 + $0x2488] sm:$0xff] }
 0xb1d   : > { %4394 = vmatprep.subr.mxu0 %v4301_v42  ;;  %v4637_v42 = vld [vmem:[#allocation2 + $0x2480] sm:$0xff] }
 0xb1e   : > { %4395 = vmatpush1.msra.mxu0 %v4300_v44  ;;  %v4636_v44 = vld [vmem:[#allocation2 + $0x2478] sm:$0xff] }
 0xb1f   : > { %4396 = vmatprep.subr.mxu0 %v4363_v45  ;;  %v4635_v45 = vld [vmem:[#allocation2 + $0x2470] sm:$0xff] }
 0xb20   : > { %4397 = vmatpush2.msra.mxu0 %v4362_v46  ;;  %v4634_v46 = vld [vmem:[#allocation2 + $0x2468] sm:$0xff] }
 0xb21   : > { %4398 = vmatprep.subr.mxu0 %v4361_v48  ;;  %v4633_v48 = vld [vmem:[#allocation2 + $0x2460] sm:$0xff] }
 0xb22   : > { %4399 = vmatpush2.msra.mxu0 %v4360_v22  ;;  %v4632_v22 = vld [vmem:[#allocation2 + $0x2458] sm:$0xff] }
 0xb23   : > { %4400 = vmatprep.subr.mxu0 %v4359_v49  ;;  %v4631_v49 = vld [vmem:[#allocation2 + $0x2450] sm:$0xff] }
 0xb24   : > { %4401 = vmatpush2.msra.mxu0 %v4358_v19  ;;  %v4630_v19 = vld [vmem:[#allocation2 + $0x2448] sm:$0xff] }
 0xb25   : > { %4402 = vmatprep.subr.mxu0 %v4357_v50 }
 0xb26   : > { %4403 = vmatpush2.msra.mxu0 %v4356_v51  ;;  %v4629_v51 = vld [vmem:[#allocation2 + $0x2440] sm:$0xff] }
 0xb27   : > { %4404 = vmatprep.subr.mxu0 %v4355_v52  ;;  %v4628_v52 = vld [vmem:[#allocation2 + $0x2438] sm:$0xff] }
 0xb28   : > { %4405 = vmatpush2.msra.mxu0 %v4354_v53  ;;  %v4627_v53 = vld [vmem:[#allocation2 + $0x2430] sm:$0xff] }
 0xb29   : > { %4406 = vmatprep.subr.mxu0 %v4353_v20  ;;  %v4626_v20 = vld [vmem:[#allocation2 + $0x2428] sm:$0xff] }
 0xb2a   : > { %4407 = vmatpush2.msra.mxu0 %v4352_v7 }
 0xb2b   : > { %4408 = vmatprep.subr.mxu0 %v4351_v25  ;;  %v4625_v25 = vld [vmem:[#allocation2 + $0x2420] sm:$0xff] }
 0xb2c   : > { %4409 = vmatpush2.msra.mxu0 %v4350_v54  ;;  %v4624_v54 = vld [vmem:[#allocation2 + $0x2418] sm:$0xff] }
 0xb2d   : > { %4410 = vmatprep.subr.mxu0 %v4349_v15 }
 0xb2e   : > { %4411 = vmatpush2.msra.mxu0 %v4348_v56  ;;  %v4623_v56 = vld [vmem:[#allocation2 + $0x2410] sm:$0xff] }
 0xb2f   : > { %4412 = vmatprep.subr.mxu0 %v4347_v8  ;;  %v4622_v8 = vld [vmem:[#allocation2 + $0x2408] sm:$0xff] }
 0xb30   : > { %4413 = vmatpush2.msra.mxu0 %v4346_v58 }
 0xb31   : > { %4414 = vmatprep.subr.mxu0 %v4345_v31 }
 0xb32   : > { %4415 = vmatpush2.msra.mxu0 %v4344_v16  ;;  %v4621_v16 = vld [vmem:[#allocation2 + $0x2400] sm:$0xff] }
 0xb33   : > { %4416 = vmatprep.subr.mxu0 %v4343_v24  ;;  %v4684_v24 = vld [vmem:[#allocation2 + $0x25f8] sm:$0xff] }
 0xb34   : > { %4417 = vmatpush2.msra.mxu0 %v4342_v59  ;;  %v4683_v59 = vld [vmem:[#allocation2 + $0x25f0] sm:$0xff] }
 0xb35   : > { %4418 = vmatprep.subr.mxu0 %v4341_v60  ;;  %v4682_v60 = vld [vmem:[#allocation2 + $0x25e8] sm:$0xff] }
 0xb36   : > { %4419 = vmatpush2.msra.mxu0 %v4340_v61 }
 0xb37   : > { %4420 = vmatprep.subr.mxu0 %v4339_v27 }
 0xb38   : > { %4421 = vmatpush2.msra.mxu0 %v4338_v62  ;;  %v4681_v62 = vld [vmem:[#allocation2 + $0x25e0] sm:$0xff] }
 0xb39   : > { %4422 = vmatprep.subr.mxu0 %v4337_v63  ;;  %v4680_v63 = vld [vmem:[#allocation2 + $0x25d8] sm:$0xff] }
 0xb3a   : > { %4423 = vmatpush2.msra.mxu0 %v4336_v0 }
 0xb3b   : > { %4424 = vmatprep.subr.mxu0 %v4335_v3  ;;  %v4679_v3 = vld [vmem:[#allocation2 + $0x25d0] sm:$0xff] }
 0xb3c   : > { %4425 = vmatpush2.msra.mxu0 %v4334_v41  ;;  %v4678_v41 = vld [vmem:[#allocation2 + $0x25c8] sm:$0xff] }
 0xb3d   : > { %4426 = vmatprep.subr.mxu0 %v4333_v4 }
 0xb3e   : > { %4427 = vmatpush2.msra.mxu0 %v4332_v35 }
 0xb3f   : > { %4827 = vmatprep.subr.mxu0 %v4652_v2 }
 0xb77   : > { %v3927_v5 = vpop.f32.mrf.mxu0 }
 0xb79   : > { %v3929_v6 = vpop.f32.mrf.mxu0 }
 0xb7a   : > { %4286 = vmatprep.mubr.f32.mxu1 %v3929_v6 }
 0xb7b   : > { %v3933_v9 = vpop.f32.mrf.mxu0  ;;  %4287 = vmatmul.mubr.f32.vlgmr.msra.gmra.mxu1 %v3927_v5  ;;  %v4677_v5 = vld [vmem:[#allocation2 + $0x25c0] sm:$0xff] }
 0xb7d   : > { %v3935_v47 = vpop.f32.mrf.mxu0 }
 0xb7e   : > { %4292 = vmatprep.mubr.f32.mxu1 %v3935_v47  ;;  %v4446_v47 = vld [vmem:[#allocation4 + $0xa] sm:$0x3] }
 0xb7f   : > { %v4004_v37 = vpop.f32.mrf.mxu0  ;;  %4293 = vmatmul.mubr.f32.gmra.mxu1 %v3933_v9 }
 0xb80   : > { %4530 = vmatprep.mubr.f32.mxu1 %v6257_v1 }
 0xb81   : > { %v4006_v40 = vpop.f32.mrf.mxu0 }
 0xb82   : > { %4428 = vmatprep.mubr.f32.mxu0 %v4006_v40 }
 0xb83   : > { %v4010_v10 = vpop.f32.mrf.mxu0  ;;  %4429 = vmatmul.mubr.f32.vlgmr.msra.gmra.mxu0 %v4004_v37  ;;  %v4676_v37 = vld [vmem:[#allocation2 + $0x25b8] sm:$0xff] }
 0xb84   : > { %4828 = vmatpush1.msra.mxu0 %v4651_v43 }
 0xb85   : > { %v4012_v12 = vpop.f32.mrf.mxu0  ;;  %4829 = vmatprep.subr.mxu0 %v4650_v21  ;;  %v4455_v21 = vrot.slane %v4446_v47, %v6454_v55 }
 0xb86   : > { %4434 = vmatprep.mubr.f32.mxu0 %v4012_v12  ;;  %4830 = vmatpush1.msra.mxu0 %v4649_v23  ;;  %v4675_v12 = vld [vmem:[#allocation2 + $0x25b0] sm:$0xff] }
 0xb87   : > { %4435 = vmatmul.mubr.f32.gmra.mxu0 %v4010_v10  ;;  %4831 = vmatprep.subr.mxu0 %v4648_v26  ;;  %v4674_v26 = vld [vmem:[#allocation2 + $0x25a8] sm:$0xff] }
 0xb88   : > { %4832 = vmatpush1.msra.mxu0 %v4647_v28 }
 0xb89   : > { %4833 = vmatprep.subr.mxu0 %v4646_v29  ;;  %v4451_v29 = vrot.slane %v4446_v47, %v6457_v57  ;;  %v4699_v47 = vld [vmem:[#allocation2 + $0x2668] sm:$0xff] }
 0xb8a   : > { %4834 = vmatpush1.msra.mxu0 %v4645_v30 }
 0xb8b   : > { %4835 = vmatprep.subr.mxu0 %v4644_v32  ;;  %v4673_v32 = vld [vmem:[#allocation2 + $0x25a0] sm:$0xff] }
 0xb8c   : > { %4836 = vmatpush1.msra.mxu0 %v4643_v33 }
 0xb8d   : > { %4837 = vmatprep.subr.mxu0 %v4642_v34  ;;  %v4672_v34 = vld [vmem:[#allocation2 + $0x2598] sm:$0xff] }
 0xb8e   : > { %4838 = vmatpush1.msra.mxu0 %v4641_v11 }
 0xb8f   : > { %4839 = vmatprep.subr.mxu0 %v4640_v36  ;;  %v4671_v36 = vld [vmem:[#allocation2 + $0x2590] sm:$0xff] }
 0xb90   : > { %4840 = vmatpush1.msra.mxu0 %v4639_v38 }
 0xb91   : > { %4841 = vmatprep.subr.mxu0 %v4638_v39 }
 0xb92   : > { %4842 = vmatpush1.msra.mxu0 %v4637_v42  ;;  %v4670_v42 = vld [vmem:[#allocation2 + $0x2588] sm:$0xff] }
 0xb93   : > { %4843 = vmatprep.subr.mxu0 %v4636_v44 }
 0xb94   : > { %4844 = vmatpush1.msra.mxu0 %v4635_v45  ;;  %v4669_v45 = vld [vmem:[#allocation2 + $0x2580] sm:$0xff] }
 0xb95   : > { %4845 = vmatprep.subr.mxu0 %v4634_v46 }
 0xb96   : > { %4846 = vmatpush1.msra.mxu0 %v4633_v48  ;;  %v4668_v48 = vld [vmem:[#allocation2 + $0x2578] sm:$0xff] }
 0xb97   : > { %4847 = vmatprep.subr.mxu0 %v4632_v22 }
 0xb98   : > { %4848 = vmatpush1.msra.mxu0 %v4631_v49  ;;  %v4667_v49 = vld [vmem:[#allocation2 + $0x2570] sm:$0xff] }
 0xb99   : > { %4849 = vmatprep.subr.mxu0 %v4630_v19 }
 0xb9a   : > { %4850 = vmatpush1.msra.mxu0 %v4629_v51 }
 0xb9b   : > { %4851 = vmatprep.subr.mxu0 %v4628_v52  ;;  %v4665_v52 = vld [vmem:[#allocation2 + $0x2560] sm:$0xff] }
 0xb9c   : > { %4852 = vmatpush1.msra.mxu0 %v4627_v53  ;;  %v4664_v53 = vld [vmem:[#allocation2 + $0x2558] sm:$0xff] }
 0xb9d   : > { %4853 = vmatprep.subr.mxu0 %v4626_v20  ;;  %v4717_v20 = vld [vmem:[#allocation2 + $0x26f8] sm:$0xff] }
 0xb9e   : > { %4854 = vmatpush1.msra.mxu0 %v4625_v25  ;;  %v4662_v25 = vld [vmem:[#allocation2 + $0x2548] sm:$0xff] }
 0xb9f   : > { %4855 = vmatprep.subr.mxu0 %v4624_v54  ;;  %v4661_v54 = vld [vmem:[#allocation2 + $0x2540] sm:$0xff] }
 0xba0   : > { %4856 = vmatpush1.msra.mxu0 %v4623_v56  ;;  %v4716_v56 = vld [vmem:[#allocation2 + $0x26f0] sm:$0xff] }
 0xba1   : > { %4857 = vmatprep.subr.mxu0 %v4622_v8  ;;  %v4715_v8 = vld [vmem:[#allocation2 + $0x26e8] sm:$0xff] }
 0xba2   : > { %4858 = vmatpush1.msra.mxu0 %v4621_v16  ;;  %v4658_v16 = vld [vmem:[#allocation2 + $0x2528] sm:$0xff] }
 0xba3   : > { %4859 = vmatprep.subr.mxu0 %v4684_v24  ;;  %v4713_v24 = vld [vmem:[#allocation2 + $0x26d8] sm:$0xff] }
 0xba4   : > { %4860 = vmatpush2.msra.mxu0 %v4683_v59  ;;  %v4712_v59 = vld [vmem:[#allocation2 + $0x26d0] sm:$0xff] }
 0xba5   : > { %4861 = vmatprep.subr.mxu0 %v4682_v60  ;;  %v4711_v60 = vld [vmem:[#allocation2 + $0x26c8] sm:$0xff] }
 0xba6   : > { %4862 = vmatpush2.msra.mxu0 %v4681_v62  ;;  %v4709_v62 = vld [vmem:[#allocation2 + $0x26b8] sm:$0xff] }
 0xba7   : > { %4863 = vmatprep.subr.mxu0 %v4680_v63  ;;  %v4708_v63 = vld [vmem:[#allocation2 + $0x26b0] sm:$0xff] }
 0xba8   : > { %4864 = vmatpush2.msra.mxu0 %v4679_v3  ;;  %v4706_v3 = vld [vmem:[#allocation2 + $0x26a0] sm:$0xff] }
 0xba9   : > { %4865 = vmatprep.subr.mxu0 %v4678_v41  ;;  %v4705_v41 = vld [vmem:[#allocation2 + $0x2698] sm:$0xff] }
 0xbaa   : > { %4866 = vmatpush2.msra.mxu0 %v4677_v5  ;;  %v4702_v5 = vld [vmem:[#allocation2 + $0x2680] sm:$0xff] }
 0xbab   : > { %4867 = vmatprep.subr.mxu0 %v4676_v37  ;;  %v4698_v37 = vld [vmem:[#allocation2 + $0x2660] sm:$0xff] }
 0xbac   : > { %4868 = vmatpush2.msra.mxu0 %v4675_v12  ;;  %v4695_v12 = vld [vmem:[#allocation2 + $0x2648] sm:$0xff] }
 0xbad   : > { %4869 = vmatprep.subr.mxu0 %v4674_v26  ;;  %v4690_v26 = vld [vmem:[#allocation2 + $0x2620] sm:$0xff] }
 0xbae   : > { %4870 = vmatpush2.msra.mxu0 %v4673_v32  ;;  %v4686_v32 = vld [vmem:[#allocation2 + $0x2600] sm:$0xff] }
 0xbaf   : > { %4871 = vmatprep.subr.mxu0 %v4672_v34  ;;  %v4748_v34 = vld [vmem:[#allocation2 + $0x27f0] sm:$0xff] }
 0xbb0   : > { %4872 = vmatpush2.msra.mxu0 %v4671_v36  ;;  %v4746_v36 = vld [vmem:[#allocation2 + $0x27e0] sm:$0xff] }
 0xbb1   : > { %4873 = vmatprep.subr.mxu0 %v4670_v42  ;;  %v4743_v42 = vld [vmem:[#allocation2 + $0x27c8] sm:$0xff] }
 0xbb2   : > { %4874 = vmatpush2.msra.mxu0 %v4669_v45  ;;  %v4741_v45 = vld [vmem:[#allocation2 + $0x27b8] sm:$0xff] }
 0xbb3   : > { %4875 = vmatprep.subr.mxu0 %v4668_v48  ;;  %v4740_v48 = vld [vmem:[#allocation2 + $0x27b0] sm:$0xff] }
 0xbb4   : > { %4876 = vmatpush2.msra.mxu0 %v4667_v49  ;;  %v4739_v49 = vld [vmem:[#allocation2 + $0x27a8] sm:$0xff] }
 0xbbf   : > { %v4211_v50 = vpop.f32.mrf.mxu0 }
 0xbc1   : > { %v4213_v7 = vpop.f32.mrf.mxu0 }
 0xbc3   : > { %v4217_v58 = vpop.f32.mrf.mxu0 }
 0xbc5   : > { %v4219_v61 = vpop.f32.mrf.mxu0 }
 0xc3b   : > { %v4288_v15 = vpop.f32.mrf.mxu1 }
 0xc3c   : > { %v4289_v40 = vadd.f32 %v4288_v15, %v4211_v50  ;;  %v4666_v50 = vld [vmem:[#allocation2 + $0x2568] sm:$0xff]  ;;  %v4660_v15 = vld [vmem:[#allocation2 + $0x2538] sm:$0xff] }
 0xc3d   : > { %v4290_v31 = vpop.f32.mrf.mxu1  ;;  %4877 = vmatprep.subr.mxu0 %v4666_v50  ;;  %v4737_v50 = vld [vmem:[#allocation2 + $0x2798] sm:$0xff] }
 0xc3e   : > { %v4291_v6 = vadd.f32 %v4290_v31, %v4213_v7  ;;  %4878 = vmatpush2.msra.mxu0 %v4665_v52  ;;  %v4663_v7 = vld [vmem:[#allocation2 + $0x2550] sm:$0xff]  ;;  %v4714_v31 = vld [vmem:[#allocation2 + $0x26e0] sm:$0xff] }
 0xc3f   : > { %v4294_v27 = vpop.f32.mrf.mxu1  ;;  %4879 = vmatprep.subr.mxu0 %v4664_v53  ;;  %v4736_v52 = vld [vmem:[#allocation2 + $0x2790] sm:$0xff]  ;;  %v4735_v53 = vld [vmem:[#allocation2 + $0x2788] sm:$0xff] }
 0xc40   : > { %v4295_v9 = vadd.f32 %v4294_v27, %v4217_v58  ;;  %4880 = vmatpush2.msra.mxu0 %v4663_v7  ;;  %v4659_v58 = vld [vmem:[#allocation2 + $0x2530] sm:$0xff]  ;;  %v4710_v27 = vld [vmem:[#allocation2 + $0x26c0] sm:$0xff]  ;;  %v4733_v7 = vld [vmem:[#allocation2 + $0x2778] sm:$0xff] }
 0xc41   : > { %v4296_v4 = vpop.f32.mrf.mxu1  ;;  %4881 = vmatprep.subr.mxu0 %v4662_v25  ;;  %v4732_v25 = vld [vmem:[#allocation2 + $0x2770] sm:$0xff] }
 0xc42   : > { %v4297_v2 = vadd.f32 %v4296_v4, %v4219_v61  ;;  %4882 = vmatpush2.msra.mxu0 %v4661_v54  ;;  %v4657_v61 = vld [vmem:[#allocation2 + $0x2520] sm:$0xff]  ;;  %v4704_v4 = vld [vmem:[#allocation2 + $0x2690] sm:$0xff]  ;;  %v4731_v54 = vld [vmem:[#allocation2 + $0x2768] sm:$0xff] }
 0xc43   : > { %v4430_v0 = vpop.f32.mrf.mxu0  ;;  %4883 = vmatprep.subr.mxu0 %v4660_v15  ;;  %v4730_v15 = vld [vmem:[#allocation2 + $0x2760] sm:$0xff] }
 0xc44   : > { %v4441_v28 = vadd.f32 %v4430_v0, %v4289_v40  ;;  %4884 = vmatpush2.msra.mxu0 %v4659_v58  ;;  %v4707_v0 = vld [vmem:[#allocation2 + $0x26a8] sm:$0xff]  ;;  %v4697_v40 = vld [vmem:[#allocation2 + $0x2658] sm:$0xff] }
 0xc45   : > { %v4432_v35 = vpop.f32.mrf.mxu0  ;;  %4885 = vmatprep.subr.mxu0 %v4658_v16  ;;  %v4727_v58 = vld [vmem:[#allocation2 + $0x2748] sm:$0xff]  ;;  %v4725_v16 = vld [vmem:[#allocation2 + $0x2738] sm:$0xff] }
 0xc46   : > { %v4442_v43 = vadd.f32 %v4432_v35, %v4291_v6  ;;  %v4458_v44 = vadd.f32 %v4451_v29, %v4441_v28  ;;  %4886 = vmatpush2.msra.mxu0 %v4657_v61  ;;  %v4703_v35 = vld [vmem:[#allocation2 + $0x2688] sm:$0xff]  ;;  %v4701_v6 = vld [vmem:[#allocation2 + $0x2678] sm:$0xff] }
 0xc47   : > { %v4436_v10 = vpop.f32.mrf.mxu0  ;;  %v4689_v28 = vld [vmem:[#allocation2 + $0x2618] sm:$0xff] }
 0xc48   : > { %v4443_v23 = vadd.f32 %v4436_v10, %v4295_v9  ;;  %v4459_v38 = vadd.f32 %v4455_v21, %v4442_v43  ;;  %v6616_v51 = vmax.f32 %v4458_v44, 0.0  ;;  %v4700_v9 = vld [vmem:[#allocation2 + $0x2670] sm:$0xff]  ;;  %v4693_v43 = vld [vmem:[#allocation2 + $0x2638] sm:$0xff]  ;;  %v4742_v44 = vld [vmem:[#allocation2 + $0x27c0] sm:$0xff] }
 0xc49   : > { %v4438_v30 = vpop.f32.mrf.mxu0  ;;  %v4696_v10 = vld [vmem:[#allocation2 + $0x2650] sm:$0xff]  ;;  %v4656_v61 = vld [vmem:[#allocation2 + $0x2518] sm:$0xff] }
 0xc4a   : > { %v4444_v33 = vadd.f32 %v4438_v30, %v4297_v2  ;;  %v4460_v11 = vadd.f32 %v4451_v29, %v4443_v23  ;;  %v4463_v19 = vmax.f32 %v4459_v38, 0.0  ;;  %v4694_v2 = vld [vmem:[#allocation2 + $0x2640] sm:$0xff]  ;;  %v4691_v23 = vld [vmem:[#allocation2 + $0x2628] sm:$0xff]  ;;  %v4688_v29 = vld [vmem:[#allocation2 + $0x2610] sm:$0xff]  ;;  %4887 = vmatprep.subr.mxu0 %v4656_v61 }
 0xc4b   : > { %v4687_v30 = vld [vmem:[#allocation2 + $0x2608] sm:$0xff]  ;;  %v4745_v38 = vld [vmem:[#allocation2 + $0x27d8] sm:$0xff]  ;;  %v4951_v61 = vld [vmem:[#allocation2 + $0x2970] sm:$0xff] }
 0xc4c   : > { %v4461_v39 = vadd.f32 %v4455_v21, %v4444_v33  ;;  %v6613_v22 = vmax.f32 %v4460_v11, 0.0  ;;  %v4692_v21 = vld [vmem:[#allocation2 + $0x2630] sm:$0xff]  ;;  %v4749_v33 = vld [vmem:[#allocation2 + $0x27f8] sm:$0xff]  ;;  %v4747_v11 = vld [vmem:[#allocation2 + $0x27e8] sm:$0xff] }
 0xc4e   : > { %v6611_v46 = vmax.f32 %v4461_v39, 0.0  ;;  %v4744_v39 = vld [vmem:[#allocation2 + $0x27d0] sm:$0xff] }
 0xc50   : > { %4494 = vmatprep.subr.mxu1 %v6611_v46 }
 0xc51   : > { %4495 = vmatpush1.msra.mxu1 %v6613_v22 }
 0xc52   : > { %4496 = vmatprep.subr.mxu1 %v4463_v19 }
 0xc53   : > { %4497 = vmatpush1.msra.mxu1 %v6616_v51 }
 0xc54   : > { %6006 = vmatmul.mubr.msk.f32.vlgmr.msra.gmra.mxu1 %vm354_vm2, %v6425_v13  ;;  %4571 = vmatprep.subr.mxu1 %v6611_v46 }
 0xc55   : > { %4572 = vmatpush1.msra.mxu1 %v6613_v22  ;;  %4536 = vmatprep.mubr.f32.mxu1 %v6257_v1 }
 0xc56   : > { %4573 = vmatprep.subr.mxu1 %v4463_v19 }
 0xc57   : > { %4574 = vmatpush1.msra.mxu1 %v6616_v51 }
 0xc58   : > { %6007 = vmatmul.mubr.msk.f32.gmra.mxu1 %vm354_vm2, %v6439_v17  ;;  %4750 = vmatprep.subr.mxu1 %v4717_v20  ;;  %v4734_v20 = vld [vmem:[#allocation2 + $0x2780] sm:$0xff] }
 0xc59   : > { %4607 = vmatprep.mubr.f32.mxu1 %v6257_v1 }
 0xc5c   : > { %6008 = vmatmul.mubr.msk.f32.vlgmr.msra.gmra.mxu1 %vm354_vm2, %v6428_v14 }
 0xc5d   : > { %4751 = vmatpush1.msra.mxu1 %v4716_v56  ;;  %4613 = vmatprep.mubr.f32.mxu1 %v6257_v1  ;;  %v4729_v56 = vld [vmem:[#allocation2 + $0x2758] sm:$0xff] }
 0xc5e   : > { %4752 = vmatprep.subr.mxu1 %v4715_v8  ;;  %v4728_v8 = vld [vmem:[#allocation2 + $0x2750] sm:$0xff] }
 0xc5f   : > { %4753 = vmatpush1.msra.mxu1 %v4714_v31  ;;  %v4726_v31 = vld [vmem:[#allocation2 + $0x2740] sm:$0xff] }
 0xc60   : > { %4754 = vmatprep.subr.mxu1 %v4713_v24  ;;  %6009 = vmatmul.mubr.msk.f32.gmra.mxu1 %vm354_vm2, %v6442_v18  ;;  %v4724_v24 = vld [vmem:[#allocation2 + $0x2730] sm:$0xff] }
 0xc61   : > { %4755 = vmatpush1.msra.mxu1 %v4712_v59  ;;  %4814 = vmatprep.mubr.f32.mxu1 %v4463_v19  ;;  %v4738_v19 = vld [vmem:[#allocation2 + $0x27a0] sm:$0xff]  ;;  %v4723_v59 = vld [vmem:[#allocation2 + $0x2728] sm:$0xff] }
 0xc62   : > { %4756 = vmatprep.subr.mxu1 %v4711_v60  ;;  %v4722_v60 = vld [vmem:[#allocation2 + $0x2720] sm:$0xff] }
 0xc63   : > { %4757 = vmatpush1.msra.mxu1 %v4710_v27  ;;  %v4655_v27 = vld [vmem:[#allocation2 + $0x2510] sm:$0xff] }
 0xc64   : > { %4758 = vmatprep.subr.mxu1 %v4709_v62  ;;  %v4721_v62 = vld [vmem:[#allocation2 + $0x2718] sm:$0xff]  ;;  %4888 = vmatpush2.msra.mxu0 %v4655_v27  ;;  %v4950_v27 = vld [vmem:[#allocation2 + $0x2968] sm:$0xff] }
 0xc65   : > { %4759 = vmatpush1.msra.mxu1 %v4708_v63  ;;  %v4720_v63 = vld [vmem:[#allocation2 + $0x2710] sm:$0xff] }
 0xc66   : > { %4760 = vmatprep.subr.mxu1 %v4707_v0  ;;  %v4654_v0 = vld [vmem:[#allocation2 + $0x2508] sm:$0xff] }
 0xc67   : > { %4761 = vmatpush1.msra.mxu1 %v4706_v3  ;;  %v4653_v3 = vld [vmem:[#allocation2 + $0x2500] sm:$0xff]  ;;  %4889 = vmatprep.subr.mxu0 %v4654_v0  ;;  %v4947_v0 = vld [vmem:[#allocation2 + $0x2950] sm:$0xff] }
 0xc68   : > { %4762 = vmatprep.subr.mxu1 %v4705_v41  ;;  %v4719_v41 = vld [vmem:[#allocation2 + $0x2708] sm:$0xff]  ;;  %4890 = vmatpush2.msra.mxu0 %v4653_v3 }
 0xc69   : > { %4763 = vmatpush1.msra.mxu1 %v4704_v4  ;;  %v4718_v4 = vld [vmem:[#allocation2 + $0x2700] sm:$0xff]  ;;  %v4946_v3 = vld [vmem:[#allocation2 + $0x2948] sm:$0xff] }
 0xc6a   : > { %4764 = vmatprep.subr.mxu1 %v4703_v35  ;;  %v4936_v35 = vld [vmem:[#allocation2 + $0x28f8] sm:$0xff] }
 0xc6b   : > { %4765 = vmatpush1.msra.mxu1 %v4702_v5  ;;  %v4935_v5 = vld [vmem:[#allocation2 + $0x28f0] sm:$0xff] }
 0xc6c   : > { %4766 = vmatprep.subr.mxu1 %v4701_v6  ;;  %v4934_v6 = vld [vmem:[#allocation2 + $0x28e8] sm:$0xff] }
 0xc6d   : > { %4767 = vmatpush1.msra.mxu1 %v4700_v9  ;;  %v4933_v9 = vld [vmem:[#allocation2 + $0x28e0] sm:$0xff] }
 0xc6e   : > { %4768 = vmatprep.subr.mxu1 %v4699_v47  ;;  %v4932_v47 = vld [vmem:[#allocation2 + $0x28d8] sm:$0xff] }
 0xc6f   : > { %4769 = vmatpush1.msra.mxu1 %v4698_v37  ;;  %v4931_v37 = vld [vmem:[#allocation2 + $0x28d0] sm:$0xff] }
 0xc70   : > { %4770 = vmatprep.subr.mxu1 %v4697_v40  ;;  %v4930_v40 = vld [vmem:[#allocation2 + $0x28c8] sm:$0xff] }
 0xc71   : > { %4771 = vmatpush1.msra.mxu1 %v4696_v10  ;;  %v4929_v10 = vld [vmem:[#allocation2 + $0x28c0] sm:$0xff] }
 0xc72   : > { %4772 = vmatprep.subr.mxu1 %v4695_v12  ;;  %v4928_v12 = vld [vmem:[#allocation2 + $0x28b8] sm:$0xff] }
 0xc73   : > { %4773 = vmatpush1.msra.mxu1 %v4694_v2  ;;  %v4927_v2 = vld [vmem:[#allocation2 + $0x28b0] sm:$0xff] }
 0xc74   : > { %4774 = vmatprep.subr.mxu1 %v4693_v43  ;;  %v4925_v43 = vld [vmem:[#allocation2 + $0x28a0] sm:$0xff] }
 0xc75   : > { %4775 = vmatpush1.msra.mxu1 %v4692_v21  ;;  %v4923_v21 = vld [vmem:[#allocation2 + $0x2890] sm:$0xff] }
 0xc76   : > { %4776 = vmatprep.subr.mxu1 %v4691_v23  ;;  %v4922_v23 = vld [vmem:[#allocation2 + $0x2888] sm:$0xff] }
 0xc77   : > { %4777 = vmatpush1.msra.mxu1 %v4690_v26  ;;  %v4921_v26 = vld [vmem:[#allocation2 + $0x2880] sm:$0xff] }
 0xc78   : > { %4778 = vmatprep.subr.mxu1 %v4689_v28  ;;  %v4919_v28 = vld [vmem:[#allocation2 + $0x2870] sm:$0xff] }
 0xc79   : > { %4779 = vmatpush1.msra.mxu1 %v4688_v29  ;;  %v4918_v29 = vld [vmem:[#allocation2 + $0x2868] sm:$0xff] }
 0xc7a   : > { %4780 = vmatprep.subr.mxu1 %v4687_v30  ;;  %v4917_v30 = vld [vmem:[#allocation2 + $0x2860] sm:$0xff] }
 0xc7b   : > { %4781 = vmatpush1.msra.mxu1 %v4686_v32  ;;  %v4916_v32 = vld [vmem:[#allocation2 + $0x2858] sm:$0xff] }
 0xc7c   : > { %4782 = vmatprep.subr.mxu1 %v4749_v33  ;;  %v4915_v33 = vld [vmem:[#allocation2 + $0x2850] sm:$0xff] }
 0xc7d   : > { %4783 = vmatpush2.msra.mxu1 %v4748_v34  ;;  %v4914_v34 = vld [vmem:[#allocation2 + $0x2848] sm:$0xff] }
 0xc7e   : > { %4784 = vmatprep.subr.mxu1 %v4747_v11  ;;  %v4913_v11 = vld [vmem:[#allocation2 + $0x2840] sm:$0xff] }
 0xc7f   : > { %4785 = vmatpush2.msra.mxu1 %v4746_v36  ;;  %v4912_v36 = vld [vmem:[#allocation2 + $0x2838] sm:$0xff] }
 0xc80   : > { %4786 = vmatprep.subr.mxu1 %v4745_v38  ;;  %v4911_v38 = vld [vmem:[#allocation2 + $0x2830] sm:$0xff] }
 0xc81   : > { %4787 = vmatpush2.msra.mxu1 %v4744_v39  ;;  %v4910_v39 = vld [vmem:[#allocation2 + $0x2828] sm:$0xff] }
 0xc82   : > { %4788 = vmatprep.subr.mxu1 %v4743_v42  ;;  %v4909_v42 = vld [vmem:[#allocation2 + $0x2820] sm:$0xff] }
 0xc83   : > { %4789 = vmatpush2.msra.mxu1 %v4742_v44  ;;  %v4908_v44 = vld [vmem:[#allocation2 + $0x2818] sm:$0xff] }
 0xc84   : > { %4790 = vmatprep.subr.mxu1 %v4741_v45  ;;  %v4907_v45 = vld [vmem:[#allocation2 + $0x2810] sm:$0xff] }
 0xc85   : > { %4791 = vmatpush2.msra.mxu1 %v4740_v48  ;;  %v4906_v48 = vld [vmem:[#allocation2 + $0x2808] sm:$0xff] }
 0xc86   : > { %4792 = vmatprep.subr.mxu1 %v4739_v49  ;;  %v4905_v49 = vld [vmem:[#allocation2 + $0x2800] sm:$0xff] }
 0xc87   : > { %4793 = vmatpush2.msra.mxu1 %v4738_v19  ;;  %v4968_v19 = vld [vmem:[#allocation2 + $0x29f8] sm:$0xff] }
 0xc88   : > { %4794 = vmatprep.subr.mxu1 %v4737_v50  ;;  %v4967_v50 = vld [vmem:[#allocation2 + $0x29f0] sm:$0xff] }
 0xc89   : > { %4795 = vmatpush2.msra.mxu1 %v4736_v52  ;;  %v4966_v52 = vld [vmem:[#allocation2 + $0x29e8] sm:$0xff] }
 0xc8a   : > { %4796 = vmatprep.subr.mxu1 %v4735_v53  ;;  %v4965_v53 = vld [vmem:[#allocation2 + $0x29e0] sm:$0xff] }
 0xc8b   : > { %4797 = vmatpush2.msra.mxu1 %v4734_v20  ;;  %v4964_v20 = vld [vmem:[#allocation2 + $0x29d8] sm:$0xff] }
 0xc8c   : > { %4798 = vmatprep.subr.mxu1 %v4733_v7  ;;  %v4963_v7 = vld [vmem:[#allocation2 + $0x29d0] sm:$0xff] }
 0xc8d   : > { %4799 = vmatpush2.msra.mxu1 %v4732_v25  ;;  %v4962_v25 = vld [vmem:[#allocation2 + $0x29c8] sm:$0xff] }
 0xc8e   : > { %4800 = vmatprep.subr.mxu1 %v4731_v54  ;;  %v4961_v54 = vld [vmem:[#allocation2 + $0x29c0] sm:$0xff] }
 0xc8f   : > { %4801 = vmatpush2.msra.mxu1 %v4730_v15  ;;  %v4960_v15 = vld [vmem:[#allocation2 + $0x29b8] sm:$0xff] }
 0xc90   : > { %4802 = vmatprep.subr.mxu1 %v4729_v56  ;;  %v4959_v56 = vld [vmem:[#allocation2 + $0x29b0] sm:$0xff] }
 0xc91   : > { %4803 = vmatpush2.msra.mxu1 %v4728_v8  ;;  %v4958_v8 = vld [vmem:[#allocation2 + $0x29a8] sm:$0xff] }
 0xc92   : > { %4804 = vmatprep.subr.mxu1 %v4727_v58  ;;  %v4957_v58 = vld [vmem:[#allocation2 + $0x29a0] sm:$0xff] }
 0xc93   : > { %4805 = vmatpush2.msra.mxu1 %v4726_v31  ;;  %v4956_v31 = vld [vmem:[#allocation2 + $0x2998] sm:$0xff] }
 0xc94   : > { %4806 = vmatprep.subr.mxu1 %v4725_v16  ;;  %v4955_v16 = vld [vmem:[#allocation2 + $0x2990] sm:$0xff] }
 0xc95   : > { %4807 = vmatpush2.msra.mxu1 %v4724_v24  ;;  %v4954_v24 = vld [vmem:[#allocation2 + $0x2988] sm:$0xff] }
 0xc96   : > { %4808 = vmatprep.subr.mxu1 %v4723_v59  ;;  %v4953_v59 = vld [vmem:[#allocation2 + $0x2980] sm:$0xff] }
 0xc97   : > { %4809 = vmatpush2.msra.mxu1 %v4722_v60  ;;  %v4952_v60 = vld [vmem:[#allocation2 + $0x2978] sm:$0xff] }
 0xc98   : > { %4810 = vmatprep.subr.mxu1 %v4721_v62  ;;  %v4949_v62 = vld [vmem:[#allocation2 + $0x2960] sm:$0xff] }
 0xc99   : > { %4811 = vmatpush2.msra.mxu1 %v4720_v63  ;;  %v4948_v63 = vld [vmem:[#allocation2 + $0x2958] sm:$0xff] }
 0xc9a   : > { %4812 = vmatprep.subr.mxu1 %v4719_v41  ;;  %v4945_v41 = vld [vmem:[#allocation2 + $0x2940] sm:$0xff] }
 0xc9b   : > { %4813 = vmatpush2.msra.mxu1 %v4718_v4  ;;  %v4944_v4 = vld [vmem:[#allocation2 + $0x2938] sm:$0xff] }
 0xc9c   : > { %4815 = vmatmul.mubr.f32.vlgmr.msra.gmra.mxu1 %v6616_v51  ;;  %4969 = vmatprep.subr.mxu1 %v4936_v35  ;;  %v4926_v51 = vld [vmem:[#allocation2 + $0x28a8] sm:$0xff]  ;;  %v4943_v35 = vld [vmem:[#allocation2 + $0x2930] sm:$0xff] }
 0xc9d   : > { %4820 = vmatprep.mubr.f32.mxu1 %v6611_v46  ;;  %4970 = vmatpush1.msra.mxu1 %v4935_v5  ;;  %v4924_v46 = vld [vmem:[#allocation2 + $0x2898] sm:$0xff]  ;;  %v4942_v5 = vld [vmem:[#allocation2 + $0x2928] sm:$0xff] }
 0xc9e   : > { %4971 = vmatprep.subr.mxu1 %v4934_v6  ;;  %v4941_v6 = vld [vmem:[#allocation2 + $0x2920] sm:$0xff] }
 0xc9f   : > { %4972 = vmatpush1.msra.mxu1 %v4933_v9  ;;  %v4940_v9 = vld [vmem:[#allocation2 + $0x2918] sm:$0xff] }
 0xca0   : > { %4821 = vmatmul.mubr.f32.gmra.mxu1 %v6613_v22  ;;  %4973 = vmatprep.subr.mxu1 %v4932_v47  ;;  %v4920_v22 = vld [vmem:[#allocation2 + $0x2878] sm:$0xff]  ;;  %v4939_v47 = vld [vmem:[#allocation2 + $0x2910] sm:$0xff] }
 0xca1   : > { %4974 = vmatpush1.msra.mxu1 %v4931_v37  ;;  %v4938_v37 = vld [vmem:[#allocation2 + $0x2908] sm:$0xff] }
 0xca2   : > { %4975 = vmatprep.subr.mxu1 %v4930_v40  ;;  %v4937_v40 = vld [vmem:[#allocation2 + $0x2900] sm:$0xff] }
 0xca3   : > { %4976 = vmatpush1.msra.mxu1 %v4929_v10 }
 0xca4   : > { %4977 = vmatprep.subr.mxu1 %v4928_v12 }
 0xca5   : > { %4978 = vmatpush1.msra.mxu1 %v4927_v2 }
 0xca6   : > { %4979 = vmatprep.subr.mxu1 %v4926_v51 }
 0xca7   : > { %4980 = vmatpush1.msra.mxu1 %v4925_v43 }
 0xca8   : > { %4981 = vmatprep.subr.mxu1 %v4924_v46 }
 0xca9   : > { %4982 = vmatpush1.msra.mxu1 %v4923_v21 }
 0xcaa   : > { %4983 = vmatprep.subr.mxu1 %v4922_v23 }
 0xcab   : > { %4984 = vmatpush1.msra.mxu1 %v4921_v26  ;;  %v5257_v26 = vld [vmem:[#allocation2 + $0x2af8] sm:$0xff] }
 0xcac   : > { %4985 = vmatprep.subr.mxu1 %v4920_v22  ;;  %v5256_v22 = vld [vmem:[#allocation2 + $0x2af0] sm:$0xff] }
 0xcad   : > { %4986 = vmatpush1.msra.mxu1 %v4919_v28  ;;  %v5255_v28 = vld [vmem:[#allocation2 + $0x2ae8] sm:$0xff] }
 0xcae   : > { %4987 = vmatprep.subr.mxu1 %v4918_v29  ;;  %v5254_v29 = vld [vmem:[#allocation2 + $0x2ae0] sm:$0xff] }
 0xcaf   : > { %4988 = vmatpush1.msra.mxu1 %v4917_v30  ;;  %v5253_v30 = vld [vmem:[#allocation2 + $0x2ad8] sm:$0xff] }
 0xcb0   : > { %4989 = vmatprep.subr.mxu1 %v4916_v32  ;;  %v5252_v32 = vld [vmem:[#allocation2 + $0x2ad0] sm:$0xff] }
 0xcb1   : > { %4990 = vmatpush1.msra.mxu1 %v4915_v33  ;;  %v5251_v33 = vld [vmem:[#allocation2 + $0x2ac8] sm:$0xff] }
 0xcb2   : > { %4991 = vmatprep.subr.mxu1 %v4914_v34  ;;  %v5250_v34 = vld [vmem:[#allocation2 + $0x2ac0] sm:$0xff] }
 0xcb3   : > { %4992 = vmatpush1.msra.mxu1 %v4913_v11  ;;  %v5249_v11 = vld [vmem:[#allocation2 + $0x2ab8] sm:$0xff] }
 0xcb4   : > { %4993 = vmatprep.subr.mxu1 %v4912_v36  ;;  %v5248_v36 = vld [vmem:[#allocation2 + $0x2ab0] sm:$0xff] }
 0xcb5   : > { %4994 = vmatpush1.msra.mxu1 %v4911_v38  ;;  %v5247_v38 = vld [vmem:[#allocation2 + $0x2aa8] sm:$0xff] }
 0xcb6   : > { %4995 = vmatprep.subr.mxu1 %v4910_v39  ;;  %v5246_v39 = vld [vmem:[#allocation2 + $0x2aa0] sm:$0xff] }
 0xcb7   : > { %4996 = vmatpush1.msra.mxu1 %v4909_v42  ;;  %v5245_v42 = vld [vmem:[#allocation2 + $0x2a98] sm:$0xff] }
 0xcb8   : > { %4997 = vmatprep.subr.mxu1 %v4908_v44  ;;  %v5244_v44 = vld [vmem:[#allocation2 + $0x2a90] sm:$0xff] }
 0xcb9   : > { %4998 = vmatpush1.msra.mxu1 %v4907_v45  ;;  %v5243_v45 = vld [vmem:[#allocation2 + $0x2a88] sm:$0xff] }
 0xcba   : > { %4999 = vmatprep.subr.mxu1 %v4906_v48  ;;  %v5242_v48 = vld [vmem:[#allocation2 + $0x2a80] sm:$0xff] }
 0xcbb   : > { %5000 = vmatpush1.msra.mxu1 %v4905_v49  ;;  %v5241_v49 = vld [vmem:[#allocation2 + $0x2a78] sm:$0xff] }
 0xcbc   : > { %5001 = vmatprep.subr.mxu1 %v4968_v19  ;;  %v5240_v19 = vld [vmem:[#allocation2 + $0x2a70] sm:$0xff] }
 0xcbd   : > { %5002 = vmatpush2.msra.mxu1 %v4967_v50  ;;  %v5239_v50 = vld [vmem:[#allocation2 + $0x2a68] sm:$0xff] }
 0xcbe   : > { %5003 = vmatprep.subr.mxu1 %v4966_v52  ;;  %v5238_v52 = vld [vmem:[#allocation2 + $0x2a60] sm:$0xff] }
 0xcbf   : > { %5004 = vmatpush2.msra.mxu1 %v4965_v53  ;;  %v5237_v53 = vld [vmem:[#allocation2 + $0x2a58] sm:$0xff] }
 0xcc0   : > { %5005 = vmatprep.subr.mxu1 %v4964_v20  ;;  %v5236_v20 = vld [vmem:[#allocation2 + $0x2a50] sm:$0xff] }
 0xcc1   : > { %5006 = vmatpush2.msra.mxu1 %v4963_v7  ;;  %v5235_v7 = vld [vmem:[#allocation2 + $0x2a48] sm:$0xff] }
 0xcc2   : > { %5007 = vmatprep.subr.mxu1 %v4962_v25 }
 0xcc3   : > { %5008 = vmatpush2.msra.mxu1 %v4961_v54  ;;  %v5234_v54 = vld [vmem:[#allocation2 + $0x2a40] sm:$0xff] }
 0xcc4   : > { %5009 = vmatprep.subr.mxu1 %v4960_v15  ;;  %v5233_v15 = vld [vmem:[#allocation2 + $0x2a38] sm:$0xff] }
 0xcc5   : > { %5010 = vmatpush2.msra.mxu1 %v4959_v56  ;;  %v5232_v56 = vld [vmem:[#allocation2 + $0x2a30] sm:$0xff] }
 0xcc6   : > { %5011 = vmatprep.subr.mxu1 %v4958_v8  ;;  %v5231_v8 = vld [vmem:[#allocation2 + $0x2a28] sm:$0xff] }
 0xcc7   : > { %5012 = vmatpush2.msra.mxu1 %v4957_v58 }
 0xcc8   : > { %5013 = vmatprep.subr.mxu1 %v4956_v31  ;;  %v5230_v31 = vld [vmem:[#allocation2 + $0x2a20] sm:$0xff] }
 0xcc9   : > { %5014 = vmatpush2.msra.mxu1 %v4955_v16  ;;  %v5229_v16 = vld [vmem:[#allocation2 + $0x2a18] sm:$0xff] }
 0xcca   : > { %5015 = vmatprep.subr.mxu1 %v4954_v24 }
 0xccb   : > { %5016 = vmatpush2.msra.mxu1 %v4953_v59  ;;  %v5228_v59 = vld [vmem:[#allocation2 + $0x2a10] sm:$0xff] }
 0xccc   : > { %5017 = vmatprep.subr.mxu1 %v4952_v60  ;;  %v5227_v60 = vld [vmem:[#allocation2 + $0x2a08] sm:$0xff] }
 0xccd   : > { %5018 = vmatpush2.msra.mxu1 %v4951_v61 }
 0xcce   : > { %5019 = vmatprep.subr.mxu1 %v4950_v27 }
 0xccf   : > { %5020 = vmatpush2.msra.mxu1 %v4949_v62  ;;  %v5226_v62 = vld [vmem:[#allocation2 + $0x2a00] sm:$0xff] }
 0xcd0   : > { %5021 = vmatprep.subr.mxu1 %v4948_v63  ;;  %v5289_v63 = vld [vmem:[#allocation2 + $0x2bf8] sm:$0xff] }
 0xcd1   : > { %5022 = vmatpush2.msra.mxu1 %v4947_v0  ;;  %v5288_v0 = vld [vmem:[#allocation2 + $0x2bf0] sm:$0xff] }
 0xcd2   : > { %5023 = vmatprep.subr.mxu1 %v4946_v3  ;;  %v5287_v3 = vld [vmem:[#allocation2 + $0x2be8] sm:$0xff] }
 0xcd3   : > { %5024 = vmatpush2.msra.mxu1 %v4945_v41 }
 0xcd4   : > { %5025 = vmatprep.subr.mxu1 %v4944_v4 }
 0xcd5   : > { %5026 = vmatpush2.msra.mxu1 %v4943_v35  ;;  %v5286_v35 = vld [vmem:[#allocation2 + $0x2be0] sm:$0xff] }
 0xcd6   : > { %5027 = vmatprep.subr.mxu1 %v4942_v5  ;;  %v5285_v5 = vld [vmem:[#allocation2 + $0x2bd8] sm:$0xff] }
 0xcd7   : > { %5028 = vmatpush2.msra.mxu1 %v4941_v6 }
 0xcd8   : > { %5029 = vmatprep.subr.mxu1 %v4940_v9  ;;  %v5284_v9 = vld [vmem:[#allocation2 + $0x2bd0] sm:$0xff] }
 0xcd9   : > { %5030 = vmatpush2.msra.mxu1 %v4939_v47  ;;  %v5283_v47 = vld [vmem:[#allocation2 + $0x2bc8] sm:$0xff] }
 0xcda   : > { %5031 = vmatprep.subr.mxu1 %v4938_v37 }
 0xcdb   : > { %5032 = vmatpush2.msra.mxu1 %v4937_v40 }
 0xcdc   : > { %5432 = vmatprep.subr.mxu1 %v5257_v26 }
 0xd14   : > { %v4532_v10 = vpop.f32.mrf.mxu1 }
 0xd16   : > { %v4534_v12 = vpop.f32.mrf.mxu1 }
 0xd17   : > { %4891 = vmatprep.mubr.f32.mxu0 %v4534_v12 }
 0xd18   : > { %v4538_v2 = vpop.f32.mrf.mxu1  ;;  %4892 = vmatmul.mubr.f32.vlgmr.msra.gmra.mxu0 %v4532_v10  ;;  %v5282_v10 = vld [vmem:[#allocation2 + $0x2bc0] sm:$0xff] }
 0xd1a   : > { %v4540_v51 = vpop.f32.mrf.mxu1 }
 0xd1b   : > { %4897 = vmatprep.mubr.f32.mxu0 %v4540_v51  ;;  %v5051_v51 = vld [vmem:[#allocation4 + $0xc] sm:$0x3] }
 0xd1c   : > { %v4609_v43 = vpop.f32.mrf.mxu1  ;;  %4898 = vmatmul.mubr.f32.gmra.mxu0 %v4538_v2 }
 0xd1d   : > { %5135 = vmatprep.mubr.f32.mxu0 %v6257_v1 }
 0xd1e   : > { %v4611_v46 = vpop.f32.mrf.mxu1 }
 0xd1f   : > { %5033 = vmatprep.mubr.f32.mxu1 %v4611_v46 }
 0xd20   : > { %v4615_v21 = vpop.f32.mrf.mxu1  ;;  %5034 = vmatmul.mubr.f32.vlgmr.msra.gmra.mxu1 %v4609_v43  ;;  %v5281_v43 = vld [vmem:[#allocation2 + $0x2bb8] sm:$0xff] }
 0xd21   : > { %5433 = vmatpush1.msra.mxu1 %v5256_v22 }
 0xd22   : > { %v4617_v23 = vpop.f32.mrf.mxu1  ;;  %5434 = vmatprep.subr.mxu1 %v5255_v28  ;;  %v5060_v28 = vrot.slane %v5051_v51, %v6454_v55 }
 0xd23   : > { %5039 = vmatprep.mubr.f32.mxu1 %v4617_v23  ;;  %5435 = vmatpush1.msra.mxu1 %v5254_v29  ;;  %v5280_v23 = vld [vmem:[#allocation2 + $0x2bb0] sm:$0xff] }
 0xd24   : > { %5040 = vmatmul.mubr.f32.gmra.mxu1 %v4615_v21  ;;  %5436 = vmatprep.subr.mxu1 %v5253_v30  ;;  %v5279_v30 = vld [vmem:[#allocation2 + $0x2ba8] sm:$0xff] }
 0xd25   : > { %5437 = vmatpush1.msra.mxu1 %v5252_v32 }
 0xd26   : > { %5438 = vmatprep.subr.mxu1 %v5251_v33  ;;  %v5056_v33 = vrot.slane %v5051_v51, %v6457_v57  ;;  %v5299_v51 = vld [vmem:[#allocation2 + $0x2c40] sm:$0xff] }
 0xd27   : > { %5439 = vmatpush1.msra.mxu1 %v5250_v34 }
 0xd28   : > { %5440 = vmatprep.subr.mxu1 %v5249_v11  ;;  %v5278_v11 = vld [vmem:[#allocation2 + $0x2ba0] sm:$0xff] }
 0xd29   : > { %5441 = vmatpush1.msra.mxu1 %v5248_v36 }
 0xd2a   : > { %5442 = vmatprep.subr.mxu1 %v5247_v38  ;;  %v5277_v38 = vld [vmem:[#allocation2 + $0x2b98] sm:$0xff] }
 0xd2b   : > { %5443 = vmatpush1.msra.mxu1 %v5246_v39 }
 0xd2c   : > { %5444 = vmatprep.subr.mxu1 %v5245_v42  ;;  %v5276_v42 = vld [vmem:[#allocation2 + $0x2b90] sm:$0xff] }
 0xd2d   : > { %5445 = vmatpush1.msra.mxu1 %v5244_v44 }
 0xd2e   : > { %5446 = vmatprep.subr.mxu1 %v5243_v45 }
 0xd2f   : > { %5447 = vmatpush1.msra.mxu1 %v5242_v48  ;;  %v5275_v48 = vld [vmem:[#allocation2 + $0x2b88] sm:$0xff] }
 0xd30   : > { %5448 = vmatprep.subr.mxu1 %v5241_v49 }
 0xd31   : > { %5449 = vmatpush1.msra.mxu1 %v5240_v19  ;;  %v5274_v19 = vld [vmem:[#allocation2 + $0x2b80] sm:$0xff] }
 0xd32   : > { %5450 = vmatprep.subr.mxu1 %v5239_v50 }
 0xd33   : > { %5451 = vmatpush1.msra.mxu1 %v5238_v52  ;;  %v5273_v52 = vld [vmem:[#allocation2 + $0x2b78] sm:$0xff] }
 0xd34   : > { %5452 = vmatprep.subr.mxu1 %v5237_v53 }
 0xd35   : > { %5453 = vmatpush1.msra.mxu1 %v5236_v20  ;;  %v5272_v20 = vld [vmem:[#allocation2 + $0x2b70] sm:$0xff] }
 0xd36   : > { %5454 = vmatprep.subr.mxu1 %v5235_v7 }
 0xd37   : > { %5455 = vmatpush1.msra.mxu1 %v5234_v54 }
 0xd38   : > { %5456 = vmatprep.subr.mxu1 %v5233_v15  ;;  %v5270_v15 = vld [vmem:[#allocation2 + $0x2b60] sm:$0xff] }
 0xd39   : > { %5457 = vmatpush1.msra.mxu1 %v5232_v56  ;;  %v5269_v56 = vld [vmem:[#allocation2 + $0x2b58] sm:$0xff] }
 0xd3a   : > { %5458 = vmatprep.subr.mxu1 %v5231_v8  ;;  %v5322_v8 = vld [vmem:[#allocation2 + $0x2cf8] sm:$0xff] }
 0xd3b   : > { %5459 = vmatpush1.msra.mxu1 %v5230_v31  ;;  %v5267_v31 = vld [vmem:[#allocation2 + $0x2b48] sm:$0xff] }
 0xd3c   : > { %5460 = vmatprep.subr.mxu1 %v5229_v16  ;;  %v5265_v16 = vld [vmem:[#allocation2 + $0x2b38] sm:$0xff] }
 0xd3d   : > { %5461 = vmatpush1.msra.mxu1 %v5228_v59  ;;  %v5320_v59 = vld [vmem:[#allocation2 + $0x2ce8] sm:$0xff] }
 0xd3e   : > { %5462 = vmatprep.subr.mxu1 %v5227_v60  ;;  %v5264_v60 = vld [vmem:[#allocation2 + $0x2b30] sm:$0xff] }
 0xd3f   : > { %5463 = vmatpush1.msra.mxu1 %v5226_v62  ;;  %v5317_v62 = vld [vmem:[#allocation2 + $0x2cd0] sm:$0xff] }
 0xd40   : > { %5464 = vmatprep.subr.mxu1 %v5289_v63  ;;  %v5316_v63 = vld [vmem:[#allocation2 + $0x2cc8] sm:$0xff] }
 0xd41   : > { %5465 = vmatpush2.msra.mxu1 %v5288_v0  ;;  %v5262_v0 = vld [vmem:[#allocation2 + $0x2b20] sm:$0xff] }
 0xd42   : > { %5466 = vmatprep.subr.mxu1 %v5287_v3  ;;  %v5315_v3 = vld [vmem:[#allocation2 + $0x2cc0] sm:$0xff] }
 0xd43   : > { %5467 = vmatpush2.msra.mxu1 %v5286_v35  ;;  %v5310_v35 = vld [vmem:[#allocation2 + $0x2c98] sm:$0xff] }
 0xd44   : > { %5468 = vmatprep.subr.mxu1 %v5285_v5  ;;  %v5309_v5 = vld [vmem:[#allocation2 + $0x2c90] sm:$0xff] }
 0xd45   : > { %5469 = vmatpush2.msra.mxu1 %v5284_v9  ;;  %v5307_v9 = vld [vmem:[#allocation2 + $0x2c80] sm:$0xff] }
 0xd46   : > { %5470 = vmatprep.subr.mxu1 %v5283_v47  ;;  %v5305_v47 = vld [vmem:[#allocation2 + $0x2c70] sm:$0xff] }
 0xd47   : > { %5471 = vmatpush2.msra.mxu1 %v5282_v10  ;;  %v5302_v10 = vld [vmem:[#allocation2 + $0x2c58] sm:$0xff] }
 0xd48   : > { %5472 = vmatprep.subr.mxu1 %v5281_v43  ;;  %v5298_v43 = vld [vmem:[#allocation2 + $0x2c38] sm:$0xff] }
 0xd49   : > { %5473 = vmatpush2.msra.mxu1 %v5280_v23  ;;  %v5295_v23 = vld [vmem:[#allocation2 + $0x2c20] sm:$0xff] }
 0xd4a   : > { %5474 = vmatprep.subr.mxu1 %v5279_v30  ;;  %v5354_v30 = vld [vmem:[#allocation2 + $0x2df8] sm:$0xff] }
 0xd4b   : > { %5475 = vmatpush2.msra.mxu1 %v5278_v11  ;;  %v5350_v11 = vld [vmem:[#allocation2 + $0x2dd8] sm:$0xff] }
 0xd4c   : > { %5476 = vmatprep.subr.mxu1 %v5277_v38  ;;  %v5348_v38 = vld [vmem:[#allocation2 + $0x2dc8] sm:$0xff] }
 0xd4d   : > { %5477 = vmatpush2.msra.mxu1 %v5276_v42  ;;  %v5346_v42 = vld [vmem:[#allocation2 + $0x2db8] sm:$0xff] }
 0xd4e   : > { %5478 = vmatprep.subr.mxu1 %v5275_v48  ;;  %v5343_v48 = vld [vmem:[#allocation2 + $0x2da0] sm:$0xff] }
 0xd4f   : > { %5479 = vmatpush2.msra.mxu1 %v5274_v19  ;;  %v5341_v19 = vld [vmem:[#allocation2 + $0x2d90] sm:$0xff] }
 0xd50   : > { %5480 = vmatprep.subr.mxu1 %v5273_v52  ;;  %v5340_v52 = vld [vmem:[#allocation2 + $0x2d88] sm:$0xff] }
 0xd51   : > { %5481 = vmatpush2.msra.mxu1 %v5272_v20  ;;  %v5339_v20 = vld [vmem:[#allocation2 + $0x2d80] sm:$0xff] }
 0xd5c   : > { %v4816_v25 = vpop.f32.mrf.mxu1 }
 0xd5e   : > { %v4818_v58 = vpop.f32.mrf.mxu1 }
 0xd60   : > { %v4822_v61 = vpop.f32.mrf.mxu1 }
 0xd62   : > { %v4824_v41 = vpop.f32.mrf.mxu1 }
 0xdd8   : > { %v4893_v24 = vpop.f32.mrf.mxu0 }
 0xdd9   : > { %v4894_v46 = vadd.f32 %v4893_v24, %v4816_v25  ;;  %v5271_v25 = vld [vmem:[#allocation2 + $0x2b68] sm:$0xff]  ;;  %v5321_v24 = vld [vmem:[#allocation2 + $0x2cf0] sm:$0xff] }
 0xdda   : > { %v4895_v27 = vpop.f32.mrf.mxu0  ;;  %5482 = vmatprep.subr.mxu1 %v5271_v25  ;;  %v5337_v25 = vld [vmem:[#allocation2 + $0x2d70] sm:$0xff] }
 0xddb   : > { %v4896_v12 = vadd.f32 %v4895_v27, %v4818_v58  ;;  %5483 = vmatpush2.msra.mxu1 %v5270_v15  ;;  %v5268_v58 = vld [vmem:[#allocation2 + $0x2b50] sm:$0xff]  ;;  %v5263_v27 = vld [vmem:[#allocation2 + $0x2b28] sm:$0xff] }
 0xddc   : > { %v4899_v4 = vpop.f32.mrf.mxu0  ;;  %5484 = vmatprep.subr.mxu1 %v5269_v56  ;;  %v5336_v15 = vld [vmem:[#allocation2 + $0x2d68] sm:$0xff]  ;;  %v5335_v56 = vld [vmem:[#allocation2 + $0x2d60] sm:$0xff] }
 0xddd   : > { %v4900_v2 = vadd.f32 %v4899_v4, %v4822_v61  ;;  %5485 = vmatpush2.msra.mxu1 %v5268_v58  ;;  %v5319_v61 = vld [vmem:[#allocation2 + $0x2ce0] sm:$0xff]  ;;  %v5333_v58 = vld [vmem:[#allocation2 + $0x2d50] sm:$0xff] }
 0xdde   : > { %v4901_v37 = vpop.f32.mrf.mxu0  ;;  %5486 = vmatprep.subr.mxu1 %v5267_v31  ;;  %v5311_v4 = vld [vmem:[#allocation2 + $0x2ca0] sm:$0xff]  ;;  %v5332_v31 = vld [vmem:[#allocation2 + $0x2d48] sm:$0xff] }
 0xddf   : > { %v4902_v26 = vadd.f32 %v4901_v37, %v4824_v41  ;;  %v5313_v41 = vld [vmem:[#allocation2 + $0x2cb0] sm:$0xff]  ;;  %v5304_v37 = vld [vmem:[#allocation2 + $0x2c68] sm:$0xff] }
 0xde0   : > { %v5035_v6 = vpop.f32.mrf.mxu1 }
 0xde1   : > { %v5046_v32 = vadd.f32 %v5035_v6, %v4894_v46  ;;  %v5308_v6 = vld [vmem:[#allocation2 + $0x2c88] sm:$0xff]  ;;  %v5297_v46 = vld [vmem:[#allocation2 + $0x2c30] sm:$0xff] }
 0xde2   : > { %v5037_v40 = vpop.f32.mrf.mxu1 }
 0xde3   : > { %v5047_v22 = vadd.f32 %v5037_v40, %v4896_v12  ;;  %v5063_v49 = vadd.f32 %v5056_v33, %v5046_v32  ;;  %v5303_v40 = vld [vmem:[#allocation2 + $0x2c60] sm:$0xff]  ;;  %v5301_v12 = vld [vmem:[#allocation2 + $0x2c50] sm:$0xff] }
 0xde4   : > { %v5041_v21 = vpop.f32.mrf.mxu1  ;;  %v5353_v32 = vld [vmem:[#allocation2 + $0x2df0] sm:$0xff] }
 0xde5   : > { %v5048_v29 = vadd.f32 %v5041_v21, %v4900_v2  ;;  %v5064_v44 = vadd.f32 %v5060_v28, %v5047_v22  ;;  %v6645_v54 = vmax.f32 %v5063_v49, 0.0  ;;  %v5300_v2 = vld [vmem:[#allocation2 + $0x2c48] sm:$0xff]  ;;  %v5293_v22 = vld [vmem:[#allocation2 + $0x2c10] sm:$0xff]  ;;  %v5342_v49 = vld [vmem:[#allocation2 + $0x2d98] sm:$0xff] }
 0xde6   : > { %v5043_v34 = vpop.f32.mrf.mxu1  ;;  %v5296_v21 = vld [vmem:[#allocation2 + $0x2c28] sm:$0xff] }
 0xde7   : > { %v5049_v36 = vadd.f32 %v5043_v34, %v4902_v26  ;;  %v5065_v39 = vadd.f32 %v5056_v33, %v5048_v29  ;;  %v5068_v7 = vmax.f32 %v5064_v44, 0.0  ;;  %v5294_v26 = vld [vmem:[#allocation2 + $0x2c18] sm:$0xff]  ;;  %v5291_v29 = vld [vmem:[#allocation2 + $0x2c00] sm:$0xff]  ;;  %v5352_v33 = vld [vmem:[#allocation2 + $0x2de8] sm:$0xff] }
 0xde8   : > { %v5351_v34 = vld [vmem:[#allocation2 + $0x2de0] sm:$0xff]  ;;  %v5345_v44 = vld [vmem:[#allocation2 + $0x2db0] sm:$0xff] }
 0xde9   : > { %v5066_v45 = vadd.f32 %v5060_v28, %v5049_v36  ;;  %v6642_v53 = vmax.f32 %v5065_v39, 0.0  ;;  %v5292_v28 = vld [vmem:[#allocation2 + $0x2c08] sm:$0xff]  ;;  %v5349_v36 = vld [vmem:[#allocation2 + $0x2dd0] sm:$0xff]  ;;  %v5347_v39 = vld [vmem:[#allocation2 + $0x2dc0] sm:$0xff] }
 0xdeb   : > { %v6640_v50 = vmax.f32 %v5066_v45, 0.0  ;;  %v5344_v45 = vld [vmem:[#allocation2 + $0x2da8] sm:$0xff] }
 0xded   : > { %5099 = vmatprep.subr.mxu0 %v6640_v50 }
 0xdee   : > { %5100 = vmatpush1.msra.mxu0 %v6642_v53 }
 0xdef   : > { %5101 = vmatprep.subr.mxu0 %v5068_v7 }
 0xdf0   : > { %5102 = vmatpush1.msra.mxu0 %v6645_v54 }
 0xdf1   : > { %6010 = vmatmul.mubr.msk.f32.vlgmr.msra.gmra.mxu0 %vm354_vm2, %v6425_v13  ;;  %5176 = vmatprep.subr.mxu0 %v6640_v50  ;;  %v5266_v13 = vld [vmem:[#allocation2 + $0x2b40] sm:$0xff] }
 0xdf2   : > { %5177 = vmatpush1.msra.mxu0 %v6642_v53  ;;  %5141 = vmatprep.mubr.f32.mxu0 %v6257_v1 }
 0xdf3   : > { %5178 = vmatprep.subr.mxu0 %v5068_v7  ;;  %5487 = vmatpush2.msra.mxu1 %v5266_v13  ;;  %v5331_v13 = vld [vmem:[#allocation2 + $0x2d40] sm:$0xff] }
 0xdf4   : > { %5179 = vmatpush1.msra.mxu0 %v6645_v54  ;;  %5488 = vmatprep.subr.mxu1 %v5265_v16  ;;  %v5330_v16 = vld [vmem:[#allocation2 + $0x2d38] sm:$0xff] }
 0xdf5   : > { %6011 = vmatmul.mubr.msk.f32.gmra.mxu0 %vm354_vm2, %v6439_v17  ;;  %5355 = vmatprep.subr.mxu0 %v5322_v8  ;;  %v5318_v17 = vld [vmem:[#allocation2 + $0x2cd8] sm:$0xff] }
 0xdf6   : > { %5212 = vmatprep.mubr.f32.mxu0 %v6257_v1  ;;  %5489 = vmatpush2.msra.mxu1 %v5264_v60  ;;  %v5334_v8 = vld [vmem:[#allocation2 + $0x2d58] sm:$0xff]  ;;  %v5327_v60 = vld [vmem:[#allocation2 + $0x2d20] sm:$0xff] }
 0xdf7   : > { %5490 = vmatprep.subr.mxu1 %v5263_v27  ;;  %v5260_v27 = vld [vmem:[#allocation2 + $0x2b10] sm:$0xff] }
 0xdf8   : > { %5491 = vmatpush2.msra.mxu1 %v5262_v0  ;;  %v5258_v0 = vld [vmem:[#allocation2 + $0x2b00] sm:$0xff] }
 0xdf9   : > { %6012 = vmatmul.mubr.msk.f32.vlgmr.msra.gmra.mxu0 %vm354_vm2, %v6428_v14  ;;  %v5314_v14 = vld [vmem:[#allocation2 + $0x2cb8] sm:$0xff] }
 0xdfa   : > { %5356 = vmatpush1.msra.mxu0 %v5321_v24  ;;  %5218 = vmatprep.mubr.f32.mxu0 %v6257_v1  ;;  %v5312_v1 = vld [vmem:[#allocation2 + $0x2ca8] sm:$0xff]  ;;  %v5329_v24 = vld [vmem:[#allocation2 + $0x2d30] sm:$0xff] }
 0xdfb   : > { %5357 = vmatprep.subr.mxu0 %v5320_v59  ;;  %v5328_v59 = vld [vmem:[#allocation2 + $0x2d28] sm:$0xff] }
 0xdfc   : > { %5358 = vmatpush1.msra.mxu0 %v5319_v61  ;;  %v5261_v61 = vld [vmem:[#allocation2 + $0x2b18] sm:$0xff] }
 0xdfd   : > { %5359 = vmatprep.subr.mxu0 %v5318_v17  ;;  %6013 = vmatmul.mubr.msk.f32.gmra.mxu0 %vm354_vm2, %v6442_v18  ;;  %v5306_v18 = vld [vmem:[#allocation2 + $0x2c78] sm:$0xff] }
 0xdfe   : > { %5360 = vmatpush1.msra.mxu0 %v5317_v62  ;;  %5419 = vmatprep.mubr.f32.mxu0 %v5068_v7  ;;  %v5338_v7 = vld [vmem:[#allocation2 + $0x2d78] sm:$0xff]  ;;  %v5325_v62 = vld [vmem:[#allocation2 + $0x2d10] sm:$0xff] }
 0xdff   : > { %5361 = vmatprep.subr.mxu0 %v5316_v63  ;;  %v5326_v17 = vld [vmem:[#allocation2 + $0x2d18] sm:$0xff]  ;;  %5492 = vmatprep.subr.mxu1 %v5261_v61  ;;  %v5259_v63 = vld [vmem:[#allocation2 + $0x2b08] sm:$0xff] }
 0xe00   : > { %5362 = vmatpush1.msra.mxu0 %v5315_v3  ;;  %5493 = vmatpush2.msra.mxu1 %v5260_v27  ;;  %v5324_v3 = vld [vmem:[#allocation2 + $0x2d08] sm:$0xff]  ;;  %v5550_v27 = vld [vmem:[#allocation2 + $0x2f40] sm:$0xff] }
 0xe01   : > { %5363 = vmatprep.subr.mxu0 %v5314_v14  ;;  %5494 = vmatprep.subr.mxu1 %v5259_v63  ;;  %v5323_v14 = vld [vmem:[#allocation2 + $0x2d00] sm:$0xff]  ;;  %v5551_v61 = vld [vmem:[#allocation2 + $0x2f48] sm:$0xff] }
 0xe02   : > { %5364 = vmatpush1.msra.mxu0 %v5313_v41  ;;  %5495 = vmatpush2.msra.mxu1 %v5258_v0  ;;  %v5541_v41 = vld [vmem:[#allocation2 + $0x2ef8] sm:$0xff]  ;;  %v5547_v63 = vld [vmem:[#allocation2 + $0x2f28] sm:$0xff]  ;;  %v5546_v0 = vld [vmem:[#allocation2 + $0x2f20] sm:$0xff] }
 0xe03   : > { %5365 = vmatprep.subr.mxu0 %v5312_v1  ;;  %v5540_v1 = vld [vmem:[#allocation2 + $0x2ef0] sm:$0xff] }
 0xe04   : > { %5366 = vmatpush1.msra.mxu0 %v5311_v4  ;;  %v5539_v4 = vld [vmem:[#allocation2 + $0x2ee8] sm:$0xff] }
 0xe05   : > { %5367 = vmatprep.subr.mxu0 %v5310_v35  ;;  %v5538_v35 = vld [vmem:[#allocation2 + $0x2ee0] sm:$0xff] }
 0xe06   : > { %5368 = vmatpush1.msra.mxu0 %v5309_v5  ;;  %v5537_v5 = vld [vmem:[#allocation2 + $0x2ed8] sm:$0xff] }
 0xe07   : > { %5369 = vmatprep.subr.mxu0 %v5308_v6  ;;  %v5536_v6 = vld [vmem:[#allocation2 + $0x2ed0] sm:$0xff] }
 0xe08   : > { %5370 = vmatpush1.msra.mxu0 %v5307_v9  ;;  %v5535_v9 = vld [vmem:[#allocation2 + $0x2ec8] sm:$0xff] }
 0xe09   : > { %5371 = vmatprep.subr.mxu0 %v5306_v18  ;;  %v5534_v18 = vld [vmem:[#allocation2 + $0x2ec0] sm:$0xff] }
 0xe0a   : > { %5372 = vmatpush1.msra.mxu0 %v5305_v47  ;;  %v5533_v47 = vld [vmem:[#allocation2 + $0x2eb8] sm:$0xff] }
 0xe0b   : > { %5373 = vmatprep.subr.mxu0 %v5304_v37  ;;  %v5532_v37 = vld [vmem:[#allocation2 + $0x2eb0] sm:$0xff] }
 0xe0c   : > { %5374 = vmatpush1.msra.mxu0 %v5303_v40  ;;  %v5530_v40 = vld [vmem:[#allocation2 + $0x2ea0] sm:$0xff] }
 0xe0d   : > { %5375 = vmatprep.subr.mxu0 %v5302_v10  ;;  %v5528_v10 = vld [vmem:[#allocation2 + $0x2e90] sm:$0xff] }
 0xe0e   : > { %5376 = vmatpush1.msra.mxu0 %v5301_v12  ;;  %v5527_v12 = vld [vmem:[#allocation2 + $0x2e88] sm:$0xff] }
 0xe0f   : > { %5377 = vmatprep.subr.mxu0 %v5300_v2  ;;  %v5526_v2 = vld [vmem:[#allocation2 + $0x2e80] sm:$0xff] }
 0xe10   : > { %5378 = vmatpush1.msra.mxu0 %v5299_v51  ;;  %v5524_v51 = vld [vmem:[#allocation2 + $0x2e70] sm:$0xff] }
 0xe11   : > { %5379 = vmatprep.subr.mxu0 %v5298_v43  ;;  %v5523_v43 = vld [vmem:[#allocation2 + $0x2e68] sm:$0xff] }
 0xe12   : > { %5380 = vmatpush1.msra.mxu0 %v5297_v46  ;;  %v5522_v46 = vld [vmem:[#allocation2 + $0x2e60] sm:$0xff] }
 0xe13   : > { %5381 = vmatprep.subr.mxu0 %v5296_v21  ;;  %v5521_v21 = vld [vmem:[#allocation2 + $0x2e58] sm:$0xff] }
 0xe14   : > { %5382 = vmatpush1.msra.mxu0 %v5295_v23  ;;  %v5520_v23 = vld [vmem:[#allocation2 + $0x2e50] sm:$0xff] }
 0xe15   : > { %5383 = vmatprep.subr.mxu0 %v5294_v26  ;;  %v5519_v26 = vld [vmem:[#allocation2 + $0x2e48] sm:$0xff] }
 0xe16   : > { %5384 = vmatpush1.msra.mxu0 %v5293_v22  ;;  %v5518_v22 = vld [vmem:[#allocation2 + $0x2e40] sm:$0xff] }
 0xe17   : > { %5385 = vmatprep.subr.mxu0 %v5292_v28  ;;  %v5517_v28 = vld [vmem:[#allocation2 + $0x2e38] sm:$0xff] }
 0xe18   : > { %5386 = vmatpush1.msra.mxu0 %v5291_v29  ;;  %v5516_v29 = vld [vmem:[#allocation2 + $0x2e30] sm:$0xff] }
 0xe19   : > { %5387 = vmatprep.subr.mxu0 %v5354_v30  ;;  %v5515_v30 = vld [vmem:[#allocation2 + $0x2e28] sm:$0xff] }
 0xe1a   : > { %5388 = vmatpush2.msra.mxu0 %v5353_v32  ;;  %v5514_v32 = vld [vmem:[#allocation2 + $0x2e20] sm:$0xff] }
 0xe1b   : > { %5389 = vmatprep.subr.mxu0 %v5352_v33  ;;  %v5513_v33 = vld [vmem:[#allocation2 + $0x2e18] sm:$0xff] }
 0xe1c   : > { %5390 = vmatpush2.msra.mxu0 %v5351_v34  ;;  %v5512_v34 = vld [vmem:[#allocation2 + $0x2e10] sm:$0xff] }
 0xe1d   : > { %5391 = vmatprep.subr.mxu0 %v5350_v11  ;;  %v5511_v11 = vld [vmem:[#allocation2 + $0x2e08] sm:$0xff] }
 0xe1e   : > { %5392 = vmatpush2.msra.mxu0 %v5349_v36  ;;  %v5510_v36 = vld [vmem:[#allocation2 + $0x2e00] sm:$0xff] }
 0xe1f   : > { %5393 = vmatprep.subr.mxu0 %v5348_v38  ;;  %v5573_v38 = vld [vmem:[#allocation2 + $0x2ff8] sm:$0xff] }
 0xe20   : > { %5394 = vmatpush2.msra.mxu0 %v5347_v39  ;;  %v5572_v39 = vld [vmem:[#allocation2 + $0x2ff0] sm:$0xff] }
 0xe21   : > { %5395 = vmatprep.subr.mxu0 %v5346_v42  ;;  %v5571_v42 = vld [vmem:[#allocation2 + $0x2fe8] sm:$0xff] }
 0xe22   : > { %5396 = vmatpush2.msra.mxu0 %v5345_v44  ;;  %v5570_v44 = vld [vmem:[#allocation2 + $0x2fe0] sm:$0xff] }
 0xe23   : > { %5397 = vmatprep.subr.mxu0 %v5344_v45  ;;  %v5569_v45 = vld [vmem:[#allocation2 + $0x2fd8] sm:$0xff] }
 0xe24   : > { %5398 = vmatpush2.msra.mxu0 %v5343_v48  ;;  %v5568_v48 = vld [vmem:[#allocation2 + $0x2fd0] sm:$0xff] }
 0xe25   : > { %5399 = vmatprep.subr.mxu0 %v5342_v49  ;;  %v5567_v49 = vld [vmem:[#allocation2 + $0x2fc8] sm:$0xff] }
 0xe26   : > { %5400 = vmatpush2.msra.mxu0 %v5341_v19  ;;  %v5566_v19 = vld [vmem:[#allocation2 + $0x2fc0] sm:$0xff] }
 0xe27   : > { %5401 = vmatprep.subr.mxu0 %v5340_v52  ;;  %v5565_v52 = vld [vmem:[#allocation2 + $0x2fb8] sm:$0xff] }
 0xe28   : > { %5402 = vmatpush2.msra.mxu0 %v5339_v20  ;;  %v5564_v20 = vld [vmem:[#allocation2 + $0x2fb0] sm:$0xff] }
 0xe29   : > { %5403 = vmatprep.subr.mxu0 %v5338_v7  ;;  %v5563_v7 = vld [vmem:[#allocation2 + $0x2fa8] sm:$0xff] }
 0xe2a   : > { %5404 = vmatpush2.msra.mxu0 %v5337_v25  ;;  %v5562_v25 = vld [vmem:[#allocation2 + $0x2fa0] sm:$0xff] }
 0xe2b   : > { %5405 = vmatprep.subr.mxu0 %v5336_v15  ;;  %v5561_v15 = vld [vmem:[#allocation2 + $0x2f98] sm:$0xff] }
 0xe2c   : > { %5406 = vmatpush2.msra.mxu0 %v5335_v56  ;;  %v5560_v56 = vld [vmem:[#allocation2 + $0x2f90] sm:$0xff] }
 0xe2d   : > { %5407 = vmatprep.subr.mxu0 %v5334_v8  ;;  %v5559_v8 = vld [vmem:[#allocation2 + $0x2f88] sm:$0xff] }
 0xe2e   : > { %5408 = vmatpush2.msra.mxu0 %v5333_v58  ;;  %v5558_v58 = vld [vmem:[#allocation2 + $0x2f80] sm:$0xff] }
 0xe2f   : > { %5409 = vmatprep.subr.mxu0 %v5332_v31  ;;  %v5557_v31 = vld [vmem:[#allocation2 + $0x2f78] sm:$0xff] }
 0xe30   : > { %5410 = vmatpush2.msra.mxu0 %v5331_v13  ;;  %v5556_v13 = vld [vmem:[#allocation2 + $0x2f70] sm:$0xff] }
 0xe31   : > { %5411 = vmatprep.subr.mxu0 %v5330_v16  ;;  %v5555_v16 = vld [vmem:[#allocation2 + $0x2f68] sm:$0xff] }
 0xe32   : > { %5412 = vmatpush2.msra.mxu0 %v5329_v24  ;;  %v5554_v24 = vld [vmem:[#allocation2 + $0x2f60] sm:$0xff] }
 0xe33   : > { %5413 = vmatprep.subr.mxu0 %v5328_v59  ;;  %v5553_v59 = vld [vmem:[#allocation2 + $0x2f58] sm:$0xff] }
 0xe34   : > { %5414 = vmatpush2.msra.mxu0 %v5327_v60  ;;  %v5552_v60 = vld [vmem:[#allocation2 + $0x2f50] sm:$0xff] }
 0xe35   : > { %5415 = vmatprep.subr.mxu0 %v5326_v17  ;;  %v5549_v17 = vld [vmem:[#allocation2 + $0x2f38] sm:$0xff] }
 0xe36   : > { %5416 = vmatpush2.msra.mxu0 %v5325_v62  ;;  %v5548_v62 = vld [vmem:[#allocation2 + $0x2f30] sm:$0xff] }
 0xe37   : > { %5417 = vmatprep.subr.mxu0 %v5324_v3  ;;  %v5545_v3 = vld [vmem:[#allocation2 + $0x2f18] sm:$0xff] }
 0xe38   : > { %5418 = vmatpush2.msra.mxu0 %v5323_v14  ;;  %v5544_v14 = vld [vmem:[#allocation2 + $0x2f10] sm:$0xff] }
 0xe39   : > { %5420 = vmatmul.mubr.f32.vlgmr.msra.gmra.mxu0 %v6645_v54  ;;  %5574 = vmatprep.subr.mxu0 %v5541_v41  ;;  %v5531_v54 = vld [vmem:[#allocation2 + $0x2ea8] sm:$0xff] }
 0xe3a   : > { %5425 = vmatprep.mubr.f32.mxu0 %v6640_v50  ;;  %5575 = vmatpush1.msra.mxu0 %v5540_v1  ;;  %v5529_v50 = vld [vmem:[#allocation2 + $0x2e98] sm:$0xff]  ;;  %v5543_v41 = vld [vmem:[#allocation2 + $0x2f08] sm:$0xff]  ;;  %v5542_v1 = vld [vmem:[#allocation2 + $0x2f00] sm:$0xff] }
 0xe3b   : > { %5576 = vmatprep.subr.mxu0 %v5539_v4 }
 0xe3c   : > { %5577 = vmatpush1.msra.mxu0 %v5538_v35 }
 0xe3d   : > { %5426 = vmatmul.mubr.f32.gmra.mxu0 %v6642_v53  ;;  %5578 = vmatprep.subr.mxu0 %v5537_v5  ;;  %v5525_v53 = vld [vmem:[#allocation2 + $0x2e78] sm:$0xff] }
 0xe3e   : > { %5579 = vmatpush1.msra.mxu0 %v5536_v6 }
 0xe3f   : > { %5580 = vmatprep.subr.mxu0 %v5535_v9 }
 0xe40   : > { %5581 = vmatpush1.msra.mxu0 %v5534_v18 }
 0xe41   : > { %5582 = vmatprep.subr.mxu0 %v5533_v47 }
 0xe42   : > { %5583 = vmatpush1.msra.mxu0 %v5532_v37 }
 0xe43   : > { %5584 = vmatprep.subr.mxu0 %v5531_v54  ;;  %v5725_v54 = vld [vmem:[#allocation9 + $0xf8] sm:$0xff] }
 0xe44   : > { %5585 = vmatpush1.msra.mxu0 %v5530_v40  ;;  %v5724_v40 = vld [vmem:[#allocation9 + $0xf0] sm:$0xff]  ;;  %5758 = vmatprep.subr.mxu1 %v5725_v54 }
 0xe45   : > { %5586 = vmatprep.subr.mxu0 %v5529_v50  ;;  %v5723_v50 = vld [vmem:[#allocation9 + $0xe8] sm:$0xff] }
 0xe46   : > { %5587 = vmatpush1.msra.mxu0 %v5528_v10  ;;  %v5722_v10 = vld [vmem:[#allocation9 + $0xe0] sm:$0xff] }
 0xe47   : > { %5588 = vmatprep.subr.mxu0 %v5527_v12  ;;  %v5721_v12 = vld [vmem:[#allocation9 + $0xd8] sm:$0xff] }
 0xe48   : > { %5589 = vmatpush1.msra.mxu0 %v5526_v2  ;;  %v5720_v2 = vld [vmem:[#allocation9 + $0xd0] sm:$0xff] }
 0xe49   : > { %5590 = vmatprep.subr.mxu0 %v5525_v53  ;;  %v5719_v53 = vld [vmem:[#allocation9 + $0xc8] sm:$0xff] }
 0xe4a   : > { %5591 = vmatpush1.msra.mxu0 %v5524_v51  ;;  %v5718_v51 = vld [vmem:[#allocation9 + $0xc0] sm:$0xff] }
 0xe4b   : > { %5592 = vmatprep.subr.mxu0 %v5523_v43  ;;  %v5717_v43 = vld [vmem:[#allocation9 + $0xb8] sm:$0xff] }
 0xe4c   : > { %5593 = vmatpush1.msra.mxu0 %v5522_v46  ;;  %v5716_v46 = vld [vmem:[#allocation9 + $0xb0] sm:$0xff] }
 0xe4d   : > { %5594 = vmatprep.subr.mxu0 %v5521_v21  ;;  %v5715_v21 = vld [vmem:[#allocation9 + $0xa8] sm:$0xff] }
 0xe4e   : > { %5595 = vmatpush1.msra.mxu0 %v5520_v23  ;;  %v5714_v23 = vld [vmem:[#allocation9 + $0xa0] sm:$0xff] }
 0xe4f   : > { %5596 = vmatprep.subr.mxu0 %v5519_v26  ;;  %v5713_v26 = vld [vmem:[#allocation9 + $0x98] sm:$0xff] }
 0xe50   : > { %5597 = vmatpush1.msra.mxu0 %v5518_v22  ;;  %v5712_v22 = vld [vmem:[#allocation9 + $0x90] sm:$0xff] }
 0xe51   : > { %5598 = vmatprep.subr.mxu0 %v5517_v28  ;;  %v5711_v28 = vld [vmem:[#allocation9 + $0x88] sm:$0xff] }
 0xe52   : > { %5599 = vmatpush1.msra.mxu0 %v5516_v29  ;;  %v5710_v29 = vld [vmem:[#allocation9 + $0x80] sm:$0xff] }
 0xe53   : > { %5600 = vmatprep.subr.mxu0 %v5515_v30  ;;  %v5709_v30 = vld [vmem:[#allocation9 + $0x78] sm:$0xff] }
 0xe54   : > { %5601 = vmatpush1.msra.mxu0 %v5514_v32  ;;  %v5708_v32 = vld [vmem:[#allocation9 + $0x70] sm:$0xff] }
 0xe55   : > { %5602 = vmatprep.subr.mxu0 %v5513_v33  ;;  %v5707_v33 = vld [vmem:[#allocation9 + $0x68] sm:$0xff] }
 0xe56   : > { %5603 = vmatpush1.msra.mxu0 %v5512_v34  ;;  %v5706_v34 = vld [vmem:[#allocation9 + $0x60] sm:$0xff] }
 0xe57   : > { %5604 = vmatprep.subr.mxu0 %v5511_v11  ;;  %v5705_v11 = vld [vmem:[#allocation9 + $0x58] sm:$0xff] }
 0xe58   : > { %5605 = vmatpush1.msra.mxu0 %v5510_v36  ;;  %v5704_v36 = vld [vmem:[#allocation9 + $0x50] sm:$0xff] }
 0xe59   : > { %5606 = vmatprep.subr.mxu0 %v5573_v38  ;;  %v5703_v38 = vld [vmem:[#allocation9 + $0x48] sm:$0xff] }
 0xe5a   : > { %5607 = vmatpush2.msra.mxu0 %v5572_v39  ;;  %v5702_v39 = vld [vmem:[#allocation9 + $0x40] sm:$0xff] }
 0xe5b   : > { %5608 = vmatprep.subr.mxu0 %v5571_v42  ;;  %v5701_v42 = vld [vmem:[#allocation9 + $0x38] sm:$0xff] }
 0xe5c   : > { %5609 = vmatpush2.msra.mxu0 %v5570_v44  ;;  %v5700_v44 = vld [vmem:[#allocation9 + $0x30] sm:$0xff] }
 0xe5d   : > { %5610 = vmatprep.subr.mxu0 %v5569_v45  ;;  %v5699_v45 = vld [vmem:[#allocation9 + $0x28] sm:$0xff] }
 0xe5e   : > { %5611 = vmatpush2.msra.mxu0 %v5568_v48  ;;  %v5698_v48 = vld [vmem:[#allocation9 + $0x20] sm:$0xff] }
 0xe5f   : > { %5612 = vmatprep.subr.mxu0 %v5567_v49  ;;  %v5697_v49 = vld [vmem:[#allocation9 + $0x18] sm:$0xff] }
 0xe60   : > { %5613 = vmatpush2.msra.mxu0 %v5566_v19  ;;  %v5696_v19 = vld [vmem:[#allocation9 + $0x10] sm:$0xff] }
 0xe61   : > { %5614 = vmatprep.subr.mxu0 %v5565_v52  ;;  %v5695_v52 = vld [vmem:[#allocation9 + $0x8] sm:$0xff] }
 0xe62   : > { %5615 = vmatpush2.msra.mxu0 %v5564_v20  ;;  %v5694_v20 = vld [vmem:[#allocation9] sm:$0xff] }
 0xe63   : > { %5616 = vmatprep.subr.mxu0 %v5563_v7  ;;  %v5757_v7 = vld [vmem:[#allocation9 + $0x1f8] sm:$0xff] }
 0xe64   : > { %5617 = vmatpush2.msra.mxu0 %v5562_v25  ;;  %v5756_v25 = vld [vmem:[#allocation9 + $0x1f0] sm:$0xff] }
 0xe65   : > { %5618 = vmatprep.subr.mxu0 %v5561_v15  ;;  %v5755_v15 = vld [vmem:[#allocation9 + $0x1e8] sm:$0xff] }
 0xe66   : > { %5619 = vmatpush2.msra.mxu0 %v5560_v56  ;;  %v5754_v56 = vld [vmem:[#allocation9 + $0x1e0] sm:$0xff] }
 0xe67   : > { %5620 = vmatprep.subr.mxu0 %v5559_v8  ;;  %v5753_v8 = vld [vmem:[#allocation9 + $0x1d8] sm:$0xff] }
 0xe68   : > { %5621 = vmatpush2.msra.mxu0 %v5558_v58  ;;  %v5752_v58 = vld [vmem:[#allocation9 + $0x1d0] sm:$0xff] }
 0xe69   : > { %5622 = vmatprep.subr.mxu0 %v5557_v31  ;;  %v5751_v31 = vld [vmem:[#allocation9 + $0x1c8] sm:$0xff] }
 0xe6a   : > { %5623 = vmatpush2.msra.mxu0 %v5556_v13  ;;  %v5750_v13 = vld [vmem:[#allocation9 + $0x1c0] sm:$0xff] }
 0xe6b   : > { %5624 = vmatprep.subr.mxu0 %v5555_v16  ;;  %v5749_v16 = vld [vmem:[#allocation9 + $0x1b8] sm:$0xff] }
 0xe6c   : > { %5625 = vmatpush2.msra.mxu0 %v5554_v24  ;;  %v5748_v24 = vld [vmem:[#allocation9 + $0x1b0] sm:$0xff] }
 0xe6d   : > { %5626 = vmatprep.subr.mxu0 %v5553_v59  ;;  %v5747_v59 = vld [vmem:[#allocation9 + $0x1a8] sm:$0xff] }
 0xe6e   : > { %5627 = vmatpush2.msra.mxu0 %v5552_v60  ;;  %v5746_v60 = vld [vmem:[#allocation9 + $0x1a0] sm:$0xff] }
 0xe6f   : > { %5628 = vmatprep.subr.mxu0 %v5551_v61  ;;  %v5745_v61 = vld [vmem:[#allocation9 + $0x198] sm:$0xff] }
 0xe70   : > { %5629 = vmatpush2.msra.mxu0 %v5550_v27 }
 0xe71   : > { %5630 = vmatprep.subr.mxu0 %v5549_v17 }
 0xe72   : > { %5631 = vmatpush2.msra.mxu0 %v5548_v62 }
 0xe73   : > { %5632 = vmatprep.subr.mxu0 %v5547_v63 }
 0xe74   : > { %5633 = vmatpush2.msra.mxu0 %v5546_v0 }
 0xe75   : > { %5634 = vmatprep.subr.mxu0 %v5545_v3  ;;  %v5656_v3 = vld [vmem:[#allocation4 + $0xe] sm:$0x3] }
 0xe76   : > { %5635 = vmatpush2.msra.mxu0 %v5544_v14 }
 0xe77   : > { %5636 = vmatprep.subr.mxu0 %v5543_v41 }
 0xe78   : > { %5637 = vmatpush2.msra.mxu0 %v5542_v1 }
 0xeb1   : > { %v5137_v4 = vpop.f32.mrf.mxu0 }
 0xeb3   : > { %v5139_v35 = vpop.f32.mrf.mxu0 }
 0xeb4   : > { %5496 = vmatprep.mubr.f32.mxu1 %v5139_v35 }
 0xeb5   : > { %v5143_v5 = vpop.f32.mrf.mxu0  ;;  %5497 = vmatmul.mubr.f32.vlgmr.msra.gmra.mxu1 %v5137_v4  ;;  %v5661_v4 = vrot.slane %v5656_v3, %v6457_v57 }
 0xeb6   : > { %5759 = vmatpush1.msra.mxu1 %v5724_v40 }
 0xeb7   : > { %v5145_v6 = vpop.f32.mrf.mxu0  ;;  %5760 = vmatprep.subr.mxu1 %v5723_v50 }
 0xeb8   : > { %5502 = vmatprep.mubr.f32.mxu1 %v5145_v6  ;;  %5761 = vmatpush1.msra.mxu1 %v5722_v10 }
 0xeb9   : > { %v5214_v9 = vpop.f32.mrf.mxu0  ;;  %5503 = vmatmul.mubr.f32.gmra.mxu1 %v5143_v5  ;;  %5762 = vmatprep.subr.mxu1 %v5721_v12 }
 0xeba   : > { %5763 = vmatpush1.msra.mxu1 %v5720_v2 }
 0xebb   : > { %v5216_v18 = vpop.f32.mrf.mxu0  ;;  %5764 = vmatprep.subr.mxu1 %v5719_v53 }
 0xebc   : > { %5638 = vmatprep.mubr.f32.mxu0 %v5216_v18  ;;  %5765 = vmatpush1.msra.mxu1 %v5718_v51 }
 0xebd   : > { %v5220_v47 = vpop.f32.mrf.mxu0  ;;  %5639 = vmatmul.mubr.f32.vlgmr.msra.gmra.mxu0 %v5214_v9  ;;  %5766 = vmatprep.subr.mxu1 %v5717_v43  ;;  %v5665_v9 = vrot.slane %v5656_v3, %v6454_v55 }
 0xebe   : > { %5767 = vmatpush1.msra.mxu1 %v5716_v46 }
 0xebf   : > { %v5222_v37 = vpop.f32.mrf.mxu0  ;;  %5768 = vmatprep.subr.mxu1 %v5715_v21 }
 0xec0   : > { %5644 = vmatprep.mubr.f32.mxu0 %v5222_v37  ;;  %5769 = vmatpush1.msra.mxu1 %v5714_v23 }
 0xec1   : > { %5645 = vmatmul.mubr.f32.gmra.mxu0 %v5220_v47  ;;  %5770 = vmatprep.subr.mxu1 %v5713_v26 }
 0xec2   : > { %5771 = vmatpush1.msra.mxu1 %v5712_v22 }
 0xec3   : > { %5772 = vmatprep.subr.mxu1 %v5711_v28  ;;  %v5744_v28 = vld [vmem:[#allocation9 + $0x190] sm:$0xff] }
 0xec4   : > { %5773 = vmatpush1.msra.mxu1 %v5710_v29  ;;  %v5743_v29 = vld [vmem:[#allocation9 + $0x188] sm:$0xff] }
 0xec5   : > { %5774 = vmatprep.subr.mxu1 %v5709_v30  ;;  %v5742_v30 = vld [vmem:[#allocation9 + $0x180] sm:$0xff] }
 0xec6   : > { %5775 = vmatpush1.msra.mxu1 %v5708_v32  ;;  %v5741_v32 = vld [vmem:[#allocation9 + $0x178] sm:$0xff] }
 0xec7   : > { %5776 = vmatprep.subr.mxu1 %v5707_v33  ;;  %v5740_v33 = vld [vmem:[#allocation9 + $0x170] sm:$0xff] }
 0xec8   : > { %5777 = vmatpush1.msra.mxu1 %v5706_v34  ;;  %v5739_v34 = vld [vmem:[#allocation9 + $0x168] sm:$0xff] }
 0xec9   : > { %5778 = vmatprep.subr.mxu1 %v5705_v11  ;;  %v5738_v11 = vld [vmem:[#allocation9 + $0x160] sm:$0xff] }
 0xeca   : > { %5779 = vmatpush1.msra.mxu1 %v5704_v36  ;;  %v5737_v36 = vld [vmem:[#allocation9 + $0x158] sm:$0xff] }
 0xecb   : > { %5780 = vmatprep.subr.mxu1 %v5703_v38  ;;  %v5736_v38 = vld [vmem:[#allocation9 + $0x150] sm:$0xff] }
 0xecc   : > { %5781 = vmatpush1.msra.mxu1 %v5702_v39  ;;  %v5735_v39 = vld [vmem:[#allocation9 + $0x148] sm:$0xff] }
 0xecd   : > { %5782 = vmatprep.subr.mxu1 %v5701_v42  ;;  %v5734_v42 = vld [vmem:[#allocation9 + $0x140] sm:$0xff] }
 0xece   : > { %5783 = vmatpush1.msra.mxu1 %v5700_v44  ;;  %v5733_v44 = vld [vmem:[#allocation9 + $0x138] sm:$0xff] }
 0xecf   : > { %5784 = vmatprep.subr.mxu1 %v5699_v45  ;;  %v5732_v45 = vld [vmem:[#allocation9 + $0x130] sm:$0xff] }
 0xed0   : > { %5785 = vmatpush1.msra.mxu1 %v5698_v48  ;;  %v5731_v48 = vld [vmem:[#allocation9 + $0x128] sm:$0xff] }
 0xed1   : > { %5786 = vmatprep.subr.mxu1 %v5697_v49  ;;  %v5730_v49 = vld [vmem:[#allocation9 + $0x120] sm:$0xff] }
 0xed2   : > { %5787 = vmatpush1.msra.mxu1 %v5696_v19  ;;  %v5729_v19 = vld [vmem:[#allocation9 + $0x118] sm:$0xff] }
 0xed3   : > { %5788 = vmatprep.subr.mxu1 %v5695_v52  ;;  %v5728_v52 = vld [vmem:[#allocation9 + $0x110] sm:$0xff] }
 0xed4   : > { %5789 = vmatpush1.msra.mxu1 %v5694_v20  ;;  %v5727_v20 = vld [vmem:[#allocation9 + $0x108] sm:$0xff] }
 0xed5   : > { %5790 = vmatprep.subr.mxu1 %v5757_v7  ;;  %v5726_v7 = vld [vmem:[#allocation9 + $0x100] sm:$0xff] }
 0xed6   : > { %5791 = vmatpush2.msra.mxu1 %v5756_v25 }
 0xed7   : > { %5792 = vmatprep.subr.mxu1 %v5755_v15 }
 0xed8   : > { %5793 = vmatpush2.msra.mxu1 %v5754_v56 }
 0xed9   : > { %5794 = vmatprep.subr.mxu1 %v5753_v8 }
 0xeda   : > { %5795 = vmatpush2.msra.mxu1 %v5752_v58 }
 0xedb   : > { %5796 = vmatprep.subr.mxu1 %v5751_v31 }
 0xedc   : > { %5797 = vmatpush2.msra.mxu1 %v5750_v13 }
 0xedd   : > { %5798 = vmatprep.subr.mxu1 %v5749_v16 }
 0xede   : > { %5799 = vmatpush2.msra.mxu1 %v5748_v24 }
 0xedf   : > { %5800 = vmatprep.subr.mxu1 %v5747_v59 }
 0xee0   : > { %5801 = vmatpush2.msra.mxu1 %v5746_v60 }
 0xee1   : > { %5802 = vmatprep.subr.mxu1 %v5745_v61 }
 0xee2   : > { %5803 = vmatpush2.msra.mxu1 %v5744_v28 }
 0xee3   : > { %5804 = vmatprep.subr.mxu1 %v5743_v29 }
 0xee4   : > { %5805 = vmatpush2.msra.mxu1 %v5742_v30 }
 0xee5   : > { %5806 = vmatprep.subr.mxu1 %v5741_v32 }
 0xee6   : > { %5807 = vmatpush2.msra.mxu1 %v5740_v33 }
 0xee7   : > { %5808 = vmatprep.subr.mxu1 %v5739_v34 }
 0xee8   : > { %5809 = vmatpush2.msra.mxu1 %v5738_v11 }
 0xee9   : > { %5810 = vmatprep.subr.mxu1 %v5737_v36 }
 0xeea   : > { %5811 = vmatpush2.msra.mxu1 %v5736_v38 }
 0xeeb   : > { %5812 = vmatprep.subr.mxu1 %v5735_v39 }
 0xeec   : > { %5813 = vmatpush2.msra.mxu1 %v5734_v42 }
 0xeed   : > { %5814 = vmatprep.subr.mxu1 %v5733_v44 }
 0xeee   : > { %5815 = vmatpush2.msra.mxu1 %v5732_v45 }
 0xeef   : > { %5816 = vmatprep.subr.mxu1 %v5731_v48 }
 0xef0   : > { %5817 = vmatpush2.msra.mxu1 %v5730_v49 }
 0xef1   : > { %5818 = vmatprep.subr.mxu1 %v5729_v19 }
 0xef2   : > { %5819 = vmatpush2.msra.mxu1 %v5728_v52 }
 0xef3   : > { %5820 = vmatprep.subr.mxu1 %v5727_v20 }
 0xef4   : > { %5821 = vmatpush2.msra.mxu1 %v5726_v7 }
 0xef9   : > { %v5421_v27 = vpop.f32.mrf.mxu0 }
 0xefb   : > { %v5423_v17 = vpop.f32.mrf.mxu0 }
 0xefd   : > { %v5427_v63 = vpop.f32.mrf.mxu0 }
 0xeff   : > { %v5429_v14 = vpop.f32.mrf.mxu0 }
 0xf75   : > { %v5498_v62 = vpop.f32.mrf.mxu1 }
 0xf76   : > { %v5499_v1 = vadd.f32 %v5498_v62, %v5421_v27 }
 0xf77   : > { %v5500_v0 = vpop.f32.mrf.mxu1 }
 0xf78   : > { %v5501_v5 = vadd.f32 %v5500_v0, %v5423_v17 }
 0xf79   : > { %v5504_v41 = vpop.f32.mrf.mxu1 }
 0xf7a   : > { %v5505_v37 = vadd.f32 %v5504_v41, %v5427_v63 }
 0xf7b   : > { %v5506_v18 = vpop.f32.mrf.mxu1 }
 0xf7c   : > { %v5507_v10 = vadd.f32 %v5506_v18, %v5429_v14 }
 0xf7d   : > { %v5640_v35 = vpop.f32.mrf.mxu0 }
 0xf7e   : > { %v5651_v6 = vadd.f32 %v5640_v35, %v5499_v1 }
 0xf7f   : > { %v5642_v47 = vpop.f32.mrf.mxu0 }
 0xf80   : > { %v5652_v54 = vadd.f32 %v5642_v47, %v5501_v5  ;;  %v5668_v40 = vadd.f32 %v5661_v4, %v5651_v6 }
 0xf81   : > { %v5646_v50 = vpop.f32.mrf.mxu0 }
 0xf82   : > { %v5653_v12 = vadd.f32 %v5646_v50, %v5505_v37  ;;  %v5669_v2 = vadd.f32 %v5665_v9, %v5652_v54  ;;  %v5672_v46 = vmax.f32 %v5668_v40, 0.0 }
 0xf83   : > { %v5648_v53 = vpop.f32.mrf.mxu0 }
 0xf84   : > { %v5670_v51 = vadd.f32 %v5661_v4, %v5653_v12  ;;  %v5654_v43 = vadd.f32 %v5648_v53, %v5507_v10  ;;  %v5673_v21 = vmax.f32 %v5669_v2, 0.0 }
 0xf86   : > { %v5671_v57 = vadd.f32 %v5665_v9, %v5654_v43  ;;  %v5676_v23 = vmax.f32 %v5672_v46, %v5673_v21  ;;  %v5674_v26 = vmax.f32 %v5670_v51, 0.0 }
 0xf88   : > { %v5675_v22 = vmax.f32 %v5671_v57, 0.0  ;;  %5677 = vmax.xlane.f32.xlu0 %v5676_v23 }
 0xf8a   : > { %v5679_v55 = vmax.f32 %v5674_v26, %v5675_v22 }
 0xf8c   : > { %5680 = vmax.xlane.f32.xlu0 %v5679_v55 }
0x1011   : > { %v5678_v25 = vpop.xlane.xlu0 %5677 }
0x1012   : > { %v5682_v15 = vsub.f32 %v5672_v46, %v5678_v25  ;;  %v5683_v56 = vsub.f32 %v5673_v21, %v5678_v25 }
0x1014   : > { %v5686_v8 = vmul.f32 1.442695, %v5682_v15  ;;  %v5688_v58 = vmul.f32 1.442695, %v5683_v56 }
0x1015   : > { %v5681_v31 = vpop.xlane.xlu0 %5680 }
0x1016   : > { %6082 = vpow2.f32 %v5686_v8  ;;  %v5684_v13 = vsub.f32 %v5674_v26, %v5681_v31  ;;  %v5685_v16 = vsub.f32 %v5675_v22, %v5681_v31 }
0x1017   : > { %6084 = vpow2.f32 %v5688_v58 }
0x1018   : > { %v5690_v24 = vmul.f32 1.442695, %v5684_v13  ;;  %v5692_v59 = vmul.f32 1.442695, %v5685_v16 }
0x101a   : > { %6086 = vpow2.f32 %v5690_v24 }
0x101b   : > { %6088 = vpow2.f32 %v5692_v59 }
0x1023   : > { %v6083_v60 = vpop.eup %6082 }
0x1024   : > { %v6085_v61 = vpop.eup %6084 }
0x1025   : > { %5822 = vmatprep.mubr.f32.mxu1 %v6085_v61 }
0x1026   : > { %5823 = vmatmul.mubr.f32.vlgmr.msra.gmra.mxu1 %v6083_v60 }
0x1027   : > { %v6087_v27 = vpop.eup %6086 }
0x1028   : > { %v6089_v17 = vpop.eup %6088 }
0x1029   : > { %5828 = vmatprep.mubr.f32.mxu1 %v6089_v17 }
0x102a   : > { %5829 = vmatmul.mubr.f32.gmra.mxu1 %v6087_v27 }
0x10e6   : > { %v5824_v62 = vpop.f32.mrf.mxu1 }
0x10e7   : > { %6090 = vlog2.f32 %v5824_v62 }
0x10e8   : > { %v5826_v63 = vpop.f32.mrf.mxu1 }
0x10e9   : > { %6092 = vlog2.f32 %v5826_v63 }
0x10ea   : > { %v5830_v0 = vpop.f32.mrf.mxu1 }
0x10eb   : > { %6094 = vlog2.f32 %v5830_v0 }
0x10ec   : > { %v5832_v3 = vpop.f32.mrf.mxu1 }
0x10ed   : > { %6096 = vlog2.f32 %v5832_v3 }
0x10f4   : > { %v6091_v14 = vpop.eup %6090 }
0x10f5   : > { %v5836_v41 = vmul.f32 0.6931472, %v6091_v14 }
0x10f6   : > { %v6093_v1 = vpop.eup %6092 }
0x10f7   : > { %v5843_v4 = vsub.f32 %v5682_v15, %v5836_v41  ;;  %v5838_v35 = vmul.f32 0.6931472, %v6093_v1 }
0x10f8   : > { %v6095_v5 = vpop.eup %6094 }
0x10f9   : > { %5847 = vst [vmem:[%s331_s16] sm:$0xff] %v5843_v4  ;;  %v5844_v6 = vsub.f32 %v5683_v56, %v5838_v35  ;;  %v5840_v9 = vmul.f32 0.6931472, %v6095_v5 }
0x10fa   : > { %v6097_v18 = vpop.eup %6096 }
0x10fb   : > { %5848 = vst [vmem:[%s331_s16 + $0x8] sm:$0xff] %v5844_v6  ;;  %v5845_v47 = vsub.f32 %v5684_v13, %v5840_v9  ;;  %v5842_v37 = vmul.f32 0.6931472, %v6097_v18 }
0x10fd   : > { %5849 = vst [vmem:[%s331_s16 + $0x10] sm:$0xff] %v5845_v47  ;;  %v5846_v54 = vsub.f32 %v5685_v16, %v5842_v37 }
0x10ff   : > { %5850 = vst [vmem:[%s331_s16 + $0x18] sm:$0xff] %v5846_v54 }
0x1100 PF: > { %s19_s21 = sadd.s32 1, %s6246_s21  }
0x1101   : > { %p16_p2 = scmp.ge.s32.totalorder %s19_s21, 4  }
0x1103   :  { %18 = sbr.rel (!%p16_p2) target bundleno = 3 (0x3), region = 129 }
0x1108   :  { %5875 = vsyncpa [#allocation3], 1 }
0x1109   :  { %5877 = vsyncpa [#allocation3 + $0x1], 1 }
0x110a   :  { %5878 = vsyncpa [#allocation5], 1 }
0x110b   :  { %5879 = vsyncpa [#allocation8], 1 }

</bundles_post_ra>
